<compile_context>
chip_gen: v6e
topology: v6e:2x2x1
jax: 0.10.0
libtpu: 0.0.40
codegen_flags: <defaults>
</compile_context>

<pallas_src>
import functools

import jax
import jax.numpy as jnp
from jax.experimental import pallas as pl
from jax.experimental.pallas import tpu as pltpu


# ----------------------------------------------------------------------------
# small helpers
# ----------------------------------------------------------------------------
def _ceil_to(x, m):
    return -(-x // m) * m


def _blk_bytes(shape, itemsize):
    """Approximate VMEM footprint of a block, accounting for (8, 128) tile padding."""
    if len(shape) == 1:
        return _ceil_to(shape[0], 128) * itemsize
    lead = 1
    for d in shape[:-2]:
        lead *= int(d)
    return lead * _ceil_to(shape[-2], 8) * _ceil_to(shape[-1], 128) * itemsize


def _device_kind():
    try:
        return jax.devices()[0].device_kind.lower()
    except Exception:
        return ""


def _physical_vmem_bytes():
    try:
        return int(pltpu.get_tpu_info().vmem_capacity_bytes)
    except Exception:
        pass
    if "v7" in _device_kind():
        return 64 << 20
    return 128 << 20


def _usable_vmem_bytes():
    # Leave headroom for compiler temps / spills: ~51 MiB of v7x's 64, ~102 MiB of
    # v5e/v6e's 128 (review: never request all of physical VMEM).
    return int(_physical_vmem_bytes() * 4 // 5)


def _use_dy_split(cin):
    # v5e has a single vector-store slot -> minimize im2col store traffic (3 dx-slab
    # copies + 3 accumulating K=3*Cin matmuls).  v6e/v7x keep the single fused K=9*Cin
    # matmul (2 vst slots, 256-deep MXU) unless Cin is large enough that K=3*Cin >= 384.
    if "v5" in _device_kind():
        return True
    return cin >= 128


def _conv_vmem_estimate(th, w, cin, cout, split_dy):
    io = (2 * 2 * _blk_bytes((1, w, cin), 2)        # top+bottom halo rows (double-buffered)
          + 2 * _blk_bytes((th, w, cin), 2)         # mid tile
          + 2 * 2 * _blk_bytes((1, 1, cin), 4)      # sc, sh
          + 2 * _blk_bytes((9 * cin, cout), 2)      # weights
          + 2 * _blk_bytes((th, w, cout), 2)        # z out
          + 2 * _blk_bytes((2, cout), 4))           # stats out
    patch = (_blk_bytes(((th + 2) * w, 3 * cin), 2) if split_dy
             else _blk_bytes((th * w, 9 * cin), 2))
    scratch = (_blk_bytes((th + 2, w + 2, cin), 2)  # zero-padded tile
               + patch
               + _blk_bytes((th * w, cout), 4))     # f32 accumulator temp
    return io + scratch


def _pick_th(h, w, cin, cout, n_images, split_dy, vmem_cap, target_rows=4096):
    """Largest row-tile dividing h with ~target_rows matmul rows, fitting the VMEM cap,
    keeping the grid >= 2 programs when there is only one image (v7x megacore)."""
    divisors = [d for d in range(1, h + 1) if h % d == 0]
    if n_images == 1 and h >= 2:
        mc = [d for d in divisors if h // d >= 2]
        if mc:
            divisors = mc
    budget = vmem_cap - (8 << 20)
    fit = [d for d in divisors
           if int(_conv_vmem_estimate(d, w, cin, cout, split_dy) * 1.5) <= budget]
    if fit:
        divisors = fit
    under = [d for d in divisors if d * w <= target_rows]
    return max(under) if under else min(divisors)


def _pick_rows(total_rows, row_bytes, target_bytes):
    """Largest divisor of total_rows with tile <= target_bytes, >= 2 steps if possible."""
    divisors = [d for d in range(1, total_rows + 1) if total_rows % d == 0]
    if total_rows >= 2:
        mc = [d for d in divisors if total_rows // d >= 2]
        if mc:
            divisors = mc
    under = [d for d in divisors if d * row_bytes <= target_bytes]
    return max(under) if under else min(divisors)


# ----------------------------------------------------------------------------
# Pallas kernel: [optional fused BN+ReLU of previous layer on load] -> 3x3 conv as
# im2col MXU matmul(s) (bf16 in, f32 acc) -> per-channel (sum, sum_sq) BN partials.
# Grid = (image, row-tile); 3x3 halo rows arrive as two extra 1-row operands.
# ----------------------------------------------------------------------------
def _conv3x3_stats_kernel(x_top_ref, x_mid_ref, x_bot_ref, sc_ref, sh_ref, w_ref,
                          z_ref, stats_ref, xp_ref, patch_ref,
                          *, th, w, cin, cout, apply_input_act, split_dy):
    # x_top/x_bot: (1, W, Cin) halo rows; x_mid: (TH, W, Cin); all bf16.
    # sc/sh: (1, 1, Cin) f32 BN scale/shift of the previous layer (applied on load).
    # w_ref: (9*Cin, Cout) bf16 im2col weights, (dy, dx, ci)-major.
    # z_ref: (TH, W, Cout) bf16 pre-BN conv output; stats_ref: (2, Cout) f32 partials.
    # xp_ref: (TH+2, W+2, Cin) bf16 padded tile; patch_ref: bf16 im2col patch.
    t = pl.program_id(1)
    n_t = pl.num_programs(1)

    if apply_input_act:
        sc = sc_ref[...]                    # hoisted: loaded once, reused at 3 call sites
        sh = sh_ref[...]

    def load_act(ref):
        v = ref[...]
        if apply_input_act:                 # fused BN(prev layer) + ReLU, f32 math
            v = jnp.maximum(v.astype(jnp.float32) * sc + sh, 0.0).astype(jnp.bfloat16)
        return v

    # Zero padding without a full-tile memset: only the left/right border columns
    # (every step; scratch contents are otherwise fully overwritten) and the 1-row
    # top/bottom halo strips at image borders.
    xp_ref[:, 0:1, :] = jnp.zeros((th + 2, 1, cin), xp_ref.dtype)
    xp_ref[:, w + 1:w + 2, :] = jnp.zeros((th + 2, 1, cin), xp_ref.dtype)
    xp_ref[1:th + 1, 1:w + 1, :] = load_act(x_mid_ref)

    @pl.when(t > 0)                         # top halo row is real away from the image top
    def _():
        xp_ref[0:1, 1:w + 1, :] = load_act(x_top_ref)

    @pl.when(t == 0)
    def _():
        xp_ref[0:1, 1:w + 1, :] = jnp.zeros((1, w, cin), xp_ref.dtype)

    @pl.when(t < n_t - 1)                   # bottom halo row is real away from the bottom
    def _():
        xp_ref[th + 1:th + 2, 1:w + 1, :] = load_act(x_bot_ref)

    @pl.when(t == n_t - 1)
    def _():
        xp_ref[th + 1:th + 2, 1:w + 1, :] = jnp.zeros((1, w, cin), xp_ref.dtype)

    if split_dy:
        # 3 dx-shifted slabs -> ((TH+2)*W, 3*Cin); 3 accumulating K=3*Cin matmuls over
        # dy (the dy row-slab is a contiguous row slice of the patch).
        for dx in range(3):
            slab = xp_ref[:, dx:dx + w, :]                              # (TH+2, W, Cin)
            patch_ref[:, dx * cin:(dx + 1) * cin] = slab.reshape((th + 2) * w, cin)
        acc = jnp.dot(patch_ref[0:th * w, :], w_ref[0:3 * cin, :],
                      preferred_element_type=jnp.float32)
        for dy in (1, 2):
            acc = acc + jnp.dot(patch_ref[dy * w:dy * w + th * w, :],
                                w_ref[dy * 3 * cin:(dy + 1) * 3 * cin, :],
                                preferred_element_type=jnp.float32)
    else:
        # Single fused im2col matmul with K = 9*Cin.
        for k in range(9):
            dy, dx = divmod(k, 3)
            tap = xp_ref[dy:dy + th, dx:dx + w, :]                      # (TH, W, Cin)
            patch_ref[:, k * cin:(k + 1) * cin] = tap.reshape(th * w, cin)
        acc = jnp.dot(patch_ref[...], w_ref[...],
                      preferred_element_type=jnp.float32)               # (TH*W, Cout)

    # Two-phase BatchNorm: per-channel partial (sum, sum_sq) for this tile.
    s1 = jnp.sum(acc, axis=0, keepdims=True)
    s2 = jnp.sum(acc * acc, axis=0, keepdims=True)
    stats_ref[...] = jnp.concatenate([s1, s2], axis=0)

    # Pre-BN conv output (conv bias dropped: it cancels exactly under train-mode BN).
    z_ref[...] = acc.reshape(th, w, cout).astype(z_ref.dtype)


def conv3x3_stats(a2, w_hwio, in_scale, in_shift, *, n_images, img_h):
    """a2: (N*H, W, Cin) bf16 activations.  Returns (z, stats):
    z = pre-BN conv output (N*H, W, Cout) bf16, stats = per-tile (sum, sum_sq) f32."""
    nh, w, cin = a2.shape
    n, h = n_images, img_h
    assert nh == n * h
    assert w_hwio.shape[:3] == (3, 3, cin)
    cout = w_hwio.shape[3]

    split_dy = _use_dy_split(cin)
    cap = _usable_vmem_bytes()
    th = _pick_th(h, w, cin, cout, n, split_dy, cap)
    ht = h // th

    apply_act = in_scale is not None
    if not apply_act:
        in_scale = jnp.ones((cin,), jnp.float32)
        in_shift = jnp.zeros((cin,), jnp.float32)
    sc = in_scale.reshape(1, 1, cin).astype(jnp.float32)
    sh = in_shift.reshape(1, 1, cin).astype(jnp.float32)
    w2 = w_hwio.reshape(9 * cin, cout).astype(jnp.bfloat16)      # (dy, dx, ci)-major

    est = _conv_vmem_estimate(th, w, cin, cout, split_dy)
    vmem_limit = int(min(max(int(est * 1.5) + (8 << 20), 32 << 20), cap))
    patch_shape = ((th + 2) * w, 3 * cin) if split_dy else (th * w, 9 * cin)

    kernel = functools.partial(_conv3x3_stats_kernel, th=th, w=w, cin=cin, cout=cout,
                               apply_input_act=apply_act, split_dy=split_dy)

    z, stats = pl.pallas_call(
        kernel,
        out_shape=(jax.ShapeDtypeStruct((nh, w, cout), jnp.bfloat16),
                   jax.ShapeDtypeStruct((n * ht, 2, cout), jnp.float32)),
        grid=(n, ht),
        in_specs=[
            # top halo row (clamped at image top; zeroed in-kernel when t == 0)
            pl.BlockSpec((1, w, cin),
                         lambda i, t: (i * h + jnp.maximum(t * th - 1, 0), 0, 0)),
            # interior rows of this tile
            pl.BlockSpec((th, w, cin), lambda i, t: (i * ht + t, 0, 0)),
            # bottom halo row (clamped at image bottom; zeroed when t == ht-1)
            pl.BlockSpec((1, w, cin),
                         lambda i, t: (i * h + jnp.minimum((t + 1) * th, h - 1), 0, 0)),
            pl.BlockSpec((1, 1, cin), lambda i, t: (0, 0, 0)),
            pl.BlockSpec((1, 1, cin), lambda i, t: (0, 0, 0)),
            pl.BlockSpec((9 * cin, cout), lambda i, t: (0, 0)),
        ],
        out_specs=(
            pl.BlockSpec((th, w, cout), lambda i, t: (i * ht + t, 0, 0)),
            pl.BlockSpec((None, 2, cout), lambda i, t: (i * ht + t, 0, 0)),
        ),
        scratch_shapes=[
            pltpu.VMEM((th + 2, w + 2, cin), jnp.bfloat16),      # zero-padded tile
            pltpu.VMEM(patch_shape, jnp.bfloat16),               # im2col patch
        ],
        compiler_params=pltpu.CompilerParams(
            dimension_semantics=("parallel", "parallel"),
            vmem_limit_bytes=vmem_limit),
    )(a2, a2, a2, sc, sh, w2)
    return z, stats


def bn_scale_shift(stats, gamma, beta, count, eps):
    """Fold partial (sum, sum_sq) into the train-mode BN affine: y = x*scale + shift."""
    s = jnp.sum(stats, axis=0)                                   # (2, C)
    mean = s[0] / count
    var = jnp.maximum(s[1] / count - mean * mean, 0.0)           # biased var (PyTorch train)
    scale = gamma.astype(jnp.float32) * jax.lax.rsqrt(var + eps)
    shift = beta.astype(jnp.float32) - mean * scale
    return scale, shift


# ----------------------------------------------------------------------------
# Final BN + ReLU kernel (only the last layer needs a standalone normalize pass).
# Purely HBM-bound -> large (~MiB) tiles; output stays f32 (module's final output).
# ----------------------------------------------------------------------------
def _bn_relu_kernel(z_ref, sc_ref, sh_ref, o_ref):
    z = z_ref[...].astype(jnp.float32)
    o_ref[...] = jnp.maximum(z * sc_ref[...] + sh_ref[...], 0.0)


def bn_relu(z2, scale, shift):
    nh, w, c = z2.shape
    cap = _usable_vmem_bytes()
    row_bytes = _blk_bytes((1, w, c), 2) + _blk_bytes((1, w, c), 4)   # bf16 in + f32 out
    tr = _pick_rows(nh, row_bytes, target_bytes=4 << 20)
    io = 2 * (_blk_bytes((tr, w, c), 2) + _blk_bytes((tr, w, c), 4)) \
        + 2 * 2 * _blk_bytes((1, 1, c), 4)
    vmem_limit = int(min(max(int(io * 1.5) + (8 << 20), 32 << 20), cap))
    sc = scale.reshape(1, 1, c).astype(jnp.float32)
    sh = shift.reshape(1, 1, c).astype(jnp.float32)
    return pl.pallas_call(
        _bn_relu_kernel,
        out_shape=jax.ShapeDtypeStruct((nh, w, c), jnp.float32),
        grid=(nh // tr,),
        in_specs=[pl.BlockSpec((tr, w, c), lambda i: (i, 0, 0)),
                  pl.BlockSpec((1, 1, c), lambda i: (0, 0, 0)),
                  pl.BlockSpec((1, 1, c), lambda i: (0, 0, 0))],
        out_specs=pl.BlockSpec((tr, w, c), lambda i: (i, 0, 0)),
        compiler_params=pltpu.CompilerParams(
            dimension_semantics=("parallel",),
            vmem_limit_bytes=vmem_limit),
    )(z2, sc, sh)


# ----------------------------------------------------------------------------
# Plain-JAX glue (bf16): PyTorch-exact bilinear up-sample x2 (align_corners=False).
# TODO(synk): fold this fixed-weight lerp + the concat into the first conv kernel's
#             load path (scalar-prefetch per-row index tables) to remove the HBM passes.
# ----------------------------------------------------------------------------
def bilinear_upsample_x2(x_nhwc):
    n, h, w, c = x_nhwc.shape
    dt = x_nhwc.dtype

    def idx(out_size, in_size):
        d = jnp.arange(out_size, dtype=jnp.float32)
        s = jnp.maximum((d + 0.5) * (in_size / out_size) - 0.5, 0.0)
        i0 = jnp.clip(jnp.floor(s).astype(jnp.int32), 0, in_size - 1)
        i1 = jnp.minimum(i0 + 1, in_size - 1)
        return i0, i1, s - i0.astype(jnp.float32)

    i0, i1, lh = idx(2 * h, h)
    lh = lh.astype(dt)
    xr = (x_nhwc[:, i0] * (1 - lh)[None, :, None, None]
          + x_nhwc[:, i1] * lh[None, :, None, None])
    j0, j1, lw = idx(2 * w, w)
    lw = lw.astype(dt)
    return (xr[:, :, j0] * (1 - lw)[None, None, :, None]
            + xr[:, :, j1] * lw[None, None, :, None])


# ----------------------------------------------------------------------------
# UNet_up_block forward (PyTorch module in training mode; NCHW external layout).
# ----------------------------------------------------------------------------
def unet_up_block_forward(prev_feature_map_nchw, x_nchw, params, eps=1e-5):
    x = jnp.transpose(x_nchw, (0, 2, 3, 1)).astype(jnp.bfloat16)
    prev = jnp.transpose(prev_feature_map_nchw, (0, 2, 3, 1)).astype(jnp.bfloat16)

    x = bilinear_upsample_x2(x)                       # Upsample(scale_factor=2, bilinear)
    x = jnp.concatenate([x, prev], axis=-1)           # torch.cat((x, prev), dim=1)

    n, h, w, c0 = x.shape
    a = x.reshape(n * h, w, c0)                       # internal (N*H, W, C) bf16 layout

    scale = shift = None
    for (wk, _bk, gamma, beta) in params:
        # _bk (conv bias) is mathematically a no-op before train-mode BatchNorm.
        z, stats = conv3x3_stats(a, wk, scale, shift, n_images=n, img_h=h)
        scale, shift = bn_scale_shift(stats, gamma, beta, n * h * w, eps)
        a = z                                         # next conv applies BN+ReLU on load

    out = bn_relu(a, scale, shift)                    # last BN + ReLU
    cout = out.shape[-1]
    return jnp.transpose(out.reshape(n, h, w, cout), (0, 3, 1, 2))  # back to NCHW


def init_params(key, prev_channel, input_channel, output_channel):
    """Deterministic synthetic init matching the PyTorch layer shapes (weights in HWIO)."""
    params = []
    cins = [prev_channel + input_channel, output_channel, output_channel]
    for cin in cins:
        key, kw, kb = jax.random.split(key, 3)
        bound = 1.0 / ((cin * 9) ** 0.5)
        w = jax.random.uniform(kw, (3, 3, cin, output_channel), jnp.float32, -bound, bound)
        b = jax.random.uniform(kb, (output_channel,), jnp.float32, -bound, bound)
        gamma = jnp.ones((output_channel,), jnp.float32)
        beta = jnp.zeros((output_channel,), jnp.float32)
        params.append((w, b, gamma, beta))
    return params


if __name__ == "__main__":
    prev_channel, input_channel, output_channel = 4, 4, 8
    n, h, w = 2, 16, 16   # prev_feature_map spatial size; x is at half resolution

    key = jax.random.PRNGKey(0)
    k_prev, k_x, k_params = jax.random.split(key, 3)

    prev_feature_map = jax.random.normal(k_prev, (n, prev_channel, h, w), jnp.float32)
    x = jax.random.normal(k_x, (n, input_channel, h // 2, w // 2), jnp.float32)
    params = init_params(k_params, prev_channel, input_channel, output_channel)

    fwd = jax.jit(unet_up_block_forward)
    out = jax.block_until_ready(fwd(prev_feature_map, x, params))

    assert out.shape == (n, output_channel, h, w), out.shape
    assert bool(jnp.all(jnp.isfinite(out)))
    print("KERNEL_OK")
</pallas_src>

<mosaic_0001>
module attributes {stable_mosaic.version = 11 : i64} {
  func.func @_conv3x3_stats_kernel(%arg0: i32, %arg1: i32, %arg2: memref<1x16x8xbf16, #tpu.memory_space<vmem>>, %arg3: memref<16x16x8xbf16, #tpu.memory_space<vmem>>, %arg4: memref<1x16x8xbf16, #tpu.memory_space<vmem>>, %arg5: memref<1x1x8xf32, #tpu.memory_space<vmem>>, %arg6: memref<1x1x8xf32, #tpu.memory_space<vmem>>, %arg7: memref<72x8xbf16, #tpu.memory_space<vmem>>, %arg8: memref<16x16x8xbf16, #tpu.memory_space<vmem>>, %arg9: memref<1x2x8xf32, #tpu.memory_space<vmem>>, %arg10: memref<18x18x8xbf16, #tpu.memory_space<vmem>>, %arg11: memref<256x72xbf16, #tpu.memory_space<vmem>>) attributes {dimension_semantics = [#tpu.dimension_semantics<parallel>, #tpu.dimension_semantics<parallel>], iteration_bounds = array<i64: 2, 1>, scalar_prefetch = 0 : i64, scratch_operands = 2 : i64, tpu.core_type = #tpu.core_type<tc>, window_params = [{transform_indices = @transform_0, window_bounds = array<i64: 1, 16, 8>}, {transform_indices = @transform_1, window_bounds = array<i64: 16, 16, 8>}, {transform_indices = @transform_2, window_bounds = array<i64: 1, 16, 8>}, {pipeline_mode = #tpu.pipeline_mode<synchronous>, transform_indices = @transform_3, window_bounds = array<i64: 1, 1, 8>}, {pipeline_mode = #tpu.pipeline_mode<synchronous>, transform_indices = @transform_4, window_bounds = array<i64: 1, 1, 8>}, {pipeline_mode = #tpu.pipeline_mode<synchronous>, transform_indices = @transform_5, window_bounds = array<i64: 72, 8>}, {transform_indices = @transform_6, window_bounds = array<i64: 16, 16, 8>}, {transform_indices = @transform_7, window_bounds = array<i64: 1, 2, 8>}]} {
    %cst = arith.constant 0.000000e+00 : bf16
    %0 = vector.broadcast %cst : bf16 to vector<18x1x8xbf16>
    %c0 = arith.constant 0 : index
    %c0_0 = arith.constant 0 : index
    %c0_1 = arith.constant 0 : index
    %1 = vector.load %arg10[%c0, %c0_0, %c0_1] : memref<18x18x8xbf16, #tpu.memory_space<vmem>>, vector<18x1x8xbf16>
    tpu.vector_store %arg10[%c0, %c0_0, %c0_1], %0 {strides = array<i32>} : memref<18x18x8xbf16, #tpu.memory_space<vmem>>, vector<18x1x8xbf16>,
    %cst_2 = arith.constant 0.000000e+00 : bf16
    %2 = vector.broadcast %cst_2 : bf16 to vector<18x1x8xbf16>
    %c0_3 = arith.constant 0 : index
    %c17 = arith.constant 17 : index
    %c0_4 = arith.constant 0 : index
    %3 = vector.load %arg10[%c0_3, %c17, %c0_4] : memref<18x18x8xbf16, #tpu.memory_space<vmem>>, vector<18x1x8xbf16>
    tpu.vector_store %arg10[%c0_3, %c17, %c0_4], %2 {strides = array<i32>} : memref<18x18x8xbf16, #tpu.memory_space<vmem>>, vector<18x1x8xbf16>,
    %c0_5 = arith.constant 0 : index
    %c0_6 = arith.constant 0 : index
    %c0_7 = arith.constant 0 : index
    %4 = vector.load %arg3[%c0_5, %c0_6, %c0_7] : memref<16x16x8xbf16, #tpu.memory_space<vmem>>, vector<16x16x8xbf16>
    %c1 = arith.constant 1 : index
    %c1_8 = arith.constant 1 : index
    %c0_9 = arith.constant 0 : index
    %5 = vector.load %arg10[%c1, %c1_8, %c0_9] : memref<18x18x8xbf16, #tpu.memory_space<vmem>>, vector<16x16x8xbf16>
    tpu.vector_store %arg10[%c1, %c1_8, %c0_9], %4 {strides = array<i32>} : memref<18x18x8xbf16, #tpu.memory_space<vmem>>, vector<16x16x8xbf16>,
    %c0_i32 = arith.constant 0 : i32
    %6 = arith.cmpi sgt, %arg1, %c0_i32 : i32
    %7 = arith.extui %6 : i1 to i32
    %c0_i32_10 = arith.constant 0 : i32
    %8 = arith.cmpi ne, %7, %c0_i32_10 : i32
    scf.if %8 {
      %c0_66 = arith.constant 0 : index
      %c0_67 = arith.constant 0 : index
      %c0_68 = arith.constant 0 : index
      %60 = vector.load %arg2[%c0_66, %c0_67, %c0_68] : memref<1x16x8xbf16, #tpu.memory_space<vmem>>, vector<1x16x8xbf16>
      %c0_69 = arith.constant 0 : index
      %c1_70 = arith.constant 1 : index
      %c0_71 = arith.constant 0 : index
      %61 = vector.load %arg10[%c0_69, %c1_70, %c0_71] : memref<18x18x8xbf16, #tpu.memory_space<vmem>>, vector<1x16x8xbf16>
      tpu.vector_store %arg10[%c0_69, %c1_70, %c0_71], %60 {strides = array<i32>} : memref<18x18x8xbf16, #tpu.memory_space<vmem>>, vector<1x16x8xbf16>,
    } else {
    }
    %c0_i32_11 = arith.constant 0 : i32
    %9 = arith.cmpi eq, %arg1, %c0_i32_11 : i32
    %10 = arith.extui %9 : i1 to i32
    %c0_i32_12 = arith.constant 0 : i32
    %11 = arith.cmpi ne, %10, %c0_i32_12 : i32
    scf.if %11 {
      %cst_66 = arith.constant 0.000000e+00 : bf16
      %60 = vector.broadcast %cst_66 : bf16 to vector<1x16x8xbf16>
      %c0_67 = arith.constant 0 : index
      %c1_68 = arith.constant 1 : index
      %c0_69 = arith.constant 0 : index
      %61 = vector.load %arg10[%c0_67, %c1_68, %c0_69] : memref<18x18x8xbf16, #tpu.memory_space<vmem>>, vector<1x16x8xbf16>
      tpu.vector_store %arg10[%c0_67, %c1_68, %c0_69], %60 {strides = array<i32>} : memref<18x18x8xbf16, #tpu.memory_space<vmem>>, vector<1x16x8xbf16>,
    } else {
    }
    %c0_i32_13 = arith.constant 0 : i32
    %12 = arith.cmpi slt, %arg1, %c0_i32_13 : i32
    %13 = arith.extui %12 : i1 to i32
    %c0_i32_14 = arith.constant 0 : i32
    %14 = arith.cmpi ne, %13, %c0_i32_14 : i32
    scf.if %14 {
      %c0_66 = arith.constant 0 : index
      %c0_67 = arith.constant 0 : index
      %c0_68 = arith.constant 0 : index
      %60 = vector.load %arg4[%c0_66, %c0_67, %c0_68] : memref<1x16x8xbf16, #tpu.memory_space<vmem>>, vector<1x16x8xbf16>
      %c17_69 = arith.constant 17 : index
      %c1_70 = arith.constant 1 : index
      %c0_71 = arith.constant 0 : index
      %61 = vector.load %arg10[%c17_69, %c1_70, %c0_71] : memref<18x18x8xbf16, #tpu.memory_space<vmem>>, vector<1x16x8xbf16>
      tpu.vector_store %arg10[%c17_69, %c1_70, %c0_71], %60 {strides = array<i32>} : memref<18x18x8xbf16, #tpu.memory_space<vmem>>, vector<1x16x8xbf16>,
    } else {
    }
    %c0_i32_15 = arith.constant 0 : i32
    %15 = arith.cmpi eq, %arg1, %c0_i32_15 : i32
    %16 = arith.extui %15 : i1 to i32
    %c0_i32_16 = arith.constant 0 : i32
    %17 = arith.cmpi ne, %16, %c0_i32_16 : i32
    scf.if %17 {
      %cst_66 = arith.constant 0.000000e+00 : bf16
      %60 = vector.broadcast %cst_66 : bf16 to vector<1x16x8xbf16>
      %c17_67 = arith.constant 17 : index
      %c1_68 = arith.constant 1 : index
      %c0_69 = arith.constant 0 : index
      %61 = vector.load %arg10[%c17_67, %c1_68, %c0_69] : memref<18x18x8xbf16, #tpu.memory_space<vmem>>, vector<1x16x8xbf16>
      tpu.vector_store %arg10[%c17_67, %c1_68, %c0_69], %60 {strides = array<i32>} : memref<18x18x8xbf16, #tpu.memory_space<vmem>>, vector<1x16x8xbf16>,
    } else {
    }
    %c0_17 = arith.constant 0 : index
    %c0_18 = arith.constant 0 : index
    %c0_19 = arith.constant 0 : index
    %18 = vector.load %arg10[%c0_17, %c0_18, %c0_19] : memref<18x18x8xbf16, #tpu.memory_space<vmem>>, vector<16x16x8xbf16>
    %19 = vector.shape_cast %18 : vector<16x16x8xbf16> to vector<256x8xbf16>
    %c0_20 = arith.constant 0 : index
    %c0_21 = arith.constant 0 : index
    %20 = vector.load %arg11[%c0_20, %c0_21] : memref<256x72xbf16, #tpu.memory_space<vmem>>, vector<256x8xbf16>
    tpu.vector_store %arg11[%c0_20, %c0_21], %19 {strides = array<i32>} : memref<256x72xbf16, #tpu.memory_space<vmem>>, vector<256x8xbf16>,
    %c0_22 = arith.constant 0 : index
    %c1_23 = arith.constant 1 : index
    %c0_24 = arith.constant 0 : index
    %21 = vector.load %arg10[%c0_22, %c1_23, %c0_24] : memref<18x18x8xbf16, #tpu.memory_space<vmem>>, vector<16x16x8xbf16>
    %22 = vector.shape_cast %21 : vector<16x16x8xbf16> to vector<256x8xbf16>
    %c0_25 = arith.constant 0 : index
    %c8 = arith.constant 8 : index
    %23 = vector.load %arg11[%c0_25, %c8] : memref<256x72xbf16, #tpu.memory_space<vmem>>, vector<256x8xbf16>
    tpu.vector_store %arg11[%c0_25, %c8], %22 {strides = array<i32>} : memref<256x72xbf16, #tpu.memory_space<vmem>>, vector<256x8xbf16>,
    %c0_26 = arith.constant 0 : index
    %c2 = arith.constant 2 : index
    %c0_27 = arith.constant 0 : index
    %24 = vector.load %arg10[%c0_26, %c2, %c0_27] : memref<18x18x8xbf16, #tpu.memory_space<vmem>>, vector<16x16x8xbf16>
    %25 = vector.shape_cast %24 : vector<16x16x8xbf16> to vector<256x8xbf16>
    %c0_28 = arith.constant 0 : index
    %c16 = arith.constant 16 : index
    %26 = vector.load %arg11[%c0_28, %c16] : memref<256x72xbf16, #tpu.memory_space<vmem>>, vector<256x8xbf16>
    tpu.vector_store %arg11[%c0_28, %c16], %25 {strides = array<i32>} : memref<256x72xbf16, #tpu.memory_space<vmem>>, vector<256x8xbf16>,
    %c1_29 = arith.constant 1 : index
    %c0_30 = arith.constant 0 : index
    %c0_31 = arith.constant 0 : index
    %27 = vector.load %arg10[%c1_29, %c0_30, %c0_31] : memref<18x18x8xbf16, #tpu.memory_space<vmem>>, vector<16x16x8xbf16>
    %28 = vector.shape_cast %27 : vector<16x16x8xbf16> to vector<256x8xbf16>
    %c0_32 = arith.constant 0 : index
    %c24 = arith.constant 24 : index
    %29 = vector.load %arg11[%c0_32, %c24] : memref<256x72xbf16, #tpu.memory_space<vmem>>, vector<256x8xbf16>
    tpu.vector_store %arg11[%c0_32, %c24], %28 {strides = array<i32>} : memref<256x72xbf16, #tpu.memory_space<vmem>>, vector<256x8xbf16>,
    %c1_33 = arith.constant 1 : index
    %c1_34 = arith.constant 1 : index
    %c0_35 = arith.constant 0 : index
    %30 = vector.load %arg10[%c1_33, %c1_34, %c0_35] : memref<18x18x8xbf16, #tpu.memory_space<vmem>>, vector<16x16x8xbf16>
    %31 = vector.shape_cast %30 : vector<16x16x8xbf16> to vector<256x8xbf16>
    %c0_36 = arith.constant 0 : index
    %c32 = arith.constant 32 : index
    %32 = vector.load %arg11[%c0_36, %c32] : memref<256x72xbf16, #tpu.memory_space<vmem>>, vector<256x8xbf16>
    tpu.vector_store %arg11[%c0_36, %c32], %31 {strides = array<i32>} : memref<256x72xbf16, #tpu.memory_space<vmem>>, vector<256x8xbf16>,
    %c1_37 = arith.constant 1 : index
    %c2_38 = arith.constant 2 : index
    %c0_39 = arith.constant 0 : index
    %33 = vector.load %arg10[%c1_37, %c2_38, %c0_39] : memref<18x18x8xbf16, #tpu.memory_space<vmem>>, vector<16x16x8xbf16>
    %34 = vector.shape_cast %33 : vector<16x16x8xbf16> to vector<256x8xbf16>
    %c0_40 = arith.constant 0 : index
    %c40 = arith.constant 40 : index
    %35 = vector.load %arg11[%c0_40, %c40] : memref<256x72xbf16, #tpu.memory_space<vmem>>, vector<256x8xbf16>
    tpu.vector_store %arg11[%c0_40, %c40], %34 {strides = array<i32>} : memref<256x72xbf16, #tpu.memory_space<vmem>>, vector<256x8xbf16>,
    %c2_41 = arith.constant 2 : index
    %c0_42 = arith.constant 0 : index
    %c0_43 = arith.constant 0 : index
    %36 = vector.load %arg10[%c2_41, %c0_42, %c0_43] : memref<18x18x8xbf16, #tpu.memory_space<vmem>>, vector<16x16x8xbf16>
    %37 = vector.shape_cast %36 : vector<16x16x8xbf16> to vector<256x8xbf16>
    %c0_44 = arith.constant 0 : index
    %c48 = arith.constant 48 : index
    %38 = vector.load %arg11[%c0_44, %c48] : memref<256x72xbf16, #tpu.memory_space<vmem>>, vector<256x8xbf16>
    tpu.vector_store %arg11[%c0_44, %c48], %37 {strides = array<i32>} : memref<256x72xbf16, #tpu.memory_space<vmem>>, vector<256x8xbf16>,
    %c2_45 = arith.constant 2 : index
    %c1_46 = arith.constant 1 : index
    %c0_47 = arith.constant 0 : index
    %39 = vector.load %arg10[%c2_45, %c1_46, %c0_47] : memref<18x18x8xbf16, #tpu.memory_space<vmem>>, vector<16x16x8xbf16>
    %40 = vector.shape_cast %39 : vector<16x16x8xbf16> to vector<256x8xbf16>
    %c0_48 = arith.constant 0 : index
    %c56 = arith.constant 56 : index
    %41 = vector.load %arg11[%c0_48, %c56] : memref<256x72xbf16, #tpu.memory_space<vmem>>, vector<256x8xbf16>
    tpu.vector_store %arg11[%c0_48, %c56], %40 {strides = array<i32>} : memref<256x72xbf16, #tpu.memory_space<vmem>>, vector<256x8xbf16>,
    %c2_49 = arith.constant 2 : index
    %c2_50 = arith.constant 2 : index
    %c0_51 = arith.constant 0 : index
    %42 = vector.load %arg10[%c2_49, %c2_50, %c0_51] : memref<18x18x8xbf16, #tpu.memory_space<vmem>>, vector<16x16x8xbf16>
    %43 = vector.shape_cast %42 : vector<16x16x8xbf16> to vector<256x8xbf16>
    %c0_52 = arith.constant 0 : index
    %c64 = arith.constant 64 : index
    %44 = vector.load %arg11[%c0_52, %c64] : memref<256x72xbf16, #tpu.memory_space<vmem>>, vector<256x8xbf16>
    tpu.vector_store %arg11[%c0_52, %c64], %43 {strides = array<i32>} : memref<256x72xbf16, #tpu.memory_space<vmem>>, vector<256x8xbf16>,
    %c0_53 = arith.constant 0 : index
    %c0_54 = arith.constant 0 : index
    %45 = vector.load %arg11[%c0_53, %c0_54] : memref<256x72xbf16, #tpu.memory_space<vmem>>, vector<256x72xbf16>
    %c0_55 = arith.constant 0 : index
    %c0_56 = arith.constant 0 : index
    %46 = vector.load %arg7[%c0_55, %c0_56] : memref<72x8xbf16, #tpu.memory_space<vmem>>, vector<72x8xbf16>
    %cst_57 = arith.constant dense<0.000000e+00> : vector<256x8xf32>
    %47 = tpu.matmul %45, %46, %cst_57 {dimension_numbers = #tpu.dot_dimension_numbers<[1], [0], [0], [1], [0, 0, 1, 1], [], []>} : vector<256x72xbf16>, vector<72x8xbf16>, vector<256x8xf32> -> vector<256x8xf32>
    %cst_58 = arith.constant dense<0.000000e+00> : vector<8xf32>
    %48 = vector.multi_reduction <add>, %47, %cst_58 [0] : vector<256x8xf32> to vector<8xf32>
    %49 = vector.shape_cast %48 : vector<8xf32> to vector<1x8xf32>
    %50 = arith.mulf %47, %47 : vector<256x8xf32>
    %cst_59 = arith.constant dense<0.000000e+00> : vector<8xf32>
    %51 = vector.multi_reduction <add>, %50, %cst_59 [0] : vector<256x8xf32> to vector<8xf32>
    %52 = vector.shape_cast %51 : vector<8xf32> to vector<1x8xf32>
    %53 = tpu.concatenate %49, %52 in 0 : vector<1x8xf32>, vector<1x8xf32> -> vector<2x8xf32>
    %c0_60 = arith.constant 0 : index
    %c0_61 = arith.constant 0 : index
    %c0_62 = arith.constant 0 : index
    %54 = vector.load %arg9[%c0_60, %c0_61, %c0_62] : memref<1x2x8xf32, #tpu.memory_space<vmem>>, vector<1x2x8xf32>
    %55 = vector.shape_cast %54 : vector<1x2x8xf32> to vector<2x8xf32>
    %56 = vector.shape_cast %53 : vector<2x8xf32> to vector<1x2x8xf32>
    tpu.vector_store %arg9[%c0_60, %c0_61, %c0_62], %56 {strides = array<i32>} : memref<1x2x8xf32, #tpu.memory_space<vmem>>, vector<1x2x8xf32>,
    %57 = vector.shape_cast %47 : vector<256x8xf32> to vector<16x16x8xf32>
    %58 = arith.truncf %57 : vector<16x16x8xf32> to vector<16x16x8xbf16>
    %c0_63 = arith.constant 0 : index
    %c0_64 = arith.constant 0 : index
    %c0_65 = arith.constant 0 : index
    %59 = vector.load %arg8[%c0_63, %c0_64, %c0_65] : memref<16x16x8xbf16, #tpu.memory_space<vmem>>, vector<16x16x8xbf16>
    tpu.vector_store %arg8[%c0_63, %c0_64, %c0_65], %58 {strides = array<i32>} : memref<16x16x8xbf16, #tpu.memory_space<vmem>>, vector<16x16x8xbf16>,
    return
  }
  func.func @transform_0(%arg0: i32, %arg1: i32) -> (i32, i32, i32) {
    %c16_i32 = arith.constant 16 : i32
    %0 = arith.muli %arg0, %c16_i32 : i32
    %c16_i32_0 = arith.constant 16 : i32
    %1 = arith.muli %arg1, %c16_i32_0 : i32
    %c1_i32 = arith.constant 1 : i32
    %2 = arith.subi %1, %c1_i32 : i32
    %c0_i32 = arith.constant 0 : i32
    %3 = arith.maxsi %2, %c0_i32 : i32
    %4 = arith.addi %0, %3 : i32
    %c0_i32_1 = arith.constant 0 : i32
    %c0_i32_2 = arith.constant 0 : i32
    %c0_i32_3 = arith.constant 0 : i32
    return %4, %c0_i32_1, %c0_i32_2 : i32, i32, i32
  }
  func.func @transform_1(%arg0: i32, %arg1: i32) -> (i32, i32, i32) {
    %c1_i32 = arith.constant 1 : i32
    %0 = arith.muli %arg0, %c1_i32 : i32
    %1 = arith.addi %0, %arg1 : i32
    %c0_i32 = arith.constant 0 : i32
    %c0_i32_0 = arith.constant 0 : i32
    %c0_i32_1 = arith.constant 0 : i32
    return %1, %c0_i32, %c0_i32_0 : i32, i32, i32
  }
  func.func @transform_2(%arg0: i32, %arg1: i32) -> (i32, i32, i32) {
    %c16_i32 = arith.constant 16 : i32
    %0 = arith.muli %arg0, %c16_i32 : i32
    %c1_i32 = arith.constant 1 : i32
    %1 = arith.addi %arg1, %c1_i32 : i32
    %c16_i32_0 = arith.constant 16 : i32
    %2 = arith.muli %1, %c16_i32_0 : i32
    %c15_i32 = arith.constant 15 : i32
    %3 = arith.minsi %2, %c15_i32 : i32
    %4 = arith.addi %0, %3 : i32
    %c0_i32 = arith.constant 0 : i32
    %c0_i32_1 = arith.constant 0 : i32
    %c0_i32_2 = arith.constant 0 : i32
    return %4, %c0_i32, %c0_i32_1 : i32, i32, i32
  }
  func.func @transform_3(%arg0: i32, %arg1: i32) -> (i32, i32, i32) {
    %c0_i32 = arith.constant 0 : i32
    %c0_i32_0 = arith.constant 0 : i32
    %c0_i32_1 = arith.constant 0 : i32
    %c0_i32_2 = arith.constant 0 : i32
    return %c0_i32, %c0_i32_0, %c0_i32_1 : i32, i32, i32
  }
  func.func @transform_4(%arg0: i32, %arg1: i32) -> (i32, i32, i32) {
    %c0_i32 = arith.constant 0 : i32
    %c0_i32_0 = arith.constant 0 : i32
    %c0_i32_1 = arith.constant 0 : i32
    %c0_i32_2 = arith.constant 0 : i32
    return %c0_i32, %c0_i32_0, %c0_i32_1 : i32, i32, i32
  }
  func.func @transform_5(%arg0: i32, %arg1: i32) -> (i32, i32) {
    %c0_i32 = arith.constant 0 : i32
    %c0_i32_0 = arith.constant 0 : i32
    %c0_i32_1 = arith.constant 0 : i32
    return %c0_i32, %c0_i32_0 : i32, i32
  }
  func.func @transform_6(%arg0: i32, %arg1: i32) -> (i32, i32, i32) {
    %c1_i32 = arith.constant 1 : i32
    %0 = arith.muli %arg0, %c1_i32 : i32
    %1 = arith.addi %0, %arg1 : i32
    %c0_i32 = arith.constant 0 : i32
    %c0_i32_0 = arith.constant 0 : i32
    %c0_i32_1 = arith.constant 0 : i32
    return %1, %c0_i32, %c0_i32_0 : i32, i32, i32
  }
  func.func @transform_7(%arg0: i32, %arg1: i32) -> (i32, i32, i32) {
    %c1_i32 = arith.constant 1 : i32
    %0 = arith.muli %arg0, %c1_i32 : i32
    %1 = arith.addi %0, %arg1 : i32
    %c0_i32 = arith.constant 0 : i32
    %c0_i32_0 = arith.constant 0 : i32
    %c0_i32_1 = arith.constant 0 : i32
    return %1, %c0_i32, %c0_i32_0 : i32, i32, i32
  }
}

module attributes {stable_mosaic.version = 11 : i64} {
  func.func @_bn_relu_kernel(%arg0: i32, %arg1: memref<16x16x8xbf16, #tpu.memory_space<vmem>>, %arg2: memref<1x1x8xf32, #tpu.memory_space<vmem>>, %arg3: memref<1x1x8xf32, #tpu.memory_space<vmem>>, %arg4: memref<16x16x8xf32, #tpu.memory_space<vmem>>) attributes {dimension_semantics = [#tpu.dimension_semantics<parallel>], iteration_bounds = array<i64: 2>, scalar_prefetch = 0 : i64, scratch_operands = 0 : i64, tpu.core_type = #tpu.core_type<tc>, window_params = [{transform_indices = @transform_0, window_bounds = array<i64: 16, 16, 8>}, {pipeline_mode = #tpu.pipeline_mode<synchronous>, transform_indices = @transform_1, window_bounds = array<i64: 1, 1, 8>}, {pipeline_mode = #tpu.pipeline_mode<synchronous>, transform_indices = @transform_2, window_bounds = array<i64: 1, 1, 8>}, {transform_indices = @transform_3, window_bounds = array<i64: 16, 16, 8>}]} {
    %c0 = arith.constant 0 : index
    %c0_0 = arith.constant 0 : index
    %c0_1 = arith.constant 0 : index
    %0 = vector.load %arg1[%c0, %c0_0, %c0_1] : memref<16x16x8xbf16, #tpu.memory_space<vmem>>, vector<16x16x8xbf16>
    %1 = arith.extf %0 : vector<16x16x8xbf16> to vector<16x16x8xf32>
    %c0_2 = arith.constant 0 : index
    %c0_3 = arith.constant 0 : index
    %c0_4 = arith.constant 0 : index
    %2 = vector.load %arg2[%c0_2, %c0_3, %c0_4] : memref<1x1x8xf32, #tpu.memory_space<vmem>>, vector<1x1x8xf32>
    %3 = vector.broadcast %2 : vector<1x1x8xf32> to vector<16x16x8xf32>
    %4 = arith.mulf %1, %3 : vector<16x16x8xf32>
    %c0_5 = arith.constant 0 : index
    %c0_6 = arith.constant 0 : index
    %c0_7 = arith.constant 0 : index
    %5 = vector.load %arg3[%c0_5, %c0_6, %c0_7] : memref<1x1x8xf32, #tpu.memory_space<vmem>>, vector<1x1x8xf32>
    %6 = vector.broadcast %5 : vector<1x1x8xf32> to vector<16x16x8xf32>
    %7 = arith.addf %4, %6 : vector<16x16x8xf32>
    %cst = arith.constant 0.000000e+00 : f32
    %8 = vector.broadcast %cst : f32 to vector<16x16x8xf32>
    %9 = arith.maximumf %7, %8 : vector<16x16x8xf32>
    %c0_8 = arith.constant 0 : index
    %c0_9 = arith.constant 0 : index
    %c0_10 = arith.constant 0 : index
    %10 = vector.load %arg4[%c0_8, %c0_9, %c0_10] : memref<16x16x8xf32, #tpu.memory_space<vmem>>, vector<16x16x8xf32>
    tpu.vector_store %arg4[%c0_8, %c0_9, %c0_10], %9 {strides = array<i32>} : memref<16x16x8xf32, #tpu.memory_space<vmem>>, vector<16x16x8xf32>,
    return
  }
  func.func @transform_0(%arg0: i32) -> (i32, i32, i32) {
    %c0_i32 = arith.constant 0 : i32
    %c0_i32_0 = arith.constant 0 : i32
    %c0_i32_1 = arith.constant 0 : i32
    return %arg0, %c0_i32, %c0_i32_0 : i32, i32, i32
  }
  func.func @transform_1(%arg0: i32) -> (i32, i32, i32) {
    %c0_i32 = arith.constant 0 : i32
    %c0_i32_0 = arith.constant 0 : i32
    %c0_i32_1 = arith.constant 0 : i32
    %c0_i32_2 = arith.constant 0 : i32
    return %c0_i32, %c0_i32_0, %c0_i32_1 : i32, i32, i32
  }
  func.func @transform_2(%arg0: i32) -> (i32, i32, i32) {
    %c0_i32 = arith.constant 0 : i32
    %c0_i32_0 = arith.constant 0 : i32
    %c0_i32_1 = arith.constant 0 : i32
    %c0_i32_2 = arith.constant 0 : i32
    return %c0_i32, %c0_i32_0, %c0_i32_1 : i32, i32, i32
  }
  func.func @transform_3(%arg0: i32) -> (i32, i32, i32) {
    %c0_i32 = arith.constant 0 : i32
    %c0_i32_0 = arith.constant 0 : i32
    %c0_i32_1 = arith.constant 0 : i32
    return %arg0, %c0_i32, %c0_i32_0 : i32, i32, i32
  }
}

module attributes {stable_mosaic.version = 11 : i64} {
  func.func @_conv3x3_stats_kernel(%arg0: i32, %arg1: i32, %arg2: memref<1x16x8xbf16, #tpu.memory_space<vmem>>, %arg3: memref<16x16x8xbf16, #tpu.memory_space<vmem>>, %arg4: memref<1x16x8xbf16, #tpu.memory_space<vmem>>, %arg5: memref<1x1x8xf32, #tpu.memory_space<vmem>>, %arg6: memref<1x1x8xf32, #tpu.memory_space<vmem>>, %arg7: memref<72x8xbf16, #tpu.memory_space<vmem>>, %arg8: memref<16x16x8xbf16, #tpu.memory_space<vmem>>, %arg9: memref<1x2x8xf32, #tpu.memory_space<vmem>>, %arg10: memref<18x18x8xbf16, #tpu.memory_space<vmem>>, %arg11: memref<256x72xbf16, #tpu.memory_space<vmem>>) attributes {dimension_semantics = [#tpu.dimension_semantics<parallel>, #tpu.dimension_semantics<parallel>], iteration_bounds = array<i64: 2, 1>, scalar_prefetch = 0 : i64, scratch_operands = 2 : i64, tpu.core_type = #tpu.core_type<tc>, window_params = [{transform_indices = @transform_0, window_bounds = array<i64: 1, 16, 8>}, {transform_indices = @transform_1, window_bounds = array<i64: 16, 16, 8>}, {transform_indices = @transform_2, window_bounds = array<i64: 1, 16, 8>}, {pipeline_mode = #tpu.pipeline_mode<synchronous>, transform_indices = @transform_3, window_bounds = array<i64: 1, 1, 8>}, {pipeline_mode = #tpu.pipeline_mode<synchronous>, transform_indices = @transform_4, window_bounds = array<i64: 1, 1, 8>}, {pipeline_mode = #tpu.pipeline_mode<synchronous>, transform_indices = @transform_5, window_bounds = array<i64: 72, 8>}, {transform_indices = @transform_6, window_bounds = array<i64: 16, 16, 8>}, {transform_indices = @transform_7, window_bounds = array<i64: 1, 2, 8>}]} {
    %c0 = arith.constant 0 : index
    %c0_0 = arith.constant 0 : index
    %c0_1 = arith.constant 0 : index
    %0 = vector.load %arg5[%c0, %c0_0, %c0_1] : memref<1x1x8xf32, #tpu.memory_space<vmem>>, vector<1x1x8xf32>
    %c0_2 = arith.constant 0 : index
    %c0_3 = arith.constant 0 : index
    %c0_4 = arith.constant 0 : index
    %1 = vector.load %arg6[%c0_2, %c0_3, %c0_4] : memref<1x1x8xf32, #tpu.memory_space<vmem>>, vector<1x1x8xf32>
    %cst = arith.constant 0.000000e+00 : bf16
    %2 = vector.broadcast %cst : bf16 to vector<18x1x8xbf16>
    %c0_5 = arith.constant 0 : index
    %c0_6 = arith.constant 0 : index
    %c0_7 = arith.constant 0 : index
    %3 = vector.load %arg10[%c0_5, %c0_6, %c0_7] : memref<18x18x8xbf16, #tpu.memory_space<vmem>>, vector<18x1x8xbf16>
    tpu.vector_store %arg10[%c0_5, %c0_6, %c0_7], %2 {strides = array<i32>} : memref<18x18x8xbf16, #tpu.memory_space<vmem>>, vector<18x1x8xbf16>,
    %cst_8 = arith.constant 0.000000e+00 : bf16
    %4 = vector.broadcast %cst_8 : bf16 to vector<18x1x8xbf16>
    %c0_9 = arith.constant 0 : index
    %c17 = arith.constant 17 : index
    %c0_10 = arith.constant 0 : index
    %5 = vector.load %arg10[%c0_9, %c17, %c0_10] : memref<18x18x8xbf16, #tpu.memory_space<vmem>>, vector<18x1x8xbf16>
    tpu.vector_store %arg10[%c0_9, %c17, %c0_10], %4 {strides = array<i32>} : memref<18x18x8xbf16, #tpu.memory_space<vmem>>, vector<18x1x8xbf16>,
    %c0_11 = arith.constant 0 : index
    %c0_12 = arith.constant 0 : index
    %c0_13 = arith.constant 0 : index
    %6 = vector.load %arg3[%c0_11, %c0_12, %c0_13] : memref<16x16x8xbf16, #tpu.memory_space<vmem>>, vector<16x16x8xbf16>
    %7 = arith.extf %6 : vector<16x16x8xbf16> to vector<16x16x8xf32>
    %8 = vector.broadcast %0 : vector<1x1x8xf32> to vector<16x16x8xf32>
    %9 = arith.mulf %7, %8 : vector<16x16x8xf32>
    %10 = vector.broadcast %1 : vector<1x1x8xf32> to vector<16x16x8xf32>
    %11 = arith.addf %9, %10 : vector<16x16x8xf32>
    %cst_14 = arith.constant 0.000000e+00 : f32
    %12 = vector.broadcast %cst_14 : f32 to vector<16x16x8xf32>
    %13 = arith.maximumf %11, %12 : vector<16x16x8xf32>
    %14 = arith.truncf %13 : vector<16x16x8xf32> to vector<16x16x8xbf16>
    %c1 = arith.constant 1 : index
    %c1_15 = arith.constant 1 : index
    %c0_16 = arith.constant 0 : index
    %15 = vector.load %arg10[%c1, %c1_15, %c0_16] : memref<18x18x8xbf16, #tpu.memory_space<vmem>>, vector<16x16x8xbf16>
    tpu.vector_store %arg10[%c1, %c1_15, %c0_16], %14 {strides = array<i32>} : memref<18x18x8xbf16, #tpu.memory_space<vmem>>, vector<16x16x8xbf16>,
    %c0_i32 = arith.constant 0 : i32
    %16 = arith.cmpi sgt, %arg1, %c0_i32 : i32
    %17 = arith.extui %16 : i1 to i32
    %c0_i32_17 = arith.constant 0 : i32
    %18 = arith.cmpi ne, %17, %c0_i32_17 : i32
    scf.if %18 {
      %c0_73 = arith.constant 0 : index
      %c0_74 = arith.constant 0 : index
      %c0_75 = arith.constant 0 : index
      %70 = vector.load %arg2[%c0_73, %c0_74, %c0_75] : memref<1x16x8xbf16, #tpu.memory_space<vmem>>, vector<1x16x8xbf16>
      %71 = arith.extf %70 : vector<1x16x8xbf16> to vector<1x16x8xf32>
      %72 = vector.broadcast %0 : vector<1x1x8xf32> to vector<1x16x8xf32>
      %73 = arith.mulf %71, %72 : vector<1x16x8xf32>
      %74 = vector.broadcast %1 : vector<1x1x8xf32> to vector<1x16x8xf32>
      %75 = arith.addf %73, %74 : vector<1x16x8xf32>
      %cst_76 = arith.constant 0.000000e+00 : f32
      %76 = vector.broadcast %cst_76 : f32 to vector<1x16x8xf32>
      %77 = arith.maximumf %75, %76 : vector<1x16x8xf32>
      %78 = arith.truncf %77 : vector<1x16x8xf32> to vector<1x16x8xbf16>
      %c0_77 = arith.constant 0 : index
      %c1_78 = arith.constant 1 : index
      %c0_79 = arith.constant 0 : index
      %79 = vector.load %arg10[%c0_77, %c1_78, %c0_79] : memref<18x18x8xbf16, #tpu.memory_space<vmem>>, vector<1x16x8xbf16>
      tpu.vector_store %arg10[%c0_77, %c1_78, %c0_79], %78 {strides = array<i32>} : memref<18x18x8xbf16, #tpu.memory_space<vmem>>, vector<1x16x8xbf16>,
    } else {
    }
    %c0_i32_18 = arith.constant 0 : i32
    %19 = arith.cmpi eq, %arg1, %c0_i32_18 : i32
    %20 = arith.extui %19 : i1 to i32
    %c0_i32_19 = arith.constant 0 : i32
    %21 = arith.cmpi ne, %20, %c0_i32_19 : i32
    scf.if %21 {
      %cst_73 = arith.constant 0.000000e+00 : bf16
      %70 = vector.broadcast %cst_73 : bf16 to vector<1x16x8xbf16>
      %c0_74 = arith.constant 0 : index
      %c1_75 = arith.constant 1 : index
      %c0_76 = arith.constant 0 : index
      %71 = vector.load %arg10[%c0_74, %c1_75, %c0_76] : memref<18x18x8xbf16, #tpu.memory_space<vmem>>, vector<1x16x8xbf16>
      tpu.vector_store %arg10[%c0_74, %c1_75, %c0_76], %70 {strides = array<i32>} : memref<18x18x8xbf16, #tpu.memory_space<vmem>>, vector<1x16x8xbf16>,
    } else {
    }
    %c0_i32_20 = arith.constant 0 : i32
    %22 = arith.cmpi slt, %arg1, %c0_i32_20 : i32
    %23 = arith.extui %22 : i1 to i32
    %c0_i32_21 = arith.constant 0 : i32
    %24 = arith.cmpi ne, %23, %c0_i32_21 : i32
    scf.if %24 {
      %c0_73 = arith.constant 0 : index
      %c0_74 = arith.constant 0 : index
      %c0_75 = arith.constant 0 : index
      %70 = vector.load %arg4[%c0_73, %c0_74, %c0_75] : memref<1x16x8xbf16, #tpu.memory_space<vmem>>, vector<1x16x8xbf16>
      %71 = arith.extf %70 : vector<1x16x8xbf16> to vector<1x16x8xf32>
      %72 = vector.broadcast %0 : vector<1x1x8xf32> to vector<1x16x8xf32>
      %73 = arith.mulf %71, %72 : vector<1x16x8xf32>
      %74 = vector.broadcast %1 : vector<1x1x8xf32> to vector<1x16x8xf32>
      %75 = arith.addf %73, %74 : vector<1x16x8xf32>
      %cst_76 = arith.constant 0.000000e+00 : f32
      %76 = vector.broadcast %cst_76 : f32 to vector<1x16x8xf32>
      %77 = arith.maximumf %75, %76 : vector<1x16x8xf32>
      %78 = arith.truncf %77 : vector<1x16x8xf32> to vector<1x16x8xbf16>
      %c17_77 = arith.constant 17 : index
      %c1_78 = arith.constant 1 : index
      %c0_79 = arith.constant 0 : index
      %79 = vector.load %arg10[%c17_77, %c1_78, %c0_79] : memref<18x18x8xbf16, #tpu.memory_space<vmem>>, vector<1x16x8xbf16>
      tpu.vector_store %arg10[%c17_77, %c1_78, %c0_79], %78 {strides = array<i32>} : memref<18x18x8xbf16, #tpu.memory_space<vmem>>, vector<1x16x8xbf16>,
    } else {
    }
    %c0_i32_22 = arith.constant 0 : i32
    %25 = arith.cmpi eq, %arg1, %c0_i32_22 : i32
    %26 = arith.extui %25 : i1 to i32
    %c0_i32_23 = arith.constant 0 : i32
    %27 = arith.cmpi ne, %26, %c0_i32_23 : i32
    scf.if %27 {
      %cst_73 = arith.constant 0.000000e+00 : bf16
      %70 = vector.broadcast %cst_73 : bf16 to vector<1x16x8xbf16>
      %c17_74 = arith.constant 17 : index
      %c1_75 = arith.constant 1 : index
      %c0_76 = arith.constant 0 : index
      %71 = vector.load %arg10[%c17_74, %c1_75, %c0_76] : memref<18x18x8xbf16, #tpu.memory_space<vmem>>, vector<1x16x8xbf16>
      tpu.vector_store %arg10[%c17_74, %c1_75, %c0_76], %70 {strides = array<i32>} : memref<18x18x8xbf16, #tpu.memory_space<vmem>>, vector<1x16x8xbf16>,
    } else {
    }
    %c0_24 = arith.constant 0 : index
    %c0_25 = arith.constant 0 : index
    %c0_26 = arith.constant 0 : index
    %28 = vector.load %arg10[%c0_24, %c0_25, %c0_26] : memref<18x18x8xbf16, #tpu.memory_space<vmem>>, vector<16x16x8xbf16>
    %29 = vector.shape_cast %28 : vector<16x16x8xbf16> to vector<256x8xbf16>
    %c0_27 = arith.constant 0 : index
    %c0_28 = arith.constant 0 : index
    %30 = vector.load %arg11[%c0_27, %c0_28] : memref<256x72xbf16, #tpu.memory_space<vmem>>, vector<256x8xbf16>
    tpu.vector_store %arg11[%c0_27, %c0_28], %29 {strides = array<i32>} : memref<256x72xbf16, #tpu.memory_space<vmem>>, vector<256x8xbf16>,
    %c0_29 = arith.constant 0 : index
    %c1_30 = arith.constant 1 : index
    %c0_31 = arith.constant 0 : index
    %31 = vector.load %arg10[%c0_29, %c1_30, %c0_31] : memref<18x18x8xbf16, #tpu.memory_space<vmem>>, vector<16x16x8xbf16>
    %32 = vector.shape_cast %31 : vector<16x16x8xbf16> to vector<256x8xbf16>
    %c0_32 = arith.constant 0 : index
    %c8 = arith.constant 8 : index
    %33 = vector.load %arg11[%c0_32, %c8] : memref<256x72xbf16, #tpu.memory_space<vmem>>, vector<256x8xbf16>
    tpu.vector_store %arg11[%c0_32, %c8], %32 {strides = array<i32>} : memref<256x72xbf16, #tpu.memory_space<vmem>>, vector<256x8xbf16>,
    %c0_33 = arith.constant 0 : index
    %c2 = arith.constant 2 : index
    %c0_34 = arith.constant 0 : index
    %34 = vector.load %arg10[%c0_33, %c2, %c0_34] : memref<18x18x8xbf16, #tpu.memory_space<vmem>>, vector<16x16x8xbf16>
    %35 = vector.shape_cast %34 : vector<16x16x8xbf16> to vector<256x8xbf16>
    %c0_35 = arith.constant 0 : index
    %c16 = arith.constant 16 : index
    %36 = vector.load %arg11[%c0_35, %c16] : memref<256x72xbf16, #tpu.memory_space<vmem>>, vector<256x8xbf16>
    tpu.vector_store %arg11[%c0_35, %c16], %35 {strides = array<i32>} : memref<256x72xbf16, #tpu.memory_space<vmem>>, vector<256x8xbf16>,
    %c1_36 = arith.constant 1 : index
    %c0_37 = arith.constant 0 : index
    %c0_38 = arith.constant 0 : index
    %37 = vector.load %arg10[%c1_36, %c0_37, %c0_38] : memref<18x18x8xbf16, #tpu.memory_space<vmem>>, vector<16x16x8xbf16>
    %38 = vector.shape_cast %37 : vector<16x16x8xbf16> to vector<256x8xbf16>
    %c0_39 = arith.constant 0 : index
    %c24 = arith.constant 24 : index
    %39 = vector.load %arg11[%c0_39, %c24] : memref<256x72xbf16, #tpu.memory_space<vmem>>, vector<256x8xbf16>
    tpu.vector_store %arg11[%c0_39, %c24], %38 {strides = array<i32>} : memref<256x72xbf16, #tpu.memory_space<vmem>>, vector<256x8xbf16>,
    %c1_40 = arith.constant 1 : index
    %c1_41 = arith.constant 1 : index
    %c0_42 = arith.constant 0 : index
    %40 = vector.load %arg10[%c1_40, %c1_41, %c0_42] : memref<18x18x8xbf16, #tpu.memory_space<vmem>>, vector<16x16x8xbf16>
    %41 = vector.shape_cast %40 : vector<16x16x8xbf16> to vector<256x8xbf16>
    %c0_43 = arith.constant 0 : index
    %c32 = arith.constant 32 : index
    %42 = vector.load %arg11[%c0_43, %c32] : memref<256x72xbf16, #tpu.memory_space<vmem>>, vector<256x8xbf16>
    tpu.vector_store %arg11[%c0_43, %c32], %41 {strides = array<i32>} : memref<256x72xbf16, #tpu.memory_space<vmem>>, vector<256x8xbf16>,
    %c1_44 = arith.constant 1 : index
    %c2_45 = arith.constant 2 : index
    %c0_46 = arith.constant 0 : index
    %43 = vector.load %arg10[%c1_44, %c2_45, %c0_46] : memref<18x18x8xbf16, #tpu.memory_space<vmem>>, vector<16x16x8xbf16>
    %44 = vector.shape_cast %43 : vector<16x16x8xbf16> to vector<256x8xbf16>
    %c0_47 = arith.constant 0 : index
    %c40 = arith.constant 40 : index
    %45 = vector.load %arg11[%c0_47, %c40] : memref<256x72xbf16, #tpu.memory_space<vmem>>, vector<256x8xbf16>
    tpu.vector_store %arg11[%c0_47, %c40], %44 {strides = array<i32>} : memref<256x72xbf16, #tpu.memory_space<vmem>>, vector<256x8xbf16>,
    %c2_48 = arith.constant 2 : index
    %c0_49 = arith.constant 0 : index
    %c0_50 = arith.constant 0 : index
    %46 = vector.load %arg10[%c2_48, %c0_49, %c0_50] : memref<18x18x8xbf16, #tpu.memory_space<vmem>>, vector<16x16x8xbf16>
    %47 = vector.shape_cast %46 : vector<16x16x8xbf16> to vector<256x8xbf16>
    %c0_51 = arith.constant 0 : index
    %c48 = arith.constant 48 : index
    %48 = vector.load %arg11[%c0_51, %c48] : memref<256x72xbf16, #tpu.memory_space<vmem>>, vector<256x8xbf16>
    tpu.vector_store %arg11[%c0_51, %c48], %47 {strides = array<i32>} : memref<256x72xbf16, #tpu.memory_space<vmem>>, vector<256x8xbf16>,
    %c2_52 = arith.constant 2 : index
    %c1_53 = arith.constant 1 : index
    %c0_54 = arith.constant 0 : index
    %49 = vector.load %arg10[%c2_52, %c1_53, %c0_54] : memref<18x18x8xbf16, #tpu.memory_space<vmem>>, vector<16x16x8xbf16>
    %50 = vector.shape_cast %49 : vector<16x16x8xbf16> to vector<256x8xbf16>
    %c0_55 = arith.constant 0 : index
    %c56 = arith.constant 56 : index
    %51 = vector.load %arg11[%c0_55, %c56] : memref<256x72xbf16, #tpu.memory_space<vmem>>, vector<256x8xbf16>
    tpu.vector_store %arg11[%c0_55, %c56], %50 {strides = array<i32>} : memref<256x72xbf16, #tpu.memory_space<vmem>>, vector<256x8xbf16>,
    %c2_56 = arith.constant 2 : index
    %c2_57 = arith.constant 2 : index
    %c0_58 = arith.constant 0 : index
    %52 = vector.load %arg10[%c2_56, %c2_57, %c0_58] : memref<18x18x8xbf16, #tpu.memory_space<vmem>>, vector<16x16x8xbf16>
    %53 = vector.shape_cast %52 : vector<16x16x8xbf16> to vector<256x8xbf16>
    %c0_59 = arith.constant 0 : index
    %c64 = arith.constant 64 : index
    %54 = vector.load %arg11[%c0_59, %c64] : memref<256x72xbf16, #tpu.memory_space<vmem>>, vector<256x8xbf16>
    tpu.vector_store %arg11[%c0_59, %c64], %53 {strides = array<i32>} : memref<256x72xbf16, #tpu.memory_space<vmem>>, vector<256x8xbf16>,
    %c0_60 = arith.constant 0 : index
    %c0_61 = arith.constant 0 : index
    %55 = vector.load %arg11[%c0_60, %c0_61] : memref<256x72xbf16, #tpu.memory_space<vmem>>, vector<256x72xbf16>
    %c0_62 = arith.constant 0 : index
    %c0_63 = arith.constant 0 : index
    %56 = vector.load %arg7[%c0_62, %c0_63] : memref<72x8xbf16, #tpu.memory_space<vmem>>, vector<72x8xbf16>
    %cst_64 = arith.constant dense<0.000000e+00> : vector<256x8xf32>
    %57 = tpu.matmul %55, %56, %cst_64 {dimension_numbers = #tpu.dot_dimension_numbers<[1], [0], [0], [1], [0, 0, 1, 1], [], []>} : vector<256x72xbf16>, vector<72x8xbf16>, vector<256x8xf32> -> vector<256x8xf32>
    %cst_65 = arith.constant dense<0.000000e+00> : vector<8xf32>
    %58 = vector.multi_reduction <add>, %57, %cst_65 [0] : vector<256x8xf32> to vector<8xf32>
    %59 = vector.shape_cast %58 : vector<8xf32> to vector<1x8xf32>
    %60 = arith.mulf %57, %57 : vector<256x8xf32>
    %cst_66 = arith.constant dense<0.000000e+00> : vector<8xf32>
    %61 = vector.multi_reduction <add>, %60, %cst_66 [0] : vector<256x8xf32> to vector<8xf32>
    %62 = vector.shape_cast %61 : vector<8xf32> to vector<1x8xf32>
    %63 = tpu.concatenate %59, %62 in 0 : vector<1x8xf32>, vector<1x8xf32> -> vector<2x8xf32>
    %c0_67 = arith.constant 0 : index
    %c0_68 = arith.constant 0 : index
    %c0_69 = arith.constant 0 : index
    %64 = vector.load %arg9[%c0_67, %c0_68, %c0_69] : memref<1x2x8xf32, #tpu.memory_space<vmem>>, vector<1x2x8xf32>
    %65 = vector.shape_cast %64 : vector<1x2x8xf32> to vector<2x8xf32>
    %66 = vector.shape_cast %63 : vector<2x8xf32> to vector<1x2x8xf32>
    tpu.vector_store %arg9[%c0_67, %c0_68, %c0_69], %66 {strides = array<i32>} : memref<1x2x8xf32, #tpu.memory_space<vmem>>, vector<1x2x8xf32>,
    %67 = vector.shape_cast %57 : vector<256x8xf32> to vector<16x16x8xf32>
    %68 = arith.truncf %67 : vector<16x16x8xf32> to vector<16x16x8xbf16>
    %c0_70 = arith.constant 0 : index
    %c0_71 = arith.constant 0 : index
    %c0_72 = arith.constant 0 : index
    %69 = vector.load %arg8[%c0_70, %c0_71, %c0_72] : memref<16x16x8xbf16, #tpu.memory_space<vmem>>, vector<16x16x8xbf16>
    tpu.vector_store %arg8[%c0_70, %c0_71, %c0_72], %68 {strides = array<i32>} : memref<16x16x8xbf16, #tpu.memory_space<vmem>>, vector<16x16x8xbf16>,
    return
  }
  func.func @transform_0(%arg0: i32, %arg1: i32) -> (i32, i32, i32) {
    %c16_i32 = arith.constant 16 : i32
    %0 = arith.muli %arg0, %c16_i32 : i32
    %c16_i32_0 = arith.constant 16 : i32
    %1 = arith.muli %arg1, %c16_i32_0 : i32
    %c1_i32 = arith.constant 1 : i32
    %2 = arith.subi %1, %c1_i32 : i32
    %c0_i32 = arith.constant 0 : i32
    %3 = arith.maxsi %2, %c0_i32 : i32
    %4 = arith.addi %0, %3 : i32
    %c0_i32_1 = arith.constant 0 : i32
    %c0_i32_2 = arith.constant 0 : i32
    %c0_i32_3 = arith.constant 0 : i32
    return %4, %c0_i32_1, %c0_i32_2 : i32, i32, i32
  }
  func.func @transform_1(%arg0: i32, %arg1: i32) -> (i32, i32, i32) {
    %c1_i32 = arith.constant 1 : i32
    %0 = arith.muli %arg0, %c1_i32 : i32
    %1 = arith.addi %0, %arg1 : i32
    %c0_i32 = arith.constant 0 : i32
    %c0_i32_0 = arith.constant 0 : i32
    %c0_i32_1 = arith.constant 0 : i32
    return %1, %c0_i32, %c0_i32_0 : i32, i32, i32
  }
  func.func @transform_2(%arg0: i32, %arg1: i32) -> (i32, i32, i32) {
    %c16_i32 = arith.constant 16 : i32
    %0 = arith.muli %arg0, %c16_i32 : i32
    %c1_i32 = arith.constant 1 : i32
    %1 = arith.addi %arg1, %c1_i32 : i32
    %c16_i32_0 = arith.constant 16 : i32
    %2 = arith.muli %1, %c16_i32_0 : i32
    %c15_i32 = arith.constant 15 : i32
    %3 = arith.minsi %2, %c15_i32 : i32
    %4 = arith.addi %0, %3 : i32
    %c0_i32 = arith.constant 0 : i32
    %c0_i32_1 = arith.constant 0 : i32
    %c0_i32_2 = arith.constant 0 : i32
    return %4, %c0_i32, %c0_i32_1 : i32, i32, i32
  }
  func.func @transform_3(%arg0: i32, %arg1: i32) -> (i32, i32, i32) {
    %c0_i32 = arith.constant 0 : i32
    %c0_i32_0 = arith.constant 0 : i32
    %c0_i32_1 = arith.constant 0 : i32
    %c0_i32_2 = arith.constant 0 : i32
    return %c0_i32, %c0_i32_0, %c0_i32_1 : i32, i32, i32
  }
  func.func @transform_4(%arg0: i32, %arg1: i32) -> (i32, i32, i32) {
    %c0_i32 = arith.constant 0 : i32
    %c0_i32_0 = arith.constant 0 : i32
    %c0_i32_1 = arith.constant 0 : i32
    %c0_i32_2 = arith.constant 0 : i32
    return %c0_i32, %c0_i32_0, %c0_i32_1 : i32, i32, i32
  }
  func.func @transform_5(%arg0: i32, %arg1: i32) -> (i32, i32) {
    %c0_i32 = arith.constant 0 : i32
    %c0_i32_0 = arith.constant 0 : i32
    %c0_i32_1 = arith.constant 0 : i32
    return %c0_i32, %c0_i32_0 : i32, i32
  }
  func.func @transform_6(%arg0: i32, %arg1: i32) -> (i32, i32, i32) {
    %c1_i32 = arith.constant 1 : i32
    %0 = arith.muli %arg0, %c1_i32 : i32
    %1 = arith.addi %0, %arg1 : i32
    %c0_i32 = arith.constant 0 : i32
    %c0_i32_0 = arith.constant 0 : i32
    %c0_i32_1 = arith.constant 0 : i32
    return %1, %c0_i32, %c0_i32_0 : i32, i32, i32
  }
  func.func @transform_7(%arg0: i32, %arg1: i32) -> (i32, i32, i32) {
    %c1_i32 = arith.constant 1 : i32
    %0 = arith.muli %arg0, %c1_i32 : i32
    %1 = arith.addi %0, %arg1 : i32
    %c0_i32 = arith.constant 0 : i32
    %c0_i32_0 = arith.constant 0 : i32
    %c0_i32_1 = arith.constant 0 : i32
    return %1, %c0_i32, %c0_i32_0 : i32, i32, i32
  }
}

</mosaic_0001>

<bundles_post_ra>
// kernel: unet_up_block_forward.7
= control target key start
LH: loop header
LB: loop body
LE: loop exit
PB: predicated region body
PF: predicated region fallthrough
CT: control target
= control target key end

     0   :  { %s576_s12 = smov 0   ;;  %s755_s0 = inlined_call_operand.vmem [shape: bf16[32,16,8], index: 0, kind: input, shape index: {}]   ;;  %s756_s1 = inlined_call_operand.vmem [shape: f32[1,1,8], index: 1, kind: input, shape index: {}]   ;;  %s757_s2 = inlined_call_operand.vmem [shape: f32[1,1,8], index: 2, kind: input, shape index: {}]   ;;  %s758_s3 = inlined_call_operand.vmem [shape: f32[32,16,8], index: 3, kind: output, shape index: {}]  }
   0x1 LB: > { %s444_s13 = sadd.s32 4294967295, %s554_s12   ;;  %p448_p0 = scmp.ge.s32.totalorder %s554_s12, 1  ;;  %s554_s12 = sphi %s576_s12, %s13_s12  }
   0x2   : > { %p139_p1 = scmp.lt.s32.totalorder %s554_s12, 3 }
   0x4   : > { %p140_p2 = pnand %p448_p0, %p139_p1 }
   0x5   : > { %s449_s14 = sshll.u32 (!%p140_p2), %s444_s13, 4 }
   0x6   : > { %143 = sbr.rel (%p140_p2) target bundleno = 51 (0x33), region = 32  ;;  %p166_p3 = scmp.lt.s32.totalorder (!%p140_p2), %s449_s14, 31 }
   0xb   : > { %s760_s14 = smov (!%p166_p3, %s449_s14), 31  ;;  %v595_v0 = vld [vmem:[%s756_s1] ss:$0 sm:$0xff]  ;;  %vm353_vm0 = vcmask 64512  }
   0xc   : > { %s459_s15 = sshll.u32 %s760_s14, 3  ;;  %v604_v9 = vld [vmem:[%s757_s2] ss:$0 sm:$0xff]  ;;  %s460_s23 = sshll.u32 %s760_s14, 4 }
   0xd   : > { %s590_s18 = scalar_lea.vmem %s755_s0, %s459_s15  ;;  %s622_s26 = scalar_lea.vmem %s758_s3, %s460_s23 }
   0xe   : > { %v462_v1 = vld [vmem:[%s590_s18] sm:$0xff]   ;;  %v525_v2 = vld [vmem:[%s590_s18 + $0x8] sm:$0xff]   ;;  %v526_v3 = vld [vmem:[%s590_s18 + $0x10] sm:$0xff]  }
   0xf   : > { %v463_v4 = vunpack.c.l.bf16 %v462_v1  ;;  %v464_v5 = vunpack.c.h.bf16 %v462_v1  ;;  %v467_v6 = vunpack.c.l.bf16 %v525_v2  ;;  %v468_v7 = vunpack.c.h.bf16 %v525_v2  ;;  %v527_v8 = vld [vmem:[%s590_s18 + $0x18] sm:$0xff]   ;;  %v528_v30 = vld [vmem:[%s590_s18 + $0x20] sm:$0xff]   ;;  %v529_v31 = vld [vmem:[%s590_s18 + $0x28] sm:$0xff]  }
  0x10   : > { %v471_v10 = vunpack.c.l.bf16 %v526_v3  ;;  %v472_v11 = vunpack.c.h.bf16 %v526_v3  ;;  %v475_v12 = vunpack.c.l.bf16 %v527_v8  ;;  %v476_v13 = vunpack.c.h.bf16 %v527_v8  ;;  %v530_v36 = vld [vmem:[%s590_s18 + $0x30] sm:$0xff]   ;;  %v531_v37 = vld [vmem:[%s590_s18 + $0x38] sm:$0xff]   ;;  %v532_v3 = vld [vmem:[%s590_s18 + $0x40] sm:$0xff]  }
  0x11   : > { %v250_v14 = vmul.f32 %v463_v4, %v595_v0  ;;  %v251_v15 = vmul.f32 %v464_v5, %v595_v0  ;;  %v252_v16 = vmul.f32 %v467_v6, %v595_v0  ;;  %v253_v17 = vmul.f32 %v468_v7, %v595_v0  ;;  %v533_v4 = vld [vmem:[%s590_s18 + $0x48] sm:$0xff]  }
  0x12   : > { %v254_v18 = vmul.f32 %v471_v10, %v595_v0  ;;  %v255_v19 = vmul.f32 %v472_v11, %v595_v0  ;;  %v256_v20 = vmul.f32 %v475_v12, %v595_v0  ;;  %v257_v21 = vmul.f32 %v476_v13, %v595_v0  ;;  %v534_v10 = vld [vmem:[%s590_s18 + $0x50] sm:$0xff]   ;;  %v535_v11 = vld [vmem:[%s590_s18 + $0x58] sm:$0xff]  }
  0x13   : > { %v289_v22 = vadd.f32 %v604_v9, %v250_v14  ;;  %v290_v23 = vadd.f32 %v604_v9, %v251_v15  ;;  %v291_v24 = vadd.f32 %v604_v9, %v252_v16  ;;  %v292_v25 = vadd.f32 %v604_v9, %v253_v17 }
  0x14   : > { %v293_v26 = vadd.f32 %v604_v9, %v254_v18  ;;  %v294_v27 = vadd.f32 %v604_v9, %v255_v19  ;;  %v295_v28 = vadd.f32 %v604_v9, %v256_v20  ;;  %v296_v29 = vadd.f32 %v604_v9, %v257_v21 }
  0x15   : > { %v321_v32 = vmax.f32 %v289_v22, 0.0  ;;  %v322_v33 = vmax.f32 %v290_v23, 0.0  ;;  %v323_v34 = vmax.f32 %v291_v24, 0.0  ;;  %v324_v35 = vmax.f32 %v292_v25, 0.0 }
  0x16   : > { %v325_v38 = vmax.f32 %v293_v26, 0.0  ;;  %v326_v39 = vmax.f32 %v294_v27, 0.0  ;;  %v327_v40 = vmax.f32 %v295_v28, 0.0  ;;  %v328_v41 = vmax.f32 %v296_v29, 0.0 }
  0x17   : > { %354 = vst.msk [vmem:[%s622_s26] sm:$0xff] %vm353_vm0, %v321_v32  ;;  %355 = vst.msk [vmem:[%s622_s26 + $0x8] sm:$0xff] %vm353_vm0, %v322_v33  ;;  %v479_v42 = vunpack.c.l.bf16 %v528_v30  ;;  %v480_v43 = vunpack.c.h.bf16 %v528_v30  ;;  %v483_v44 = vunpack.c.l.bf16 %v529_v31  ;;  %v484_v45 = vunpack.c.h.bf16 %v529_v31 }
  0x18   : > { %356 = vst.msk [vmem:[%s622_s26 + $0x10] sm:$0xff] %vm353_vm0, %v323_v34  ;;  %357 = vst.msk [vmem:[%s622_s26 + $0x18] sm:$0xff] %vm353_vm0, %v324_v35  ;;  %v487_v46 = vunpack.c.l.bf16 %v530_v36  ;;  %v488_v47 = vunpack.c.h.bf16 %v530_v36  ;;  %v491_v48 = vunpack.c.l.bf16 %v531_v37  ;;  %v492_v49 = vunpack.c.h.bf16 %v531_v37 }
  0x19   : > { %358 = vst.msk [vmem:[%s622_s26 + $0x20] sm:$0xff] %vm353_vm0, %v325_v38  ;;  %359 = vst.msk [vmem:[%s622_s26 + $0x28] sm:$0xff] %vm353_vm0, %v326_v39  ;;  %v258_v50 = vmul.f32 %v479_v42, %v595_v0  ;;  %v259_v51 = vmul.f32 %v480_v43, %v595_v0  ;;  %v260_v52 = vmul.f32 %v483_v44, %v595_v0  ;;  %v495_v16 = vunpack.c.l.bf16 %v532_v3 }
  0x1a   : > { %360 = vst.msk [vmem:[%s622_s26 + $0x30] sm:$0xff] %vm353_vm0, %v327_v40  ;;  %361 = vst.msk [vmem:[%s622_s26 + $0x38] sm:$0xff] %vm353_vm0, %v328_v41  ;;  %v261_v53 = vmul.f32 %v484_v45, %v595_v0  ;;  %v262_v54 = vmul.f32 %v487_v46, %v595_v0  ;;  %v263_v55 = vmul.f32 %v488_v47, %v595_v0  ;;  %v496_v17 = vunpack.c.h.bf16 %v532_v3  ;;  %v536_v40 = vld [vmem:[%s590_s18 + $0x60] sm:$0xff]   ;;  %v537_v41 = vld [vmem:[%s590_s18 + $0x68] sm:$0xff]  }
  0x1b   : > { %v264_v56 = vmul.f32 %v491_v48, %v595_v0  ;;  %v265_v57 = vmul.f32 %v492_v49, %v595_v0  ;;  %v297_v58 = vadd.f32 %v604_v9, %v258_v50  ;;  %v298_v59 = vadd.f32 %v604_v9, %v259_v51  ;;  %v538_v46 = vld [vmem:[%s590_s18 + $0x70] sm:$0xff]   ;;  %v539_v47 = vld [vmem:[%s590_s18 + $0x78] sm:$0xff]  }
  0x1c   : > { %v299_v60 = vadd.f32 %v604_v9, %v260_v52  ;;  %v300_v61 = vadd.f32 %v604_v9, %v261_v53  ;;  %v301_v62 = vadd.f32 %v604_v9, %v262_v54  ;;  %v302_v63 = vadd.f32 %v604_v9, %v263_v55 }
  0x1d   : > { %v303_v1 = vadd.f32 %v604_v9, %v264_v56  ;;  %v304_v2 = vadd.f32 %v604_v9, %v265_v57  ;;  %v329_v5 = vmax.f32 %v297_v58, 0.0  ;;  %v330_v6 = vmax.f32 %v298_v59, 0.0 }
  0x1e   : > { %v331_v7 = vmax.f32 %v299_v60, 0.0  ;;  %v332_v8 = vmax.f32 %v300_v61, 0.0  ;;  %v333_v12 = vmax.f32 %v301_v62, 0.0  ;;  %v334_v13 = vmax.f32 %v302_v63, 0.0 }
  0x1f   : > { %v335_v14 = vmax.f32 %v303_v1, 0.0  ;;  %v336_v15 = vmax.f32 %v304_v2, 0.0  ;;  %362 = vst.msk [vmem:[%s622_s26 + $0x40] sm:$0xff] %vm353_vm0, %v329_v5  ;;  %363 = vst.msk [vmem:[%s622_s26 + $0x48] sm:$0xff] %vm353_vm0, %v330_v6  ;;  %v499_v18 = vunpack.c.l.bf16 %v533_v4  ;;  %v500_v19 = vunpack.c.h.bf16 %v533_v4 }
  0x20   : > { %364 = vst.msk [vmem:[%s622_s26 + $0x50] sm:$0xff] %vm353_vm0, %v331_v7  ;;  %365 = vst.msk [vmem:[%s622_s26 + $0x58] sm:$0xff] %vm353_vm0, %v332_v8  ;;  %v503_v20 = vunpack.c.l.bf16 %v534_v10  ;;  %v504_v21 = vunpack.c.h.bf16 %v534_v10  ;;  %v507_v22 = vunpack.c.l.bf16 %v535_v11  ;;  %v508_v23 = vunpack.c.h.bf16 %v535_v11 }
  0x21   : > { %366 = vst.msk [vmem:[%s622_s26 + $0x60] sm:$0xff] %vm353_vm0, %v333_v12  ;;  %367 = vst.msk [vmem:[%s622_s26 + $0x68] sm:$0xff] %vm353_vm0, %v334_v13  ;;  %v266_v24 = vmul.f32 %v495_v16, %v595_v0  ;;  %v267_v25 = vmul.f32 %v496_v17, %v595_v0  ;;  %v268_v26 = vmul.f32 %v499_v18, %v595_v0  ;;  %v511_v52 = vunpack.c.l.bf16 %v536_v40 }
  0x22   : > { %368 = vst.msk [vmem:[%s622_s26 + $0x70] sm:$0xff] %vm353_vm0, %v335_v14  ;;  %369 = vst.msk [vmem:[%s622_s26 + $0x78] sm:$0xff] %vm353_vm0, %v336_v15  ;;  %v269_v27 = vmul.f32 %v500_v19, %v595_v0  ;;  %v270_v28 = vmul.f32 %v503_v20, %v595_v0  ;;  %v271_v29 = vmul.f32 %v504_v21, %v595_v0  ;;  %v512_v53 = vunpack.c.h.bf16 %v536_v40 }
  0x23   : > { %v272_v30 = vmul.f32 %v507_v22, %v595_v0  ;;  %v273_v31 = vmul.f32 %v508_v23, %v595_v0  ;;  %v305_v32 = vadd.f32 %v604_v9, %v266_v24  ;;  %v306_v33 = vadd.f32 %v604_v9, %v267_v25 }
  0x24   : > { %v307_v34 = vadd.f32 %v604_v9, %v268_v26  ;;  %v308_v35 = vadd.f32 %v604_v9, %v269_v27  ;;  %v309_v36 = vadd.f32 %v604_v9, %v270_v28  ;;  %v310_v37 = vadd.f32 %v604_v9, %v271_v29 }
  0x25   : > { %v311_v38 = vadd.f32 %v604_v9, %v272_v30  ;;  %v312_v39 = vadd.f32 %v604_v9, %v273_v31  ;;  %v337_v42 = vmax.f32 %v305_v32, 0.0  ;;  %v338_v43 = vmax.f32 %v306_v33, 0.0 }
  0x26   : > { %v339_v44 = vmax.f32 %v307_v34, 0.0  ;;  %v340_v45 = vmax.f32 %v308_v35, 0.0  ;;  %v341_v48 = vmax.f32 %v309_v36, 0.0  ;;  %v342_v49 = vmax.f32 %v310_v37, 0.0 }
  0x27   : > { %v343_v50 = vmax.f32 %v311_v38, 0.0  ;;  %v344_v51 = vmax.f32 %v312_v39, 0.0  ;;  %370 = vst.msk [vmem:[%s622_s26 + $0x80] sm:$0xff] %vm353_vm0, %v337_v42  ;;  %371 = vst.msk [vmem:[%s622_s26 + $0x88] sm:$0xff] %vm353_vm0, %v338_v43  ;;  %v515_v54 = vunpack.c.l.bf16 %v537_v41  ;;  %v516_v55 = vunpack.c.h.bf16 %v537_v41 }
  0x28   : > { %372 = vst.msk [vmem:[%s622_s26 + $0x90] sm:$0xff] %vm353_vm0, %v339_v44  ;;  %373 = vst.msk [vmem:[%s622_s26 + $0x98] sm:$0xff] %vm353_vm0, %v340_v45  ;;  %v519_v56 = vunpack.c.l.bf16 %v538_v46  ;;  %v520_v57 = vunpack.c.h.bf16 %v538_v46  ;;  %v523_v58 = vunpack.c.l.bf16 %v539_v47  ;;  %v524_v59 = vunpack.c.h.bf16 %v539_v47 }
  0x29   : > { %374 = vst.msk [vmem:[%s622_s26 + $0xa0] sm:$0xff] %vm353_vm0, %v341_v48  ;;  %375 = vst.msk [vmem:[%s622_s26 + $0xa8] sm:$0xff] %vm353_vm0, %v342_v49  ;;  %v274_v60 = vmul.f32 %v511_v52, %v595_v0  ;;  %v275_v61 = vmul.f32 %v512_v53, %v595_v0  ;;  %v276_v62 = vmul.f32 %v515_v54, %v595_v0 }
  0x2a   : > { %376 = vst.msk [vmem:[%s622_s26 + $0xb0] sm:$0xff] %vm353_vm0, %v343_v50  ;;  %377 = vst.msk [vmem:[%s622_s26 + $0xb8] sm:$0xff] %vm353_vm0, %v344_v51  ;;  %v277_v63 = vmul.f32 %v516_v55, %v595_v0  ;;  %v278_v1 = vmul.f32 %v519_v56, %v595_v0  ;;  %v279_v2 = vmul.f32 %v520_v57, %v595_v0 }
  0x2b   : > { %v280_v3 = vmul.f32 %v523_v58, %v595_v0  ;;  %v281_v4 = vmul.f32 %v524_v59, %v595_v0  ;;  %v313_v5 = vadd.f32 %v604_v9, %v274_v60  ;;  %v314_v6 = vadd.f32 %v604_v9, %v275_v61 }
  0x2c   : > { %v315_v7 = vadd.f32 %v604_v9, %v276_v62  ;;  %v316_v8 = vadd.f32 %v604_v9, %v277_v63  ;;  %v317_v10 = vadd.f32 %v604_v9, %v278_v1  ;;  %v318_v11 = vadd.f32 %v604_v9, %v279_v2 }
  0x2d   : > { %v319_v0 = vadd.f32 %v604_v9, %v280_v3  ;;  %v320_v12 = vadd.f32 %v604_v9, %v281_v4  ;;  %v345_v13 = vmax.f32 %v313_v5, 0.0  ;;  %v346_v14 = vmax.f32 %v314_v6, 0.0 }
  0x2e   : > { %v347_v15 = vmax.f32 %v315_v7, 0.0  ;;  %v348_v16 = vmax.f32 %v316_v8, 0.0  ;;  %v349_v17 = vmax.f32 %v317_v10, 0.0  ;;  %v350_v18 = vmax.f32 %v318_v11, 0.0 }
  0x2f   : > { %v351_v19 = vmax.f32 %v319_v0, 0.0  ;;  %v352_v20 = vmax.f32 %v320_v12, 0.0  ;;  %378 = vst.msk [vmem:[%s622_s26 + $0xc0] sm:$0xff] %vm353_vm0, %v345_v13  ;;  %379 = vst.msk [vmem:[%s622_s26 + $0xc8] sm:$0xff] %vm353_vm0, %v346_v14 }
  0x30   : > { %380 = vst.msk [vmem:[%s622_s26 + $0xd0] sm:$0xff] %vm353_vm0, %v347_v15  ;;  %381 = vst.msk [vmem:[%s622_s26 + $0xd8] sm:$0xff] %vm353_vm0, %v348_v16 }
  0x31   : > { %382 = vst.msk [vmem:[%s622_s26 + $0xe0] sm:$0xff] %vm353_vm0, %v349_v17  ;;  %383 = vst.msk [vmem:[%s622_s26 + $0xe8] sm:$0xff] %vm353_vm0, %v350_v18 }
  0x32   : > { %384 = vst.msk [vmem:[%s622_s26 + $0xf0] sm:$0xff] %vm353_vm0, %v351_v19  ;;  %385 = vst.msk [vmem:[%s622_s26 + $0xf8] sm:$0xff] %vm353_vm0, %v352_v20 }
  0x33 PF: > { %s13_s12 = sadd.s32 1, %s554_s12  }
  0x34   : > { %p10_p4 = scmp.ge.s32.totalorder %s13_s12, 4  }
  0x36   :  { %12 = sbr.rel (!%p10_p4) target bundleno = 1 (0x1), region = 62 }

// kernel: unet_up_block_forward.4
= control target key start
LH: loop header
LB: loop body
LE: loop exit
PB: predicated region body
PF: predicated region fallthrough
CT: control target
= control target key end

     0   :  { %s5479_s23 = smov 0   ;;  %s5481_s24 = smov 0   ;;  %s7037_s0 = inlined_call_operand.vmem [shape: bf16[32,16,8], index: 0, kind: input, shape index: {}, may-alias: {0,1,2}]   ;;  %s7038_s1 = inlined_call_operand.vmem [shape: bf16[32,16,8], index: 1, kind: input, shape index: {}, may-alias: {0,1,2}]   ;;  %s7039_s2 = inlined_call_operand.vmem [shape: bf16[32,16,8], index: 2, kind: input, shape index: {}, may-alias: {0,1,2}]   ;;  %s7040_s3 = inlined_call_operand.vmem [shape: f32[1,1,8], index: 3, kind: input, shape index: {}]   ;;  %s7041_s4 = inlined_call_operand.vmem [shape: f32[1,1,8], index: 4, kind: input, shape index: {}]   ;;  %s7042_s5 = inlined_call_operand.vmem [shape: bf16[72,8], index: 5, kind: input, shape index: {}]   ;;  %s7043_s6 = inlined_call_operand.vmem [shape: bf16[32,16,8], index: 6, kind: output, shape index: {0}]   ;;  %s7044_s7 = inlined_call_operand.vmem [shape: f32[2,2,8], index: 7, kind: output, shape index: {1}]  }
   0x1   :  { %s5483_s2 = smov 0  }
   0x2 LB: > { %s30_s3 = sadd.s32 1, %s5424_s24  ;;  %p5108_p0 = scmp.ge.s32.totalorder %s5428_s2, 1  ;;  %s5428_s2 = sphi %s5483_s2, %s18_s2   ;;  %s5424_s24 = sphi %s5481_s24, %s7058_s24   ;;  %s5420_s23 = sphi %s5479_s23, %s7057_s23  }
   0x3   : > { %p32_p1 = scmp.ge.s32.totalorder %s30_s3, 2  ;;  %p330_p2 = scmp.lt.s32.totalorder %s5428_s2, 3 }
   0x5   : > { %s7060_s3 = smov (%p32_p1, %s30_s3), 0  ;;  %p331_p3 = pnand %p5108_p0, %p330_p2 }
   0x6   : > { %s5112_s4 = sshll.u32 (!%p331_p3), %s5420_s23, 4  ;;  %s5431_s29 = smov (!%p331_p3), 8  }
   0x7   : > { %334 = sbr.rel (%p331_p3) target bundleno = 961 (0x3c1), region = 44  ;;  %p412_p4 = scmp.lt.s32.totalorder (!%p331_p3), %s5112_s4, 31 }
   0x8   : > { %s5432_s30 = smov (!%p331_p3), 16   ;;  %s5433_s8 = smov (!%p331_p3), 24  }
   0x9   : > { %s5434_s9 = smov (!%p331_p3), 32   ;;  %s5435_s10 = smov (!%p331_p3), 40  }
   0xa   : > { %s5436_s13 = smov (!%p331_p3), 48   ;;  %s5437_s18 = smov (!%p331_p3), 56  }
   0xb   : > { %s5438_s0 = smov (!%p331_p3), 64   ;;  %p446_p5 = scmp.lt.s32.totalorder (!%p331_p3), %s5420_s23, 1 }
   0xc   : > { %vm452_vm0 = vcmask 57344   ;;  %vm453_vm1 = vsmask.f32 256  ;;  %vm509_vm2 = vsmask.f32 7938  ;;  %vm920_vm3 = vcmask 60416  }
   0xd   : > { %vm5500_vm4 = vmand %vm452_vm0, %vm453_vm1  ;;  %v511_v1 = vld [vmem:[#allocation2 + $0x8] sm:$0x1]  ;;  %v5430_v3 = vmov 0   ;;  %v455_v4 = vld [vmem:[#allocation2] sm:$0x1]  ;;  %s7062_s4 = smov (!%p412_p4, %s5112_s4), 31 }
   0xe   : > { %vm5505_vm5 = vmand %vm452_vm0, %vm509_vm2  ;;  %1075 = vst.msk [vmem:[#allocation2 + $0x4] sm:$0xf] %vm920_vm3, %v5430_v3  ;;  %v456_v6 = vsel %vm5500_vm4, 0, %v455_v4  ;;  %v458_v7 = vld [vmem:[#allocation2 + $0xc] sm:$0x1]  ;;  %s5242_s25 = sshll.u32 %s7062_s4, 3 }
   0xf   : > { %1120 = vst.msk [vmem:[#allocation2 + $0xd0] sm:$0xf] %vm920_vm3, %v5430_v3  ;;  %v512_v5 = vsel %vm5505_vm5, 0, %v511_v1  ;;  %457 = vst [vmem:[#allocation2] sm:$0x1] %v456_v6  ;;  %v459_v8 = vsel %vm5500_vm4, 0, %v458_v7  ;;  %s5542_s28 = scalar_lea.vmem %s7038_s1, %s5242_s25 }
  0x10   : > { %513 = vst [vmem:[#allocation2 + $0x8] sm:$0x1] %v512_v5  ;;  %v461_v9 = vld [vmem:[#allocation2 + $0x18] sm:$0x1]  ;;  %460 = vst [vmem:[#allocation2 + $0xc] sm:$0x1] %v459_v8 }
  0x11   : > { %v462_v10 = vsel %vm5500_vm4, 0, %v461_v9  ;;  %v514_v11 = vld [vmem:[#allocation2 + $0x14] sm:$0x1]  ;;  %v464_v12 = vld [vmem:[#allocation2 + $0x24] sm:$0x1]  ;;  %vm5533_vm6 = vmand %vm920_vm3, %vm509_vm2  ;;  %vm1848_vm12 = vcmask 1042432  }
  0x12   : > { %463 = vst [vmem:[#allocation2 + $0x18] sm:$0x1] %v462_v10  ;;  %v515_v13 = vsel %vm5505_vm5, 0, %v514_v11  ;;  %v465_v14 = vsel %vm5500_vm4, 0, %v464_v12  ;;  %v517_v15 = vld [vmem:[#allocation2 + $0x20] sm:$0x1] }
  0x13   : > { %v467_v16 = vld [vmem:[#allocation2 + $0x30] sm:$0x1]  ;;  %516 = vst [vmem:[#allocation2 + $0x14] sm:$0x1] %v515_v13  ;;  %466 = vst [vmem:[#allocation2 + $0x24] sm:$0x1] %v465_v14 }
  0x14   : > { %v518_v17 = vsel %vm5505_vm5, 0, %v517_v15  ;;  %v468_v18 = vsel %vm5500_vm4, 0, %v467_v16  ;;  %v520_v19 = vld [vmem:[#allocation2 + $0x2c] sm:$0x1]  ;;  %vm597_vm7 = vsmask.f32 4368 }
  0x15   : > { %519 = vst [vmem:[#allocation2 + $0x20] sm:$0x1] %v518_v17  ;;  %469 = vst [vmem:[#allocation2 + $0x30] sm:$0x1] %v468_v18  ;;  %v521_v21 = vsel %vm5505_vm5, 0, %v520_v19  ;;  %vm1849_vm13 = vcmask 1046532  }
  0x16   : > { %v1189_v22 = vld [vmem:[#allocation2 + $0x4] sm:$0xf]  ;;  %v565_v23 = vld [vmem:[%s5542_s28] sm:$0xf]  ;;  %522 = vst [vmem:[#allocation2 + $0x2c] sm:$0x1] %v521_v21  ;;  %vm5559_vm10 = vmor %vm453_vm1, %vm597_vm7 }
  0x17   : > { %v566_v24 = vld [vmem:[%s5542_s28 + $0x4] sm:$0xf]  ;;  %v1249_v25 = vshll.u32 %v1189_v22, 16  ;;  %v1253_v26 = vshrl.u32 %v1189_v22, 16  ;;  %v600_v27 = vshrl.u32 %v565_v23, 16  ;;  %v603_v28 = vshll.u32 %v565_v23, 16  ;;  %vm5912_vm14 = vmor %vm1848_vm12, %vm1849_vm13 }
  0x18   : > { %v567_v29 = vld [vmem:[%s5542_s28 + $0x8] sm:$0xf]  ;;  %vm1236_vm8 = vsmask.f32 3328  ;;  %vm1237_vm9 = vsmask.f32 7440 }
  0x19   : > { %v1076_v30 = vld [vmem:[#allocation2 + $0x8] sm:$0x1]  ;;  %v1072_v31 = vld [vmem:[#allocation2] sm:$0xf]  ;;  %v608_v32 = vshrl.u32 %v566_v24, 16  ;;  %v611_v33 = vshll.u32 %v566_v24, 16  ;;  %vm5585_vm11 = vmor %vm1236_vm8, %vm1237_vm9 }
  0x1a   : > { %v1077_v34 = vsel %vm5500_vm4, 0, %v1076_v30  ;;  %v5551_v35 = vrot.slane %v1249_v25, 5  ;;  %v1255_v36 = vrot.slane %v1253_v26, 4  ;;  %v1073_v37 = vsel %vm5533_vm6, 0, %v1072_v31  ;;  %v568_v40 = vld [vmem:[%s5542_s28 + $0xc] sm:$0xf] }
  0x1b   : > { %1078 = vst [vmem:[#allocation2 + $0x8] sm:$0x1] %v1077_v34  ;;  %1074 = vst [vmem:[#allocation2] sm:$0xf] %v1073_v37  ;;  %v602_v38 = vrot.slane %v600_v27, 7  ;;  %v610_v39 = vrot.slane %v608_v32, 7 }
  0x1c   : > { %v617_v41 = vshrl.u32 %v567_v29, 16  ;;  %v620_v42 = vshll.u32 %v567_v29, 16  ;;  %v1256_v43 = vor.u32 %v1255_v36, %v5551_v35  ;;  %v922_v45 = vld [vmem:[#allocation2 + $0xc] sm:$0xf]  ;;  %v625_v46 = vshrl.u32 %v568_v40, 16  ;;  %s7064_s23 = smov (!%p446_p5, %s5420_s23), 1 }
  0x1d   : > { %v628_v47 = vshll.u32 %v568_v40, 16  ;;  %v930_v48 = vld [vmem:[#allocation2 + $0x18] sm:$0xf]  ;;  %v605_v49 = vor.u32 %v603_v28, %v602_v38  ;;  %v606_v50 = vrot.slane %v602_v38, 4  ;;  %v613_v51 = vor.u32 %v611_v33, %v610_v39  ;;  %v927_v53 = vld [vmem:[#allocation2 + $0x14] sm:$0x1] }
  0x1e   : > { %v619_v52 = vrot.slane %v617_v41, 7  ;;  %v569_v54 = vld [vmem:[%s5542_s28 + $0x10] sm:$0xf]  ;;  %v1257_v55 = vrot.slane %v1256_v43, 4  ;;  %v627_v56 = vrot.slane %v625_v46, 7  ;;  %v615_v57 = vrot.slane %v610_v39, 4 }
  0x1f   : > { %v570_v58 = vld [vmem:[%s5542_s28 + $0x14] sm:$0xf]  ;;  %v634_v59 = vshrl.u32 %v569_v54, 16  ;;  %v614_v60 = vsel %vm5559_vm10, %v606_v50, %v613_v51  ;;  %v923_v61 = vsel %vm5533_vm6, %v605_v49, %v922_v45  ;;  %v571_v1 = vld [vmem:[%s5542_s28 + $0x18] sm:$0xf]  ;;  %v637_v6 = vshll.u32 %v569_v54, 16 }
  0x20   : > { %v622_v62 = vor.u32 %v620_v42, %v619_v52  ;;  %v623_v63 = vrot.slane %v619_v52, 4  ;;  %924 = vst [vmem:[#allocation2 + $0xc] sm:$0xf] %v923_v61  ;;  %926 = vst.msk [vmem:[#allocation2 + $0x10] sm:$0xf] %vm920_vm3, %v614_v60  ;;  %v630_v3 = vor.u32 %v628_v47, %v627_v56  ;;  %v928_v4 = vsel %vm5500_vm4, %v615_v57, %v927_v53  ;;  %s5121_s4 = sshll.u32 %s7064_s23, 1 }
  0x21   : > { %v636_v5 = vrot.slane %v634_v59, 7  ;;  %v937_v7 = vld [vmem:[#allocation2 + $0x24] sm:$0xf]  ;;  %929 = vst [vmem:[#allocation2 + $0x14] sm:$0x1] %v928_v4  ;;  %v642_v9 = vshrl.u32 %v570_v58, 16 }
  0x22   : > { %v931_v8 = vsel %vm5533_vm6, %v622_v62, %v930_v48  ;;  %v645_v10 = vshll.u32 %v570_v58, 16  ;;  %v632_v11 = vrot.slane %v627_v56, 4  ;;  %v934_v12 = vld [vmem:[#allocation2 + $0x20] sm:$0x1]  ;;  %v1190_v13 = vld [vmem:[#allocation2 + $0x8] sm:$0x1]  ;;  %v631_v15 = vsel %vm5559_vm10, %v623_v63, %v630_v3 }
  0x23   : > { %v1188_v14 = vld [vmem:[#allocation2] sm:$0xf]  ;;  %932 = vst [vmem:[#allocation2 + $0x18] sm:$0xf] %v931_v8  ;;  %v639_v16 = vor.u32 %v637_v6, %v636_v5  ;;  %v640_v17 = vrot.slane %v636_v5, 4  ;;  %v651_v18 = vshrl.u32 %v571_v1, 16 }
  0x24   : > { %v1259_v19 = vshll.u32 %v1190_v13, 16  ;;  %v1240_v21 = vshrl.u32 %v1188_v14, 16  ;;  %v1243_v22 = vshll.u32 %v1188_v14, 16  ;;  %933 = vst.msk [vmem:[#allocation2 + $0x1c] sm:$0xf] %vm920_vm3, %v631_v15  ;;  %v5578_v23 = vrot.slane %v642_v9, 7 }
  0x25   : > { %v5581_v24 = vld [vmem:[%s5542_s28 + $0x1c] sm:$0xf]  ;;  %v938_v26 = vsel %vm5533_vm6, %v639_v16, %v937_v7  ;;  %v935_v27 = vsel %vm5500_vm4, %v632_v11, %v934_v12  ;;  %v5593_v28 = vrot.slane %v651_v18, 7  ;;  %v654_v29 = vshll.u32 %v571_v1, 16  ;;  %v944_v39 = vld [vmem:[#allocation2 + $0x30] sm:$0xf] }
  0x26   : > { %v1261_v30 = vrot.slane %v1259_v19, 5  ;;  %v1242_v31 = vrot.slane %v1240_v21, 4  ;;  %v1245_v32 = vrot.slane %v1243_v22, 5  ;;  %v647_v33 = vor.u32 %v645_v10, %v5578_v23  ;;  %939 = vst [vmem:[#allocation2 + $0x24] sm:$0xf] %v938_v26 }
  0x27   : > { %936 = vst [vmem:[#allocation2 + $0x20] sm:$0x1] %v935_v27  ;;  %v656_v34 = vor.u32 %v654_v29, %v5593_v28  ;;  %v657_v36 = vrot.slane %v5593_v28, 4  ;;  %v659_v37 = vshrl.u32 %v5581_v24, 16  ;;  %v662_v38 = vshll.u32 %v5581_v24, 16 }
  0x28   : > { %v1262_v40 = vsel %vm5585_vm11, %v1257_v55, %v1261_v30  ;;  %v1246_v41 = vor.u32 %v1245_v32, %v1242_v31  ;;  %v1191_v42 = vld [vmem:[#allocation2 + $0xc] sm:$0xf]  ;;  %v1192_v43 = vld [vmem:[#allocation2 + $0x10] sm:$0xf]  ;;  %v648_v45 = vsel %vm5559_vm10, %v640_v17, %v647_v33  ;;  %v649_v46 = vrot.slane %v5578_v23, 4 }
  0x29   : > { %1625 = vrot.lane.b32.xlu0 %v1262_v40, %s5431_s29  ;;  %v1264_v47 = vshrl.u32 %v1191_v42, 16  ;;  %v1267_v48 = vshll.u32 %v1191_v42, 16  ;;  %v1273_v49 = vshll.u32 %v1192_v43, 16  ;;  %v1277_v50 = vshrl.u32 %v1192_v43, 16  ;;  %v1193_v51 = vld [vmem:[#allocation2 + $0x14] sm:$0x1] }
  0x2a   : > { %940 = vst.msk [vmem:[#allocation2 + $0x28] sm:$0xf] %vm920_vm3, %v648_v45  ;;  %v1247_v52 = vrot.slane %v1246_v41, 4  ;;  %v1194_v53 = vld [vmem:[#allocation2 + $0x18] sm:$0xf]  ;;  %v1283_v54 = vshll.u32 %v1193_v51, 16  ;;  %v945_v56 = vsel %vm5533_vm6, %v656_v34, %v944_v39 }
  0x2b   : > { %v5607_v55 = vrot.slane %v659_v37, 7  ;;  %v1266_v57 = vrot.slane %v1264_v47, 4  ;;  %v1269_v58 = vrot.slane %v1267_v48, 5  ;;  %v1275_v59 = vrot.slane %v1273_v49, 5  ;;  %v1195_v61 = vld [vmem:[#allocation2 + $0x1c] sm:$0xf] }
  0x2c   : > { %v1279_v60 = vrot.slane %v1277_v50, 4  ;;  %946 = vst [vmem:[#allocation2 + $0x30] sm:$0xf] %v945_v56  ;;  %v1252_v62 = vsel %vm5585_vm11, %v1247_v52, %v5551_v35  ;;  %v1288_v63 = vshrl.u32 %v1194_v53, 16  ;;  %v1291_v1 = vshll.u32 %v1194_v53, 16 }
  0x2d   : > { %v1297_v3 = vshll.u32 %v1195_v61, 16  ;;  %1623 = vrot.lane.b32.xlu0 %v1252_v62, %s5431_s29  ;;  %v1270_v4 = vor.u32 %v1269_v58, %v1266_v57  ;;  %v1301_v5 = vshrl.u32 %v1195_v61, 16  ;;  %v1285_v7 = vrot.slane %v1283_v54, 5  ;;  %v1197_v8 = vld [vmem:[#allocation2 + $0x24] sm:$0xf] }
  0x2e   : > { %v1280_v6 = vor.u32 %v1279_v60, %v1275_v59  ;;  %v1196_v9 = vld [vmem:[#allocation2 + $0x20] sm:$0x1]  ;;  %v1290_v10 = vrot.slane %v1288_v63, 4  ;;  %v1293_v11 = vrot.slane %v1291_v1, 5  ;;  %v1312_v13 = vshrl.u32 %v1197_v8, 16 }
  0x2f   : > { %v1299_v12 = vrot.slane %v1297_v3, 5  ;;  %v1271_v14 = vrot.slane %v1270_v4, 4  ;;  %v1315_v16 = vshll.u32 %v1197_v8, 16  ;;  %v1303_v17 = vrot.slane %v1301_v5, 4  ;;  %v941_v30 = vld [vmem:[#allocation2 + $0x2c] sm:$0x1] }
  0x30   : > { %v1281_v15 = vrot.slane %v1280_v6, 4  ;;  %v1294_v35 = vor.u32 %v1293_v11, %v1290_v10  ;;  %v1314_v19 = vrot.slane %v1312_v13, 4  ;;  %v1307_v21 = vshll.u32 %v1196_v9, 16  ;;  %v470_v31 = vld [vmem:[#allocation2 + $0x3c] sm:$0x1] }
  0x31   : > { %v1198_v18 = vld [vmem:[#allocation2 + $0x28] sm:$0xf]  ;;  %v664_v22 = vor.u32 %v662_v38, %v5607_v55  ;;  %v1276_v24 = vsel %vm5585_vm11, %v1271_v14, %v1275_v59  ;;  %v1317_v27 = vrot.slane %v1315_v16, 5  ;;  %v1304_v34 = vor.u32 %v1303_v17, %v1299_v12  ;;  %v573_v43 = vld [vmem:[%s5542_s28 + $0x20] sm:$0xf] }
  0x32   : > { %v1286_v26 = vsel %vm5585_vm11, %v1281_v15, %v1285_v7  ;;  %v1321_v29 = vshll.u32 %v1198_v18, 16  ;;  %1627 = vrot.lane.b32.xlu1 %v1276_v24, %s5431_s29  ;;  %v1295_v32 = vrot.slane %v1294_v35, 4  ;;  %v1325_v33 = vshrl.u32 %v1198_v18, 16  ;;  %v574_v50 = vld [vmem:[%s5542_s28 + $0x24] sm:$0xf] }
  0x33   : > { %v1309_v37 = vrot.slane %v1307_v21, 5  ;;  %v1200_v39 = vld [vmem:[#allocation2 + $0x30] sm:$0xf]  ;;  %v1318_v38 = vor.u32 %v1317_v27, %v1314_v19  ;;  %v665_v41 = vsel %vm5559_vm10, %v657_v36, %v664_v22  ;;  %v1305_v47 = vrot.slane %v1304_v34, 4  ;;  %v523_v28 = vld [vmem:[#allocation2 + $0x38] sm:$0x1] }
  0x34   : > { %v1323_v40 = vrot.slane %v1321_v29, 5  ;;  %v1336_v42 = vshrl.u32 %v1200_v39, 16  ;;  %v1300_v45 = vsel %vm5585_vm11, %v1295_v32, %v1299_v12  ;;  %947 = vst.msk [vmem:[#allocation2 + $0x34] sm:$0xf] %vm920_vm3, %v665_v41  ;;  %v1339_v48 = vshll.u32 %v1200_v39, 16 }
  0x35   : > { %v942_v49 = vsel %vm5500_vm4, %v649_v46, %v941_v30  ;;  %1631 = vrot.lane.b32.xlu0 %v1300_v45, %s5431_s29  ;;  %v1319_v36 = vrot.slane %v1318_v38, 4  ;;  %v1327_v52 = vrot.slane %v1325_v33, 4  ;;  %v471_v53 = vsel %vm5500_vm4, 0, %v470_v31  ;;  %v473_v54 = vld [vmem:[#allocation2 + $0x48] sm:$0x1] }
  0x36   : > { %v1338_v51 = vrot.slane %v1336_v42, 4  ;;  %943 = vst [vmem:[#allocation2 + $0x2c] sm:$0x1] %v942_v49  ;;  %1629 = vrot.lane.b32.xlu1 %v1286_v26, %s5431_s29  ;;  %v1310_v23 = vsel %vm5585_vm11, %v1305_v47, %v1309_v37  ;;  %v1341_v46 = vrot.slane %v1339_v48, 5  ;;  %472 = vst [vmem:[#allocation2 + $0x3c] sm:$0x1] %v471_v53 }
  0x37   : > { %v668_v56 = vshrl.u32 %v573_v43, 16  ;;  %v671_v57 = vshll.u32 %v573_v43, 16  ;;  %v575_v58 = vld [vmem:[%s5542_s28 + $0x28] sm:$0xf]  ;;  %v1324_v59 = vsel %vm5585_vm11, %v1319_v36, %v1323_v40  ;;  %v1328_v60 = vor.u32 %v1327_v52, %v1323_v40  ;;  %v576_v5 = vld [vmem:[%s5542_s28 + $0x2c] sm:$0xf] }
  0x38   : > { %v676_v61 = vshrl.u32 %v574_v50, 16  ;;  %v679_v62 = vshll.u32 %v574_v50, 16  ;;  %v1342_v63 = vor.u32 %v1341_v46, %v1338_v51  ;;  %v524_v3 = vsel %vm5505_vm5, 0, %v523_v28  ;;  %v526_v10 = vld [vmem:[#allocation2 + $0x44] sm:$0x1] }
  0x39   : > { %v670_v1 = vrot.slane %v668_v56, 7  ;;  %v666_v4 = vrot.slane %v5607_v55, 4  ;;  %1635 = vrot.lane.b32.xlu0 %v1324_v59, %s5431_s29  ;;  %v1329_v6 = vrot.slane %v1328_v60, 4  ;;  %525 = vst [vmem:[#allocation2 + $0x38] sm:$0x1] %v524_v3  ;;  %v474_v8 = vsel %vm5500_vm4, 0, %v473_v54 }
  0x3a   : > { %v5648_v7 = vrot.slane %v676_v61, 7  ;;  %v685_v9 = vshrl.u32 %v575_v58, 16  ;;  %1633 = vrot.lane.b32.xlu1 %v1310_v23, %s5431_s29  ;;  %v1343_v11 = vrot.slane %v1342_v63, 4  ;;  %475 = vst [vmem:[#allocation2 + $0x48] sm:$0x1] %v474_v8  ;;  %v688_v55 = vshll.u32 %v575_v58, 16 }
  0x3b   : > { %v673_v12 = vor.u32 %v671_v57, %v670_v1  ;;  %v674_v13 = vrot.slane %v670_v1, 4  ;;  %v476_v14 = vld [vmem:[#allocation2 + $0x54] sm:$0x1]  ;;  %v577_v15 = vld [vmem:[%s5542_s28 + $0x30] sm:$0xf]  ;;  %v693_v18 = vshrl.u32 %v576_v5, 16 }
  0x3c   : > { %v1201_v16 = vld [vmem:[#allocation2 + $0x34] sm:$0xf]  ;;  %v681_v17 = vor.u32 %v679_v62, %v5648_v7  ;;  %v687_v35 = vrot.slane %v685_v9, 7  ;;  %v696_v19 = vshll.u32 %v576_v5, 16  ;;  %v527_v26 = vsel %vm5505_vm5, 0, %v526_v10 }
  0x3d   : > { %v1345_v21 = vshll.u32 %v1201_v16, 16  ;;  %v1349_v22 = vshrl.u32 %v1201_v16, 16  ;;  %v1199_v24 = vld [vmem:[#allocation2 + $0x2c] sm:$0x1]  ;;  %v683_v27 = vrot.slane %v5648_v7, 4  ;;  %v5664_v40 = vrot.slane %v693_v18, 7 }
  0x3e   : > { %v1331_v29 = vshll.u32 %v1199_v24, 16  ;;  %v682_v30 = vsel %vm5559_vm10, %v674_v13, %v681_v17  ;;  %v951_v31 = vld [vmem:[#allocation2 + $0x3c] sm:$0xf]  ;;  %v690_v32 = vor.u32 %v688_v55, %v687_v35  ;;  %v691_v33 = vrot.slane %v687_v35, 4  ;;  %528 = vst [vmem:[#allocation2 + $0x44] sm:$0x1] %v527_v26 }
  0x3f   : > { %v578_v34 = vld [vmem:[%s5542_s28 + $0x34] sm:$0xf]  ;;  %v1347_v37 = vrot.slane %v1345_v21, 5  ;;  %v952_v39 = vsel %vm5533_vm6, %v673_v12, %v951_v31  ;;  %954 = vst.msk [vmem:[#allocation2 + $0x40] sm:$0xf] %vm920_vm3, %v682_v30  ;;  %v1351_v38 = vrot.slane %v1349_v22, 4  ;;  %v698_v28 = vor.u32 %v696_v19, %v5664_v40 }
  0x40   : > { %v1333_v41 = vrot.slane %v1331_v29, 5  ;;  %953 = vst [vmem:[#allocation2 + $0x3c] sm:$0xf] %v952_v39  ;;  %v477_v42 = vsel %vm5500_vm4, 0, %v476_v14  ;;  %v702_v43 = vshrl.u32 %v577_v15, 16  ;;  %v705_v45 = vshll.u32 %v577_v15, 16 }
  0x41   : > { %v529_v47 = vld [vmem:[#allocation2 + $0x50] sm:$0x1]  ;;  %v1348_v48 = vsel %vm5585_vm11, %v1343_v11, %v1347_v37  ;;  %v948_v49 = vld [vmem:[#allocation2 + $0x38] sm:$0x1]  ;;  %v1352_v50 = vor.u32 %v1351_v38, %v1347_v37  ;;  %478 = vst [vmem:[#allocation2 + $0x54] sm:$0x1] %v477_v42  ;;  %v699_v57 = vsel %vm5559_vm10, %v691_v33, %v698_v28 }
  0x42   : > { %v710_v36 = vshrl.u32 %v578_v34, 16  ;;  %v479_v51 = vld [vmem:[#allocation2 + $0x60] sm:$0x1]  ;;  %1639 = vrot.lane.b32.xlu0 %v1348_v48, %s5431_s29  ;;  %v1334_v52 = vsel %vm5585_vm11, %v1329_v6, %v1333_v41  ;;  %v949_v53 = vsel %vm5500_vm4, %v666_v4, %v948_v49  ;;  %v958_v54 = vld [vmem:[#allocation2 + $0x48] sm:$0xf]  ;;  %v704_v23 = vrot.slane %v702_v43, 7 }
  0x43   : > { %v713_v46 = vshll.u32 %v578_v34, 16  ;;  %v579_v56 = vld [vmem:[%s5542_s28 + $0x38] sm:$0xf]  ;;  %1637 = vrot.lane.b32.xlu1 %v1334_v52, %s5431_s29  ;;  %950 = vst [vmem:[#allocation2 + $0x38] sm:$0x1] %v949_v53  ;;  %v959_v58 = vsel %vm5533_vm6, %v690_v32, %v958_v54  ;;  %v5685_v62 = vrot.slane %v1352_v50, 4 }
  0x44   : > { %v5682_v59 = vrot.slane %v710_v36, 7  ;;  %v580_v60 = vld [vmem:[%s5542_s28 + $0x3c] sm:$0xf]  ;;  %960 = vst [vmem:[#allocation2 + $0x48] sm:$0xf] %v959_v58  ;;  %v707_v63 = vor.u32 %v705_v45, %v704_v23  ;;  %v708_v1 = vrot.slane %v704_v23, 4 }
  0x45   : > { %v532_v61 = vld [vmem:[#allocation2 + $0x5c] sm:$0x1]  ;;  %961 = vst.msk [vmem:[#allocation2 + $0x4c] sm:$0xf] %vm920_vm3, %v699_v57  ;;  %v530_v3 = vsel %vm5505_vm5, 0, %v529_v47  ;;  %v480_v6 = vsel %vm5500_vm4, 0, %v479_v51 }
  0x46   : > { %v955_v4 = vld [vmem:[#allocation2 + $0x44] sm:$0x1]  ;;  %v715_v5 = vor.u32 %v713_v46, %v5682_v59  ;;  %531 = vst [vmem:[#allocation2 + $0x50] sm:$0x1] %v530_v3  ;;  %v719_v7 = vshrl.u32 %v579_v56, 16  ;;  %v722_v8 = vshll.u32 %v579_v56, 16 }
  0x47   : > { %v1204_v9 = vld [vmem:[#allocation2 + $0x40] sm:$0xf]  ;;  %v956_v10 = vsel %vm5500_vm4, %v683_v27, %v955_v4  ;;  %481 = vst [vmem:[#allocation2 + $0x60] sm:$0x1] %v480_v6  ;;  %v727_v11 = vshrl.u32 %v580_v60, 16  ;;  %v730_v12 = vshll.u32 %v580_v60, 16 }
  0x48   : > { %v533_v13 = vsel %vm5505_vm5, 0, %v532_v61  ;;  %v482_v55 = vld [vmem:[#allocation2 + $0x6c] sm:$0x1]  ;;  %v1203_v14 = vld [vmem:[#allocation2 + $0x3c] sm:$0xf]  ;;  %v1369_v15 = vshll.u32 %v1204_v9, 16  ;;  %v716_v17 = vsel %vm5559_vm10, %v708_v1, %v715_v5 }
  0x49   : > { %v1373_v16 = vshrl.u32 %v1204_v9, 16  ;;  %957 = vst [vmem:[#allocation2 + $0x44] sm:$0x1] %v956_v10  ;;  %v721_v35 = vrot.slane %v719_v7, 7  ;;  %534 = vst [vmem:[#allocation2 + $0x5c] sm:$0x1] %v533_v13 }
  0x4a   : > { %v1360_v18 = vshrl.u32 %v1203_v14, 16  ;;  %v1363_v19 = vshll.u32 %v1203_v14, 16  ;;  %v965_v21 = vld [vmem:[#allocation2 + $0x54] sm:$0xf]  ;;  %968 = vst.msk [vmem:[#allocation2 + $0x58] sm:$0xf] %vm920_vm3, %v716_v17 }
  0x4b   : > { %v700_v22 = vrot.slane %v5664_v40, 4  ;;  %v5701_v24 = vrot.slane %v727_v11, 7  ;;  %v1371_v26 = vrot.slane %v1369_v15, 5  ;;  %v1375_v27 = vrot.slane %v1373_v16, 4  ;;  %v1202_v33 = vld [vmem:[#allocation2 + $0x38] sm:$0x1] }
  0x4c   : > { %v966_v29 = vsel %vm5533_vm6, %v707_v63, %v965_v21  ;;  %v717_v30 = vrot.slane %v5682_v59, 4  ;;  %v1362_v31 = vrot.slane %v1360_v18, 4  ;;  %v1365_v32 = vrot.slane %v1363_v19, 5  ;;  %v1206_v38 = vld [vmem:[#allocation2 + $0x48] sm:$0xf] }
  0x4d   : > { %967 = vst [vmem:[#allocation2 + $0x54] sm:$0xf] %v966_v29  ;;  %v724_v34 = vor.u32 %v722_v8, %v721_v35  ;;  %v725_v37 = vrot.slane %v721_v35, 4  ;;  %v1355_v39 = vshll.u32 %v1202_v33, 16  ;;  %v1207_v41 = vld [vmem:[#allocation2 + $0x4c] sm:$0xf]  ;;  %v1376_v42 = vor.u32 %v1375_v27, %v1371_v26 }
  0x4e   : > { %v732_v40 = vor.u32 %v730_v12, %v5701_v24  ;;  %v483_v43 = vsel %vm5500_vm4, 0, %v482_v55  ;;  %v1366_v45 = vor.u32 %v1365_v32, %v1362_v31  ;;  %v1384_v47 = vshrl.u32 %v1206_v38, 16  ;;  %v962_v50 = vld [vmem:[#allocation2 + $0x50] sm:$0x1]  ;;  %v972_v53 = vld [vmem:[#allocation2 + $0x60] sm:$0xf] }
  0x4f   : > { %v1387_v48 = vshll.u32 %v1206_v38, 16  ;;  %v1393_v49 = vshll.u32 %v1207_v41, 16  ;;  %484 = vst [vmem:[#allocation2 + $0x6c] sm:$0x1] %v483_v43  ;;  %v1357_v28 = vrot.slane %v1355_v39, 5  ;;  %v1397_v36 = vshrl.u32 %v1207_v41, 16 }
  0x50   : > { %v1377_v51 = vrot.slane %v1376_v42, 4  ;;  %v963_v52 = vsel %vm5500_vm4, %v700_v22, %v962_v50  ;;  %v1367_v54 = vrot.slane %v1366_v45, 4  ;;  %v1386_v23 = vrot.slane %v1384_v47, 4  ;;  %v1205_v57 = vld [vmem:[#allocation2 + $0x44] sm:$0x1] }
  0x51   : > { %v1389_v46 = vrot.slane %v1387_v48, 5  ;;  %v1395_v56 = vrot.slane %v1393_v49, 5  ;;  %964 = vst [vmem:[#allocation2 + $0x50] sm:$0x1] %v963_v52  ;;  %v1358_v58 = vsel %vm5585_vm11, %v5685_v62, %v1357_v28  ;;  %v1379_v59 = vshll.u32 %v1205_v57, 16 }
  0x52   : > { %v1210_v60 = vld [vmem:[#allocation2 + $0x58] sm:$0xf]  ;;  %v1399_v61 = vrot.slane %v1397_v36, 4  ;;  %v733_v63 = vsel %vm5559_vm10, %v725_v37, %v732_v40  ;;  %v969_v1 = vld [vmem:[#allocation2 + $0x5c] sm:$0x1]  ;;  %v1372_v3 = vsel %vm5585_vm11, %v1367_v54, %v1371_v26  ;;  %1641 = vrot.lane.b32.xlu1 %v1358_v58, %s5431_s29  ;;  %v973_v10 = vsel %vm5533_vm6, %v724_v34, %v972_v53 }
  0x53   : > { %v1390_v4 = vor.u32 %v1389_v46, %v1386_v23  ;;  %v1417_v5 = vshll.u32 %v1210_v60, 16  ;;  %v1421_v6 = vshrl.u32 %v1210_v60, 16  ;;  %975 = vst.msk [vmem:[#allocation2 + $0x64] sm:$0xf] %vm920_vm3, %v733_v63  ;;  %v581_v7 = vld [vmem:[%s5542_s28 + $0x40] sm:$0xf]  ;;  %1643 = vrot.lane.b32.xlu0 %v1372_v3, %s5431_s29  ;;  %v970_v11 = vsel %vm5500_vm4, %v717_v30, %v969_v1 }
  0x54   : > { %v1381_v62 = vrot.slane %v1379_v59, 5  ;;  %v1209_v8 = vld [vmem:[#allocation2 + $0x54] sm:$0xf]  ;;  %v1400_v9 = vor.u32 %v1399_v61, %v1395_v56  ;;  %974 = vst [vmem:[#allocation2 + $0x60] sm:$0xf] %v973_v10  ;;  %v736_v18 = vshrl.u32 %v581_v7, 16 }
  0x55   : > { %v1391_v12 = vrot.slane %v1390_v4, 4  ;;  %v1408_v13 = vshrl.u32 %v1209_v8, 16  ;;  %v1411_v55 = vshll.u32 %v1209_v8, 16  ;;  %v1419_v14 = vrot.slane %v1417_v5, 5  ;;  %971 = vst [vmem:[#allocation2 + $0x5c] sm:$0x1] %v970_v11 }
  0x56   : > { %v582_v15 = vld [vmem:[%s5542_s28 + $0x44] sm:$0xf]  ;;  %v1382_v16 = vsel %vm5585_vm11, %v1377_v51, %v1381_v62  ;;  %v1401_v17 = vrot.slane %v1400_v9, 4  ;;  %v1423_v35 = vrot.slane %v1421_v6, 4  ;;  %v535_v19 = vld [vmem:[#allocation2 + $0x68] sm:$0x1] }
  0x57   : > { %v1396_v21 = vsel %vm5585_vm11, %v1391_v12, %v1395_v56  ;;  %1645 = vrot.lane.b32.xlu1 %v1382_v16, %s5431_s29  ;;  %v1410_v22 = vrot.slane %v1408_v13, 4  ;;  %v1413_v26 = vrot.slane %v1411_v55, 5  ;;  %v739_v27 = vshll.u32 %v581_v7, 16  ;;  %v485_v29 = vld [vmem:[#allocation2 + $0x78] sm:$0x1] }
  0x58   : > { %v583_v30 = vld [vmem:[%s5542_s28 + $0x48] sm:$0xf]  ;;  %1647 = vrot.lane.b32.xlu0 %v1396_v21, %s5431_s29  ;;  %v1208_v31 = vld [vmem:[#allocation2 + $0x50] sm:$0x1]  ;;  %v1424_v32 = vor.u32 %v1423_v35, %v1419_v14  ;;  %v738_v33 = vrot.slane %v736_v18, 7  ;;  %v744_v34 = vshrl.u32 %v582_v15, 16 }
  0x59   : > { %v747_v37 = vshll.u32 %v582_v15, 16  ;;  %v1414_v39 = vor.u32 %v1413_v26, %v1410_v22  ;;  %v1403_v38 = vshll.u32 %v1208_v31, 16  ;;  %v979_v41 = vld [vmem:[#allocation2 + $0x6c] sm:$0xf]  ;;  %v536_v42 = vsel %vm5505_vm5, 0, %v535_v19 }
  0x5a   : > { %v734_v40 = vrot.slane %v5701_v24, 4  ;;  %v1213_v43 = vld [vmem:[#allocation2 + $0x64] sm:$0xf]  ;;  %v1425_v45 = vrot.slane %v1424_v32, 4  ;;  %v741_v47 = vor.u32 %v739_v27, %v738_v33  ;;  %v742_v48 = vrot.slane %v738_v33, 4 }
  0x5b   : > { %v5737_v49 = vrot.slane %v744_v34, 7  ;;  %537 = vst [vmem:[#allocation2 + $0x68] sm:$0x1] %v536_v42  ;;  %v1415_v50 = vrot.slane %v1414_v39, 4  ;;  %v1405_v28 = vrot.slane %v1403_v38, 5  ;;  %v1441_v36 = vshll.u32 %v1213_v43, 16 }
  0x5c   : > { %v1445_v51 = vshrl.u32 %v1213_v43, 16  ;;  %v1212_v52 = vld [vmem:[#allocation2 + $0x60] sm:$0xf]  ;;  %v1211_v53 = vld [vmem:[#allocation2 + $0x5c] sm:$0x1]  ;;  %v980_v23 = vsel %vm5533_vm6, %v741_v47, %v979_v41  ;;  %v486_v24 = vsel %vm5500_vm4, 0, %v485_v29 }
  0x5d   : > { %v749_v54 = vor.u32 %v747_v37, %v5737_v49  ;;  %v753_v46 = vshrl.u32 %v583_v30, 16  ;;  %v1420_v56 = vsel %vm5585_vm11, %v1415_v50, %v1419_v14  ;;  %v1406_v57 = vsel %vm5585_vm11, %v1401_v17, %v1405_v28  ;;  %981 = vst [vmem:[#allocation2 + $0x6c] sm:$0xf] %v980_v23  ;;  %487 = vst [vmem:[#allocation2 + $0x78] sm:$0x1] %v486_v24 }
  0x5e   : > { %v1432_v58 = vshrl.u32 %v1212_v52, 16  ;;  %v1435_v59 = vshll.u32 %v1212_v52, 16  ;;  %v584_v60 = vld [vmem:[%s5542_s28 + $0x4c] sm:$0xf]  ;;  %1651 = vrot.lane.b32.xlu0 %v1420_v56, %s5431_s29  ;;  %1649 = vrot.lane.b32.xlu1 %v1406_v57, %s5431_s29  ;;  %v1443_v61 = vrot.slane %v1441_v36, 5  ;;  %v1427_v63 = vshll.u32 %v1211_v53, 16 }
  0x5f   : > { %v750_v1 = vsel %vm5559_vm10, %v742_v48, %v749_v54  ;;  %v1447_v3 = vrot.slane %v1445_v51, 4  ;;  %v538_v4 = vld [vmem:[#allocation2 + $0x74] sm:$0x1]  ;;  %v755_v7 = vrot.slane %v753_v46, 7  ;;  %v756_v62 = vshll.u32 %v583_v30, 16 }
  0x60   : > { %v1434_v5 = vrot.slane %v1432_v58, 4  ;;  %v1437_v6 = vrot.slane %v1435_v59, 5  ;;  %982 = vst.msk [vmem:[#allocation2 + $0x70] sm:$0xf] %vm920_vm3, %v750_v1  ;;  %v488_v8 = vld [vmem:[#allocation2 + $0x84] sm:$0x1] }
  0x61   : > { %v1429_v9 = vrot.slane %v1427_v63, 5  ;;  %v1448_v10 = vor.u32 %v1447_v3, %v1443_v61  ;;  %v761_v11 = vshrl.u32 %v584_v60, 16  ;;  %v764_v12 = vshll.u32 %v584_v60, 16  ;;  %v585_v13 = vld [vmem:[%s5542_s28 + $0x50] sm:$0xf] }
  0x62   : > { %v1438_v55 = vor.u32 %v1437_v6, %v1434_v5  ;;  %v976_v14 = vld [vmem:[#allocation2 + $0x68] sm:$0x1]  ;;  %v758_v15 = vor.u32 %v756_v62, %v755_v7  ;;  %v759_v16 = vrot.slane %v755_v7, 4  ;;  %v539_v17 = vsel %vm5505_vm5, 0, %v538_v4  ;;  %v586_v35 = vld [vmem:[%s5542_s28 + $0x54] sm:$0xf] }
  0x63   : > { %v1430_v18 = vsel %vm5585_vm11, %v1425_v45, %v1429_v9  ;;  %v977_v19 = vsel %vm5500_vm4, %v734_v40, %v976_v14  ;;  %v5762_v21 = vrot.slane %v1448_v10, 4  ;;  %v5764_v22 = vrot.slane %v761_v11, 7  ;;  %540 = vst [vmem:[#allocation2 + $0x74] sm:$0x1] %v539_v17  ;;  %v541_v40 = vld [vmem:[#allocation2 + $0x80] sm:$0x1] }
  0x64   : > { %v1439_v26 = vrot.slane %v1438_v55, 4  ;;  %1653 = vrot.lane.b32.xlu1 %v1430_v18, %s5431_s29  ;;  %978 = vst [vmem:[#allocation2 + $0x68] sm:$0x1] %v977_v19  ;;  %v751_v27 = vrot.slane %v5737_v49, 4  ;;  %v489_v29 = vsel %vm5500_vm4, 0, %v488_v8  ;;  %v770_v30 = vshrl.u32 %v585_v13, 16 }
  0x65   : > { %v1215_v31 = vld [vmem:[#allocation2 + $0x6c] sm:$0xf]  ;;  %v766_v32 = vor.u32 %v764_v12, %v5764_v22  ;;  %v986_v33 = vld [vmem:[#allocation2 + $0x78] sm:$0xf]  ;;  %490 = vst [vmem:[#allocation2 + $0x84] sm:$0x1] %v489_v29 }
  0x66   : > { %v773_v34 = vshll.u32 %v585_v13, 16  ;;  %v778_v37 = vshrl.u32 %v586_v35, 16  ;;  %v1444_v39 = vsel %vm5585_vm11, %v1439_v26, %v1443_v61  ;;  %v1456_v38 = vshrl.u32 %v1215_v31, 16  ;;  %v491_v43 = vld [vmem:[#allocation2 + $0x90] sm:$0x1] }
  0x67   : > { %v1459_v41 = vshll.u32 %v1215_v31, 16  ;;  %v987_v42 = vsel %vm5533_vm6, %v758_v15, %v986_v33  ;;  %1655 = vrot.lane.b32.xlu0 %v1444_v39, %s5431_s29  ;;  %v1216_v45 = vld [vmem:[#allocation2 + $0x70] sm:$0xf]  ;;  %v767_v47 = vsel %vm5559_vm10, %v759_v16, %v766_v32  ;;  %v772_v48 = vrot.slane %v770_v30, 7  ;;  %v587_v53 = vld [vmem:[%s5542_s28 + $0x58] sm:$0xf] }
  0x68   : > { %988 = vst [vmem:[#allocation2 + $0x78] sm:$0xf] %v987_v42  ;;  %v5778_v49 = vrot.slane %v778_v37, 7  ;;  %v781_v50 = vshll.u32 %v586_v35, 16  ;;  %v1458_v28 = vrot.slane %v1456_v38, 4  ;;  %v1465_v51 = vshll.u32 %v1216_v45, 16 }
  0x69   : > { %v1461_v36 = vrot.slane %v1459_v41, 5  ;;  %v1469_v52 = vshrl.u32 %v1216_v45, 16  ;;  %989 = vst.msk [vmem:[#allocation2 + $0x7c] sm:$0xf] %vm920_vm3, %v767_v47  ;;  %v775_v54 = vor.u32 %v773_v34, %v772_v48  ;;  %v776_v23 = vrot.slane %v772_v48, 4 }
  0x6a   : > { %v783_v24 = vor.u32 %v781_v50, %v5778_v49  ;;  %v542_v46 = vsel %vm5505_vm5, 0, %v541_v40  ;;  %v588_v56 = vld [vmem:[%s5542_s28 + $0x5c] sm:$0xf]  ;;  %v1467_v58 = vrot.slane %v1465_v51, 5  ;;  %v983_v59 = vld [vmem:[#allocation2 + $0x74] sm:$0x1] }
  0x6b   : > { %v1462_v57 = vor.u32 %v1461_v36, %v1458_v28  ;;  %v1471_v60 = vrot.slane %v1469_v52, 4  ;;  %543 = vst [vmem:[#allocation2 + $0x80] sm:$0x1] %v542_v46  ;;  %v768_v61 = vrot.slane %v5764_v22, 4  ;;  %v1214_v63 = vld [vmem:[#allocation2 + $0x68] sm:$0x1]  ;;  %v984_v1 = vsel %vm5500_vm4, %v751_v27, %v983_v59 }
  0x6c   : > { %v784_v3 = vsel %vm5559_vm10, %v776_v23, %v783_v24  ;;  %v492_v4 = vsel %vm5500_vm4, 0, %v491_v43  ;;  %v787_v5 = vshrl.u32 %v587_v53, 16  ;;  %v544_v6 = vld [vmem:[#allocation2 + $0x8c] sm:$0x1]  ;;  %v1451_v62 = vshll.u32 %v1214_v63, 16 }
  0x6d   : > { %v1463_v7 = vrot.slane %v1462_v57, 4  ;;  %985 = vst [vmem:[#allocation2 + $0x74] sm:$0x1] %v984_v1  ;;  %v1472_v8 = vor.u32 %v1471_v60, %v1467_v58  ;;  %v993_v9 = vld [vmem:[#allocation2 + $0x84] sm:$0xf]  ;;  %v790_v10 = vshll.u32 %v587_v53, 16 }
  0x6e   : > { %996 = vst.msk [vmem:[#allocation2 + $0x88] sm:$0xf] %vm920_vm3, %v784_v3  ;;  %493 = vst [vmem:[#allocation2 + $0x90] sm:$0x1] %v492_v4  ;;  %v994_v11 = vsel %vm5533_vm6, %v775_v54, %v993_v9  ;;  %v789_v12 = vrot.slane %v787_v5, 7  ;;  %v795_v13 = vshrl.u32 %v588_v56, 16 }
  0x6f   : > { %v798_v55 = vshll.u32 %v588_v56, 16  ;;  %v494_v14 = vld [vmem:[#allocation2 + $0x9c] sm:$0x1]  ;;  %v1468_v15 = vsel %vm5585_vm11, %v1463_v7, %v1467_v58  ;;  %v1453_v16 = vrot.slane %v1451_v62, 5  ;;  %v1218_v17 = vld [vmem:[#allocation2 + $0x78] sm:$0xf] }
  0x70   : > { %v1473_v35 = vrot.slane %v1472_v8, 4  ;;  %995 = vst [vmem:[#allocation2 + $0x84] sm:$0xf] %v994_v11  ;;  %v545_v18 = vsel %vm5505_vm5, 0, %v544_v6  ;;  %1659 = vrot.lane.b32.xlu0 %v1468_v15, %s5431_s29  ;;  %v1219_v19 = vld [vmem:[#allocation2 + $0x7c] sm:$0xf]  ;;  %v792_v27 = vor.u32 %v790_v10, %v789_v12 }
  0x71   : > { %v1480_v22 = vshrl.u32 %v1218_v17, 16  ;;  %v1483_v26 = vshll.u32 %v1218_v17, 16  ;;  %v793_v29 = vrot.slane %v789_v12, 4  ;;  %546 = vst [vmem:[#allocation2 + $0x8c] sm:$0x1] %v545_v18  ;;  %v1454_v30 = vsel %vm5585_vm11, %v5762_v21, %v1453_v16 }
  0x72   : > { %v1489_v31 = vshll.u32 %v1219_v19, 16  ;;  %v1493_v32 = vshrl.u32 %v1219_v19, 16  ;;  %v5804_v33 = vrot.slane %v795_v13, 7  ;;  %1657 = vrot.lane.b32.xlu1 %v1454_v30, %s5431_s29  ;;  %v990_v39 = vld [vmem:[#allocation2 + $0x80] sm:$0x1]  ;;  %v785_v38 = vrot.slane %v5778_v49, 4 }
  0x73   : > { %v1482_v34 = vrot.slane %v1480_v22, 4  ;;  %v1485_v37 = vrot.slane %v1483_v26, 5  ;;  %v495_v41 = vsel %vm5500_vm4, 0, %v494_v14  ;;  %v991_v40 = vsel %vm5500_vm4, %v768_v61, %v990_v39  ;;  %v589_v45 = vld [vmem:[%s5542_s28 + $0x60] sm:$0xf] }
  0x74   : > { %v1491_v42 = vrot.slane %v1489_v31, 5  ;;  %v1495_v21 = vrot.slane %v1493_v32, 4  ;;  %v800_v43 = vor.u32 %v798_v55, %v5804_v33  ;;  %496 = vst [vmem:[#allocation2 + $0x9c] sm:$0x1] %v495_v41  ;;  %v1217_v48 = vld [vmem:[#allocation2 + $0x74] sm:$0x1] }
  0x75   : > { %v1486_v47 = vor.u32 %v1485_v37, %v1482_v34  ;;  %v1222_v50 = vld [vmem:[#allocation2 + $0x88] sm:$0xf]  ;;  %992 = vst [vmem:[#allocation2 + $0x80] sm:$0x1] %v991_v40  ;;  %v1000_v28 = vld [vmem:[#allocation2 + $0x90] sm:$0xf] }
  0x76   : > { %v1475_v36 = vshll.u32 %v1217_v48, 16  ;;  %v1513_v49 = vshll.u32 %v1222_v50, 16  ;;  %v1517_v51 = vshrl.u32 %v1222_v50, 16  ;;  %v1496_v52 = vor.u32 %v1495_v21, %v1491_v42  ;;  %v590_v53 = vld [vmem:[%s5542_s28 + $0x64] sm:$0xf] }
  0x77   : > { %v1487_v54 = vrot.slane %v1486_v47, 4  ;;  %v1221_v23 = vld [vmem:[#allocation2 + $0x84] sm:$0xf]  ;;  %v801_v24 = vsel %vm5559_vm10, %v793_v29, %v800_v43  ;;  %v1001_v46 = vsel %vm5533_vm6, %v792_v27, %v1000_v28  ;;  %v804_v56 = vshrl.u32 %v589_v45, 16  ;;  %v547_v57 = vld [vmem:[#allocation2 + $0x98] sm:$0x1] }
  0x78   : > { %v1477_v58 = vrot.slane %v1475_v36, 5  ;;  %v1504_v59 = vshrl.u32 %v1221_v23, 16  ;;  %v1507_v60 = vshll.u32 %v1221_v23, 16  ;;  %v1515_v61 = vrot.slane %v1513_v49, 5  ;;  %1002 = vst [vmem:[#allocation2 + $0x90] sm:$0xf] %v1001_v46 }
  0x79   : > { %1003 = vst.msk [vmem:[#allocation2 + $0x94] sm:$0xf] %vm920_vm3, %v801_v24  ;;  %v997_v63 = vld [vmem:[#allocation2 + $0x8c] sm:$0x1]  ;;  %v1492_v1 = vsel %vm5585_vm11, %v1487_v54, %v1491_v42  ;;  %v1497_v3 = vrot.slane %v1496_v52, 4  ;;  %v1519_v5 = vrot.slane %v1517_v51, 4 }
  0x7a   : > { %v998_v4 = vsel %vm5500_vm4, %v785_v38, %v997_v63  ;;  %v497_v6 = vld [vmem:[#allocation2 + $0xa8] sm:$0x1]  ;;  %1663 = vrot.lane.b32.xlu0 %v1492_v1, %s5431_s29  ;;  %v1478_v62 = vsel %vm5585_vm11, %v1473_v35, %v1477_v58  ;;  %v1506_v8 = vrot.slane %v1504_v59, 4  ;;  %v1509_v9 = vrot.slane %v1507_v60, 5  ;;  %v5829_v11 = vld [vmem:[%s5542_s28 + $0x6c] sm:$0xf] }
  0x7b   : > { %v591_v7 = vld [vmem:[%s5542_s28 + $0x68] sm:$0xf]  ;;  %999 = vst [vmem:[#allocation2 + $0x8c] sm:$0x1] %v998_v4  ;;  %v806_v10 = vrot.slane %v804_v56, 7  ;;  %1661 = vrot.lane.b32.xlu1 %v1478_v62, %s5431_s29  ;;  %v1520_v12 = vor.u32 %v1519_v5, %v1515_v61  ;;  %v807_v13 = vshll.u32 %v589_v45, 16 }
  0x7c   : > { %v812_v55 = vshrl.u32 %v590_v53, 16  ;;  %v815_v14 = vshll.u32 %v590_v53, 16  ;;  %v1007_v15 = vld [vmem:[#allocation2 + $0x9c] sm:$0xf]  ;;  %v1510_v16 = vor.u32 %v1509_v9, %v1506_v8  ;;  %v1220_v17 = vld [vmem:[#allocation2 + $0x80] sm:$0x1] }
  0x7d   : > { %v810_v18 = vrot.slane %v806_v10, 4  ;;  %v548_v19 = vsel %vm5505_vm5, 0, %v547_v57  ;;  %v802_v35 = vrot.slane %v5804_v33, 4  ;;  %v1499_v22 = vshll.u32 %v1220_v17, 16  ;;  %v550_v47 = vld [vmem:[#allocation2 + $0xa4] sm:$0x1] }
  0x7e   : > { %v1521_v26 = vrot.slane %v1520_v12, 4  ;;  %v809_v27 = vor.u32 %v807_v13, %v806_v10  ;;  %v5835_v29 = vrot.slane %v812_v55, 7  ;;  %549 = vst [vmem:[#allocation2 + $0x98] sm:$0x1] %v548_v19  ;;  %v1511_v30 = vrot.slane %v1510_v16, 4 }
  0x7f   : > { %v498_v31 = vsel %vm5500_vm4, 0, %v497_v6  ;;  %v821_v32 = vshrl.u32 %v591_v7, 16  ;;  %v824_v34 = vshll.u32 %v591_v7, 16  ;;  %v1501_v37 = vrot.slane %v1499_v22, 5  ;;  %v1224_v39 = vld [vmem:[#allocation2 + $0x90] sm:$0xf] }
  0x80   : > { %v1225_v38 = vld [vmem:[#allocation2 + $0x94] sm:$0xf]  ;;  %v817_v41 = vor.u32 %v815_v14, %v5835_v29  ;;  %v1008_v33 = vsel %vm5533_vm6, %v809_v27, %v1007_v15  ;;  %499 = vst [vmem:[#allocation2 + $0xa8] sm:$0x1] %v498_v31  ;;  %v829_v42 = vshrl.u32 %v5829_v11, 16  ;;  %v1516_v40 = vsel %vm5585_vm11, %v1511_v30, %v1515_v61 }
  0x81   : > { %v1528_v21 = vshrl.u32 %v1224_v39, 16  ;;  %v1531_v43 = vshll.u32 %v1224_v39, 16  ;;  %v1537_v45 = vshll.u32 %v1225_v38, 16  ;;  %1009 = vst [vmem:[#allocation2 + $0x9c] sm:$0xf] %v1008_v33  ;;  %1667 = vrot.lane.b32.xlu0 %v1516_v40, %s5431_s29  ;;  %v1502_v48 = vsel %vm5585_vm11, %v1497_v3, %v1501_v37 }
  0x82   : > { %v1541_v50 = vshrl.u32 %v1225_v38, 16  ;;  %v1223_v28 = vld [vmem:[#allocation2 + $0x8c] sm:$0x1]  ;;  %v818_v36 = vsel %vm5559_vm10, %v810_v18, %v817_v41  ;;  %v823_v49 = vrot.slane %v821_v32, 7  ;;  %v500_v51 = vld [vmem:[#allocation2 + $0xb4] sm:$0x1]  ;;  %1665 = vrot.lane.b32.xlu1 %v1502_v48, %s5431_s29 }
  0x83   : > { %v1530_v52 = vrot.slane %v1528_v21, 4  ;;  %v1533_v53 = vrot.slane %v1531_v43, 5  ;;  %v1539_v54 = vrot.slane %v1537_v45, 5  ;;  %v1523_v23 = vshll.u32 %v1223_v28, 16  ;;  %1010 = vst.msk [vmem:[#allocation2 + $0xa0] sm:$0xf] %vm920_vm3, %v818_v36 }
  0x84   : > { %v593_v24 = vld [vmem:[%s5542_s28 + $0x70] sm:$0xf]  ;;  %v1543_v46 = vrot.slane %v1541_v50, 4  ;;  %v826_v56 = vor.u32 %v824_v34, %v823_v49  ;;  %v827_v57 = vrot.slane %v823_v49, 4  ;;  %v5853_v58 = vrot.slane %v829_v42, 7 }
  0x85   : > { %v594_v59 = vld [vmem:[%s5542_s28 + $0x74] sm:$0xf]  ;;  %v1534_v60 = vor.u32 %v1533_v53, %v1530_v52  ;;  %v1525_v61 = vrot.slane %v1523_v23, 5  ;;  %v1004_v63 = vld [vmem:[#allocation2 + $0x98] sm:$0x1]  ;;  %v832_v1 = vshll.u32 %v5829_v11, 16 }
  0x86   : > { %v551_v3 = vsel %vm5505_vm5, 0, %v550_v47  ;;  %v1005_v4 = vsel %vm5500_vm4, %v802_v35, %v1004_v63  ;;  %v1544_v5 = vor.u32 %v1543_v46, %v1539_v54  ;;  %v501_v6 = vsel %vm5500_vm4, 0, %v500_v51  ;;  %v553_v11 = vld [vmem:[#allocation2 + $0xb0] sm:$0x1]  ;;  %v556_v40 = vld [vmem:[#allocation2 + $0xbc] sm:$0x1] }
  0x87   : > { %552 = vst [vmem:[#allocation2 + $0xa4] sm:$0x1] %v551_v3  ;;  %v1535_v7 = vrot.slane %v1534_v60, 4  ;;  %v1526_v62 = vsel %vm5585_vm11, %v1521_v26, %v1525_v61  ;;  %1006 = vst [vmem:[#allocation2 + $0x98] sm:$0x1] %v1005_v4  ;;  %v834_v8 = vor.u32 %v832_v1, %v5853_v58  ;;  %v838_v10 = vshrl.u32 %v593_v24, 16 }
  0x88   : > { %v1014_v9 = vld [vmem:[#allocation2 + $0xa8] sm:$0xf]  ;;  %502 = vst [vmem:[#allocation2 + $0xb4] sm:$0x1] %v501_v6  ;;  %1669 = vrot.lane.b32.xlu1 %v1526_v62, %s5431_s29  ;;  %v1227_v12 = vld [vmem:[#allocation2 + $0x9c] sm:$0xf] }
  0x89   : > { %v1015_v13 = vsel %vm5533_vm6, %v826_v56, %v1014_v9  ;;  %v819_v55 = vrot.slane %v5835_v29, 4  ;;  %v841_v14 = vshll.u32 %v593_v24, 16  ;;  %v846_v15 = vshrl.u32 %v594_v59, 16  ;;  %v1125_v6 = vld [vmem:[#allocation2 + $0x4] sm:$0xf] }
  0x8a   : > { %v1540_v16 = vsel %vm5585_vm11, %v1535_v7, %v1539_v54  ;;  %v1552_v17 = vshrl.u32 %v1227_v12, 16  ;;  %v1555_v18 = vshll.u32 %v1227_v12, 16  ;;  %v835_v19 = vsel %vm5559_vm10, %v827_v57, %v834_v8  ;;  %1016 = vst [vmem:[#allocation2 + $0xa8] sm:$0xf] %v1015_v13  ;;  %v1228_v35 = vld [vmem:[#allocation2 + $0xa0] sm:$0xf] }
  0x8b   : > { %1671 = vrot.lane.b32.xlu0 %v1540_v16, %s5431_s29  ;;  %1017 = vst.msk [vmem:[#allocation2 + $0xac] sm:$0xf] %vm920_vm3, %v835_v19  ;;  %v840_v22 = vrot.slane %v838_v10, 7  ;;  %v5876_v26 = vrot.slane %v846_v15, 7  ;;  %v849_v27 = vshll.u32 %v594_v59, 16  ;;  %v554_v29 = vsel %vm5505_vm5, 0, %v553_v11 }
  0x8c   : > { %v1554_v30 = vrot.slane %v1552_v17, 4  ;;  %v1557_v31 = vrot.slane %v1555_v18, 5  ;;  %v1561_v32 = vshll.u32 %v1228_v35, 16  ;;  %v1565_v34 = vshrl.u32 %v1228_v35, 16  ;;  %555 = vst [vmem:[#allocation2 + $0xb0] sm:$0x1] %v554_v29 }
  0x8d   : > { %v843_v37 = vor.u32 %v841_v14, %v840_v22  ;;  %v844_v39 = vrot.slane %v840_v22, 4  ;;  %v851_v38 = vor.u32 %v849_v27, %v5876_v26  ;;  %v1545_v43 = vrot.slane %v1544_v5, 4  ;;  %1157 = vst.msk [vmem:[#allocation3 + $0x4] sm:$0xf] %vm920_vm3, %v1125_v6  ;;  %v1752_v22 = vld [vmem:[#allocation2] sm:$0xe] }
  0x8e   : > { %v1558_v41 = vor.u32 %v1557_v31, %v1554_v30  ;;  %v1563_v33 = vrot.slane %v1561_v32, 5  ;;  %v1011_v42 = vld [vmem:[#allocation2 + $0xa4] sm:$0x1]  ;;  %v1226_v21 = vld [vmem:[#allocation2 + $0x98] sm:$0x1]  ;;  %v1567_v47 = vrot.slane %v1565_v34, 4 }
  0x8f   : > { %v1012_v45 = vsel %vm5500_vm4, %v819_v55, %v1011_v42  ;;  %v852_v48 = vsel %vm5559_vm10, %v844_v39, %v851_v38  ;;  %v1021_v50 = vld [vmem:[#allocation2 + $0xb4] sm:$0xf]  ;;  %v1547_v36 = vshll.u32 %v1226_v21, 16  ;;  %v836_v51 = vrot.slane %v5853_v58, 4  ;;  %v1124_v34 = vld [vmem:[#allocation2] sm:$0xf] }
  0x90   : > { %v1559_v28 = vrot.slane %v1558_v41, 4  ;;  %1013 = vst [vmem:[#allocation2 + $0xa4] sm:$0x1] %v1012_v45  ;;  %v1022_v49 = vsel %vm5533_vm6, %v843_v37, %v1021_v50  ;;  %1024 = vst.msk [vmem:[#allocation2 + $0xb8] sm:$0xf] %vm920_vm3, %v852_v48  ;;  %v557_v53 = vsel %vm5505_vm5, 0, %v556_v40  ;;  %v1568_v60 = vor.u32 %v1567_v47, %v1563_v33 }
  0x91   : > { %v1230_v52 = vld [vmem:[#allocation2 + $0xa8] sm:$0xf]  ;;  %1023 = vst [vmem:[#allocation2 + $0xb4] sm:$0xf] %v1022_v49  ;;  %v1549_v23 = vrot.slane %v1547_v36, 5  ;;  %v853_v62 = vrot.slane %v5876_v26, 4 }
  0x92   : > { %v1564_v54 = vsel %vm5585_vm11, %v1559_v28, %v1563_v33  ;;  %v1231_v24 = vld [vmem:[#allocation2 + $0xac] sm:$0xf]  ;;  %v1576_v46 = vshrl.u32 %v1230_v52, 16  ;;  %v1579_v56 = vshll.u32 %v1230_v52, 16  ;;  %558 = vst [vmem:[#allocation2 + $0xbc] sm:$0x1] %v557_v53 }
  0x93   : > { %1675 = vrot.lane.b32.xlu0 %v1564_v54, %s5431_s29  ;;  %v1585_v57 = vshll.u32 %v1231_v24, 16  ;;  %v1589_v59 = vshrl.u32 %v1231_v24, 16  ;;  %v1018_v61 = vld [vmem:[#allocation2 + $0xb0] sm:$0x1]  ;;  %v1550_v58 = vsel %vm5585_vm11, %v1545_v43, %v1549_v23  ;;  %v1569_v9 = vrot.slane %v1568_v60, 4 }
  0x94   : > { %v1578_v63 = vrot.slane %v1576_v46, 4  ;;  %v1581_v1 = vrot.slane %v1579_v56, 5  ;;  %v1019_v3 = vsel %vm5500_vm4, %v836_v51, %v1018_v61  ;;  %1673 = vrot.lane.b32.xlu1 %v1550_v58, %s5431_s29  ;;  %v1753_v26 = vld [vmem:[#allocation2 + $0x4] sm:$0xf]  ;;  %1156 = vst.msk [vmem:[#allocation3] sm:$0xf] %vm920_vm3, %v1124_v34 }
  0x95   : > { %v1587_v4 = vrot.slane %v1585_v57, 5  ;;  %1020 = vst [vmem:[#allocation2 + $0xb0] sm:$0x1] %v1019_v3  ;;  %v1591_v5 = vrot.slane %v1589_v59, 4  ;;  %v1126_v38 = vld [vmem:[#allocation2 + $0xc] sm:$0xf] }
  0x96   : > { %v1582_v7 = vor.u32 %v1581_v1, %v1578_v63  ;;  %1158 = vst.msk [vmem:[#allocation3 + $0x8] sm:$0xf] %vm920_vm3, %v1126_v38  ;;  %v5122_v40 = vrot.slane %v1752_v22, 9  ;;  %v1755_v21 = vld [vmem:[#allocation2 + $0xc] sm:$0xe]  ;;  %v1853_v47 = vrot.slane %v1753_v26, 5 }
  0x97   : > { %v1229_v8 = vld [vmem:[#allocation2 + $0xa4] sm:$0x1]  ;;  %v1234_v10 = vld [vmem:[#allocation2 + $0xb8] sm:$0xf]  ;;  %v1592_v17 = vor.u32 %v1591_v5, %v1587_v4  ;;  %v1756_v36 = vld [vmem:[#allocation2 + $0x10] sm:$0xf] }
  0x98   : > { %v1583_v11 = vrot.slane %v1582_v7, 4  ;;  %v1571_v12 = vshll.u32 %v1229_v8, 16  ;;  %v1233_v13 = vld [vmem:[#allocation2 + $0xb4] sm:$0xf]  ;;  %v1609_v55 = vshll.u32 %v1234_v10, 16  ;;  %v1613_v14 = vshrl.u32 %v1234_v10, 16 }
  0x99   : > { %v1600_v15 = vshrl.u32 %v1233_v13, 16  ;;  %v1603_v16 = vshll.u32 %v1233_v13, 16  ;;  %v1025_v18 = vld [vmem:[#allocation2 + $0xbc] sm:$0x1]  ;;  %v1593_v33 = vrot.slane %v1592_v17, 4  ;;  %v5123_v54 = vrot.slane %v1755_v21, 9 }
  0x9a   : > { %v1588_v19 = vsel %vm5585_vm11, %v1583_v11, %v1587_v4  ;;  %v1573_v35 = vrot.slane %v1571_v12, 5  ;;  %v1026_v27 = vsel %vm5500_vm4, %v853_v62, %v1025_v18  ;;  %v1611_v31 = vrot.slane %v1609_v55, 5  ;;  %v1128_v50 = vld [vmem:[#allocation2 + $0x18] sm:$0xf]  ;;  %v1127_v49 = vld [vmem:[#allocation2 + $0x10] sm:$0xf] }
  0x9b   : > { %1679 = vrot.lane.b32.xlu0 %v1588_v19, %s5431_s29  ;;  %v1602_v29 = vrot.slane %v1600_v15, 4  ;;  %v1605_v30 = vrot.slane %v1603_v16, 5  ;;  %1027 = vst [vmem:[#allocation2 + $0xbc] sm:$0x1] %v1026_v27  ;;  %v1615_v32 = vrot.slane %v1613_v14, 4  ;;  %v1854_v24 = vsel %vm5912_vm14, %v5122_v40, %v1853_v47  ;;  %v1626_v58 = vpop.permute.xlu0 %1625 }
  0x9c   : > { %v1574_v37 = vsel %vm5585_vm11, %v1569_v9, %v1573_v35  ;;  %v1232_v39 = vld [vmem:[#allocation2 + $0xb0] sm:$0x1]  ;;  %1160 = vst.msk [vmem:[#allocation3 + $0x10] sm:$0xf] %vm920_vm3, %v1128_v50  ;;  %1159 = vst.msk [vmem:[#allocation3 + $0xc] sm:$0xf] %vm920_vm3, %v1127_v49 }
  0x9d   : > { %1677 = vrot.lane.b32.xlu1 %v1574_v37, %s5431_s29  ;;  %v1606_v41 = vor.u32 %v1605_v30, %v1602_v29  ;;  %v1595_v42 = vshll.u32 %v1232_v39, 16  ;;  %v1616_v48 = vor.u32 %v1615_v32, %v1611_v31  ;;  %v1754_v23 = vld [vmem:[#allocation2 + $0x8] sm:$0x1]  ;;  %v1860_v57 = vrot.slane %v1756_v36, 5  ;;  %v1130_v59 = vld [vmem:[#allocation2 + $0x24] sm:$0xf] }
  0x9e   : > { %v1758_v60 = vld [vmem:[#allocation2 + $0x18] sm:$0xe]  ;;  %v1759_v61 = vld [vmem:[#allocation2 + $0x1c] sm:$0xf]  ;;  %1162 = vst.msk [vmem:[#allocation3 + $0x18] sm:$0xf] %vm920_vm3, %v1130_v59 }
  0x9f   : > { %v1607_v43 = vrot.slane %v1606_v41, 4  ;;  %v1597_v45 = vrot.slane %v1595_v42, 5  ;;  %v1617_v46 = vrot.slane %v1616_v48, 4  ;;  %v1129_v63 = vld [vmem:[#allocation2 + $0x1c] sm:$0xf]  ;;  %v1855_v3 = vrot.slane %v1853_v47, 4  ;;  %v1624_v17 = vpop.permute.xlu0 %1623 }
  0xa0   : > { %v1856_v4 = vrot.slane %v1754_v23, 5  ;;  %1161 = vst.msk [vmem:[#allocation3 + $0x14] sm:$0xf] %vm920_vm3, %v1129_v63  ;;  %v1757_v5 = vld [vmem:[#allocation2 + $0x14] sm:$0x1]  ;;  %v1861_v62 = vsel %vm5912_vm14, %v5123_v54, %v1860_v57  ;;  %v5124_v8 = vrot.slane %v1758_v60, 9 }
  0xa1   : > { %v1612_v51 = vsel %vm5585_vm11, %v1607_v43, %v1611_v31  ;;  %v1598_v52 = vsel %vm5585_vm11, %v1593_v33, %v1597_v45  ;;  %v1132_v6 = vld [vmem:[#allocation2 + $0x30] sm:$0xf]  ;;  %v1867_v9 = vrot.slane %v1759_v61, 5  ;;  %v1131_v10 = vld [vmem:[#allocation2 + $0x28] sm:$0xf]  ;;  %v1862_v55 = vrot.slane %v1860_v57, 4 }
  0xa2   : > { %1683 = vrot.lane.b32.xlu0 %v1612_v51, %s5431_s29  ;;  %1681 = vrot.lane.b32.xlu1 %v1598_v52, %s5431_s29  ;;  %v1235_v53 = vld [vmem:[#allocation2 + $0xbc] sm:$0x1]  ;;  %1164 = vst.msk [vmem:[#allocation3 + $0x20] sm:$0xf] %vm920_vm3, %v1132_v6  ;;  %v1761_v11 = vld [vmem:[#allocation2 + $0x24] sm:$0xe]  ;;  %v1857_v13 = vsel %vm5912_vm14, %v1855_v3, %v1856_v4 }
  0xa3   : > { %v1619_v56 = vshll.u32 %v1235_v53, 16  ;;  %v1762_v12 = vld [vmem:[#allocation2 + $0x28] sm:$0xf]  ;;  %1163 = vst.msk [vmem:[#allocation3 + $0x1c] sm:$0xf] %vm920_vm3, %v1131_v10  ;;  %v1863_v14 = vrot.slane %v1757_v5, 5  ;;  %v1868_v19 = vsel %vm5912_vm14, %v5124_v8, %v1867_v9 }
  0xa4   : > { %v1134_v15 = vld [vmem:[#allocation2 + $0x3c] sm:$0xf]  ;;  %v1760_v16 = vld [vmem:[#allocation2 + $0x20] sm:$0x1]  ;;  %v1133_v18 = vld [vmem:[#allocation2 + $0x34] sm:$0xf]  ;;  %v1628_v34 = vpop.permute.xlu1 %1627 }
  0xa5   : > { %v1621_v1 = vrot.slane %v1619_v56, 5  ;;  %1166 = vst.msk [vmem:[#allocation3 + $0x28] sm:$0xf] %vm920_vm3, %v1134_v15  ;;  %v5125_v35 = vrot.slane %v1761_v11, 9  ;;  %v1874_v22 = vrot.slane %v1762_v12, 5  ;;  %v1864_v30 = vsel %vm5912_vm14, %v1862_v55, %v1863_v14 }
  0xa6   : > { %1963 = vrot.lane.b32.xlu0 %v1854_v24, %s5432_s30  ;;  %1165 = vst.msk [vmem:[#allocation3 + $0x24] sm:$0xf] %vm920_vm3, %v1133_v18  ;;  %v1764_v26 = vld [vmem:[#allocation2 + $0x30] sm:$0xe]  ;;  %v1765_v27 = vld [vmem:[#allocation2 + $0x34] sm:$0xf] }
  0xa7   : > { %v1622_v7 = vsel %vm5585_vm11, %v1617_v46, %v1621_v1  ;;  %v1136_v29 = vld [vmem:[#allocation2 + $0x48] sm:$0xf]  ;;  %v1869_v31 = vrot.slane %v1867_v9, 4  ;;  %v1870_v32 = vrot.slane %v1760_v16, 5  ;;  %vm1719_vm15 = vcmask 126016   ;;  %v1632_v43 = vpop.permute.xlu0 %1631 }
  0xa8   : > { %1685 = vrot.lane.b32.xlu1 %v1622_v7, %s5431_s29  ;;  %1168 = vst.msk [vmem:[#allocation3 + $0x30] sm:$0xf] %vm920_vm3, %v1136_v29  ;;  %v1135_v37 = vld [vmem:[#allocation2 + $0x40] sm:$0xf]  ;;  %v1763_v39 = vld [vmem:[#allocation2 + $0x2c] sm:$0x1]  ;;  %v1875_v38 = vsel %vm5912_vm14, %v5125_v35, %v1874_v22  ;;  %v1630_v36 = vpop.permute.xlu1 %1629 }
  0xa9   : > { %1721 = vst.msk [vmem:[#allocation3 + $0x4] sm:$0xf] %vm1719_vm15, %v1626_v58  ;;  %1720 = vst.msk [vmem:[#allocation3] sm:$0xf] %vm1719_vm15, %v1624_v17  ;;  %v5126_v41 = vrot.slane %v1764_v26, 9  ;;  %v1881_v33 = vrot.slane %v1765_v27, 5  ;;  %v1871_v47 = vsel %vm5912_vm14, %v1869_v31, %v1870_v32 }
  0xaa   : > { %1967 = vrot.lane.b32.xlu0 %v1861_v62, %s5432_s30  ;;  %1722 = vst.msk [vmem:[#allocation3 + $0x8] sm:$0xf] %vm1719_vm15, %v1628_v34  ;;  %v1138_v42 = vld [vmem:[#allocation2 + $0x54] sm:$0xf]  ;;  %v1767_v40 = vld [vmem:[#allocation2 + $0x3c] sm:$0xe] }
  0xab   : > { %1167 = vst.msk [vmem:[#allocation3 + $0x2c] sm:$0xf] %vm920_vm3, %v1135_v37  ;;  %v1768_v21 = vld [vmem:[#allocation2 + $0x40] sm:$0xf]  ;;  %1170 = vst.msk [vmem:[#allocation3 + $0x38] sm:$0xf] %vm920_vm3, %v1138_v42  ;;  %v1882_v53 = vsel %vm5912_vm14, %v5126_v41, %v1881_v33  ;;  %v1636_v56 = vpop.permute.xlu0 %1635 }
  0xac   : > { %1965 = vrot.lane.b32.xlu1 %v1857_v13, %s5432_s30  ;;  %v1137_v45 = vld [vmem:[#allocation2 + $0x4c] sm:$0xf]  ;;  %v1876_v48 = vrot.slane %v1874_v22, 4  ;;  %v1877_v50 = vrot.slane %v1763_v39, 5  ;;  %1724 = vst.msk [vmem:[#allocation3 + $0x10] sm:$0xf] %vm1719_vm15, %v1632_v43  ;;  %v1634_v63 = vpop.permute.xlu1 %1633 }
  0xad   : > { %1169 = vst.msk [vmem:[#allocation3 + $0x34] sm:$0xf] %vm920_vm3, %v1137_v45  ;;  %v1766_v49 = vld [vmem:[#allocation2 + $0x38] sm:$0x1]  ;;  %v1140_v51 = vld [vmem:[#allocation2 + $0x60] sm:$0xf] }
  0xae   : > { %1971 = vrot.lane.b32.xlu0 %v1868_v19, %s5432_s30  ;;  %1723 = vst.msk [vmem:[#allocation3 + $0xc] sm:$0xf] %vm1719_vm15, %v1630_v36  ;;  %v1139_v52 = vld [vmem:[#allocation2 + $0x58] sm:$0xf]  ;;  %v5127_v54 = vrot.slane %v1767_v40, 9  ;;  %v1888_v23 = vrot.slane %v1768_v21, 5  ;;  %v1878_v60 = vsel %vm5912_vm14, %v1876_v48, %v1877_v50 }
  0xaf   : > { %v1770_v24 = vld [vmem:[#allocation2 + $0x48] sm:$0xe]  ;;  %1172 = vst.msk [vmem:[#allocation3 + $0x40] sm:$0xf] %vm920_vm3, %v1140_v51  ;;  %1171 = vst.msk [vmem:[#allocation3 + $0x3c] sm:$0xf] %vm920_vm3, %v1139_v52 }
  0xb0   : > { %1969 = vrot.lane.b32.xlu1 %v1864_v30, %s5432_s30  ;;  %v1771_v46 = vld [vmem:[#allocation2 + $0x4c] sm:$0xf]  ;;  %v1141_v59 = vld [vmem:[#allocation2 + $0x64] sm:$0xf]  ;;  %v1883_v61 = vrot.slane %v1881_v33, 4  ;;  %v1884_v58 = vrot.slane %v1766_v49, 5  ;;  %v1889_v6 = vsel %vm5912_vm14, %v5127_v54, %v1888_v23 }
  0xb1   : > { %v1142_v57 = vld [vmem:[#allocation2 + $0x6c] sm:$0xf]  ;;  %1726 = vst.msk [vmem:[#allocation3 + $0x18] sm:$0xf] %vm1719_vm15, %v1636_v56  ;;  %v1144_v1 = vld [vmem:[#allocation2 + $0x78] sm:$0xf] }
  0xb2   : > { %1975 = vrot.lane.b32.xlu0 %v1875_v38, %s5432_s30  ;;  %1174 = vst.msk [vmem:[#allocation3 + $0x48] sm:$0xf] %vm920_vm3, %v1142_v57  ;;  %1173 = vst.msk [vmem:[#allocation3 + $0x44] sm:$0xf] %vm920_vm3, %v1141_v59  ;;  %v1143_v3 = vld [vmem:[#allocation2 + $0x70] sm:$0xf]  ;;  %v1885_v13 = vsel %vm5912_vm14, %v1883_v61, %v1884_v58 }
  0xb3   : > { %v1769_v4 = vld [vmem:[#allocation2 + $0x44] sm:$0x1]  ;;  %1725 = vst.msk [vmem:[#allocation3 + $0x14] sm:$0xf] %vm1719_vm15, %v1634_v63  ;;  %v5128_v7 = vrot.slane %v1770_v24, 9  ;;  %v1895_v62 = vrot.slane %v1771_v46, 5 }
  0xb4   : > { %1973 = vrot.lane.b32.xlu1 %v1871_v47, %s5432_s30  ;;  %1176 = vst.msk [vmem:[#allocation3 + $0x50] sm:$0xf] %vm920_vm3, %v1144_v1  ;;  %1175 = vst.msk [vmem:[#allocation3 + $0x4c] sm:$0xf] %vm920_vm3, %v1143_v3  ;;  %v1146_v5 = vld [vmem:[#allocation2 + $0x84] sm:$0xf]  ;;  %v1640_v27 = vpop.permute.xlu0 %1639 }
  0xb5   : > { %v1773_v8 = vld [vmem:[#allocation2 + $0x54] sm:$0xe]  ;;  %1178 = vst.msk [vmem:[#allocation3 + $0x58] sm:$0xf] %vm920_vm3, %v1146_v5  ;;  %v1145_v9 = vld [vmem:[#allocation2 + $0x7c] sm:$0xf]  ;;  %v1896_v17 = vsel %vm5912_vm14, %v5128_v7, %v1895_v62  ;;  %v1638_v32 = vpop.permute.xlu1 %1637 }
  0xb6   : > { %1979 = vrot.lane.b32.xlu0 %v1882_v53, %s5432_s30  ;;  %v1774_v10 = vld [vmem:[#allocation2 + $0x58] sm:$0xf]  ;;  %1177 = vst.msk [vmem:[#allocation3 + $0x54] sm:$0xf] %vm920_vm3, %v1145_v9  ;;  %v1148_v11 = vld [vmem:[#allocation2 + $0x90] sm:$0xf] }
  0xb7   : > { %v1147_v12 = vld [vmem:[#allocation2 + $0x88] sm:$0xf]  ;;  %v1890_v55 = vrot.slane %v1888_v23, 4  ;;  %v1891_v14 = vrot.slane %v1769_v4, 5  ;;  %1180 = vst.msk [vmem:[#allocation3 + $0x60] sm:$0xf] %vm920_vm3, %v1148_v11 }
  0xb8   : > { %1977 = vrot.lane.b32.xlu1 %v1878_v60, %s5432_s30  ;;  %1179 = vst.msk [vmem:[#allocation3 + $0x5c] sm:$0xf] %vm920_vm3, %v1147_v12  ;;  %v1772_v15 = vld [vmem:[#allocation2 + $0x50] sm:$0x1]  ;;  %v1150_v16 = vld [vmem:[#allocation2 + $0x9c] sm:$0xf] }
  0xb9   : > { %v5129_v18 = vrot.slane %v1773_v8, 9  ;;  %v1902_v19 = vrot.slane %v1774_v10, 5  ;;  %1182 = vst.msk [vmem:[#allocation3 + $0x68] sm:$0xf] %vm920_vm3, %v1150_v16  ;;  %v1149_v35 = vld [vmem:[#allocation2 + $0x94] sm:$0xf]  ;;  %v1892_v29 = vsel %vm5912_vm14, %v1890_v55, %v1891_v14 }
  0xba   : > { %1983 = vrot.lane.b32.xlu0 %v1889_v6, %s5432_s30  ;;  %v1776_v22 = vld [vmem:[#allocation2 + $0x60] sm:$0xe]  ;;  %v1777_v26 = vld [vmem:[#allocation2 + $0x64] sm:$0xf]  ;;  %1181 = vst.msk [vmem:[#allocation3 + $0x64] sm:$0xf] %vm920_vm3, %v1149_v35 }
  0xbb   : > { %v1897_v30 = vrot.slane %v1895_v62, 4  ;;  %v1898_v31 = vrot.slane %v1772_v15, 5  ;;  %1728 = vst.msk [vmem:[#allocation3 + $0x20] sm:$0xf] %vm1719_vm15, %v1640_v27  ;;  %v1152_v34 = vld [vmem:[#allocation2 + $0xa8] sm:$0xf]  ;;  %v1903_v38 = vsel %vm5912_vm14, %v5129_v18, %v1902_v19 }
  0xbc   : > { %1981 = vrot.lane.b32.xlu1 %v1885_v13, %s5432_s30  ;;  %v1775_v37 = vld [vmem:[#allocation2 + $0x5c] sm:$0x1]  ;;  %1727 = vst.msk [vmem:[#allocation3 + $0x1c] sm:$0xf] %vm1719_vm15, %v1638_v32  ;;  %v1151_v39 = vld [vmem:[#allocation2 + $0xa0] sm:$0xf] }
  0xbd   : > { %1184 = vst.msk [vmem:[#allocation3 + $0x70] sm:$0xf] %vm920_vm3, %v1152_v34  ;;  %v5130_v41 = vrot.slane %v1776_v22, 9  ;;  %v1909_v33 = vrot.slane %v1777_v26, 5  ;;  %1183 = vst.msk [vmem:[#allocation3 + $0x6c] sm:$0xf] %vm920_vm3, %v1151_v39  ;;  %v1899_v21 = vsel %vm5912_vm14, %v1897_v30, %v1898_v31 }
  0xbe   : > { %1987 = vrot.lane.b32.xlu0 %v1896_v17, %s5432_s30  ;;  %v1779_v42 = vld [vmem:[#allocation2 + $0x6c] sm:$0xe]  ;;  %v1780_v40 = vld [vmem:[#allocation2 + $0x70] sm:$0xf]  ;;  %v1904_v43 = vrot.slane %v1902_v19, 4  ;;  %v1905_v45 = vrot.slane %v1775_v37, 5 }
  0xbf   : > { %v1154_v47 = vld [vmem:[#allocation2 + $0xb4] sm:$0xf]  ;;  %v1778_v48 = vld [vmem:[#allocation2 + $0x68] sm:$0x1]  ;;  %v1153_v50 = vld [vmem:[#allocation2 + $0xac] sm:$0xf]  ;;  %v1910_v36 = vsel %vm5912_vm14, %v5130_v41, %v1909_v33 }
  0xc0   : > { %1985 = vrot.lane.b32.xlu1 %v1892_v29, %s5432_s30  ;;  %1186 = vst.msk [vmem:[#allocation3 + $0x78] sm:$0xf] %vm920_vm3, %v1154_v47  ;;  %v5131_v49 = vrot.slane %v1779_v42, 9  ;;  %v1916_v51 = vrot.slane %v1780_v40, 5  ;;  %1185 = vst.msk [vmem:[#allocation3 + $0x74] sm:$0xf] %vm920_vm3, %v1153_v50  ;;  %v1906_v23 = vsel %vm5912_vm14, %v1904_v43, %v1905_v45 }
  0xc1   : > { %v1782_v52 = vld [vmem:[#allocation2 + $0x78] sm:$0xe]  ;;  %v1783_v53 = vld [vmem:[#allocation2 + $0x7c] sm:$0xf]  ;;  %v1911_v24 = vrot.slane %v1909_v33, 4  ;;  %v1912_v46 = vrot.slane %v1778_v48, 5 }
  0xc2   : > { %1991 = vrot.lane.b32.xlu0 %v1903_v38, %s5432_s30  ;;  %v1155_v54 = vld [vmem:[#allocation2 + $0xb8] sm:$0xf]  ;;  %v1781_v56 = vld [vmem:[#allocation2 + $0x74] sm:$0x1]  ;;  %v1917_v57 = vsel %vm5912_vm14, %v5131_v49, %v1916_v51  ;;  %v5132_v59 = vrot.slane %v1782_v52, 9  ;;  %v1923_v60 = vrot.slane %v1783_v53, 5 }
  0xc3   : > { %1187 = vst.msk [vmem:[#allocation3 + $0x7c] sm:$0xf] %vm920_vm3, %v1155_v54  ;;  %v1785_v61 = vld [vmem:[#allocation2 + $0x84] sm:$0xe]  ;;  %v1786_v58 = vld [vmem:[#allocation2 + $0x88] sm:$0xf]  ;;  %v1913_v63 = vsel %vm5912_vm14, %v1911_v24, %v1912_v46 }
  0xc4   : > { %1989 = vrot.lane.b32.xlu1 %v1899_v21, %s5432_s30  ;;  %v1918_v1 = vrot.slane %v1916_v51, 4  ;;  %v1919_v3 = vrot.slane %v1781_v56, 5  ;;  %v1784_v4 = vld [vmem:[#allocation2 + $0x80] sm:$0x1]  ;;  %v1642_v5 = vpop.permute.xlu1 %1641  ;;  %v1924_v6 = vsel %vm5912_vm14, %v5132_v59, %v1923_v60  ;;  %v5133_v7 = vrot.slane %v1785_v61, 9 }
  0xc5   : > { %v1930_v62 = vrot.slane %v1786_v58, 5  ;;  %v1644_v8 = vpop.permute.xlu0 %1643  ;;  %1729 = vst.msk [vmem:[#allocation3 + $0x24] sm:$0xf] %vm1719_vm15, %v1642_v5  ;;  %v1788_v9 = vld [vmem:[#allocation2 + $0x90] sm:$0xe]  ;;  %v1925_v12 = vrot.slane %v1923_v60, 4 }
  0xc6   : > { %1995 = vrot.lane.b32.xlu0 %v1910_v36, %s5432_s30  ;;  %v1789_v10 = vld [vmem:[#allocation2 + $0x94] sm:$0xf]  ;;  %1730 = vst.msk [vmem:[#allocation3 + $0x28] sm:$0xf] %vm1719_vm15, %v1644_v8  ;;  %v1920_v11 = vsel %vm5912_vm14, %v1918_v1, %v1919_v3  ;;  %v1926_v13 = vrot.slane %v1784_v4, 5  ;;  %v5134_v16 = vrot.slane %v1788_v9, 9 }
  0xc7   : > { %v1787_v55 = vld [vmem:[#allocation2 + $0x8c] sm:$0x1]  ;;  %v1931_v15 = vsel %vm5912_vm14, %v5133_v7, %v1930_v62  ;;  %v1937_v17 = vrot.slane %v1789_v10, 5  ;;  %v1791_v19 = vld [vmem:[#allocation2 + $0x9c] sm:$0xe]  ;;  %v1932_v26 = vrot.slane %v1930_v62, 4 }
  0xc8   : > { %1993 = vrot.lane.b32.xlu1 %v1906_v23, %s5432_s30  ;;  %v1792_v35 = vld [vmem:[#allocation2 + $0xa0] sm:$0xf]  ;;  %v1927_v22 = vsel %vm5912_vm14, %v1925_v12, %v1926_v13  ;;  %v1933_v27 = vrot.slane %v1787_v55, 5  ;;  %v1790_v29 = vld [vmem:[#allocation2 + $0x98] sm:$0x1]  ;;  %v5135_v31 = vrot.slane %v1791_v19, 9 }
  0xc9   : > { %v1646_v14 = vpop.permute.xlu1 %1645  ;;  %v1938_v30 = vsel %vm5912_vm14, %v5134_v16, %v1937_v17  ;;  %v1944_v32 = vrot.slane %v1792_v35, 5  ;;  %v1794_v34 = vld [vmem:[#allocation2 + $0xa8] sm:$0xe]  ;;  %v1795_v37 = vld [vmem:[#allocation2 + $0xac] sm:$0xf]  ;;  %v1939_v38 = vrot.slane %v1937_v17, 4 }
  0xca   : > { %1999 = vrot.lane.b32.xlu0 %v1917_v57, %s5432_s30  ;;  %v1648_v18 = vpop.permute.xlu0 %1647  ;;  %1731 = vst.msk [vmem:[#allocation3 + $0x2c] sm:$0xf] %vm1719_vm15, %v1646_v14  ;;  %v1934_v39 = vsel %vm5912_vm14, %v1932_v26, %v1933_v27  ;;  %v1940_v41 = vrot.slane %v1790_v29, 5  ;;  %v1793_v40 = vld [vmem:[#allocation2 + $0xa4] sm:$0x1]  ;;  %v5136_v43 = vrot.slane %v1794_v34, 9 }
  0xcb   : > { %1732 = vst.msk [vmem:[#allocation3 + $0x30] sm:$0xf] %vm1719_vm15, %v1648_v18  ;;  %v1945_v21 = vsel %vm5912_vm14, %v5135_v31, %v1944_v32  ;;  %v1951_v45 = vrot.slane %v1795_v37, 5  ;;  %v1797_v47 = vld [vmem:[#allocation2 + $0xb4] sm:$0xe]  ;;  %v1946_v36 = vrot.slane %v1944_v32, 4 }
  0xcc   : > { %1997 = vrot.lane.b32.xlu1 %v1913_v63, %s5432_s30  ;;  %v1798_v48 = vld [vmem:[#allocation2 + $0xb8] sm:$0xf]  ;;  %v1941_v50 = vsel %vm5912_vm14, %v1939_v38, %v1940_v41  ;;  %v1947_v49 = vrot.slane %v1793_v40, 5  ;;  %v1796_v51 = vld [vmem:[#allocation2 + $0xb0] sm:$0x1]  ;;  %v5137_v54 = vrot.slane %v1797_v47, 9 }
  0xcd   : > { %v1952_v53 = vsel %vm5912_vm14, %v5136_v43, %v1951_v45  ;;  %v1958_v23 = vrot.slane %v1798_v48, 5  ;;  %v1953_v46 = vrot.slane %v1951_v45, 4  ;;  %v1954_v56 = vrot.slane %v1796_v51, 5  ;;  %v1799_v59 = vld [vmem:[#allocation2 + $0xbc] sm:$0x1] }
  0xce   : > { %2003 = vrot.lane.b32.xlu0 %v1924_v6, %s5432_s30  ;;  %v1948_v24 = vsel %vm5912_vm14, %v1946_v36, %v1947_v49  ;;  %v1961_v63 = vrot.slane %v1799_v59, 5  ;;  %v2092_v1 = vld [vmem:[#allocation2 + $0xc] sm:$0xf]  ;;  %v2094_v5 = vld [vmem:[#allocation2 + $0x18] sm:$0xf]  ;;  %vm2059_vm0 = vcmask 191616  }
  0xcf   : > { %v1959_v60 = vsel %vm5912_vm14, %v5137_v54, %v1958_v23  ;;  %v1955_v61 = vsel %vm5912_vm14, %v1953_v46, %v1954_v56  ;;  %v1960_v58 = vrot.slane %v1958_v23, 4  ;;  %v2093_v7 = vld [vmem:[#allocation2 + $0x10] sm:$0xf]  ;;  %v2096_v62 = vld [vmem:[#allocation2 + $0x24] sm:$0xf]  ;;  %vm4472_vm1 = vcmask 1043456  }
  0xd0   : > { %2001 = vrot.lane.b32.xlu1 %v1920_v11, %s5432_s30  ;;  %v1652_v33 = vpop.permute.xlu0 %1651  ;;  %v1650_v42 = vpop.permute.xlu1 %1649  ;;  %v2095_v8 = vld [vmem:[#allocation2 + $0x1c] sm:$0xf]  ;;  %v2098_v10 = vld [vmem:[#allocation2 + $0x30] sm:$0xf]  ;;  %v2097_v12 = vld [vmem:[#allocation2 + $0x28] sm:$0xf] }
  0xd1   : > { %1734 = vst.msk [vmem:[#allocation3 + $0x38] sm:$0xf] %vm1719_vm15, %v1652_v33  ;;  %1733 = vst.msk [vmem:[#allocation3 + $0x34] sm:$0xf] %vm1719_vm15, %v1650_v42  ;;  %v1962_v3 = vsel %vm5912_vm14, %v1960_v58, %v1961_v63  ;;  %v2100_v13 = vld [vmem:[#allocation2 + $0x3c] sm:$0xf] }
  0xd2   : > { %2007 = vrot.lane.b32.xlu0 %v1931_v15, %s5432_s30  ;;  %v2286_v55 = vld [vmem:[#allocation2 + $0x10] sm:$0xf]  ;;  %v2099_v14 = vld [vmem:[#allocation2 + $0x34] sm:$0xf]  ;;  %v2285_v17 = vld [vmem:[#allocation2 + $0xc] sm:$0xf] }
  0xd3   : > { %v2102_v18 = vld [vmem:[#allocation2 + $0x48] sm:$0xf]  ;;  %v2343_v19 = vshll.u32 %v2286_v55, 16  ;;  %v2347_v35 = vshrl.u32 %v2286_v55, 16  ;;  %v2101_v26 = vld [vmem:[#allocation2 + $0x40] sm:$0xf] }
  0xd4   : > { %2005 = vrot.lane.b32.xlu1 %v1927_v22, %s5432_s30  ;;  %v2289_v22 = vld [vmem:[#allocation2 + $0x1c] sm:$0xf]  ;;  %v2334_v27 = vshrl.u32 %v2285_v17, 16  ;;  %v2337_v29 = vshll.u32 %v2285_v17, 16  ;;  %v2288_v31 = vld [vmem:[#allocation2 + $0x18] sm:$0xf] }
  0xd5   : > { %v2287_v34 = vld [vmem:[#allocation2 + $0x14] sm:$0x1]  ;;  %v2345_v37 = vrot.slane %v2343_v19, 5  ;;  %v2367_v38 = vshll.u32 %v2289_v22, 16  ;;  %v2371_v41 = vshrl.u32 %v2289_v22, 16  ;;  %v2358_v43 = vshrl.u32 %v2288_v31, 16 }
  0xd6   : > { %2011 = vrot.lane.b32.xlu0 %v1938_v30, %s5432_s30  ;;  %v1654_v52 = vpop.permute.xlu1 %1653  ;;  %v2104_v30 = vld [vmem:[#allocation2 + $0x54] sm:$0xf]  ;;  %v2103_v33 = vld [vmem:[#allocation2 + $0x4c] sm:$0xf]  ;;  %v2336_v40 = vrot.slane %v2334_v27, 4  ;;  %v2361_v45 = vshll.u32 %v2288_v31, 16 }
  0xd7   : > { %1735 = vst.msk [vmem:[#allocation3 + $0x3c] sm:$0xf] %vm1719_vm15, %v1654_v52  ;;  %v2353_v47 = vshll.u32 %v2287_v34, 16  ;;  %v2106_v48 = vld [vmem:[#allocation2 + $0x60] sm:$0xf]  ;;  %v2369_v36 = vrot.slane %v2367_v38, 5 }
  0xd8   : > { %2009 = vrot.lane.b32.xlu1 %v1934_v39, %s5432_s30  ;;  %v2349_v39 = vrot.slane %v2347_v35, 4  ;;  %v2373_v49 = vrot.slane %v2371_v41, 4  ;;  %v2290_v51 = vld [vmem:[#allocation2 + $0x20] sm:$0x1]  ;;  %v2105_v52 = vld [vmem:[#allocation2 + $0x58] sm:$0xf] }
  0xd9   : > { %v1656_v57 = vpop.permute.xlu0 %1655  ;;  %v2360_v54 = vrot.slane %v2358_v43, 4  ;;  %v2363_v23 = vrot.slane %v2361_v45, 5  ;;  %v2355_v46 = vrot.slane %v2353_v47, 5  ;;  %v2377_v59 = vshll.u32 %v2290_v51, 16  ;;  %v2849_v22 = vld [vmem:[#allocation2 + $0x18] sm:$0xe] }
  0xda   : > { %2015 = vrot.lane.b32.xlu0 %v1945_v21, %s5432_s30  ;;  %1736 = vst.msk [vmem:[#allocation3 + $0x40] sm:$0xf] %vm1719_vm15, %v1656_v57  ;;  %v2339_v21 = vrot.slane %v2337_v29, 5  ;;  %v2374_v57 = vor.u32 %v2373_v49, %v2369_v36  ;;  %v3381_v34 = vld [vmem:[#allocation2 + $0x28] sm:$0xf]  ;;  %vm2252_vm2 = vcmask 257216  }
  0xdb   : > { %vm2813_vm7 = vcmask 322816   ;;  %vm3150_vm8 = vcmask 388416   ;;  %vm3344_vm9 = vcmask 454016   ;;  %vm3905_vm12 = vcmask 519616  }
  0xdc   : > { %2013 = vrot.lane.b32.xlu1 %v1941_v50, %s5432_s30  ;;  %v2350_v50 = vor.u32 %v2349_v39, %v2345_v37  ;;  %v5139_v39 = vrot.slane %v2849_v22, 9  ;;  %vm4242_vm13 = vcmask 585216  }
  0xde   : > { %2019 = vrot.lane.b32.xlu0 %v1952_v53, %s5432_s30  ;;  %v2340_v53 = vor.u32 %v2339_v21, %v2336_v40  ;;  %v2351_v56 = vrot.slane %v2350_v50, 4  ;;  %v3463_v40 = vshrl.u32 %v3381_v34, 16  ;;  %v3379_v50 = vld [vmem:[#allocation2 + $0x20] sm:$0x1] }
  0xe0   : > { %2017 = vrot.lane.b32.xlu1 %v1948_v24, %s5432_s30  ;;  %v2108_v24 = vld [vmem:[#allocation2 + $0x6c] sm:$0xf]  ;;  %v2341_v58 = vrot.slane %v2340_v53, 4 }
  0xe2   : > { %2023 = vrot.lane.b32.xlu0 %v1959_v60, %s5432_s30  ;;  %v1660_v4 = vpop.permute.xlu0 %1659  ;;  %v2847_v60 = vld [vmem:[#allocation2 + $0x10] sm:$0xf] }
  0xe3   : > { %1738 = vst.msk [vmem:[#allocation3 + $0x48] sm:$0xf] %vm1719_vm15, %v1660_v4  ;;  %v2356_v4 = vsel %vm5585_vm11, %v2351_v56, %v2355_v46  ;;  %v3185_v46 = vld [vmem:[#allocation2 + $0x1c] sm:$0xf] }
  0xe4   : > { %2021 = vrot.lane.b32.xlu1 %v1955_v61, %s5432_s30  ;;  %v1658_v6 = vpop.permute.xlu1 %1657  ;;  %v2107_v61 = vld [vmem:[#allocation2 + $0x64] sm:$0xf] }
  0xe5   : > { %1737 = vst.msk [vmem:[#allocation3 + $0x44] sm:$0xf] %vm1719_vm15, %v1658_v6  ;;  %v2375_v6 = vrot.slane %v2374_v57, 4  ;;  %v3445_v57 = vshll.u32 %v3379_v50, 16 }
  0xe6   : > { %2156 = vrot.lane.b32.xlu0 %v2092_v1, %s5433_s8  ;;  %v2364_v1 = vor.u32 %v2363_v23, %v2360_v54  ;;  %v3465_v23 = vrot.slane %v3463_v40, 4 }
  0xe8   : > { %2025 = vrot.lane.b32.xlu1 %v1962_v3, %s5432_s30  ;;  %v2944_v3 = vrot.slane %v2847_v60, 5  ;;  %s449_s30 = scalar_lea.vmem %s7044_s7, %s5121_s4 }
  0xea   : > { %2160 = vrot.lane.b32.xlu0 %v2094_v5, %s5433_s8 }
  0xec   : > { %2158 = vrot.lane.b32.xlu1 %v2093_v7, %s5433_s8  ;;  %v1664_v9 = vpop.permute.xlu0 %1663  ;;  %v2379_v7 = vrot.slane %v2377_v59, 5  ;;  %v3382_v59 = vld [vmem:[#allocation2 + $0x2c] sm:$0x1] }
  0xed   : > { %1740 = vst.msk [vmem:[#allocation3 + $0x50] sm:$0xf] %vm1719_vm15, %v1664_v9  ;;  %v1662_v11 = vpop.permute.xlu1 %1661  ;;  %v2346_v9 = vsel %vm5585_vm11, %v2341_v58, %v2345_v37 }
  0xee   : > { %2164 = vrot.lane.b32.xlu0 %v2096_v62, %s5433_s8  ;;  %1739 = vst.msk [vmem:[#allocation3 + $0x4c] sm:$0xf] %vm1719_vm15, %v1662_v11  ;;  %v2848_v62 = vld [vmem:[#allocation2 + $0x14] sm:$0x1]  ;;  %v2946_v11 = vrot.slane %v2944_v3, 4  ;;  %v2380_v55 = vsel %vm5585_vm11, %v2375_v6, %v2379_v7  ;;  %v3469_v6 = vshll.u32 %v3382_v59, 16 }
  0xef   : > { %v5386_v7 = vld [vmem:[%s7042_s5 + $0x18] sm:$0xff]  }
  0xf0   : > { %2162 = vrot.lane.b32.xlu1 %v2095_v8, %s5433_s8  ;;  %v2850_v8 = vld [vmem:[#allocation2 + $0x1c] sm:$0xf] }
  0xf2   : > { %2168 = vrot.lane.b32.xlu0 %v2098_v10, %s5433_s8  ;;  %v2365_v10 = vrot.slane %v2364_v1, 4  ;;  %v3184_v1 = vld [vmem:[#allocation2 + $0x18] sm:$0xf] }
  0xf3   : > { %v1668_v15 = vpop.permute.xlu0 %1667 }
  0xf4   : > { %2166 = vrot.lane.b32.xlu1 %v2097_v12, %s5433_s8  ;;  %1742 = vst.msk [vmem:[#allocation3 + $0x58] sm:$0xf] %vm1719_vm15, %v1668_v15  ;;  %v1666_v16 = vpop.permute.xlu1 %1665  ;;  %v2947_v12 = vrot.slane %v2848_v62, 5  ;;  %v2851_v15 = vld [vmem:[#allocation2 + $0x20] sm:$0x1]  ;;  %v2370_v17 = vsel %vm5585_vm11, %v2365_v10, %v2369_v36 }
  0xf5   : > { %1741 = vst.msk [vmem:[#allocation3 + $0x54] sm:$0xf] %vm1719_vm15, %v1666_v16  ;;  %v3378_v16 = vld [vmem:[#allocation2 + $0x1c] sm:$0xf]  ;;  %v3187_v62 = vld [vmem:[#allocation2 + $0x28] sm:$0xf] }
  0xf6   : > { %2172 = vrot.lane.b32.xlu0 %v2100_v13, %s5433_s8  ;;  %v2846_v13 = vld [vmem:[#allocation2 + $0xc] sm:$0xe]  ;;  %v2948_v35 = vsel %vm5912_vm14, %v2946_v11, %v2947_v12  ;;  %v3435_v31 = vshll.u32 %v3378_v16, 16  ;;  %v6137_v10 = vld [vmem:[#allocation2 + $0x1c] sm:$0xf] }
  0xf7   : > { %v5138_v19 = vrot.slane %v2846_v13, 9  ;;  %v2292_v13 = vld [vmem:[#allocation2 + $0x28] sm:$0xf] }
  0xf8   : > { %2170 = vrot.lane.b32.xlu1 %v2099_v14, %s5433_s8  ;;  %v2951_v14 = vrot.slane %v2850_v8, 5  ;;  %v6115_v43 = vrot.slane %v3435_v31, 5 }
  0xf9   : > { %v2945_v37 = vsel %vm5912_vm14, %v5138_v19, %v2944_v3  ;;  %v2291_v19 = vld [vmem:[#allocation2 + $0x24] sm:$0xf] }
  0xfa   : > { %2176 = vrot.lane.b32.xlu0 %v2102_v18, %s5433_s8  ;;  %v1670_v32 = vpop.permute.xlu1 %1669  ;;  %v2953_v29 = vrot.slane %v2951_v14, 4  ;;  %v2952_v51 = vsel %vm5912_vm14, %v5139_v39, %v2951_v14  ;;  %v3938_v39 = vld [vmem:[#allocation2 + $0x18] sm:$0xe] }
  0xfb   : > { %1743 = vst.msk [vmem:[#allocation3 + $0x5c] sm:$0xf] %vm1719_vm15, %v1670_v32  ;;  %v3439_v32 = vshrl.u32 %v3378_v16, 16 }
  0xfc   : > { %2174 = vrot.lane.b32.xlu1 %v2101_v26, %s5433_s8  ;;  %v3377_v26 = vld [vmem:[#allocation2 + $0x18] sm:$0xf] }
  0xfd   : > { %v1672_v42 = vpop.permute.xlu0 %1671  ;;  %v3426_v38 = vshrl.u32 %v3377_v26, 16  ;;  %v3429_v41 = vshll.u32 %v3377_v26, 16  ;;  %v3441_v45 = vrot.slane %v3439_v32, 4  ;;  %v3940_v26 = vld [vmem:[#allocation2 + $0x20] sm:$0x1] }
  0xfe   : > { %2180 = vrot.lane.b32.xlu0 %v2104_v30, %s5433_s8  ;;  %1744 = vst.msk [vmem:[#allocation3 + $0x60] sm:$0xf] %vm1719_vm15, %v1672_v42  ;;  %v2954_v30 = vrot.slane %v2851_v15, 5  ;;  %v3459_v42 = vshll.u32 %v3381_v34, 16  ;;  %v2295_v34 = vld [vmem:[#allocation2 + $0x34] sm:$0xf] }
  0xff   : > { %v3431_v53 = vrot.slane %v3429_v41, 5  ;;  %v3442_v56 = vor.u32 %v3441_v45, %v6115_v43  ;;  %v2385_v41 = vshll.u32 %v2291_v19, 16 }
 0x100   : > { %2178 = vrot.lane.b32.xlu1 %v2103_v33, %s5433_s8  ;;  %v3380_v33 = vld [vmem:[#allocation2 + $0x24] sm:$0xf]  ;;  %v2955_v21 = vsel %vm5912_vm14, %v2953_v29, %v2954_v30  ;;  %v6123_v54 = vrot.slane %v3459_v42, 5  ;;  %v2391_v29 = vshll.u32 %v2292_v13, 16  ;;  %v2395_v30 = vshrl.u32 %v2292_v13, 16 }
 0x101   : > { %v3450_v36 = vshrl.u32 %v3380_v33, 16  ;;  %v3453_v49 = vshll.u32 %v3380_v33, 16  ;;  %v3443_v8 = vrot.slane %v3442_v56, 4  ;;  %v2387_v56 = vrot.slane %v2385_v41, 5 }
 0x102   : > { %2184 = vrot.lane.b32.xlu0 %v2106_v48, %s5433_s8  ;;  %v6166_v50 = vrot.slane %v2391_v29, 5 }
 0x103   : > { %v3455_v58 = vrot.slane %v3453_v49, 5  ;;  %v2415_v49 = vshll.u32 %v2295_v34, 16 }
 0x104   : > { %2182 = vrot.lane.b32.xlu1 %v2105_v52, %s5433_s8  ;;  %v3428_v52 = vrot.slane %v3426_v38, 4  ;;  %v2382_v38 = vshrl.u32 %v2291_v19, 16 }
 0x105   : > { %v1676_v63 = vpop.permute.xlu0 %1675 }
 0x106   : > { %2188 = vrot.lane.b32.xlu0 %v2108_v24, %s5433_s8  ;;  %1746 = vst.msk [vmem:[#allocation3 + $0x68] sm:$0xf] %vm1719_vm15, %v1676_v63  ;;  %v1674_v5 = vpop.permute.xlu1 %1673  ;;  %v5385_v24 = vld [vmem:[%s7042_s5 + $0x20] ss:$0 sps:$4 sm:$0xff]   ;;  %v3432_v3 = vor.u32 %v3431_v53, %v3428_v52 }
 0x107   : > { %1745 = vst.msk [vmem:[#allocation3 + $0x64] sm:$0xf] %vm1719_vm15, %v1674_v5  ;;  %5350 = vmatprep.subr.msk.bf16.mxu0 %vm4472_vm1, %v5385_v24  ;;  %v4474_v63 = vsel %vm4472_vm1, %v5385_v24, 0  ;;  %5351 = vmatprep.subr.msk.bf16.mxu1 %vm4472_vm1, %v5385_v24  ;;  %v3466_v5 = vor.u32 %v3465_v23, %v6123_v54  ;;  %v5154_v23 = vrot.slane %v3938_v39, 9  ;;  %v2293_v24 = vld [vmem:[#allocation2 + $0x2c] sm:$0x1] }
 0x108   : > { %2186 = vrot.lane.b32.xlu1 %v2107_v61, %s5433_s8  ;;  %v3452_v61 = vrot.slane %v3450_v36, 4  ;;  %5299 = vmatpush3.bf16.msra.mxu0 %v4474_v63  ;;  %v3433_v14 = vrot.slane %v3432_v3, 4  ;;  %v2397_v36 = vrot.slane %v2395_v30, 4  ;;  %v2856_v39 = vld [vmem:[#allocation2 + $0x34] sm:$0xf] }
 0x109   : > { %5345 = vmatpush3.bf16.msra.mxu1 %v4474_v63  ;;  %5300 = vmatprep.subr.bf16.mxu0 %v5386_v7  ;;  %v3467_v16 = vrot.slane %v3466_v5, 4  ;;  %v3941_v63 = vld [vmem:[#allocation2 + $0x24] sm:$0xe]  ;;  %v6183_v5 = vrot.slane %v2415_v49, 5 }
 0x10a   : > { %2719 = vrot.lane.b32.xlu0 %v2356_v4, %s5434_s9  ;;  %v3456_v12 = vor.u32 %v3455_v58, %v3452_v61  ;;  %5341 = vmatprep.subr.bf16.mxu1 %v5386_v7  ;;  %v2398_v3 = vor.u32 %v2397_v36, %v6166_v50  ;;  %v3384_v36 = vld [vmem:[#allocation2 + $0x34] sm:$0xf] }
 0x10c   : > { %2717 = vrot.lane.b32.xlu1 %v2346_v9, %s5434_s9  ;;  %v3447_v9 = vrot.slane %v3445_v57, 5  ;;  %5301 = vmatpush3.bf16.msra.mxu0 %v5386_v7  ;;  %v3457_v32 = vrot.slane %v3456_v12, 4 }
 0x10d   : > { %v1680_v18 = vpop.permute.xlu0 %1679  ;;  %5346 = vmatpush3.bf16.msra.mxu1 %v5386_v7 }
 0x10e   : > { %2723 = vrot.lane.b32.xlu0 %v2380_v55, %s5434_s9  ;;  %1748 = vst.msk [vmem:[#allocation3 + $0x70] sm:$0xf] %vm1719_vm15, %v1680_v18  ;;  %v3186_v55 = vld [vmem:[#allocation2 + $0x24] sm:$0xf]  ;;  %v4036_v18 = vrot.slane %v6137_v10, 5  ;;  %v3448_v22 = vsel %vm5585_vm11, %v3443_v8, %v3447_v9  ;;  %v3462_v53 = vsel %vm5585_vm11, %v3457_v32, %v6123_v54  ;;  %v5155_v9 = vrot.slane %v3941_v63, 9 }
 0x10f   : > { %v1678_v27 = vpop.permute.xlu1 %1677  ;;  %v2296_v8 = vld [vmem:[#allocation2 + $0x38] sm:$0x1] }
 0x110   : > { %2721 = vrot.lane.b32.xlu1 %v2370_v17, %s5434_s9  ;;  %1747 = vst.msk [vmem:[#allocation3 + $0x6c] sm:$0xf] %vm1719_vm15, %v1678_v27  ;;  %v3471_v17 = vrot.slane %v3469_v6, 5  ;;  %v6149_v27 = vld [vmem:[#allocation2 + $0x28] sm:$0xf]  ;;  %v4038_v40 = vrot.slane %v4036_v18, 4 }
 0x111   : > { %v4043_v45 = vrot.slane %v6149_v27, 5 }
 0x112   : > { %3056 = vrot.lane.b32.xlu0 %v2948_v35, %s5435_s10  ;;  %v5387_v35 = vld [vmem:[%s7042_s5 + $0x10] sm:$0xff]   ;;  %v3472_v42 = vsel %vm5585_vm11, %v3467_v16, %v3471_v17  ;;  %v2425_v17 = vshll.u32 %v2296_v8, 16 }
 0x113   : > { %5302 = vmatprep.subr.bf16.mxu0 %v5387_v35  ;;  %5342 = vmatprep.subr.bf16.mxu1 %v5387_v35  ;;  %v4045_v54 = vrot.slane %v4043_v45, 4 }
 0x114   : > { %3054 = vrot.lane.b32.xlu1 %v2945_v37, %s5435_s10  ;;  %v1684_v47 = vpop.permute.xlu0 %1683  ;;  %v1682_v48 = vpop.permute.xlu1 %1681  ;;  %v3438_v37 = vsel %vm5585_vm11, %v3433_v14, %v6115_v43  ;;  %5303 = vmatpush3.bf16.msra.mxu0 %v5387_v35  ;;  %v5388_v43 = vld [vmem:[%s7042_s5 + $0x8] sm:$0xff]   ;;  %v2399_v14 = vrot.slane %v2398_v3, 4 }
 0x115   : > { %1750 = vst.msk [vmem:[#allocation3 + $0x78] sm:$0xf] %vm1719_vm15, %v1684_v47  ;;  %1749 = vst.msk [vmem:[#allocation3 + $0x74] sm:$0xf] %vm1719_vm15, %v1682_v48  ;;  %v2294_v47 = vld [vmem:[#allocation2 + $0x30] sm:$0xf]  ;;  %5347 = vmatpush3.bf16.msra.mxu1 %v5387_v35  ;;  %5304 = vmatprep.subr.bf16.mxu0 %v5388_v43  ;;  %v4044_v35 = vsel %vm5912_vm14, %v5155_v9, %v4043_v45 }
 0x116   : > { %3060 = vrot.lane.b32.xlu0 %v2955_v21, %s5435_s10  ;;  %v4039_v21 = vrot.slane %v3940_v26, 5  ;;  %v3943_v48 = vld [vmem:[#allocation2 + $0x2c] sm:$0x1]  ;;  %v2406_v57 = vshrl.u32 %v2294_v47, 16  ;;  %v2409_v59 = vshll.u32 %v2294_v47, 16  ;;  %5343 = vmatprep.subr.bf16.mxu1 %v5388_v43  ;;  %v2965_v47 = vrot.slane %v2856_v39, 5 }
 0x117   : > { %v4046_v58 = vrot.slane %v3943_v48, 5  ;;  %v2857_v48 = vld [vmem:[#allocation2 + $0x38] sm:$0x1] }
 0x118   : > { %3058 = vrot.lane.b32.xlu1 %v2952_v51, %s5435_s10  ;;  %v1964_v60 = vpop.permute.xlu0 %1963  ;;  %v2419_v51 = vshrl.u32 %v2295_v34, 16  ;;  %5305 = vmatpush3.bf16.msra.mxu0 %v5388_v43  ;;  %v4040_v61 = vsel %vm5912_vm14, %v4038_v40, %v4039_v21  ;;  %v2408_v12 = vrot.slane %v2406_v57, 4  ;;  %v2411_v13 = vrot.slane %v2409_v59, 5  ;;  %v2852_v21 = vld [vmem:[#allocation2 + $0x24] sm:$0xe] }
 0x119   : > { %2060 = vst.msk [vmem:[#allocation3] sm:$0xf] %vm2059_vm0, %v1964_v60  ;;  %5348 = vmatpush3.bf16.msra.mxu1 %v5388_v43  ;;  %v4047_v10 = vsel %vm5912_vm14, %v4045_v54, %v4046_v58  ;;  %v2427_v34 = vrot.slane %v2425_v17, 5  ;;  %v5140_v49 = vrot.slane %v2852_v21, 9  ;;  %v3487_v57 = vshrl.u32 %v3384_v36, 16 }
 0x11a   : > { %v1686_v4 = vpop.permute.xlu1 %1685  ;;  %3250 = vrot.lane.b32.xlu0 %v3185_v46, %s5436_s13  ;;  %v2384_v46 = vrot.slane %v2382_v38, 4  ;;  %v2421_v6 = vrot.slane %v2419_v51, 4  ;;  %v2412_v26 = vor.u32 %v2411_v13, %v2408_v12  ;;  %v3387_v59 = vld [vmem:[#allocation2 + $0x40] sm:$0xf]  ;;  %v3385_v9 = vld [vmem:[#allocation2 + $0x38] sm:$0x1] }
 0x11b   : > { %1751 = vst.msk [vmem:[#allocation3 + $0x7c] sm:$0xf] %vm1719_vm15, %v1686_v4  ;;  %v2401_v4 = vshll.u32 %v2293_v24, 16  ;;  %v2967_v24 = vrot.slane %v2965_v47, 4  ;;  %v3189_v17 = vld [vmem:[#allocation2 + $0x34] sm:$0xf] }
 0x11c   : > { %3248 = vrot.lane.b32.xlu1 %v3184_v1, %s5436_s13  ;;  %v1968_v11 = vpop.permute.xlu0 %1967  ;;  %v5389_v1 = vld [vmem:[%s7042_s5] sm:$0xff]   ;;  %v2422_v16 = vor.u32 %v2421_v6, %v6183_v5  ;;  %v2413_v41 = vrot.slane %v2412_v26, 4  ;;  %v3190_v21 = vld [vmem:[#allocation2 + $0x3c] sm:$0xf]  ;;  %vm4423_vm15 = vcmask 588800  }
 0x11d   : > { %2062 = vst.msk [vmem:[#allocation3 + $0x8] sm:$0xf] %vm2059_vm0, %v1968_v11  ;;  %5306 = vmatprep.subr.bf16.mxu0 %v5389_v1  ;;  %v2388_v11 = vor.u32 %v2387_v56, %v2384_v46  ;;  %5344 = vmatprep.subr.bf16.mxu1 %v5389_v1  ;;  %v2968_v46 = vrot.slane %v2857_v48, 5  ;;  %v3483_v56 = vshll.u32 %v3384_v36, 16 }
 0x11e   : > { %v1966_v15 = vpop.permute.xlu1 %1965  ;;  %3254 = vrot.lane.b32.xlu0 %v3187_v62, %s5436_s13  ;;  %v4037_v62 = vsel %vm5912_vm14, %v5154_v23, %v4036_v18  ;;  %5307 = vmatpush3.bf16.msra.mxu0 %v5389_v1  ;;  %v2853_v18 = vld [vmem:[#allocation2 + $0x28] sm:$0xf]  ;;  %v2423_v32 = vrot.slane %v2422_v16, 4  ;;  %v3383_v23 = vld [vmem:[#allocation2 + $0x30] sm:$0xf] }
 0x11f   : > { %2061 = vst.msk [vmem:[#allocation3 + $0x4] sm:$0xf] %vm2059_vm0, %v1966_v15  ;;  %5349 = vmatpush3.bf16.msra.mxu1 %v5389_v1  ;;  %v2403_v15 = vrot.slane %v2401_v4, 5  ;;  %v2958_v30 = vrot.slane %v2853_v18, 5  ;;  %v3474_v58 = vshrl.u32 %v3383_v23, 16  ;;  %v3477_v63 = vshll.u32 %v3383_v23, 16 }
 0x120   : > { %3252 = vrot.lane.b32.xlu1 %v3186_v55, %s5436_s13  ;;  %v1972_v31 = vpop.permute.xlu0 %1971  ;;  %v2428_v45 = vsel %vm5585_vm11, %v2423_v32, %v2427_v34  ;;  %v3386_v1 = vld [vmem:[#allocation2 + $0x3c] sm:$0xf]  ;;  %v3507_v4 = vshll.u32 %v3387_v59, 16  ;;  %v2969_v6 = vsel %vm5912_vm14, %v2967_v24, %v2968_v46 }
 0x121   : > { %2064 = vst.msk [vmem:[#allocation3 + $0x10] sm:$0xf] %vm2059_vm0, %v1972_v31  ;;  %v2404_v31 = vsel %vm5585_vm11, %v2399_v14, %v2403_v15  ;;  %v3501_v12 = vshll.u32 %v3386_v1, 16 }
 0x122   : > { %v1970_v33 = vpop.permute.xlu1 %1969  ;;  %3811 = vrot.lane.b32.xlu0 %v3448_v22, %s5437_s18  ;;  %v2389_v22 = vrot.slane %v2388_v11, 4  ;;  %v3498_v11 = vshrl.u32 %v3386_v1, 16  ;;  %v6239_v15 = vrot.slane %v3507_v4, 5  ;;  %v2300_v4 = vld [vmem:[#allocation2 + $0x48] sm:$0xf] }
 0x123   : > { %2063 = vst.msk [vmem:[#allocation3 + $0xc] sm:$0xf] %vm2059_vm0, %v1970_v33 }
 0x124   : > { %3809 = vrot.lane.b32.xlu1 %v3438_v37, %s5437_s18  ;;  %v1976_v52 = vpop.permute.xlu0 %1975  ;;  %v2854_v37 = vld [vmem:[#allocation2 + $0x2c] sm:$0x1]  ;;  %v2394_v38 = vsel %vm5585_vm11, %v2389_v22, %v6166_v50  ;;  %v2418_v50 = vsel %vm5585_vm11, %v2413_v41, %v6183_v5  ;;  %v3511_v5 = vshrl.u32 %v3387_v59, 16  ;;  %v3500_v26 = vrot.slane %v3498_v11, 4  ;;  %v6248_v41 = vld [vmem:[#allocation2 + $0x34] sm:$0xf] }
 0x125   : > { %2066 = vst.msk [vmem:[#allocation3 + $0x18] sm:$0xf] %vm2059_vm0, %v1976_v52  ;;  %v2961_v40 = vrot.slane %v2854_v37, 5  ;;  %v4050_v36 = vrot.slane %v6248_v41, 5  ;;  %v3944_v59 = vld [vmem:[#allocation2 + $0x30] sm:$0xe] }
 0x126   : > { %v1974_v60 = vpop.permute.xlu1 %1973  ;;  %3815 = vrot.lane.b32.xlu0 %v3472_v42, %s5437_s18  ;;  %v2960_v42 = vrot.slane %v2958_v30, 4  ;;  %v3513_v16 = vrot.slane %v3511_v5, 4  ;;  %v3949_v5 = vld [vmem:[#allocation2 + $0x44] sm:$0x1] }
 0x127   : > { %2065 = vst.msk [vmem:[#allocation3 + $0x14] sm:$0xf] %vm2059_vm0, %v1974_v60 }
 0x128   : > { %3813 = vrot.lane.b32.xlu1 %v3462_v53, %s5437_s18  ;;  %v1980_v7 = vpop.permute.xlu0 %1979  ;;  %v2962_v52 = vsel %vm5912_vm14, %v2960_v42, %v2961_v40  ;;  %v2855_v53 = vld [vmem:[#allocation2 + $0x30] sm:$0xe]  ;;  %v3514_v34 = vor.u32 %v3513_v16, %v6239_v15  ;;  %v2298_v40 = vld [vmem:[#allocation2 + $0x40] sm:$0xf]  ;;  %v2457_v16 = vshll.u32 %v2300_v4, 16 }
 0x129   : > { %2068 = vst.msk [vmem:[#allocation3 + $0x20] sm:$0xf] %vm2059_vm0, %v1980_v7  ;;  %v5141_v54 = vrot.slane %v2855_v53, 9  ;;  %v6232_v7 = vrot.slane %v3483_v56, 5  ;;  %v2439_v53 = vshll.u32 %v2298_v40, 16  ;;  %v2443_v23 = vshrl.u32 %v2298_v40, 16 }
 0x12a   : > { %v1978_v55 = vpop.permute.xlu1 %1977  ;;  %4148 = vrot.lane.b32.xlu0 %v4040_v61, %s5438_s0  ;;  %v2959_v61 = vsel %vm5912_vm14, %v5140_v49, %v2958_v30  ;;  %v3188_v30 = vld [vmem:[#allocation2 + $0x30] sm:$0xf]  ;;  %v2301_v56 = vld [vmem:[#allocation2 + $0x4c] sm:$0xf] }
 0x12b   : > { %2067 = vst.msk [vmem:[#allocation3 + $0x1c] sm:$0xf] %vm2059_vm0, %v1978_v55  ;;  %v2966_v13 = vsel %vm5912_vm14, %v5141_v54, %v2965_v47  ;;  %v3476_v55 = vrot.slane %v3474_v58, 4 }
 0x12c   : > { %4146 = vrot.lane.b32.xlu1 %v4037_v62, %s5438_s0  ;;  %v1984_v19 = vpop.permute.xlu0 %1983  ;;  %v3489_v62 = vrot.slane %v3487_v57, 4 }
 0x12d   : > { %2070 = vst.msk [vmem:[#allocation3 + $0x28] sm:$0xf] %vm2059_vm0, %v1984_v19  ;;  %v3493_v19 = vshll.u32 %v3385_v9, 16 }
 0x12e   : > { %v1982_v29 = vpop.permute.xlu1 %1981  ;;  %4152 = vrot.lane.b32.xlu0 %v4047_v10, %s5438_s0  ;;  %v3479_v10 = vrot.slane %v3477_v63, 5  ;;  %v3490_v18 = vor.u32 %v3489_v62, %v6232_v7  ;;  %v4052_v63 = vrot.slane %v4050_v36, 4  ;;  %v2463_v62 = vshll.u32 %v2301_v56, 16 }
 0x12f   : > { %2069 = vst.msk [vmem:[#allocation3 + $0x24] sm:$0xf] %vm2059_vm0, %v1982_v29  ;;  %v3503_v29 = vrot.slane %v3501_v12, 5  ;;  %v5156_v12 = vrot.slane %v3944_v59, 9 }
 0x130   : > { %4150 = vrot.lane.b32.xlu1 %v4044_v35, %s5438_s0  ;;  %v1988_v27 = vpop.permute.xlu0 %1987  ;;  %v3388_v35 = vld [vmem:[#allocation2 + $0x44] sm:$0x1]  ;;  %v3491_v39 = vrot.slane %v3490_v18, 4 }
 0x131   : > { %2072 = vst.msk [vmem:[#allocation3 + $0x30] sm:$0xf] %vm2059_vm0, %v1988_v27  ;;  %v3517_v37 = vshll.u32 %v3388_v35, 16  ;;  %v3191_v27 = vld [vmem:[#allocation2 + $0x40] sm:$0xf]  ;;  %v3504_v42 = vor.u32 %v3503_v29, %v3500_v26  ;;  %v4060_v35 = vrot.slane %v3949_v5, 5 }
 0x132   : > { %v1986_v33 = vpop.permute.xlu1 %1985  ;;  %2727 = vrot.lane.b32.xlu0 %v2404_v31, %s5434_s9  ;;  %v3480_v31 = vor.u32 %v3479_v10, %v3476_v55  ;;  %v6281_v29 = vrot.slane %v2463_v62, 5  ;;  %v3390_v5 = vld [vmem:[#allocation2 + $0x4c] sm:$0xf] }
 0x133   : > { %2071 = vst.msk [vmem:[#allocation3 + $0x2c] sm:$0xf] %vm2059_vm0, %v1986_v33  ;;  %v3519_v48 = vrot.slane %v3517_v37, 5  ;;  %v3505_v46 = vrot.slane %v3504_v42, 4 }
 0x134   : > { %2725 = vrot.lane.b32.xlu1 %v2394_v38, %s5434_s9  ;;  %v1992_v43 = vpop.permute.xlu0 %1991  ;;  %v3495_v38 = vrot.slane %v3493_v19, 5 }
 0x135   : > { %2074 = vst.msk [vmem:[#allocation3 + $0x38] sm:$0xf] %vm2059_vm0, %v1992_v43  ;;  %v3515_v43 = vrot.slane %v3514_v34, 4  ;;  %v3510_v11 = vsel %vm5585_vm11, %v3505_v46, %v6239_v15  ;;  %v2302_v34 = vld [vmem:[#allocation2 + $0x50] sm:$0x1] }
 0x136   : > { %v1990_v51 = vpop.permute.xlu1 %1989  ;;  %2731 = vrot.lane.b32.xlu0 %v2428_v45, %s5434_s9  ;;  %v3481_v45 = vrot.slane %v3480_v31, 4  ;;  %v3496_v49 = vsel %vm5585_vm11, %v3491_v39, %v3495_v38  ;;  %v2459_v38 = vrot.slane %v2457_v16, 5  ;;  %v2860_v46 = vld [vmem:[#allocation2 + $0x44] sm:$0x1] }
 0x137   : > { %2073 = vst.msk [vmem:[#allocation3 + $0x34] sm:$0xf] %vm2059_vm0, %v1990_v51  ;;  %v3946_v51 = vld [vmem:[#allocation2 + $0x38] sm:$0x1]  ;;  %v3520_v58 = vsel %vm5585_vm11, %v3515_v43, %v3519_v48  ;;  %v2859_v43 = vld [vmem:[#allocation2 + $0x40] sm:$0xf] }
 0x138   : > { %2729 = vrot.lane.b32.xlu1 %v2418_v50, %s5434_s9  ;;  %v1996_v60 = vpop.permute.xlu0 %1995  ;;  %v2297_v50 = vld [vmem:[#allocation2 + $0x3c] sm:$0xf]  ;;  %v3486_v57 = vsel %vm5585_vm11, %v3481_v45, %v6232_v7  ;;  %v4053_v1 = vrot.slane %v3946_v51, 5  ;;  %v2445_v7 = vrot.slane %v2443_v23, 4  ;;  %v2473_v45 = vshll.u32 %v2302_v34, 16 }
 0x139   : > { %2076 = vst.msk [vmem:[#allocation3 + $0x40] sm:$0xf] %vm2059_vm0, %v1996_v60  ;;  %v2430_v60 = vshrl.u32 %v2297_v50, 16  ;;  %v2972_v23 = vrot.slane %v2859_v43, 5 }
 0x13a   : > { %v1994_v3 = vpop.permute.xlu1 %1993  ;;  %3064 = vrot.lane.b32.xlu0 %v2962_v52, %s5435_s10  ;;  %v6257_v52 = vld [vmem:[#allocation2 + $0x40] sm:$0xf]  ;;  %v4054_v18 = vsel %vm5912_vm14, %v4052_v63, %v4053_v1  ;;  %v2975_v63 = vrot.slane %v2860_v46, 5  ;;  %v2863_v1 = vld [vmem:[#allocation2 + $0x50] sm:$0x1] }
 0x13b   : > { %2075 = vst.msk [vmem:[#allocation3 + $0x3c] sm:$0xf] %vm2059_vm0, %v1994_v3  ;;  %v4057_v3 = vrot.slane %v6257_v52, 5  ;;  %v2432_v55 = vrot.slane %v2430_v60, 4  ;;  %v3195_v46 = vld [vmem:[#allocation2 + $0x58] sm:$0xf] }
 0x13c   : > { %3062 = vrot.lane.b32.xlu1 %v2959_v61, %s5435_s10  ;;  %v2000_v8 = vpop.permute.xlu0 %1999  ;;  %v2433_v61 = vshll.u32 %v2297_v50, 16 }
 0x13d   : > { %2078 = vst.msk [vmem:[#allocation3 + $0x48] sm:$0xf] %vm2059_vm0, %v2000_v8  ;;  %v2467_v8 = vshrl.u32 %v2301_v56, 16  ;;  %v4059_v19 = vrot.slane %v4057_v3, 4  ;;  %v2862_v56 = vld [vmem:[#allocation2 + $0x4c] sm:$0xf] }
 0x13e   : > { %v1998_v14 = vpop.permute.xlu1 %1997  ;;  %3068 = vrot.lane.b32.xlu0 %v2969_v6, %s5435_s10  ;;  %v6269_v6 = vrot.slane %v2439_v53, 5  ;;  %v2435_v10 = vrot.slane %v2433_v61, 5  ;;  %v2475_v53 = vrot.slane %v2473_v45, 5  ;;  %v2858_v61 = vld [vmem:[#allocation2 + $0x3c] sm:$0xe] }
 0x13f   : > { %2077 = vst.msk [vmem:[#allocation3 + $0x44] sm:$0xf] %vm2059_vm0, %v1998_v14  ;;  %v2454_v14 = vshrl.u32 %v2300_v4, 16  ;;  %v3193_v45 = vld [vmem:[#allocation2 + $0x4c] sm:$0xf] }
 0x140   : > { %3066 = vrot.lane.b32.xlu1 %v2966_v13, %s5435_s10  ;;  %v2004_v22 = vpop.permute.xlu0 %2003  ;;  %v2299_v13 = vld [vmem:[#allocation2 + $0x44] sm:$0x1]  ;;  %v2446_v15 = vor.u32 %v2445_v7, %v6269_v6  ;;  %v5142_v7 = vrot.slane %v2858_v61, 9 }
 0x141   : > { %2080 = vst.msk [vmem:[#allocation3 + $0x50] sm:$0xf] %vm2059_vm0, %v2004_v22  ;;  %v3947_v22 = vld [vmem:[#allocation2 + $0x3c] sm:$0xe]  ;;  %v2449_v26 = vshll.u32 %v2299_v13, 16  ;;  %v2456_v39 = vrot.slane %v2454_v14, 4 }
 0x142   : > { %v2002_v32 = vpop.permute.xlu1 %2001  ;;  %3258 = vrot.lane.b32.xlu0 %v3189_v17, %s5436_s13  ;;  %v5157_v37 = vrot.slane %v3947_v22, 9  ;;  %v2447_v42 = vrot.slane %v2446_v15, 4  ;;  %v3393_v14 = vld [vmem:[#allocation2 + $0x58] sm:$0xf]  ;;  %v3392_v22 = vld [vmem:[#allocation2 + $0x54] sm:$0xf] }
 0x143   : > { %2079 = vst.msk [vmem:[#allocation3 + $0x4c] sm:$0xf] %vm2059_vm0, %v2002_v32  ;;  %v4051_v32 = vsel %vm5912_vm14, %v5156_v12, %v4050_v36  ;;  %v2451_v40 = vrot.slane %v2449_v26, 5  ;;  %v2460_v50 = vor.u32 %v2459_v38, %v2456_v39  ;;  %v3555_v26 = vshll.u32 %v3393_v14, 16 }
 0x144   : > { %3256 = vrot.lane.b32.xlu1 %v3188_v30, %s5436_s13  ;;  %v2008_v33 = vpop.permute.xlu0 %2007  ;;  %v2469_v30 = vrot.slane %v2467_v8, 4  ;;  %v4058_v48 = vsel %vm5912_vm14, %v5157_v37, %v4057_v3  ;;  %v2979_v3 = vrot.slane %v2862_v56, 5  ;;  %v2982_v8 = vrot.slane %v2863_v1, 5  ;;  %v3391_v37 = vld [vmem:[#allocation2 + $0x50] sm:$0x1] }
 0x145   : > { %2082 = vst.msk [vmem:[#allocation3 + $0x58] sm:$0xf] %vm2059_vm0, %v2008_v33  ;;  %v4061_v33 = vsel %vm5912_vm14, %v4059_v19, %v4060_v35  ;;  %v2452_v51 = vsel %vm5585_vm11, %v2447_v42, %v2451_v40  ;;  %v2461_v59 = vrot.slane %v2460_v50, 4  ;;  %v3549_v39 = vshll.u32 %v3392_v22, 16 }
 0x146   : > { %v2006_v47 = vpop.permute.xlu1 %2005  ;;  %3262 = vrot.lane.b32.xlu0 %v3191_v27, %s5436_s13  ;;  %v2436_v27 = vor.u32 %v2435_v10, %v2432_v55  ;;  %v2981_v13 = vrot.slane %v2979_v3, 4  ;;  %v3531_v55 = vshll.u32 %v3390_v5, 16  ;;  %v3535_v10 = vshrl.u32 %v3390_v5, 16 }
 0x147   : > { %2081 = vst.msk [vmem:[#allocation3 + $0x54] sm:$0xf] %vm2059_vm0, %v2006_v47  ;;  %v6333_v40 = vrot.slane %v3555_v26, 5  ;;  %v3541_v43 = vshll.u32 %v3391_v37, 16  ;;  %v2306_v26 = vld [vmem:[#allocation2 + $0x60] sm:$0xf] }
 0x148   : > { %3260 = vrot.lane.b32.xlu1 %v3190_v21, %s5436_s13  ;;  %v2012_v24 = vpop.permute.xlu0 %2011  ;;  %v2470_v21 = vor.u32 %v2469_v30, %v6281_v29  ;;  %v2437_v36 = vrot.slane %v2436_v27, 4  ;;  %v2983_v30 = vsel %vm5912_vm14, %v2981_v13, %v2982_v8  ;;  %v3546_v27 = vshrl.u32 %v3392_v22, 16  ;;  %v6351_v8 = vld [vmem:[#allocation2 + $0x58] sm:$0xf] }
 0x149   : > { %2084 = vst.msk [vmem:[#allocation3 + $0x60] sm:$0xf] %vm2059_vm0, %v2012_v24 }
 0x14a   : > { %v2010_v54 = vpop.permute.xlu1 %2009  ;;  %3819 = vrot.lane.b32.xlu0 %v3496_v49, %s5437_s18  ;;  %v2471_v52 = vrot.slane %v2470_v21, 4  ;;  %v3548_v50 = vrot.slane %v3546_v27, 4 }
 0x14b   : > { %2083 = vst.msk [vmem:[#allocation3 + $0x5c] sm:$0xf] %vm2059_vm0, %v2010_v54 }
 0x14c   : > { %3817 = vrot.lane.b32.xlu1 %v3486_v57, %s5437_s18  ;;  %v2016_v9 = vpop.permute.xlu0 %2015  ;;  %v2442_v57 = vsel %vm5585_vm11, %v2437_v36, %v6269_v6  ;;  %v2476_v54 = vsel %vm5585_vm11, %v2471_v52, %v2475_v53  ;;  %v2466_v6 = vsel %vm5585_vm11, %v2461_v59, %v6281_v29  ;;  %v3559_v29 = vshrl.u32 %v3393_v14, 16  ;;  %v6342_v59 = vld [vmem:[#allocation2 + $0x4c] sm:$0xf]  ;;  %v3950_v14 = vld [vmem:[#allocation2 + $0x48] sm:$0xe] }
 0x14d   : > { %2086 = vst.msk [vmem:[#allocation3 + $0x68] sm:$0xf] %vm2059_vm0, %v2016_v9  ;;  %v2861_v9 = vld [vmem:[#allocation2 + $0x48] sm:$0xe]  ;;  %v4064_v5 = vrot.slane %v6342_v59, 5 }
 0x14e   : > { %v2014_v17 = vpop.permute.xlu1 %2013  ;;  %3823 = vrot.lane.b32.xlu0 %v3520_v58, %s5437_s18  ;;  %v2974_v58 = vrot.slane %v2972_v23, 4  ;;  %v3561_v21 = vrot.slane %v3559_v29, 4  ;;  %v3955_v29 = vld [vmem:[#allocation2 + $0x5c] sm:$0x1] }
 0x14f   : > { %2085 = vst.msk [vmem:[#allocation3 + $0x64] sm:$0xf] %vm2059_vm0, %v2014_v17  ;;  %v2973_v17 = vsel %vm5912_vm14, %v5142_v7, %v2972_v23 }
 0x150   : > { %3821 = vrot.lane.b32.xlu1 %v3510_v11, %s5437_s18  ;;  %v2020_v31 = vpop.permute.xlu0 %2019  ;;  %v3389_v11 = vld [vmem:[#allocation2 + $0x48] sm:$0xf]  ;;  %v2976_v12 = vsel %vm5912_vm14, %v2974_v58, %v2975_v63  ;;  %v3562_v23 = vor.u32 %v3561_v21, %v6333_v40  ;;  %v3194_v58 = vld [vmem:[#allocation2 + $0x54] sm:$0xf]  ;;  %v2505_v21 = vshll.u32 %v2306_v26, 16 }
 0x151   : > { %2088 = vst.msk [vmem:[#allocation3 + $0x70] sm:$0xf] %vm2059_vm0, %v2020_v31  ;;  %v3522_v19 = vshrl.u32 %v3389_v11, 16  ;;  %v3525_v35 = vshll.u32 %v3389_v11, 16  ;;  %v6326_v31 = vrot.slane %v3531_v55, 5 }
 0x152   : > { %v2018_v41 = vpop.permute.xlu1 %2017  ;;  %4156 = vrot.lane.b32.xlu0 %v4054_v18, %s5438_s0  ;;  %v5143_v18 = vrot.slane %v2861_v9, 9  ;;  %v2307_v55 = vld [vmem:[#allocation2 + $0x64] sm:$0xf] }
 0x153   : > { %2087 = vst.msk [vmem:[#allocation3 + $0x6c] sm:$0xf] %vm2059_vm0, %v2018_v41  ;;  %v3524_v41 = vrot.slane %v3522_v19, 4 }
 0x154   : > { %4154 = vrot.lane.b32.xlu1 %v4051_v32, %s5438_s0  ;;  %v2024_v47 = vpop.permute.xlu0 %2023  ;;  %v3537_v32 = vrot.slane %v3535_v10, 4  ;;  %v2980_v38 = vsel %vm5912_vm14, %v5143_v18, %v2979_v3  ;;  %v3563_v3 = vrot.slane %v3562_v23, 4  ;;  %v2308_v23 = vld [vmem:[#allocation2 + $0x68] sm:$0x1] }
 0x155   : > { %2090 = vst.msk [vmem:[#allocation3 + $0x78] sm:$0xf] %vm2059_vm0, %v2024_v47 }
 0x156   : > { %v2022_v49 = vpop.permute.xlu1 %2021  ;;  %4160 = vrot.lane.b32.xlu0 %v4061_v33, %s5438_s0  ;;  %v3527_v33 = vrot.slane %v3525_v35, 5  ;;  %v3538_v47 = vor.u32 %v3537_v32, %v6326_v31  ;;  %v4066_v35 = vrot.slane %v4064_v5, 4  ;;  %v2511_v32 = vshll.u32 %v2307_v55, 16 }
 0x157   : > { %2089 = vst.msk [vmem:[#allocation3 + $0x74] sm:$0xf] %vm2059_vm0, %v2022_v49  ;;  %v3551_v49 = vrot.slane %v3549_v39, 5  ;;  %v5158_v39 = vrot.slane %v3950_v14, 9 }
 0x158   : > { %4158 = vrot.lane.b32.xlu1 %v4058_v48, %s5438_s0  ;;  %v2157_v24 = vpop.permute.xlu0 %2156  ;;  %v3394_v48 = vld [vmem:[#allocation2 + $0x5c] sm:$0x1]  ;;  %v3528_v52 = vor.u32 %v3527_v33, %v3524_v41  ;;  %v3539_v56 = vrot.slane %v3538_v47, 4 }
 0x159   : > { %2253 = vst.msk [vmem:[#allocation3] sm:$0xf] %vm2252_vm2, %v2157_v24  ;;  %v3565_v24 = vshll.u32 %v3394_v48, 16  ;;  %v3552_v61 = vor.u32 %v3551_v49, %v3548_v50  ;;  %v4074_v48 = vrot.slane %v3955_v29, 5  ;;  %v6375_v49 = vrot.slane %v2511_v32, 5 }
 0x15a   : > { %v2026_v60 = vpop.permute.xlu1 %2025  ;;  %2735 = vrot.lane.b32.xlu0 %v2452_v51, %s5434_s9  ;;  %v3192_v51 = vld [vmem:[#allocation2 + $0x48] sm:$0xf]  ;;  %v3529_v63 = vrot.slane %v3528_v52, 4  ;;  %v3396_v29 = vld [vmem:[#allocation2 + $0x64] sm:$0xf] }
 0x15b   : > { %2091 = vst.msk [vmem:[#allocation3 + $0x7c] sm:$0xf] %vm2059_vm0, %v2026_v60  ;;  %v3553_v13 = vrot.slane %v3552_v61, 4  ;;  %v2867_v32 = vld [vmem:[#allocation2 + $0x60] sm:$0xe] }
 0x15c   : > { %2733 = vrot.lane.b32.xlu1 %v2442_v57, %s5434_s9  ;;  %v2161_v4 = vpop.permute.xlu0 %2160  ;;  %v3543_v57 = vrot.slane %v3541_v43, 5  ;;  %v3534_v10 = vsel %vm5585_vm11, %v3529_v63, %v6326_v31  ;;  %v2521_v63 = vshll.u32 %v2308_v23, 16 }
 0x15d   : > { %2255 = vst.msk [vmem:[#allocation3 + $0x8] sm:$0xf] %vm2252_vm2, %v2161_v4  ;;  %v3567_v4 = vrot.slane %v3565_v24, 5  ;;  %v3558_v27 = vsel %vm5585_vm11, %v3553_v13, %v6333_v40 }
 0x15e   : > { %v2159_v62 = vpop.permute.xlu1 %2158  ;;  %2739 = vrot.lane.b32.xlu0 %v2476_v54, %s5434_s9  ;;  %v2304_v54 = vld [vmem:[#allocation2 + $0x58] sm:$0xf]  ;;  %v3544_v7 = vsel %vm5585_vm11, %v3539_v56, %v3543_v57  ;;  %v2507_v57 = vrot.slane %v2505_v21, 5  ;;  %v5145_v21 = vrot.slane %v2867_v32, 9 }
 0x15f   : > { %2254 = vst.msk [vmem:[#allocation3 + $0x4] sm:$0xf] %vm2252_vm2, %v2159_v62  ;;  %v3952_v62 = vld [vmem:[#allocation2 + $0x50] sm:$0x1]  ;;  %v2487_v9 = vshll.u32 %v2304_v54, 16  ;;  %v2491_v11 = vshrl.u32 %v2304_v54, 16  ;;  %v3568_v19 = vsel %vm5585_vm11, %v3563_v3, %v3567_v4 }
 0x160   : > { %2737 = vrot.lane.b32.xlu1 %v2466_v6, %s5434_s9  ;;  %v2165_v16 = vpop.permute.xlu0 %2164  ;;  %v2303_v6 = vld [vmem:[#allocation2 + $0x54] sm:$0xf]  ;;  %v4067_v22 = vrot.slane %v3952_v62, 5  ;;  %v2865_v3 = vld [vmem:[#allocation2 + $0x58] sm:$0xf] }
 0x161   : > { %2257 = vst.msk [vmem:[#allocation3 + $0x10] sm:$0xf] %vm2252_vm2, %v2165_v16  ;;  %v2478_v16 = vshrl.u32 %v2303_v6, 16  ;;  %v2493_v31 = vrot.slane %v2491_v11, 4  ;;  %v2986_v11 = vrot.slane %v2865_v3, 5 }
 0x162   : > { %v2163_v15 = vpop.permute.xlu1 %2162  ;;  %3072 = vrot.lane.b32.xlu0 %v2976_v12, %s5435_s10  ;;  %v4068_v47 = vsel %vm5912_vm14, %v4066_v35, %v4067_v22 }
 0x163   : > { %2256 = vst.msk [vmem:[#allocation3 + $0xc] sm:$0xf] %vm2252_vm2, %v2163_v15  ;;  %v4071_v15 = vrot.slane %v6351_v8, 5  ;;  %v2480_v41 = vrot.slane %v2478_v16, 4  ;;  %v2988_v35 = vrot.slane %v2986_v11, 4 }
 0x164   : > { %3070 = vrot.lane.b32.xlu1 %v2973_v17, %s5435_s10  ;;  %v2169_v34 = vpop.permute.xlu0 %2168  ;;  %v2481_v17 = vshll.u32 %v2303_v6, 16 }
 0x165   : > { %2259 = vst.msk [vmem:[#allocation3 + $0x18] sm:$0xf] %vm2252_vm2, %v2169_v34  ;;  %v2515_v34 = vshrl.u32 %v2307_v55, 16  ;;  %v4073_v43 = vrot.slane %v4071_v15, 4  ;;  %v2866_v55 = vld [vmem:[#allocation2 + $0x5c] sm:$0x1] }
 0x166   : > { %v2167_v42 = vpop.permute.xlu1 %2166  ;;  %3076 = vrot.lane.b32.xlu0 %v2983_v30, %s5435_s10  ;;  %v6363_v30 = vrot.slane %v2487_v9, 5  ;;  %v2483_v33 = vrot.slane %v2481_v17, 5  ;;  %v2523_v9 = vrot.slane %v2521_v63, 5  ;;  %v2864_v17 = vld [vmem:[#allocation2 + $0x54] sm:$0xe]  ;;  %v2989_v22 = vrot.slane %v2866_v55, 5 }
 0x167   : > { %2258 = vst.msk [vmem:[#allocation3 + $0x14] sm:$0xf] %vm2252_vm2, %v2167_v42  ;;  %v2502_v42 = vshrl.u32 %v2306_v26, 16 }
 0x168   : > { %3074 = vrot.lane.b32.xlu1 %v2980_v38, %s5435_s10  ;;  %v2173_v36 = vpop.permute.xlu0 %2172  ;;  %v2305_v38 = vld [vmem:[#allocation2 + $0x5c] sm:$0x1]  ;;  %v2494_v40 = vor.u32 %v2493_v31, %v6363_v30  ;;  %v5144_v31 = vrot.slane %v2864_v17, 9  ;;  %v3198_v17 = vld [vmem:[#allocation2 + $0x6c] sm:$0xf] }
 0x169   : > { %2261 = vst.msk [vmem:[#allocation3 + $0x20] sm:$0xf] %vm2252_vm2, %v2173_v36  ;;  %v3953_v36 = vld [vmem:[#allocation2 + $0x54] sm:$0xe]  ;;  %v2497_v50 = vshll.u32 %v2305_v38, 16  ;;  %v2504_v56 = vrot.slane %v2502_v42, 4  ;;  %v2990_v38 = vsel %vm5912_vm14, %v2988_v35, %v2989_v22 }
 0x16a   : > { %v2171_v53 = vpop.permute.xlu1 %2170  ;;  %3266 = vrot.lane.b32.xlu0 %v3193_v45, %s5436_s13  ;;  %v5159_v24 = vrot.slane %v3953_v36, 9  ;;  %v2495_v61 = vrot.slane %v2494_v40, 4 }
 0x16b   : > { %2260 = vst.msk [vmem:[#allocation3 + $0x1c] sm:$0xf] %vm2252_vm2, %v2171_v53  ;;  %v4065_v53 = vsel %vm5912_vm14, %v5158_v39, %v4064_v5  ;;  %v2499_v54 = vrot.slane %v2497_v50, 5  ;;  %v2508_v6 = vor.u32 %v2507_v57, %v2504_v56  ;;  %v3395_v39 = vld [vmem:[#allocation2 + $0x60] sm:$0xf] }
 0x16c   : > { %3264 = vrot.lane.b32.xlu1 %v3192_v51, %s5436_s13  ;;  %v2177_v60 = vpop.permute.xlu0 %2176  ;;  %v2517_v51 = vrot.slane %v2515_v34, 4  ;;  %v4072_v4 = vsel %vm5912_vm14, %v5159_v24, %v4071_v15  ;;  %v2869_v15 = vld [vmem:[#allocation2 + $0x68] sm:$0x1]  ;;  %v3398_v50 = vld [vmem:[#allocation2 + $0x6c] sm:$0xf] }
 0x16d   : > { %2263 = vst.msk [vmem:[#allocation3 + $0x28] sm:$0xf] %vm2252_vm2, %v2177_v60  ;;  %v4075_v60 = vsel %vm5912_vm14, %v4073_v43, %v4074_v48  ;;  %v2500_v62 = vsel %vm5585_vm11, %v2495_v61, %v2499_v54  ;;  %v2509_v14 = vrot.slane %v2508_v6, 4  ;;  %v3570_v43 = vshrl.u32 %v3395_v39, 16  ;;  %v3197_v54 = vld [vmem:[#allocation2 + $0x64] sm:$0xf] }
 0x16e   : > { %v2175_v1 = vpop.permute.xlu1 %2174  ;;  %3270 = vrot.lane.b32.xlu0 %v3195_v46, %s5436_s13  ;;  %v2484_v46 = vor.u32 %v2483_v33, %v2480_v41  ;;  %v3579_v41 = vshll.u32 %v3396_v29, 16  ;;  %v3583_v33 = vshrl.u32 %v3396_v29, 16  ;;  %v3573_v48 = vshll.u32 %v3395_v39, 16  ;;  %v3196_v6 = vld [vmem:[#allocation2 + $0x60] sm:$0xf] }
 0x16f   : > { %2262 = vst.msk [vmem:[#allocation3 + $0x24] sm:$0xf] %vm2252_vm2, %v2175_v1  ;;  %v3572_v56 = vrot.slane %v3570_v43, 4 }
 0x170   : > { %3268 = vrot.lane.b32.xlu1 %v3194_v58, %s5436_s13  ;;  %v2181_v12 = vpop.permute.xlu0 %2180  ;;  %v2518_v58 = vor.u32 %v2517_v51, %v6375_v49  ;;  %v2485_v5 = vrot.slane %v2484_v46, 4  ;;  %v3585_v51 = vrot.slane %v3583_v33, 4  ;;  %v3397_v46 = vld [vmem:[#allocation2 + $0x68] sm:$0x1]  ;;  %v3575_v57 = vrot.slane %v3573_v48, 5 }
 0x171   : > { %2265 = vst.msk [vmem:[#allocation3 + $0x30] sm:$0xf] %vm2252_vm2, %v2181_v12  ;;  %v2868_v12 = vld [vmem:[#allocation2 + $0x64] sm:$0xf]  ;;  %v3589_v63 = vshll.u32 %v3397_v46, 16 }
 0x172   : > { %v2179_v18 = vpop.permute.xlu1 %2178  ;;  %3827 = vrot.lane.b32.xlu0 %v3544_v7, %s5437_s18  ;;  %v2519_v8 = vrot.slane %v2518_v58, 4  ;;  %v3956_v33 = vld [vmem:[#allocation2 + $0x60] sm:$0xe] }
 0x173   : > { %2264 = vst.msk [vmem:[#allocation3 + $0x2c] sm:$0xf] %vm2252_vm2, %v2179_v18  ;;  %v2993_v18 = vrot.slane %v2868_v12, 5 }
 0x174   : > { %3825 = vrot.lane.b32.xlu1 %v3534_v10, %s5437_s18  ;;  %v2185_v37 = vpop.permute.xlu0 %2184  ;;  %v2490_v10 = vsel %vm5585_vm11, %v2485_v5, %v6363_v30  ;;  %v2514_v30 = vsel %vm5585_vm11, %v2509_v14, %v6375_v49  ;;  %v6420_v49 = vrot.slane %v3579_v41, 5  ;;  %v3400_v5 = vld [vmem:[#allocation2 + $0x74] sm:$0x1]  ;;  %v3957_v14 = vld [vmem:[#allocation2 + $0x64] sm:$0xf] }
 0x175   : > { %2267 = vst.msk [vmem:[#allocation3 + $0x38] sm:$0xf] %vm2252_vm2, %v2185_v37  ;;  %v2995_v37 = vrot.slane %v2993_v18, 4  ;;  %v2994_v24 = vsel %vm5912_vm14, %v5145_v21, %v2993_v18  ;;  %v4078_v22 = vrot.slane %v3957_v14, 5 }
 0x176   : > { %v2183_v45 = vpop.permute.xlu1 %2182  ;;  %3831 = vrot.lane.b32.xlu0 %v3568_v19, %s5437_s18  ;;  %v2524_v19 = vsel %vm5585_vm11, %v2519_v8, %v2523_v9  ;;  %v3586_v58 = vor.u32 %v3585_v51, %v6420_v49 }
 0x177   : > { %2266 = vst.msk [vmem:[#allocation3 + $0x34] sm:$0xf] %vm2252_vm2, %v2183_v45  ;;  %v3399_v45 = vld [vmem:[#allocation2 + $0x70] sm:$0xf] }
 0x178   : > { %3829 = vrot.lane.b32.xlu1 %v3558_v27, %s5437_s18  ;;  %v2189_v52 = vpop.permute.xlu0 %2188  ;;  %v2996_v27 = vrot.slane %v2869_v15, 5  ;;  %v3587_v12 = vrot.slane %v3586_v58, 4 }
 0x179   : > { %2269 = vst.msk [vmem:[#allocation3 + $0x40] sm:$0xf] %vm2252_vm2, %v2189_v52  ;;  %v3603_v52 = vshll.u32 %v3399_v45, 16 }
 0x17a   : > { %v2187_v59 = vpop.permute.xlu1 %2186  ;;  %4164 = vrot.lane.b32.xlu0 %v4068_v47, %s5438_s0  ;;  %v2987_v47 = vsel %vm5912_vm14, %v5144_v31, %v2986_v11  ;;  %v2997_v40 = vsel %vm5912_vm14, %v2995_v37, %v2996_v27  ;;  %v3199_v11 = vld [vmem:[#allocation2 + $0x70] sm:$0xf] }
 0x17b   : > { %2268 = vst.msk [vmem:[#allocation3 + $0x3c] sm:$0xf] %vm2252_vm2, %v2187_v59  ;;  %v3594_v59 = vshrl.u32 %v3398_v50, 16  ;;  %v3960_v31 = vld [vmem:[#allocation2 + $0x70] sm:$0xf] }
 0x17c   : > { %4162 = vrot.lane.b32.xlu1 %v4065_v53, %s5438_s0  ;;  %v2720_v1 = vpop.permute.xlu0 %2719  ;;  %v3607_v53 = vshrl.u32 %v3399_v45, 16  ;;  %v3961_v45 = vld [vmem:[#allocation2 + $0x74] sm:$0x1] }
 0x17d   : > { %2815 = vst.msk [vmem:[#allocation3 + $0x4] sm:$0xf] %vm2813_vm7, %v2720_v1  ;;  %v6429_v1 = vrot.slane %v3603_v52, 5 }
 0x17e   : > { %v2718_v7 = vpop.permute.xlu1 %2717  ;;  %4168 = vrot.lane.b32.xlu0 %v4075_v60, %s5438_s0  ;;  %v3597_v60 = vshll.u32 %v3398_v50, 16  ;;  %v3609_v3 = vrot.slane %v3607_v53, 4  ;;  %v5160_v50 = vrot.slane %v3956_v33, 9  ;;  %v503_v33 = vld [vmem:[#allocation2 + $0xc0] sm:$0x1] }
 0x17f   : > { %2814 = vst.msk [vmem:[#allocation3] sm:$0xf] %vm2813_vm7, %v2718_v7  ;;  %v3576_v7 = vor.u32 %v3575_v57, %v3572_v56 }
 0x180   : > { %4166 = vrot.lane.b32.xlu1 %v4072_v4, %s5438_s0  ;;  %v2724_v13 = vpop.permute.xlu0 %2723  ;;  %v3599_v8 = vrot.slane %v3597_v60, 5  ;;  %v3610_v55 = vor.u32 %v3609_v3, %v6429_v1  ;;  %v4079_v58 = vsel %vm5912_vm14, %v5160_v50, %v4078_v22  ;;  %v2313_v3 = vld [vmem:[#allocation2 + $0x7c] sm:$0xf] }
 0x181   : > { %2817 = vst.msk [vmem:[#allocation3 + $0xc] sm:$0xf] %vm2813_vm7, %v2724_v13  ;;  %v3591_v13 = vrot.slane %v3589_v63, 5  ;;  %v3577_v18 = vrot.slane %v3576_v7, 4 }
 0x182   : > { %v2722_v16 = vpop.permute.xlu1 %2721  ;;  %2743 = vrot.lane.b32.xlu0 %v2500_v62, %s5434_s9  ;;  %v3596_v62 = vrot.slane %v3594_v59, 4 }
 0x183   : > { %2816 = vst.msk [vmem:[#allocation3 + $0x8] sm:$0xf] %vm2813_vm7, %v2722_v16  ;;  %v3592_v15 = vsel %vm5585_vm11, %v3587_v12, %v3591_v13  ;;  %v3582_v37 = vsel %vm5585_vm11, %v3577_v18, %v6420_v49  ;;  %v2310_v49 = vld [vmem:[#allocation2 + $0x70] sm:$0xf]  ;;  %v2311_v12 = vld [vmem:[#allocation2 + $0x74] sm:$0x1] }
 0x184   : > { %2741 = vrot.lane.b32.xlu1 %v2490_v10, %s5434_s9  ;;  %v3057_v26 = vpop.permute.xlu0 %3056  ;;  %v3613_v10 = vshll.u32 %v3400_v5, 16  ;;  %v2559_v13 = vshll.u32 %v2313_v3, 16 }
 0x185   : > { %3152 = vst.msk [vmem:[#allocation3 + $0x4] sm:$0xf] %vm3150_vm8, %v3057_v26  ;;  %v3611_v26 = vrot.slane %v3610_v55, 4  ;;  %v2563_v55 = vshrl.u32 %v2313_v3, 16 }
 0x186   : > { %v3055_v34 = vpop.permute.xlu1 %3054  ;;  %2747 = vrot.lane.b32.xlu0 %v2524_v19, %s5434_s9  ;;  %v3600_v19 = vor.u32 %v3599_v8, %v3596_v62  ;;  %v3615_v29 = vrot.slane %v3613_v10, 5 }
 0x187   : > { %3151 = vst.msk [vmem:[#allocation3] sm:$0xf] %vm3150_vm8, %v3055_v34  ;;  %v2309_v34 = vld [vmem:[#allocation2 + $0x6c] sm:$0xf] }
 0x188   : > { %2745 = vrot.lane.b32.xlu1 %v2514_v30, %s5434_s9  ;;  %v3061_v42 = vpop.permute.xlu0 %3060  ;;  %v3958_v30 = vld [vmem:[#allocation2 + $0x68] sm:$0x1]  ;;  %v3601_v27 = vrot.slane %v3600_v19, 4  ;;  %v3616_v21 = vsel %vm5585_vm11, %v3611_v26, %v3615_v29  ;;  %v2529_v43 = vshll.u32 %v2309_v34, 16  ;;  %v2561_v26 = vrot.slane %v2559_v13, 5 }
 0x189   : > { %3154 = vst.msk [vmem:[#allocation3 + $0xc] sm:$0xf] %vm3150_vm8, %v3061_v42  ;;  %v4081_v41 = vrot.slane %v3958_v30, 5  ;;  %v4085_v42 = vrot.slane %v3960_v31, 5  ;;  %v2565_v29 = vrot.slane %v2563_v55, 4 }
 0x18a   : > { %v3059_v36 = vpop.permute.xlu1 %3058  ;;  %3080 = vrot.lane.b32.xlu0 %v2990_v38, %s5435_s10  ;;  %v4080_v38 = vrot.slane %v4078_v22, 4  ;;  %v2531_v56 = vrot.slane %v2529_v43, 5  ;;  %v2545_v22 = vshll.u32 %v2311_v12, 16  ;;  %v504_v43 = vsel %vm5500_vm4, 0, %v503_v33 }
 0x18b   : > { %3153 = vst.msk [vmem:[#allocation3 + $0x8] sm:$0xf] %vm3150_vm8, %v3059_v36  ;;  %v2312_v36 = vld [vmem:[#allocation2 + $0x78] sm:$0xf]  ;;  %v4087_v53 = vrot.slane %v4085_v42, 4 }
 0x18c   : > { %3078 = vrot.lane.b32.xlu1 %v2987_v47, %s5435_s10  ;;  %v3251_v23 = vpop.permute.xlu0 %3250  ;;  %v2526_v47 = vshrl.u32 %v2309_v34, 16  ;;  %v4082_v52 = vsel %vm5912_vm14, %v4080_v38, %v4081_v41  ;;  %v2550_v57 = vshrl.u32 %v2312_v36, 16  ;;  %v2553_v59 = vshll.u32 %v2312_v36, 16  ;;  %505 = vst [vmem:[#allocation2 + $0xc0] sm:$0x1] %v504_v43 }
 0x18d   : > { %3346 = vst.msk [vmem:[#allocation3 + $0x4] sm:$0xf] %vm3344_vm9, %v3251_v23  ;;  %v4088_v23 = vrot.slane %v3961_v45, 5  ;;  %v2547_v41 = vrot.slane %v2545_v22, 5 }
 0x18e   : > { %v3249_v61 = vpop.permute.xlu1 %3248  ;;  %3084 = vrot.lane.b32.xlu0 %v2997_v40, %s5435_s10  ;;  %v3606_v40 = vsel %vm5585_vm11, %v3601_v27, %v6429_v1  ;;  %v2528_v46 = vrot.slane %v2526_v47, 4  ;;  %v2555_v7 = vrot.slane %v2553_v59, 5  ;;  %v2870_v27 = vld [vmem:[#allocation2 + $0x6c] sm:$0xe]  ;;  %v2871_v47 = vld [vmem:[#allocation2 + $0x70] sm:$0xf] }
 0x18f   : > { %3345 = vst.msk [vmem:[#allocation3] sm:$0xf] %vm3344_vm9, %v3249_v61  ;;  %v2535_v61 = vshll.u32 %v2310_v49, 16  ;;  %v5146_v36 = vrot.slane %v2870_v27, 9  ;;  %v2872_v59 = vld [vmem:[#allocation2 + $0x74] sm:$0x1] }
 0x190   : > { %3082 = vrot.lane.b32.xlu1 %v2994_v24, %s5435_s10  ;;  %v3255_v4 = vpop.permute.xlu0 %3254  ;;  %v3959_v24 = vld [vmem:[#allocation2 + $0x6c] sm:$0xe]  ;;  %v2532_v5 = vor.u32 %v2531_v56, %v2528_v46  ;;  %v2874_v46 = vld [vmem:[#allocation2 + $0x7c] sm:$0xf] }
 0x191   : > { %3348 = vst.msk [vmem:[#allocation3 + $0xc] sm:$0xf] %vm3344_vm9, %v3255_v4  ;;  %v5161_v63 = vrot.slane %v3959_v24, 9  ;;  %v4089_v4 = vsel %vm5912_vm14, %v4087_v53, %v4088_v23  ;;  %v2537_v8 = vrot.slane %v2535_v61, 5  ;;  %v3000_v24 = vrot.slane %v2871_v47, 5 }
 0x192   : > { %v3253_v9 = vpop.permute.xlu1 %3252  ;;  %3274 = vrot.lane.b32.xlu0 %v3197_v54, %s5436_s13  ;;  %v2539_v54 = vshrl.u32 %v2310_v49, 16  ;;  %v3401_v49 = vld [vmem:[#allocation2 + $0x78] sm:$0xf] }
 0x193   : > { %3347 = vst.msk [vmem:[#allocation3 + $0x8] sm:$0xf] %vm3344_vm9, %v3253_v9  ;;  %v3001_v3 = vsel %vm5912_vm14, %v5146_v36, %v3000_v24 }
 0x194   : > { %3272 = vrot.lane.b32.xlu1 %v3196_v6, %s5436_s13  ;;  %v3812_v16 = vpop.permute.xlu0 %3811  ;;  %v2552_v6 = vrot.slane %v2550_v57, 4  ;;  %v2541_v9 = vrot.slane %v2539_v54, 4 }
 0x195   : > { %3907 = vst.msk [vmem:[#allocation3 + $0x4] sm:$0xf] %vm3905_vm12, %v3812_v16  ;;  %v2110_v16 = vld [vmem:[#allocation2 + $0x78] sm:$0xf] }
 0x196   : > { %v3810_v35 = vpop.permute.xlu1 %3809  ;;  %3278 = vrot.lane.b32.xlu0 %v3199_v11, %s5436_s13  ;;  %v4086_v11 = vsel %vm5912_vm14, %v5161_v63, %v4085_v42  ;;  %v2556_v18 = vor.u32 %v2555_v7, %v2552_v6  ;;  %v2111_v42 = vld [vmem:[#allocation2 + $0x7c] sm:$0xf]  ;;  %v559_v7 = vld [vmem:[#allocation2 + $0xc8] sm:$0x1] }
 0x197   : > { %3906 = vst.msk [vmem:[#allocation3] sm:$0xf] %vm3905_vm12, %v3810_v35  ;;  %v2542_v35 = vor.u32 %v2541_v9, %v2537_v8  ;;  %v3003_v9 = vrot.slane %v2872_v59, 5 }
 0x198   : > { %3276 = vrot.lane.b32.xlu1 %v3198_v17, %s5436_s13  ;;  %v3816_v32 = vpop.permute.xlu0 %3815  ;;  %v2533_v17 = vrot.slane %v2532_v5, 4  ;;  %v3621_v5 = vshll.u32 %v3401_v49, 16 }
 0x199   : > { %3909 = vst.msk [vmem:[#allocation3 + $0xc] sm:$0xf] %vm3905_vm12, %v3816_v32  ;;  %v2314_v32 = vld [vmem:[#allocation2 + $0x80] sm:$0x1]  ;;  %v2543_v38 = vrot.slane %v2542_v35, 4 }
 0x19a   : > { %v3814_v39 = vpop.permute.xlu1 %3813  ;;  %3835 = vrot.lane.b32.xlu0 %v3592_v15, %s5437_s18  ;;  %v2109_v15 = vld [vmem:[#allocation2 + $0x70] sm:$0xf]  ;;  %v2538_v34 = vsel %vm5585_vm11, %v2533_v17, %v2537_v8  ;;  %v2569_v45 = vshll.u32 %v2314_v32, 16  ;;  %v3002_v8 = vrot.slane %v3000_v24, 4  ;;  %v1028_v17 = vld [vmem:[#allocation2 + $0xc0] sm:$0xf] }
 0x19b   : > { %3908 = vst.msk [vmem:[#allocation3 + $0x8] sm:$0xf] %vm3905_vm12, %v3814_v39  ;;  %v2548_v23 = vsel %vm5585_vm11, %v2543_v38, %v2547_v41 }
 0x19c   : > { %3833 = vrot.lane.b32.xlu1 %v3582_v37, %s5437_s18  ;;  %v4149_v48 = vpop.permute.xlu0 %4148  ;;  %v2557_v37 = vrot.slane %v2556_v18, 4  ;;  %v2571_v57 = vrot.slane %v2569_v45, 5  ;;  %v3200_v45 = vld [vmem:[#allocation2 + $0x78] sm:$0xf] }
 0x19d   : > { %4244 = vst.msk [vmem:[#allocation3 + $0x4] sm:$0xf] %vm4242_vm13, %v4149_v48 }
 0x19e   : > { %v4147_v51 = vpop.permute.xlu1 %4146  ;;  %3839 = vrot.lane.b32.xlu0 %v3616_v21, %s5437_s18  ;;  %v2566_v21 = vor.u32 %v2565_v29, %v2561_v26  ;;  %v2562_v50 = vsel %vm5585_vm11, %v2557_v37, %v2561_v26  ;;  %v560_v26 = vsel %vm5505_vm5, 0, %v559_v7  ;;  %v3623_v29 = vrot.slane %v3621_v5, 5 }
 0x19f   : > { %4243 = vst.msk [vmem:[#allocation3] sm:$0xf] %vm4242_vm13, %v4147_v51  ;;  %v595_v51 = vld [vmem:[%s5542_s28 + $0x78] sm:$0xf]  ;;  %561 = vst [vmem:[#allocation2 + $0xc8] sm:$0x1] %v560_v26  ;;  %v3004_v37 = vsel %vm5912_vm14, %v3002_v8, %v3003_v9 }
 0x1a0   : > { %3837 = vrot.lane.b32.xlu1 %v3606_v40, %s5437_s18  ;;  %v4153_v60 = vpop.permute.xlu0 %4152  ;;  %v2873_v40 = vld [vmem:[#allocation2 + $0x78] sm:$0xe]  ;;  %v2567_v56 = vrot.slane %v2566_v21, 4  ;;  %v855_v61 = vshrl.u32 %v595_v51, 16  ;;  %v858_v63 = vshll.u32 %v595_v51, 16 }
 0x1a1   : > { %4246 = vst.msk [vmem:[#allocation3 + $0xc] sm:$0xf] %vm4242_vm13, %v4153_v60  ;;  %v5147_v60 = vrot.slane %v2873_v40, 9  ;;  %v3962_v9 = vld [vmem:[#allocation2 + $0x78] sm:$0xe] }
 0x1a2   : > { %v4151_v1 = vpop.permute.xlu1 %4150  ;;  %4172 = vrot.lane.b32.xlu0 %v4082_v52, %s5438_s0  ;;  %v596_v52 = vld [vmem:[%s5542_s28 + $0x7c] sm:$0xf]  ;;  %v857_v6 = vrot.slane %v855_v61, 7  ;;  %v2572_v55 = vsel %vm5585_vm11, %v2567_v56, %v2571_v57  ;;  %s6832_s28 = scalar_lea.vmem %s7043_s6, %s5242_s25 }
 0x1a3   : > { %4245 = vst.msk [vmem:[#allocation3 + $0x8] sm:$0xf] %vm4242_vm13, %v4151_v1  ;;  %v863_v1 = vshrl.u32 %v596_v52, 16  ;;  %v866_v13 = vshll.u32 %v596_v52, 16 }
 0x1a4   : > { %4170 = vrot.lane.b32.xlu1 %v4079_v58, %s5438_s0  ;;  %v2728_v62 = vpop.permute.xlu0 %2727  ;;  %v3618_v58 = vshrl.u32 %v3401_v49, 16  ;;  %v861_v22 = vrot.slane %v857_v6, 4 }
 0x1a5   : > { %2819 = vst.msk [vmem:[#allocation3 + $0x14] sm:$0xf] %vm2813_vm7, %v2728_v62  ;;  %v865_v12 = vrot.slane %v863_v1, 7 }
 0x1a6   : > { %v2726_v10 = vpop.permute.xlu1 %2725  ;;  %4176 = vrot.lane.b32.xlu0 %v4089_v4, %s5438_s0  ;;  %v5390_v14 = vld [vmem:[#allocation3] sm:$0xff]   ;;  %v3007_v4 = vrot.slane %v2874_v46, 5  ;;  %v3620_v35 = vrot.slane %v3618_v58, 4  ;;  %v1032_v24 = vld [vmem:[#allocation2 + $0xc8] sm:$0x1] }
 0x1a7   : > { %2818 = vst.msk [vmem:[#allocation3 + $0x10] sm:$0xf] %vm2813_vm7, %v2726_v10  ;;  %5308 = vmatprep.mubr.msk.bf16.mxu0 %vm4423_vm15, %v5390_v14  ;;  %v2875_v14 = vld [vmem:[#allocation2 + $0x80] sm:$0x1]  ;;  %v870_v44 = vrot.slane %v865_v12, 4 }
 0x1a8   : > { %4174 = vrot.lane.b32.xlu1 %v4086_v11, %s5438_s0  ;;  %v2732_v19 = vpop.permute.xlu0 %2731  ;;  %v3404_v11 = vld [vmem:[#allocation2 + $0x84] sm:$0xf]  ;;  %v3008_v10 = vsel %vm5912_vm14, %v5147_v60, %v3007_v4  ;;  %v3010_v38 = vrot.slane %v2875_v14, 5  ;;  %v3624_v47 = vor.u32 %v3623_v29, %v3620_v35 }
 0x1a9   : > { %2821 = vst.msk [vmem:[#allocation3 + $0x1c] sm:$0xf] %vm2813_vm7, %v2732_v19  ;;  %v3402_v19 = vld [vmem:[#allocation2 + $0x7c] sm:$0xf]  ;;  %v3202_v46 = vld [vmem:[#allocation2 + $0x84] sm:$0xf]  ;;  %v1033_v59 = vsel %vm5500_vm4, %v870_v44, %v1032_v24 }
 0x1aa   : > { %v2730_v30 = vpop.permute.xlu1 %2729  ;;  %v5391_v31 = vld [vmem:[#allocation3 + $0x8] sm:$0xff]   ;;  %2192 = vrot.lane.b32.xlu0 %v2110_v16, %s5433_s8  ;;  %v860_v16 = vor.u32 %v858_v63, %v857_v6  ;;  %v3627_v41 = vshll.u32 %v3402_v19, 16  ;;  %v3631_v33 = vshrl.u32 %v3402_v19, 16  ;;  %v3625_v56 = vrot.slane %v3624_v47, 4  ;;  %1034 = vst [vmem:[#allocation2 + $0xc8] sm:$0x1] %v1033_v59 }
 0x1ab   : > { %2820 = vst.msk [vmem:[#allocation3 + $0x18] sm:$0xf] %vm2813_vm7, %v2730_v30  ;;  %5309 = vmatmul.mubr.msk.bf16.vlgmr.msra.gmra.mxu0 %vm4423_vm15, %v5391_v31  ;;  %v3642_v30 = vshrl.u32 %v3404_v11, 16  ;;  %v3645_v31 = vshll.u32 %v3404_v11, 16  ;;  %v3201_v63 = vld [vmem:[#allocation2 + $0x7c] sm:$0xf] }
 0x1ac   : > { %2190 = vrot.lane.b32.xlu1 %v2109_v15, %s5433_s8  ;;  %v3065_v39 = vpop.permute.xlu0 %3064  ;;  %v868_v15 = vor.u32 %v866_v13, %v865_v12  ;;  %v1029_v32 = vsel %vm5533_vm6, %v860_v16, %v1028_v17  ;;  %v3629_v51 = vrot.slane %v3627_v41, 5  ;;  %v3633_v52 = vrot.slane %v3631_v33, 4  ;;  %v3963_v11 = vld [vmem:[#allocation2 + $0x7c] sm:$0xf]  ;;  %v506_v12 = vld [vmem:[#allocation2 + $0xcc] sm:$0x1] }
 0x1ad   : > { %3156 = vst.msk [vmem:[#allocation3 + $0x14] sm:$0xf] %vm3150_vm8, %v3065_v39  ;;  %1030 = vst [vmem:[#allocation2 + $0xc0] sm:$0xf] %v1029_v32  ;;  %v3009_v39 = vrot.slane %v3007_v4, 4  ;;  %v3644_v43 = vrot.slane %v3642_v30, 4 }
 0x1ae   : > { %v3063_v48 = vpop.permute.xlu1 %3062  ;;  %2749 = vrot.lane.b32.xlu0 %v2538_v34, %s5434_s9  ;;  %v869_v27 = vsel %vm5559_vm10, %v861_v22, %v868_v15  ;;  %v3634_v1 = vor.u32 %v3633_v52, %v3629_v51  ;;  %v3630_v5 = vsel %vm5585_vm11, %v3625_v56, %v3629_v51  ;;  %v3203_v13 = vld [vmem:[#allocation2 + $0x88] sm:$0xf]  ;;  %v507_v14 = vsel %vm5500_vm4, 0, %v506_v12  ;;  %v3965_v35 = vld [vmem:[#allocation2 + $0x84] sm:$0xe] }
 0x1af   : > { %3155 = vst.msk [vmem:[#allocation3 + $0x10] sm:$0xf] %vm3150_vm8, %v3063_v48  ;;  %v3647_v48 = vrot.slane %v3645_v31, 5  ;;  %v3011_v49 = vsel %vm5912_vm14, %v3009_v39, %v3010_v38  ;;  %508 = vst [vmem:[#allocation2 + $0xcc] sm:$0x1] %v507_v14  ;;  %v4092_v19 = vrot.slane %v3963_v11, 5 }
 0x1b0   : > { %2194 = vrot.lane.b32.xlu1 %v2111_v42, %s5433_s8  ;;  %v3069_v53 = vpop.permute.xlu0 %3068  ;;  %v3405_v42 = vld [vmem:[#allocation2 + $0x88] sm:$0xf]  ;;  %1031 = vst.msk [vmem:[#allocation2 + $0xc4] sm:$0xf] %vm920_vm3, %v869_v27  ;;  %v2315_v29 = vld [vmem:[#allocation2 + $0x84] sm:$0xf] }
 0x1b1   : > { %3158 = vst.msk [vmem:[#allocation3 + $0x1c] sm:$0xf] %vm3150_vm8, %v3069_v53  ;;  %v3651_v40 = vshll.u32 %v3405_v42, 16  ;;  %v3648_v57 = vor.u32 %v3647_v48, %v3644_v43  ;;  %v3964_v31 = vld [vmem:[#allocation2 + $0x80] sm:$0x1]  ;;  %v5163_v27 = vrot.slane %v3965_v35, 9 }
 0x1b2   : > { %v3067_v54 = vpop.permute.xlu1 %3066  ;;  %2753 = vrot.lane.b32.xlu0 %v2562_v50, %s5434_s9  ;;  %v3655_v50 = vshrl.u32 %v3405_v42, 16  ;;  %v3966_v32 = vld [vmem:[#allocation2 + $0x88] sm:$0xf]  ;;  %v4094_v41 = vrot.slane %v4092_v19, 4  ;;  %v2574_v33 = vshrl.u32 %v2315_v29, 16  ;;  %v2577_v42 = vshll.u32 %v2315_v29, 16 }
 0x1b3   : > { %3157 = vst.msk [vmem:[#allocation3 + $0x18] sm:$0xf] %vm3150_vm8, %v3067_v54  ;;  %v3653_v61 = vrot.slane %v3651_v40, 5  ;;  %v3406_v54 = vld [vmem:[#allocation2 + $0x8c] sm:$0x1]  ;;  %v3649_v6 = vrot.slane %v3648_v57, 4 }
 0x1b4   : > { %2751 = vrot.lane.b32.xlu1 %v2548_v23, %s5434_s9  ;;  %v3259_v62 = vpop.permute.xlu0 %3258  ;;  %v3403_v23 = vld [vmem:[#allocation2 + $0x80] sm:$0x1]  ;;  %v3657_v58 = vrot.slane %v3655_v50, 4  ;;  %v3661_v7 = vshll.u32 %v3406_v54, 16  ;;  %v4099_v47 = vrot.slane %v3966_v32, 5  ;;  %v2576_v52 = vrot.slane %v2574_v33, 4 }
 0x1b5   : > { %3350 = vst.msk [vmem:[#allocation3 + $0x14] sm:$0xf] %vm3344_vm9, %v3259_v62  ;;  %v3654_v17 = vsel %vm5585_vm11, %v3649_v6, %v3653_v61  ;;  %v2318_v43 = vld [vmem:[#allocation2 + $0x90] sm:$0xf]  ;;  %v3967_v48 = vld [vmem:[#allocation2 + $0x8c] sm:$0x1] }
 0x1b6   : > { %v3257_v18 = vpop.permute.xlu1 %3256  ;;  %3086 = vrot.lane.b32.xlu0 %v3001_v3, %s5435_s10  ;;  %v3637_v3 = vshll.u32 %v3403_v23, 16  ;;  %v3658_v8 = vor.u32 %v3657_v58, %v3653_v61  ;;  %v3663_v26 = vrot.slane %v3661_v7, 5  ;;  %v2316_v44 = vld [vmem:[#allocation2 + $0x88] sm:$0xf]  ;;  %v2598_v23 = vshrl.u32 %v2318_v43, 16 }
 0x1b7   : > { %3349 = vst.msk [vmem:[#allocation3 + $0x10] sm:$0xf] %vm3344_vm9, %v3257_v18  ;;  %v5162_v18 = vrot.slane %v3962_v9, 9  ;;  %v2601_v24 = vshll.u32 %v2318_v43, 16  ;;  %v4101_v56 = vrot.slane %v4099_v47, 4  ;;  %v4102_v57 = vrot.slane %v3967_v48, 5 }
 0x1b8   : > { %2755 = vrot.lane.b32.xlu1 %v2572_v55, %s5434_s9  ;;  %v3263_v34 = vpop.permute.xlu0 %3262  ;;  %v3635_v55 = vrot.slane %v3634_v1, 4  ;;  %v3659_v15 = vrot.slane %v3658_v8, 4  ;;  %v2583_v59 = vshll.u32 %v2316_v44, 16  ;;  %v2319_v58 = vld [vmem:[#allocation2 + $0x94] sm:$0xf] }
 0x1b9   : > { %3352 = vst.msk [vmem:[#allocation3 + $0x1c] sm:$0xf] %vm3344_vm9, %v3263_v34  ;;  %v562_v34 = vld [vmem:[#allocation2 + $0xd4] sm:$0x1]  ;;  %v4093_v38 = vsel %vm5912_vm14, %v5162_v18, %v4092_v19  ;;  %v4103_v6 = vsel %vm5912_vm14, %v4101_v56, %v4102_v57  ;;  %v2607_v9 = vshll.u32 %v2319_v58, 16  ;;  %v2611_v11 = vshrl.u32 %v2319_v58, 16 }
 0x1ba   : > { %v3261_v21 = vpop.permute.xlu1 %3260  ;;  %3090 = vrot.lane.b32.xlu0 %v3008_v10, %s5435_s10  ;;  %v3639_v10 = vrot.slane %v3637_v3, 5  ;;  %v563_v39 = vsel %vm5505_vm5, 0, %v562_v34  ;;  %v3664_v2 = vsel %vm5585_vm11, %v3659_v15, %v3663_v26  ;;  %v2600_v3 = vrot.slane %v2598_v23, 4  ;;  %v2113_v18 = vld [vmem:[#allocation2 + $0x88] sm:$0xf] }
 0x1bb   : > { %3351 = vst.msk [vmem:[#allocation3 + $0x18] sm:$0xf] %vm3344_vm9, %v3261_v21  ;;  %564 = vst [vmem:[#allocation2 + $0xd4] sm:$0x1] %v563_v39  ;;  %v2585_v7 = vrot.slane %v2583_v59, 5  ;;  %v2609_v0 = vrot.slane %v2607_v9, 5 }
 0x1bc   : > { %3088 = vrot.lane.b32.xlu1 %v3004_v37, %s5435_s10  ;;  %v3820_v36 = vpop.permute.xlu0 %3819  ;;  %v3640_v30 = vsel %vm5585_vm11, %v3635_v55, %v3639_v10  ;;  %v2317_v55 = vld [vmem:[#allocation2 + $0x8c] sm:$0x1]  ;;  %v2114_v10 = vld [vmem:[#allocation2 + $0x90] sm:$0xf]  ;;  %v2320_v26 = vld [vmem:[#allocation2 + $0x98] sm:$0x1] }
 0x1bd   : > { %3911 = vst.msk [vmem:[#allocation3 + $0x14] sm:$0xf] %vm3905_vm12, %v3820_v36  ;;  %v1117_v36 = vld [vmem:[#allocation2 + $0xcc] sm:$0xf]  ;;  %v2593_v35 = vshll.u32 %v2317_v55, 16  ;;  %vm4810_vm5 = vcmask 58368  }
 0x1be   : > { %v3818_v53 = vpop.permute.xlu1 %3817  ;;  %3280 = vrot.lane.b32.xlu0 %v3200_v45, %s5436_s13  ;;  %v4095_v45 = vrot.slane %v3964_v31, 5  ;;  %v1118_v51 = vsel %vm5533_vm6, 0, %v1117_v36  ;;  %v2876_v32 = vld [vmem:[#allocation2 + $0x84] sm:$0xe]  ;;  %v2115_v34 = vld [vmem:[#allocation2 + $0x94] sm:$0xf] }
 0x1bf   : > { %3910 = vst.msk [vmem:[#allocation3 + $0x10] sm:$0xf] %vm3905_vm12, %v3818_v53  ;;  %v2579_v53 = vrot.slane %v2577_v42, 5  ;;  %1119 = vst [vmem:[#allocation2 + $0xcc] sm:$0xf] %v1118_v51 }
 0x1c0   : > { %3092 = vrot.lane.b32.xlu1 %v3011_v49, %s5435_s10  ;;  %v3824_v60 = vpop.permute.xlu0 %3823  ;;  %v4100_v49 = vsel %vm5912_vm14, %v5163_v27, %v4099_v47  ;;  %v4096_v20 = vsel %vm5912_vm14, %v4094_v41, %v4095_v45  ;;  %v2595_v27 = vrot.slane %v2593_v35, 5  ;;  %v2877_v33 = vld [vmem:[#allocation2 + $0x88] sm:$0xf]  ;;  %v2879_v45 = vld [vmem:[#allocation2 + $0x90] sm:$0xe] }
 0x1c1   : > { %3913 = vst.msk [vmem:[#allocation3 + $0x1c] sm:$0xf] %vm3905_vm12, %v3824_v60  ;;  %v2587_v60 = vshrl.u32 %v2316_v44, 16  ;;  %v2580_v1 = vor.u32 %v2579_v53, %v2576_v52  ;;  %v3407_v43 = vld [vmem:[#allocation2 + $0x90] sm:$0xf]  ;;  %v3014_v36 = vrot.slane %v2877_v33, 5 }
 0x1c2   : > { %v3822_v4 = vpop.permute.xlu1 %3821  ;;  %3284 = vrot.lane.b32.xlu0 %v3202_v46, %s5436_s13  ;;  %v5149_v51 = vrot.slane %v2879_v45, 9  ;;  %v3666_v53 = vshrl.u32 %v3407_v43, 16  ;;  %v3669_v23 = vshll.u32 %v3407_v43, 16  ;;  %v3410_v56 = vld [vmem:[#allocation2 + $0x9c] sm:$0xf] }
 0x1c3   : > { %3912 = vst.msk [vmem:[#allocation3 + $0x18] sm:$0xf] %vm3905_vm12, %v3822_v4  ;;  %v2603_v4 = vrot.slane %v2601_v24, 5  ;;  %v2589_v8 = vrot.slane %v2587_v60, 4  ;;  %v2581_v14 = vrot.slane %v2580_v1, 4  ;;  %v3016_v59 = vrot.slane %v3014_v36, 4 }
 0x1c4   : > { %3282 = vrot.lane.b32.xlu1 %v3201_v63, %s5436_s13  ;;  %v4157_v62 = vpop.permute.xlu0 %4156  ;;  %v2112_v63 = vld [vmem:[#allocation2 + $0x84] sm:$0xf]  ;;  %v2881_v60 = vld [vmem:[#allocation2 + $0x98] sm:$0x1]  ;;  %v3408_v58 = vld [vmem:[#allocation2 + $0x94] sm:$0xf] }
 0x1c5   : > { %4248 = vst.msk [vmem:[#allocation3 + $0x14] sm:$0xf] %vm4242_vm13, %v4157_v62  ;;  %v1121_v62 = vld [vmem:[#allocation2 + $0xd4] sm:$0x1]  ;;  %v2590_v19 = vor.u32 %v2589_v8, %v2585_v7  ;;  %v2586_v29 = vsel %vm5585_vm11, %v2581_v14, %v2585_v7  ;;  %v3671_v1 = vrot.slane %v3669_v23, 5  ;;  %v3024_v7 = vrot.slane %v2881_v60, 5 }
 0x1c6   : > { %v4155_v16 = vpop.permute.xlu1 %4154  ;;  %3841 = vrot.lane.b32.xlu0 %v3630_v5, %s5437_s18  ;;  %v1122_v12 = vsel %vm5500_vm4, 0, %v1121_v62  ;;  %v3675_v8 = vshll.u32 %v3408_v58, 16  ;;  %v3679_v9 = vshrl.u32 %v3408_v58, 16  ;;  %v3968_v45 = vld [vmem:[#allocation2 + $0x90] sm:$0xe]  ;;  %vm4637_vm4 = vcmask 64512  }
 0x1c7   : > { %4247 = vst.msk [vmem:[#allocation3 + $0x10] sm:$0xf] %vm4242_vm13, %v4155_v16  ;;  %1123 = vst [vmem:[#allocation2 + $0xd4] sm:$0x1] %v1122_v12  ;;  %v2604_v16 = vor.u32 %v2603_v4, %v2600_v3  ;;  %v3690_v3 = vshrl.u32 %v3410_v56, 16  ;;  %v3693_v4 = vshll.u32 %v3410_v56, 16 }
 0x1c8   : > { %3286 = vrot.lane.b32.xlu1 %v3203_v13, %s5436_s13  ;;  %v4161_v22 = vpop.permute.xlu0 %4160  ;;  %v3411_v12 = vld [vmem:[#allocation2 + $0xa0] sm:$0xf]  ;;  %v2321_v23 = vld [vmem:[#allocation2 + $0x9c] sm:$0xf] }
 0x1c9   : > { %4250 = vst.msk [vmem:[#allocation3 + $0x1c] sm:$0xf] %vm4242_vm13, %v4161_v22  ;;  %v2613_v22 = vrot.slane %v2611_v11, 4  ;;  %v3695_v14 = vrot.slane %v3693_v4, 5  ;;  %v3699_v35 = vshll.u32 %v3411_v12, 16 }
 0x1ca   : > { %v4159_v37 = vpop.permute.xlu1 %4158  ;;  %3845 = vrot.lane.b32.xlu0 %v3654_v17, %s5437_s18 }
 0x1cb   : > { %4249 = vst.msk [vmem:[#allocation3 + $0x18] sm:$0xf] %vm4242_vm13, %v4159_v37  ;;  %v2591_v37 = vrot.slane %v2590_v19, 4  ;;  %v2614_v39 = vor.u32 %v2613_v22, %v2609_v0  ;;  %v3681_v19 = vrot.slane %v3679_v9, 4 }
 0x1cc   : > { %3843 = vrot.lane.b32.xlu1 %v3640_v30, %s5437_s18  ;;  %v2736_v21 = vpop.permute.xlu0 %2735  ;;  %v2605_v30 = vrot.slane %v2604_v16, 4 }
 0x1cd   : > { %2823 = vst.msk [vmem:[#allocation3 + $0x24] sm:$0xf] %vm2813_vm7, %v2736_v21  ;;  %v5148_v21 = vrot.slane %v2876_v32, 9  ;;  %v2615_v48 = vrot.slane %v2614_v39, 4  ;;  %v3205_v32 = vld [vmem:[#allocation2 + $0x94] sm:$0xf] }
 0x1ce   : > { %v2734_v40 = vpop.permute.xlu1 %2733  ;;  %v5392_v50 = vld [vmem:[#allocation3 + $0x10] sm:$0xff]   ;;  %4178 = vrot.lane.b32.xlu0 %v4093_v38, %s5438_s0  ;;  %v2617_v38 = vshll.u32 %v2320_v26, 16  ;;  %v2610_v42 = vsel %vm5585_vm11, %v2605_v30, %v2609_v0  ;;  %v3703_v0 = vshrl.u32 %v3411_v12, 16  ;;  %v3206_v26 = vld [vmem:[#allocation2 + $0x9c] sm:$0xf] }
 0x1cf   : > { %2822 = vst.msk [vmem:[#allocation3 + $0x20] sm:$0xf] %vm2813_vm7, %v2734_v40  ;;  %5312 = vmatprep.mubr.msk.bf16.mxu0 %vm4423_vm15, %v5392_v50  ;;  %v2880_v40 = vld [vmem:[#allocation2 + $0x94] sm:$0xf]  ;;  %v3015_v52 = vsel %vm5912_vm14, %v5148_v21, %v3014_v36  ;;  %v2322_v12 = vld [vmem:[#allocation2 + $0xa0] sm:$0xf] }
 0x1d0   : > { %3847 = vrot.lane.b32.xlu1 %v3664_v2, %s5437_s18  ;;  %v2740_v46 = vpop.permute.xlu0 %2739  ;;  %v2596_v2 = vsel %vm5585_vm11, %v2591_v37, %v2595_v27  ;;  %v2619_v44 = vrot.slane %v2617_v38, 5  ;;  %v3701_v27 = vrot.slane %v3699_v35, 5  ;;  %v3705_v39 = vrot.slane %v3703_v0, 4 }
 0x1d1   : > { %2825 = vst.msk [vmem:[#allocation3 + $0x2c] sm:$0xf] %vm2813_vm7, %v2740_v46  ;;  %v3021_v46 = vrot.slane %v2880_v40, 5  ;;  %v2631_v35 = vshll.u32 %v2322_v12, 16  ;;  %v2635_v0 = vshrl.u32 %v2322_v12, 16 }
 0x1d2   : > { %v2738_v61 = vpop.permute.xlu1 %2737  ;;  %v5393_v54 = vld [vmem:[#allocation3 + $0x18] sm:$0xff]   ;;  %4182 = vrot.lane.b32.xlu0 %v4100_v49, %s5438_s0  ;;  %v2878_v49 = vld [vmem:[#allocation2 + $0x8c] sm:$0x1]  ;;  %v2620_v57 = vsel %vm5585_vm11, %v2615_v48, %v2619_v44  ;;  %v3706_v48 = vor.u32 %v3705_v39, %v3701_v27 }
 0x1d3   : > { %2824 = vst.msk [vmem:[#allocation3 + $0x28] sm:$0xf] %vm2813_vm7, %v2738_v61  ;;  %5313 = vmatmul.mubr.msk.bf16.gmra.mxu0 %vm4423_vm15, %v5393_v54  ;;  %v3022_v54 = vsel %vm5912_vm14, %v5149_v51, %v3021_v46  ;;  %v5164_v51 = vrot.slane %v3968_v45, 9 }
 0x1d4   : > { %4180 = vrot.lane.b32.xlu1 %v4096_v20, %s5438_s0  ;;  %v3073_v5 = vpop.permute.xlu0 %3072  ;;  %v3017_v20 = vrot.slane %v2878_v49, 5 }
 0x1d5   : > { %3160 = vst.msk [vmem:[#allocation3 + $0x24] sm:$0xf] %vm3150_vm8, %v3073_v5 }
 0x1d6   : > { %v3071_v13 = vpop.permute.xlu1 %3070  ;;  %2196 = vrot.lane.b32.xlu0 %v2112_v63, %s5433_s8  ;;  %v3668_v63 = vrot.slane %v3666_v53, 4  ;;  %v3018_v62 = vsel %vm5912_vm14, %v3016_v59, %v3017_v20  ;;  %v3972_v59 = vld [vmem:[#allocation2 + $0xa0] sm:$0xf] }
 0x1d7   : > { %3159 = vst.msk [vmem:[#allocation3 + $0x20] sm:$0xf] %vm3150_vm8, %v3071_v13  ;;  %v3204_v13 = vld [vmem:[#allocation2 + $0x90] sm:$0xf]  ;;  %v4113_v4 = vrot.slane %v3972_v59, 5 }
 0x1d8   : > { %4184 = vrot.lane.b32.xlu1 %v4103_v6, %s5438_s0  ;;  %v3077_v17 = vpop.permute.xlu0 %3076  ;;  %v3023_v6 = vrot.slane %v3021_v46, 4  ;;  %v3672_v55 = vor.u32 %v3671_v1, %v3668_v63  ;;  %v3707_v46 = vrot.slane %v3706_v48, 4  ;;  %v2622_v63 = vshrl.u32 %v2321_v23, 16 }
 0x1d9   : > { %3162 = vst.msk [vmem:[#allocation3 + $0x2c] sm:$0xf] %vm3150_vm8, %v3077_v17  ;;  %v2625_v1 = vshll.u32 %v2321_v23, 16  ;;  %v2119_v23 = vld [vmem:[#allocation2 + $0xac] sm:$0xf] }
 0x1da   : > { %v3075_v15 = vpop.permute.xlu1 %3074  ;;  %2200 = vrot.lane.b32.xlu0 %v2114_v10, %s5433_s8  ;;  %v3692_v10 = vrot.slane %v3690_v3, 4  ;;  %v3025_v17 = vsel %vm5912_vm14, %v3023_v6, %v3024_v7 }
 0x1db   : > { %3161 = vst.msk [vmem:[#allocation3 + $0x28] sm:$0xf] %vm3150_vm8, %v3075_v15  ;;  %v3409_v15 = vld [vmem:[#allocation2 + $0x98] sm:$0x1] }
 0x1dc   : > { %2198 = vrot.lane.b32.xlu1 %v2113_v18, %s5433_s8  ;;  %v3267_v31 = vpop.permute.xlu0 %3266  ;;  %v3677_v18 = vrot.slane %v3675_v8, 5  ;;  %v3696_v30 = vor.u32 %v3695_v14, %v3692_v10  ;;  %v3685_v37 = vshll.u32 %v3409_v15, 16  ;;  %v3973_v8 = vld [vmem:[#allocation2 + $0xa4] sm:$0x1]  ;;  %v2325_v15 = vld [vmem:[#allocation2 + $0xac] sm:$0xf] }
 0x1dd   : > { %3354 = vst.msk [vmem:[#allocation3 + $0x24] sm:$0xf] %vm3344_vm9, %v3267_v31  ;;  %v2655_v39 = vshll.u32 %v2325_v15, 16 }
 0x1de   : > { %v3265_v41 = vpop.permute.xlu1 %3264  ;;  %2757 = vrot.lane.b32.xlu0 %v2586_v29, %s5434_s9  ;;  %v3673_v29 = vrot.slane %v3672_v55, 4  ;;  %v2627_v55 = vrot.slane %v2625_v1, 5 }
 0x1df   : > { %3353 = vst.msk [vmem:[#allocation3 + $0x20] sm:$0xf] %vm3344_vm9, %v3265_v41  ;;  %v3412_v41 = vld [vmem:[#allocation2 + $0xa4] sm:$0x1] }
 0x1e0   : > { %2202 = vrot.lane.b32.xlu1 %v2115_v34, %s5433_s8  ;;  %v3271_v47 = vpop.permute.xlu0 %3270  ;;  %v3682_v34 = vor.u32 %v3681_v19, %v3677_v18  ;;  %v3678_v33 = vsel %vm5585_vm11, %v3673_v29, %v3677_v18  ;;  %v3709_v44 = vshll.u32 %v3412_v41, 16  ;;  %v4116_v18 = vrot.slane %v3973_v8, 5 }
 0x1e1   : > { %3356 = vst.msk [vmem:[#allocation3 + $0x2c] sm:$0xf] %vm3344_vm9, %v3271_v47  ;;  %v3207_v47 = vld [vmem:[#allocation2 + $0xa0] sm:$0xf] }
 0x1e2   : > { %v3269_v50 = vpop.permute.xlu1 %3268  ;;  %2761 = vrot.lane.b32.xlu0 %v2610_v42, %s5434_s9  ;;  %v3697_v42 = vrot.slane %v3696_v30, 4  ;;  %v3683_v43 = vrot.slane %v3682_v34, 4  ;;  %v3711_v56 = vrot.slane %v3709_v44, 5  ;;  %v2657_v44 = vrot.slane %v2655_v39, 5 }
 0x1e3   : > { %3355 = vst.msk [vmem:[#allocation3 + $0x28] sm:$0xf] %vm3344_vm9, %v3269_v50  ;;  %v3969_v50 = vld [vmem:[#allocation2 + $0x94] sm:$0xf] }
 0x1e4   : > { %2759 = vrot.lane.b32.xlu1 %v2596_v2, %s5434_s9  ;;  %v3828_v24 = vpop.permute.xlu0 %3827  ;;  %v3687_v2 = vrot.slane %v3685_v37, 5  ;;  %v3702_v49 = vsel %vm5585_vm11, %v3697_v42, %v3701_v27  ;;  %v3712_v6 = vsel %vm5585_vm11, %v3707_v46, %v3711_v56  ;;  %v2633_v37 = vrot.slane %v2631_v35, 5  ;;  %v2118_v42 = vld [vmem:[#allocation2 + $0xa8] sm:$0xf] }
 0x1e5   : > { %3915 = vst.msk [vmem:[#allocation3 + $0x24] sm:$0xf] %vm3905_vm12, %v3828_v24  ;;  %v2637_v27 = vrot.slane %v2635_v0, 4  ;;  %v3414_v0 = vld [vmem:[#allocation2 + $0xac] sm:$0xf] }
 0x1e6   : > { %v3826_v61 = vpop.permute.xlu1 %3825  ;;  %3094 = vrot.lane.b32.xlu0 %v3015_v52, %s5435_s10  ;;  %v3971_v52 = vld [vmem:[#allocation2 + $0x9c] sm:$0xe]  ;;  %v3688_v24 = vsel %vm5585_vm11, %v3683_v43, %v3687_v2  ;;  %v2117_v43 = vld [vmem:[#allocation2 + $0xa0] sm:$0xf] }
 0x1e7   : > { %3914 = vst.msk [vmem:[#allocation3 + $0x20] sm:$0xf] %vm3905_vm12, %v3826_v61  ;;  %v3970_v61 = vld [vmem:[#allocation2 + $0x98] sm:$0x1]  ;;  %v2638_v2 = vor.u32 %v2637_v27, %v2633_v37  ;;  %v3727_v27 = vshrl.u32 %v3414_v0, 16 }
 0x1e8   : > { %2763 = vrot.lane.b32.xlu1 %v2620_v57, %s5434_s9  ;;  %v3832_v5 = vpop.permute.xlu0 %3831  ;;  %v4106_v57 = vrot.slane %v3969_v50, 5  ;;  %v2326_v50 = vld [vmem:[#allocation2 + $0xb0] sm:$0x1] }
 0x1e9   : > { %3917 = vst.msk [vmem:[#allocation3 + $0x2c] sm:$0xf] %vm3905_vm12, %v3832_v5  ;;  %v2324_v5 = vld [vmem:[#allocation2 + $0xa8] sm:$0xf] }
 0x1ea   : > { %v3830_v11 = vpop.permute.xlu1 %3829  ;;  %3098 = vrot.lane.b32.xlu0 %v3022_v54, %s5435_s10  ;;  %v5165_v54 = vrot.slane %v3971_v52, 9  ;;  %v4107_v58 = vsel %vm5912_vm14, %v5164_v51, %v4106_v57  ;;  %v4108_v7 = vrot.slane %v4106_v57, 4  ;;  %v2646_v10 = vshrl.u32 %v2324_v5, 16 }
 0x1eb   : > { %3916 = vst.msk [vmem:[#allocation3 + $0x28] sm:$0xf] %vm3905_vm12, %v3830_v11  ;;  %v2649_v14 = vshll.u32 %v2324_v5, 16  ;;  %v2665_v57 = vshll.u32 %v2326_v50, 16  ;;  %v3415_v50 = vld [vmem:[#allocation2 + $0xb0] sm:$0x1] }
 0x1ec   : > { %3096 = vrot.lane.b32.xlu1 %v3018_v62, %s5435_s10  ;;  %v4165_v16 = vpop.permute.xlu0 %4164  ;;  %v4109_v62 = vrot.slane %v3970_v61, 5  ;;  %v4114_v11 = vsel %vm5912_vm14, %v5165_v54, %v4113_v4  ;;  %v2648_v30 = vrot.slane %v2646_v10, 4  ;;  %v2885_v54 = vld [vmem:[#allocation2 + $0xa8] sm:$0xe]  ;;  %v3416_v10 = vld [vmem:[#allocation2 + $0xb4] sm:$0xf] }
 0x1ed   : > { %4252 = vst.msk [vmem:[#allocation3 + $0x24] sm:$0xf] %vm4242_vm13, %v4165_v16  ;;  %v5151_v8 = vrot.slane %v2885_v54, 9 }
 0x1ee   : > { %v4163_v22 = vpop.permute.xlu1 %4162  ;;  %3288 = vrot.lane.b32.xlu0 %v3204_v13, %s5436_s13  ;;  %v2624_v13 = vrot.slane %v2622_v63, 4  ;;  %v4110_v19 = vsel %vm5912_vm14, %v4108_v7, %v4109_v62  ;;  %v3413_v63 = vld [vmem:[#allocation2 + $0xa8] sm:$0xf]  ;;  %v2884_v62 = vld [vmem:[#allocation2 + $0xa4] sm:$0x1] }
 0x1ef   : > { %4251 = vst.msk [vmem:[#allocation3 + $0x20] sm:$0xf] %vm4242_vm13, %v4163_v22  ;;  %v3717_v12 = vshll.u32 %v3413_v63, 16 }
 0x1f0   : > { %3100 = vrot.lane.b32.xlu1 %v3025_v17, %s5435_s10  ;;  %v4169_v31 = vpop.permute.xlu0 %4168  ;;  %v4115_v17 = vrot.slane %v4113_v4, 4  ;;  %v2628_v29 = vor.u32 %v2627_v55, %v2624_v13  ;;  %v2667_v4 = vrot.slane %v2665_v57, 5 }
 0x1f1   : > { %4254 = vst.msk [vmem:[#allocation3 + $0x2c] sm:$0xf] %vm4242_vm13, %v4169_v31  ;;  %v2651_v31 = vrot.slane %v2649_v14, 5 }
 0x1f2   : > { %v4167_v38 = vpop.permute.xlu1 %4166  ;;  %3292 = vrot.lane.b32.xlu0 %v3206_v26, %s5436_s13  ;;  %v2116_v26 = vld [vmem:[#allocation2 + $0x9c] sm:$0xf]  ;;  %v4117_v34 = vsel %vm5912_vm14, %v4115_v17, %v4116_v18  ;;  %v3031_v17 = vrot.slane %v2884_v62, 5  ;;  %v2887_v18 = vld [vmem:[#allocation2 + $0xb0] sm:$0x1] }
 0x1f3   : > { %4253 = vst.msk [vmem:[#allocation3 + $0x28] sm:$0xf] %vm4242_vm13, %v4167_v38  ;;  %v2659_v38 = vshrl.u32 %v2325_v15, 16  ;;  %v2652_v45 = vor.u32 %v2651_v31, %v2648_v30  ;;  %v3719_v15 = vrot.slane %v3717_v12, 5  ;;  %v3975_v62 = vld [vmem:[#allocation2 + $0xac] sm:$0xf] }
 0x1f4   : > { %3290 = vrot.lane.b32.xlu1 %v3205_v32, %s5436_s13  ;;  %v2744_v21 = vpop.permute.xlu0 %2743 }
 0x1f5   : > { %2827 = vst.msk [vmem:[#allocation3 + $0x34] sm:$0xf] %vm2813_vm7, %v2744_v21  ;;  %v2629_v21 = vrot.slane %v2628_v29, 4  ;;  %v2653_v51 = vrot.slane %v2652_v45, 4  ;;  %v3741_v29 = vshll.u32 %v3416_v10, 16 }
 0x1f6   : > { %v2742_v36 = vpop.permute.xlu1 %2741  ;;  %v5394_v40 = vld [vmem:[#allocation3 + $0x20] sm:$0xff]   ;;  %3849 = vrot.lane.b32.xlu0 %v3678_v33, %s5437_s18  ;;  %v2323_v33 = vld [vmem:[#allocation2 + $0xa4] sm:$0x1] }
 0x1f7   : > { %2826 = vst.msk [vmem:[#allocation3 + $0x30] sm:$0xf] %vm2813_vm7, %v2742_v36  ;;  %5316 = vmatprep.mubr.msk.bf16.mxu0 %vm4423_vm15, %v5394_v40  ;;  %v2641_v48 = vshll.u32 %v2323_v33, 16  ;;  %v2661_v36 = vrot.slane %v2659_v38, 4  ;;  %v3417_v38 = vld [vmem:[#allocation2 + $0xb8] sm:$0xf] }
 0x1f8   : > { %3294 = vrot.lane.b32.xlu1 %v3207_v47, %s5436_s13  ;;  %v2748_v53 = vpop.permute.xlu0 %2747 }
 0x1f9   : > { %2829 = vst.msk [vmem:[#allocation3 + $0x3c] sm:$0xf] %vm2813_vm7, %v2748_v53  ;;  %v2882_v53 = vld [vmem:[#allocation2 + $0x9c] sm:$0xe]  ;;  %v2643_v46 = vrot.slane %v2641_v48, 5  ;;  %v2662_v56 = vor.u32 %v2661_v36, %v2657_v44  ;;  %v3747_v48 = vshll.u32 %v3417_v38, 16 }
 0x1fa   : > { %v2746_v20 = vpop.permute.xlu1 %2745  ;;  %v5395_v60 = vld [vmem:[#allocation3 + $0x28] sm:$0xff]   ;;  %3853 = vrot.lane.b32.xlu0 %v3702_v49, %s5437_s18  ;;  %v2634_v49 = vsel %vm5585_vm11, %v2629_v21, %v2633_v37  ;;  %v5150_v61 = vrot.slane %v2882_v53, 9  ;;  %v3723_v37 = vshll.u32 %v3414_v0, 16  ;;  %v3743_v21 = vrot.slane %v3741_v29, 5 }
 0x1fb   : > { %2828 = vst.msk [vmem:[#allocation3 + $0x38] sm:$0xf] %vm2813_vm7, %v2746_v20  ;;  %5317 = vmatmul.mubr.msk.bf16.gmra.mxu0 %vm4423_vm15, %v5395_v60  ;;  %v2883_v20 = vld [vmem:[#allocation2 + $0xa0] sm:$0xf]  ;;  %v2658_v60 = vsel %vm5585_vm11, %v2653_v51, %v2657_v44  ;;  %v3751_v44 = vshrl.u32 %v3417_v38, 16 }
 0x1fc   : > { %3851 = vrot.lane.b32.xlu1 %v3688_v24, %s5437_s18  ;;  %v3081_v3 = vpop.permute.xlu0 %3080  ;;  %v2639_v24 = vrot.slane %v2638_v2, 4  ;;  %v3028_v5 = vrot.slane %v2883_v20, 5  ;;  %v3729_v2 = vrot.slane %v3727_v27, 4  ;;  %v2328_v38 = vld [vmem:[#allocation2 + $0xb8] sm:$0xf] }
 0x1fd   : > { %3164 = vst.msk [vmem:[#allocation3 + $0x34] sm:$0xf] %vm3150_vm8, %v3081_v3  ;;  %v2663_v3 = vrot.slane %v2662_v56, 4  ;;  %v3749_v56 = vrot.slane %v3747_v48, 5  ;;  %v3753_v57 = vrot.slane %v3751_v44, 4  ;;  %v2679_v48 = vshll.u32 %v2328_v38, 16 }
 0x1fe   : > { %v3079_v9 = vpop.permute.xlu1 %3078  ;;  %4186 = vrot.lane.b32.xlu0 %v4107_v58, %s5438_s0  ;;  %v2644_v1 = vsel %vm5585_vm11, %v2639_v24, %v2643_v46  ;;  %v3733_v46 = vshll.u32 %v3415_v50, 16  ;;  %v2683_v44 = vshrl.u32 %v2328_v38, 16  ;;  %v2120_v50 = vld [vmem:[#allocation2 + $0xb4] sm:$0xf] }
 0x1ff   : > { %3163 = vst.msk [vmem:[#allocation3 + $0x30] sm:$0xf] %vm3150_vm8, %v3079_v9  ;;  %v3029_v9 = vsel %vm5912_vm14, %v5150_v61, %v3028_v5  ;;  %v2668_v14 = vsel %vm5585_vm11, %v2663_v3, %v2667_v4 }
 0x200   : > { %3855 = vrot.lane.b32.xlu1 %v3712_v6, %s5437_s18  ;;  %v3085_v16 = vpop.permute.xlu0 %3084  ;;  %v2886_v6 = vld [vmem:[#allocation2 + $0xac] sm:$0xf]  ;;  %v3735_v4 = vrot.slane %v3733_v46, 5  ;;  %v2685_v46 = vrot.slane %v2683_v44, 4  ;;  %v3420_v44 = vld [vmem:[#allocation2 + $0xc4] sm:$0xf] }
 0x201   : > { %3166 = vst.msk [vmem:[#allocation3 + $0x3c] sm:$0xf] %vm3150_vm8, %v3085_v16  ;;  %v3035_v55 = vrot.slane %v2886_v6, 5  ;;  %v3030_v16 = vrot.slane %v3028_v5, 4  ;;  %v3754_v5 = vor.u32 %v3753_v57, %v3749_v56 }
 0x202   : > { %v3083_v22 = vpop.permute.xlu1 %3082  ;;  %4190 = vrot.lane.b32.xlu0 %v4114_v11, %s5438_s0  ;;  %v3714_v11 = vshrl.u32 %v3413_v63, 16  ;;  %v3974_v63 = vld [vmem:[#allocation2 + $0xa8] sm:$0xe] }
 0x203   : > { %3165 = vst.msk [vmem:[#allocation3 + $0x38] sm:$0xf] %vm3150_vm8, %v3083_v22  ;;  %v3036_v35 = vsel %vm5912_vm14, %v5151_v8, %v3035_v55  ;;  %v3037_v31 = vrot.slane %v3035_v55, 4 }
 0x204   : > { %4188 = vrot.lane.b32.xlu1 %v4110_v19, %s5438_s0  ;;  %v3275_v32 = vpop.permute.xlu0 %3274  ;;  %v3716_v22 = vrot.slane %v3714_v11, 4  ;;  %v3977_v11 = vld [vmem:[#allocation2 + $0xb4] sm:$0xe] }
 0x205   : > { %3358 = vst.msk [vmem:[#allocation3 + $0x34] sm:$0xf] %vm3344_vm9, %v3275_v32  ;;  %v3038_v32 = vrot.slane %v2887_v18, 5 }
 0x206   : > { %v3273_v41 = vpop.permute.xlu1 %3272  ;;  %2204 = vrot.lane.b32.xlu0 %v2116_v26, %s5433_s8  ;;  %v3738_v26 = vshrl.u32 %v3416_v10, 16  ;;  %v3720_v33 = vor.u32 %v3719_v15, %v3716_v22  ;;  %v3755_v10 = vrot.slane %v3754_v5, 4 }
 0x207   : > { %3357 = vst.msk [vmem:[#allocation3 + $0x30] sm:$0xf] %vm3344_vm9, %v3273_v41  ;;  %v3208_v41 = vld [vmem:[#allocation2 + $0xa8] sm:$0xf]  ;;  %v3039_v45 = vsel %vm5912_vm14, %v3037_v31, %v3038_v32 }
 0x208   : > { %4192 = vrot.lane.b32.xlu1 %v4117_v34, %s5438_s0  ;;  %v3279_v47 = vpop.permute.xlu0 %3278  ;;  %v3032_v34 = vsel %vm5912_vm14, %v3030_v16, %v3031_v17  ;;  %v3721_v51 = vrot.slane %v3720_v33, 4  ;;  %v4120_v16 = vrot.slane %v3975_v62, 5  ;;  %v3978_v17 = vld [vmem:[#allocation2 + $0xb8] sm:$0xf] }
 0x209   : > { %3360 = vst.msk [vmem:[#allocation3 + $0x3c] sm:$0xf] %vm3344_vm9, %v3279_v47  ;;  %v4127_v29 = vrot.slane %v3978_v17, 5  ;;  %v2889_v17 = vld [vmem:[#allocation2 + $0xb8] sm:$0xf] }
 0x20a   : > { %v3277_v40 = vpop.permute.xlu1 %3276  ;;  %2208 = vrot.lane.b32.xlu0 %v2118_v42, %s5433_s8  ;;  %v3740_v42 = vrot.slane %v3738_v26, 4  ;;  %v4122_v32 = vrot.slane %v4120_v16, 4 }
 0x20b   : > { %3359 = vst.msk [vmem:[#allocation3 + $0x38] sm:$0xf] %vm3344_vm9, %v3277_v40 }
 0x20c   : > { %2206 = vrot.lane.b32.xlu1 %v2117_v43, %s5433_s8  ;;  %v3836_v52 = vpop.permute.xlu0 %3835  ;;  %v3725_v43 = vrot.slane %v3723_v37, 5  ;;  %v3979_v37 = vld [vmem:[#allocation2 + $0xbc] sm:$0x1] }
 0x20d   : > { %3919 = vst.msk [vmem:[#allocation3 + $0x34] sm:$0xf] %vm3905_vm12, %v3836_v52  ;;  %v3744_v52 = vor.u32 %v3743_v21, %v3740_v42 }
 0x20e   : > { %v3834_v59 = vpop.permute.xlu1 %3833  ;;  %2765 = vrot.lane.b32.xlu0 %v2634_v49, %s5434_s9  ;;  %v3210_v49 = vld [vmem:[#allocation2 + $0xb4] sm:$0xf]  ;;  %v3730_v24 = vor.u32 %v3729_v2, %v3725_v43  ;;  %v3726_v61 = vsel %vm5585_vm11, %v3721_v51, %v3725_v43  ;;  %v4130_v43 = vrot.slane %v3979_v37, 5 }
 0x20f   : > { %3918 = vst.msk [vmem:[#allocation3 + $0x30] sm:$0xf] %vm3905_vm12, %v3834_v59  ;;  %v3745_v54 = vrot.slane %v3744_v52, 4 }
 0x210   : > { %2210 = vrot.lane.b32.xlu1 %v2119_v23, %s5433_s8  ;;  %v3840_v58 = vpop.permute.xlu0 %3839  ;;  %v3209_v23 = vld [vmem:[#allocation2 + $0xac] sm:$0xf]  ;;  %v3731_v3 = vrot.slane %v3730_v24, 4  ;;  %v2681_v24 = vrot.slane %v2679_v48, 5 }
 0x211   : > { %3921 = vst.msk [vmem:[#allocation3 + $0x3c] sm:$0xf] %vm3905_vm12, %v3840_v58  ;;  %v3750_v8 = vsel %vm5585_vm11, %v3745_v54, %v3749_v56 }
 0x212   : > { %v3838_v7 = vpop.permute.xlu1 %3837  ;;  %2769 = vrot.lane.b32.xlu0 %v2658_v60, %s5434_s9  ;;  %v3418_v60 = vld [vmem:[#allocation2 + $0xbc] sm:$0x1]  ;;  %v3736_v55 = vsel %vm5585_vm11, %v3731_v3, %v3735_v4 }
 0x213   : > { %3920 = vst.msk [vmem:[#allocation3 + $0x38] sm:$0xf] %vm3905_vm12, %v3838_v7  ;;  %v3757_v6 = vshll.u32 %v3418_v60, 16  ;;  %v2122_v60 = vld [vmem:[#allocation2 + $0xc0] sm:$0xf] }
 0x214   : > { %2767 = vrot.lane.b32.xlu1 %v2644_v1, %s5434_s9  ;;  %v4173_v13 = vpop.permute.xlu0 %4172  ;;  %v3211_v1 = vld [vmem:[#allocation2 + $0xb8] sm:$0xf] }
 0x215   : > { %4256 = vst.msk [vmem:[#allocation3 + $0x34] sm:$0xf] %vm4242_vm13, %v4173_v13  ;;  %v2327_v13 = vld [vmem:[#allocation2 + $0xb4] sm:$0xf] }
 0x216   : > { %v4171_v19 = vpop.permute.xlu1 %4170  ;;  %3102 = vrot.lane.b32.xlu0 %v3029_v9, %s5435_s10  ;;  %v5166_v9 = vrot.slane %v3974_v63, 9  ;;  %v2670_v22 = vshrl.u32 %v2327_v13, 16  ;;  %v2673_v15 = vshll.u32 %v2327_v13, 16  ;;  %v2121_v63 = vld [vmem:[#allocation2 + $0xb8] sm:$0xf] }
 0x217   : > { %4255 = vst.msk [vmem:[#allocation3 + $0x30] sm:$0xf] %vm4242_vm13, %v4171_v19  ;;  %v3976_v19 = vld [vmem:[#allocation2 + $0xb0] sm:$0x1] }
 0x218   : > { %2771 = vrot.lane.b32.xlu1 %v2668_v14, %s5434_s9  ;;  %v4177_v30 = vpop.permute.xlu0 %4176  ;;  %v3759_v14 = vrot.slane %v3757_v6, 5  ;;  %v4121_v0 = vsel %vm5912_vm14, %v5166_v9, %v4120_v16  ;;  %v2675_v33 = vrot.slane %v2673_v15, 5 }
 0x219   : > { %4258 = vst.msk [vmem:[#allocation3 + $0x3c] sm:$0xf] %vm4242_vm13, %v4177_v30  ;;  %v2330_v30 = vld [vmem:[#allocation2 + $0xc0] sm:$0xf] }
 0x21a   : > { %v4175_v39 = vpop.permute.xlu1 %4174  ;;  %3106 = vrot.lane.b32.xlu0 %v3036_v35, %s5435_s10  ;;  %v5167_v35 = vrot.slane %v3977_v11, 9  ;;  %v3760_v31 = vsel %vm5585_vm11, %v3755_v10, %v3759_v14  ;;  %v2694_v42 = vshrl.u32 %v2330_v30, 16  ;;  %v2697_v21 = vshll.u32 %v2330_v30, 16  ;;  %v2888_v11 = vld [vmem:[#allocation2 + $0xb4] sm:$0xe] }
 0x21b   : > { %4257 = vst.msk [vmem:[#allocation3 + $0x38] sm:$0xf] %vm4242_vm13, %v4175_v39  ;;  %v3042_v30 = vrot.slane %v2889_v17, 5 }
 0x21c   : > { %3104 = vrot.lane.b32.xlu1 %v3032_v34, %s5435_s10  ;;  %v2193_v47 = vpop.permute.xlu0 %2192  ;;  %v4123_v34 = vrot.slane %v3976_v19, 5  ;;  %v4128_v39 = vsel %vm5912_vm14, %v5167_v35, %v4127_v29  ;;  %v2696_v51 = vrot.slane %v2694_v42, 4  ;;  %v2699_v52 = vrot.slane %v2697_v21, 5  ;;  %v2891_v35 = vld [vmem:[#allocation2 + $0xc0] sm:$0xe] }
 0x21d   : > { %2271 = vst.msk [vmem:[#allocation3 + $0x48] sm:$0xf] %vm2252_vm2, %v2193_v47  ;;  %v4129_v47 = vrot.slane %v4127_v29, 4  ;;  %v5152_v19 = vrot.slane %v2888_v11, 9  ;;  %v5153_v37 = vrot.slane %v2891_v35, 9 }
 0x21e   : > { %v2191_v36 = vpop.permute.xlu1 %2190  ;;  %v5396_v40 = vld [vmem:[#allocation3 + $0x30] sm:$0xff]   ;;  %3296 = vrot.lane.b32.xlu0 %v3208_v41, %s5436_s13  ;;  %v2672_v41 = vrot.slane %v2670_v22, 4  ;;  %v4124_v2 = vsel %vm5912_vm14, %v4122_v32, %v4123_v34  ;;  %v2700_v54 = vor.u32 %v2699_v52, %v2696_v51  ;;  %v3419_v22 = vld [vmem:[#allocation2 + $0xc0] sm:$0xf]  ;;  %v2890_v34 = vld [vmem:[#allocation2 + $0xbc] sm:$0x1] }
 0x21f   : > { %2270 = vst.msk [vmem:[#allocation3 + $0x44] sm:$0xf] %vm2252_vm2, %v2191_v36  ;;  %5320 = vmatprep.mubr.msk.bf16.mxu0 %vm4423_vm15, %v5396_v40  ;;  %v2331_v40 = vld [vmem:[#allocation2 + $0xc4] sm:$0xf]  ;;  %v3765_v38 = vshll.u32 %v3419_v22, 16 }
 0x220   : > { %3108 = vrot.lane.b32.xlu1 %v3039_v45, %s5435_s10  ;;  %v2750_v53 = vpop.permute.xlu0 %2749  ;;  %v2703_v56 = vshll.u32 %v2331_v40, 16  ;;  %v2707_v57 = vshrl.u32 %v2331_v40, 16  ;;  %v3422_v42 = vld [vmem:[#allocation2 + $0xcc] sm:$0xf] }
 0x221   : > { %2830 = vst.msk [vmem:[#allocation3 + $0x40] sm:$0xf] %vm2813_vm7, %v2750_v53  ;;  %v4131_v53 = vsel %vm5912_vm14, %v4129_v47, %v4130_v43  ;;  %v3045_v47 = vrot.slane %v2890_v34, 5  ;;  %v2893_v43 = vld [vmem:[#allocation2 + $0xc8] sm:$0x1]  ;;  %v3767_v40 = vrot.slane %v3765_v38, 5 }
 0x222   : > { %v2195_v59 = vpop.permute.xlu1 %2194  ;;  %v5397_v20 = vld [vmem:[#allocation3 + $0x38] sm:$0xff]   ;;  %3300 = vrot.lane.b32.xlu0 %v3210_v49, %s5436_s13  ;;  %v2676_v49 = vor.u32 %v2675_v33, %v2672_v41  ;;  %v2705_v4 = vrot.slane %v2703_v56, 5  ;;  %v2709_v5 = vrot.slane %v2707_v57, 4  ;;  %v3981_v34 = vld [vmem:[#allocation2 + $0xc4] sm:$0xf] }
 0x223   : > { %2272 = vst.msk [vmem:[#allocation3 + $0x4c] sm:$0xf] %vm2252_vm2, %v2195_v59  ;;  %5321 = vmatmul.mubr.msk.bf16.gmra.mxu0 %vm4423_vm15, %v5397_v20  ;;  %v2329_v20 = vld [vmem:[#allocation2 + $0xbc] sm:$0x1]  ;;  %v3423_v57 = vld [vmem:[#allocation2 + $0xd0] sm:$0xf] }
 0x224   : > { %3298 = vrot.lane.b32.xlu1 %v3209_v23, %s5436_s13  ;;  %v2754_v58 = vpop.permute.xlu0 %2753  ;;  %v2689_v3 = vshll.u32 %v2329_v20, 16  ;;  %v2710_v10 = vor.u32 %v2709_v5, %v2705_v4  ;;  %v3983_v38 = vld [vmem:[#allocation2 + $0xcc] sm:$0xe] }
 0x225   : > { %2832 = vst.msk [vmem:[#allocation3 + $0x48] sm:$0xf] %vm2813_vm7, %v2754_v58 }
 0x226   : > { %v2752_v7 = vpop.permute.xlu1 %2751  ;;  %3857 = vrot.lane.b32.xlu0 %v3726_v61, %s5437_s18  ;;  %v2677_v61 = vrot.slane %v2676_v49, 4  ;;  %v3789_v49 = vshll.u32 %v3422_v42, 16 }
 0x227   : > { %2831 = vst.msk [vmem:[#allocation3 + $0x44] sm:$0xf] %vm2813_vm7, %v2752_v7  ;;  %v2332_v7 = vld [vmem:[#allocation2 + $0xc8] sm:$0x1] }
 0x228   : > { %3302 = vrot.lane.b32.xlu1 %v3211_v1, %s5436_s13  ;;  %v3087_v12 = vpop.permute.xlu0 %3086  ;;  %v2686_v1 = vor.u32 %v2685_v46, %v2681_v24  ;;  %v2682_v62 = vsel %vm5585_vm11, %v2677_v61, %v2681_v24  ;;  %v2713_v14 = vshll.u32 %v2332_v7, 16  ;;  %v3771_v24 = vshll.u32 %v3420_v44, 16  ;;  %v3421_v7 = vld [vmem:[#allocation2 + $0xc8] sm:$0x1] }
 0x229   : > { %3167 = vst.msk [vmem:[#allocation3 + $0x40] sm:$0xf] %vm3150_vm8, %v3087_v12  ;;  %v2123_v12 = vld [vmem:[#allocation2 + $0xc4] sm:$0xf]  ;;  %v3775_v46 = vshrl.u32 %v3420_v44, 16  ;;  %v3791_v61 = vrot.slane %v3789_v49, 5 }
 0x22a   : > { %v2756_v18 = vpop.permute.xlu1 %2755  ;;  %3861 = vrot.lane.b32.xlu0 %v3750_v8, %s5437_s18  ;;  %v2701_v8 = vrot.slane %v2700_v54, 4  ;;  %v2687_v13 = vrot.slane %v2686_v1, 4  ;;  %v2715_v29 = vrot.slane %v2713_v14, 5 }
 0x22b   : > { %2833 = vst.msk [vmem:[#allocation3 + $0x4c] sm:$0xf] %vm2813_vm7, %v2756_v18  ;;  %v3777_v1 = vrot.slane %v3775_v46, 4 }
 0x22c   : > { %3859 = vrot.lane.b32.xlu1 %v3736_v55, %s5437_s18  ;;  %v3091_v26 = vpop.permute.xlu0 %3090  ;;  %v2691_v55 = vrot.slane %v2689_v3, 5  ;;  %v2706_v18 = vsel %vm5585_vm11, %v2701_v8, %v2705_v4  ;;  %v3795_v3 = vshll.u32 %v3423_v57, 16  ;;  %v3799_v4 = vshrl.u32 %v3423_v57, 16 }
 0x22d   : > { %3169 = vst.msk [vmem:[#allocation3 + $0x48] sm:$0xf] %vm3150_vm8, %v3091_v26  ;;  %v2711_v26 = vrot.slane %v2710_v10, 4 }
 0x22e   : > { %v3089_v27 = vpop.permute.xlu1 %3088  ;;  %4194 = vrot.lane.b32.xlu0 %v4121_v0, %s5438_s0  ;;  %v2692_v15 = vsel %vm5585_vm11, %v2687_v13, %v2691_v55  ;;  %v3781_v55 = vshll.u32 %v3421_v7, 16  ;;  %v3797_v10 = vrot.slane %v3795_v3, 5  ;;  %v3801_v14 = vrot.slane %v3799_v4, 4 }
 0x22f   : > { %3168 = vst.msk [vmem:[#allocation3 + $0x44] sm:$0xf] %vm3150_vm8, %v3089_v27  ;;  %v3043_v27 = vsel %vm5912_vm14, %v5152_v19, %v3042_v30  ;;  %v2716_v21 = vsel %vm5585_vm11, %v2711_v26, %v2715_v29 }
 0x230   : > { %3863 = vrot.lane.b32.xlu1 %v3760_v31, %s5437_s18  ;;  %v3281_v45 = vpop.permute.xlu0 %3280  ;;  %v2892_v31 = vld [vmem:[#allocation2 + $0xc4] sm:$0xf]  ;;  %v3783_v29 = vrot.slane %v3781_v55, 5 }
 0x231   : > { %3361 = vst.msk [vmem:[#allocation3 + $0x40] sm:$0xf] %vm3344_vm9, %v3281_v45  ;;  %v3049_v33 = vrot.slane %v2892_v31, 5  ;;  %v3044_v45 = vrot.slane %v3042_v30, 4  ;;  %v3802_v30 = vor.u32 %v3801_v14, %v3797_v10 }
 0x232   : > { %v3093_v36 = vpop.permute.xlu1 %3092  ;;  %4198 = vrot.lane.b32.xlu0 %v4128_v39, %s5438_s0  ;;  %v3762_v39 = vshrl.u32 %v3419_v22, 16  ;;  %v3980_v22 = vld [vmem:[#allocation2 + $0xc0] sm:$0xe] }
 0x233   : > { %3170 = vst.msk [vmem:[#allocation3 + $0x4c] sm:$0xf] %vm3150_vm8, %v3093_v36  ;;  %v3050_v48 = vsel %vm5912_vm14, %v5153_v37, %v3049_v33  ;;  %v3051_v52 = vrot.slane %v3049_v33, 4  ;;  %v3803_v33 = vrot.slane %v3802_v30, 4 }
 0x234   : > { %4196 = vrot.lane.b32.xlu1 %v4124_v2, %s5438_s0  ;;  %v3285_v23 = vpop.permute.xlu0 %3284  ;;  %v3764_v36 = vrot.slane %v3762_v39, 4 }
 0x235   : > { %3363 = vst.msk [vmem:[#allocation3 + $0x48] sm:$0xf] %vm3344_vm9, %v3285_v23  ;;  %v3046_v23 = vsel %vm5912_vm14, %v3044_v45, %v3045_v47  ;;  %v3982_v47 = vld [vmem:[#allocation2 + $0xc8] sm:$0x1] }
 0x236   : > { %v3283_v59 = vpop.permute.xlu1 %3282  ;;  %2212 = vrot.lane.b32.xlu0 %v2120_v50, %s5433_s8  ;;  %v3786_v50 = vshrl.u32 %v3422_v42, 16  ;;  %v3768_v20 = vor.u32 %v3767_v40, %v3764_v36 }
 0x237   : > { %3362 = vst.msk [vmem:[#allocation3 + $0x44] sm:$0xf] %vm3344_vm9, %v3283_v59  ;;  %v3212_v59 = vld [vmem:[#allocation2 + $0xc0] sm:$0xf] }
 0x238   : > { %4200 = vrot.lane.b32.xlu1 %v4131_v53, %s5438_s0  ;;  %v3842_v58 = vpop.permute.xlu0 %3841  ;;  %v3052_v53 = vrot.slane %v2893_v43, 5  ;;  %v3769_v8 = vrot.slane %v3768_v20, 4  ;;  %v3984_v43 = vld [vmem:[#allocation2 + $0xd0] sm:$0xf] }
 0x239   : > { %3922 = vst.msk [vmem:[#allocation3 + $0x40] sm:$0xf] %vm3905_vm12, %v3842_v58  ;;  %v4141_v49 = vrot.slane %v3984_v43, 5 }
 0x23a   : > { %v3287_v6 = vpop.permute.xlu1 %3286  ;;  %2216 = vrot.lane.b32.xlu0 %v2122_v60, %s5433_s8  ;;  %v3788_v60 = vrot.slane %v3786_v50, 4  ;;  %v3053_v54 = vsel %vm5912_vm14, %v3051_v52, %v3052_v53  ;;  %v4137_v50 = vrot.slane %v3982_v47, 5  ;;  %v3985_v52 = vld [vmem:[#allocation2 + $0xd4] sm:$0x1] }
 0x23b   : > { %3364 = vst.msk [vmem:[#allocation3 + $0x4c] sm:$0xf] %vm3344_vm9, %v3287_v6  ;;  %v4144_v46 = vrot.slane %v3985_v52, 5 }
 0x23c   : > { %2214 = vrot.lane.b32.xlu1 %v2121_v63, %s5433_s8  ;;  %v3846_v9 = vpop.permute.xlu0 %3845  ;;  %v3773_v63 = vrot.slane %v3771_v24, 5  ;;  %v4143_v24 = vrot.slane %v4141_v49, 4 }
 0x23d   : > { %3924 = vst.msk [vmem:[#allocation3 + $0x48] sm:$0xf] %vm3905_vm12, %v3846_v9  ;;  %v3792_v9 = vor.u32 %v3791_v61, %v3788_v60 }
 0x23e   : > { %v3844_v16 = vpop.permute.xlu1 %3843  ;;  %2773 = vrot.lane.b32.xlu0 %v2682_v62, %s5434_s9  ;;  %v3214_v62 = vld [vmem:[#allocation2 + $0xcc] sm:$0xf]  ;;  %v3778_v13 = vor.u32 %v3777_v1, %v3773_v63  ;;  %v3774_v19 = vsel %vm5585_vm11, %v3769_v8, %v3773_v63 }
 0x23f   : > { %3923 = vst.msk [vmem:[#allocation3 + $0x44] sm:$0xf] %vm3905_vm12, %v3844_v16  ;;  %v3793_v35 = vrot.slane %v3792_v9, 4 }
 0x240   : > { %2218 = vrot.lane.b32.xlu1 %v2123_v12, %s5433_s8  ;;  %v4179_v0 = vpop.permute.xlu0 %4178  ;;  %v3213_v12 = vld [vmem:[#allocation2 + $0xc4] sm:$0xf]  ;;  %v3779_v26 = vrot.slane %v3778_v13, 4 }
 0x241   : > { %4259 = vst.msk [vmem:[#allocation3 + $0x40] sm:$0xf] %vm4242_vm13, %v4179_v0  ;;  %v3798_v37 = vsel %vm5585_vm11, %v3793_v35, %v3797_v10 }
 0x242   : > { %v3848_v32 = vpop.permute.xlu1 %3847  ;;  %2777 = vrot.lane.b32.xlu0 %v2706_v18, %s5434_s9  ;;  %v3424_v18 = vld [vmem:[#allocation2 + $0xd4] sm:$0x1] }
 0x243   : > { %3925 = vst.msk [vmem:[#allocation3 + $0x4c] sm:$0xf] %vm3905_vm12, %v3848_v32  ;;  %v3805_v31 = vshll.u32 %v3424_v18, 16 }
 0x244   : > { %2775 = vrot.lane.b32.xlu1 %v2692_v15, %s5434_s9  ;;  %v4183_v41 = vpop.permute.xlu0 %4182  ;;  %v3215_v15 = vld [vmem:[#allocation2 + $0xd0] sm:$0xf] }
 0x245   : > { %4261 = vst.msk [vmem:[#allocation3 + $0x48] sm:$0xf] %vm4242_vm13, %v4183_v41  ;;  %v3784_v41 = vsel %vm5585_vm11, %v3779_v26, %v3783_v29  ;;  %v3807_v42 = vrot.slane %v3805_v31, 5 }
 0x246   : > { %v4181_v2 = vpop.permute.xlu1 %4180  ;;  %3110 = vrot.lane.b32.xlu0 %v3043_v27, %s5435_s10  ;;  %v5168_v27 = vrot.slane %v3980_v22, 9 }
 0x247   : > { %4260 = vst.msk [vmem:[#allocation3 + $0x44] sm:$0xf] %vm4242_vm13, %v4181_v2  ;;  %v3808_v36 = vsel %vm5585_vm11, %v3803_v33, %v3807_v42 }
 0x248   : > { %2779 = vrot.lane.b32.xlu1 %v2716_v21, %s5434_s9  ;;  %v2197_v51 = vpop.permute.xlu0 %2196  ;;  %v4134_v21 = vrot.slane %v3981_v34, 5 }
 0x249   : > { %2273 = vst.msk [vmem:[#allocation3 + $0x50] sm:$0xf] %vm2252_vm2, %v2197_v51 }
 0x24a   : > { %v4185_v56 = vpop.permute.xlu1 %4184  ;;  %3114 = vrot.lane.b32.xlu0 %v3050_v48, %s5435_s10  ;;  %v4135_v2 = vsel %vm5912_vm14, %v5168_v27, %v4134_v21  ;;  %v5169_v48 = vrot.slane %v3983_v38, 9  ;;  %v4136_v40 = vrot.slane %v4134_v21, 4 }
 0x24b   : > { %4262 = vst.msk [vmem:[#allocation3 + $0x4c] sm:$0xf] %vm4242_vm13, %v4185_v56 }
 0x24c   : > { %3112 = vrot.lane.b32.xlu1 %v3046_v23, %s5435_s10  ;;  %v2201_v58 = vpop.permute.xlu0 %2200  ;;  %v4142_v53 = vsel %vm5912_vm14, %v5169_v48, %v4141_v49  ;;  %v4138_v25 = vsel %vm5912_vm14, %v4136_v40, %v4137_v50 }
 0x24d   : > { %2275 = vst.msk [vmem:[#allocation3 + $0x58] sm:$0xf] %vm2252_vm2, %v2201_v58 }
 0x24e   : > { %v2199_v5 = vpop.permute.xlu1 %2198  ;;  %v5398_v6 = vld [vmem:[#allocation3 + $0x40] sm:$0xff]   ;;  %3304 = vrot.lane.b32.xlu0 %v3212_v59, %s5436_s13  ;;  %v4145_v59 = vsel %vm5912_vm14, %v4143_v24, %v4144_v46 }
 0x24f   : > { %2274 = vst.msk [vmem:[#allocation3 + $0x54] sm:$0xf] %vm2252_vm2, %v2199_v5  ;;  %5324 = vmatprep.mubr.msk.bf16.mxu1 %vm4423_vm15, %v5398_v6 }
 0x250   : > { %3116 = vrot.lane.b32.xlu1 %v3053_v54, %s5435_s10  ;;  %v2758_v11 = vpop.permute.xlu0 %2757 }
 0x251   : > { %2834 = vst.msk [vmem:[#allocation3 + $0x50] sm:$0xf] %vm2813_vm7, %v2758_v11 }
 0x252   : > { %v2203_v16 = vpop.permute.xlu1 %2202  ;;  %v5399_v17 = vld [vmem:[#allocation3 + $0x48] sm:$0xff]   ;;  %3308 = vrot.lane.b32.xlu0 %v3214_v62, %s5436_s13 }
 0x253   : > { %2276 = vst.msk [vmem:[#allocation3 + $0x5c] sm:$0xf] %vm2252_vm2, %v2203_v16  ;;  %5325 = vmatmul.mubr.msk.bf16.vlgmr.msra.gmra.mxu1 %vm4423_vm15, %v5399_v17 }
 0x254   : > { %3306 = vrot.lane.b32.xlu1 %v3213_v12, %s5436_s13  ;;  %v2762_v0 = vpop.permute.xlu0 %2761 }
 0x255   : > { %2836 = vst.msk [vmem:[#allocation3 + $0x58] sm:$0xf] %vm2813_vm7, %v2762_v0 }
 0x256   : > { %v2760_v32 = vpop.permute.xlu1 %2759  ;;  %3865 = vrot.lane.b32.xlu0 %v3774_v19, %s5437_s18 }
 0x257   : > { %2835 = vst.msk [vmem:[#allocation3 + $0x54] sm:$0xf] %vm2813_vm7, %v2760_v32 }
 0x258   : > { %3310 = vrot.lane.b32.xlu1 %v3215_v15, %s5436_s13  ;;  %v3095_v39 = vpop.permute.xlu0 %3094 }
 0x259   : > { %3171 = vst.msk [vmem:[#allocation3 + $0x50] sm:$0xf] %vm3150_vm8, %v3095_v39 }
 0x25a   : > { %v2764_v45 = vpop.permute.xlu1 %2763  ;;  %3869 = vrot.lane.b32.xlu0 %v3798_v37, %s5437_s18 }
 0x25b   : > { %2837 = vst.msk [vmem:[#allocation3 + $0x5c] sm:$0xf] %vm2813_vm7, %v2764_v45 }
 0x25c   : > { %3867 = vrot.lane.b32.xlu1 %v3784_v41, %s5437_s18  ;;  %v3099_v44 = vpop.permute.xlu0 %3098 }
 0x25d   : > { %3173 = vst.msk [vmem:[#allocation3 + $0x58] sm:$0xf] %vm3150_vm8, %v3099_v44 }
 0x25e   : > { %v3097_v51 = vpop.permute.xlu1 %3096  ;;  %4202 = vrot.lane.b32.xlu0 %v4135_v2, %s5438_s0 }
 0x25f   : > { %3172 = vst.msk [vmem:[#allocation3 + $0x54] sm:$0xf] %vm3150_vm8, %v3097_v51 }
 0x260   : > { %3871 = vrot.lane.b32.xlu1 %v3808_v36, %s5437_s18  ;;  %v3289_v23 = vpop.permute.xlu0 %3288 }
 0x261   : > { %3365 = vst.msk [vmem:[#allocation3 + $0x50] sm:$0xf] %vm3344_vm9, %v3289_v23 }
 0x262   : > { %v3101_v56 = vpop.permute.xlu1 %3100  ;;  %4206 = vrot.lane.b32.xlu0 %v4142_v53, %s5438_s0 }
 0x263   : > { %3174 = vst.msk [vmem:[#allocation3 + $0x5c] sm:$0xf] %vm3150_vm8, %v3101_v56 }
 0x264   : > { %4204 = vrot.lane.b32.xlu1 %v4138_v25, %s5438_s0  ;;  %v3293_v57 = vpop.permute.xlu0 %3292 }
 0x265   : > { %3367 = vst.msk [vmem:[#allocation3 + $0x58] sm:$0xf] %vm3344_vm9, %v3293_v57 }
 0x266   : > { %v3291_v20 = vpop.permute.xlu1 %3290 }
 0x267   : > { %3366 = vst.msk [vmem:[#allocation3 + $0x54] sm:$0xf] %vm3344_vm9, %v3291_v20 }
 0x268   : > { %4208 = vrot.lane.b32.xlu1 %v4145_v59, %s5438_s0  ;;  %v3850_v60 = vpop.permute.xlu0 %3849 }
 0x269   : > { %3926 = vst.msk [vmem:[#allocation3 + $0x50] sm:$0xf] %vm3905_vm12, %v3850_v60 }
 0x26a   : > { %v3295_v61 = vpop.permute.xlu1 %3294 }
 0x26b   : > { %3368 = vst.msk [vmem:[#allocation3 + $0x5c] sm:$0xf] %vm3344_vm9, %v3295_v61  ;;  %v5310_v28 = vpop.f32.mrf.mxu0 }
 0x26c   : > { %v3854_v54 = vpop.permute.xlu0 %3853  ;;  %v5247_v58 = vpack.c.bf16 %v5310_v28, %v5310_v28  ;;  %v4709_v62 = vmul.f32 %v5310_v28, %v5310_v28  ;;  %v4641_v16 = vsel %vm4637_vm4, %v5310_v28, 0.0 }
 0x26d   : > { %3928 = vst.msk [vmem:[#allocation3 + $0x58] sm:$0xf] %vm3905_vm12, %v3854_v54  ;;  %v4510_v1 = vpop.f32.mrf.mxu0 }
 0x26e   : > { %v3852_v63 = vpop.permute.xlu1 %3851  ;;  %4942 = vst.msk [vmem:[%s6832_s28 + $0x8] sm:$0xf] %vm920_vm3, %v5247_v58  ;;  %v5245_v3 = vpack.c.bf16 %v4510_v1, %v4510_v1  ;;  %v4707_v6 = vmul.f32 %v4510_v1, %v4510_v1  ;;  %v4638_v11 = vsel %vm4637_vm4, %v4510_v1, 0.0  ;;  %v4742_v15 = vsel %vm4637_vm4, %v4709_v62, 0.0 }
 0x26f   : > { %3927 = vst.msk [vmem:[#allocation3 + $0x54] sm:$0xf] %vm3905_vm12, %v3852_v63  ;;  %v5311_v4 = vpop.f32.mrf.mxu0 }
 0x270   : > { %v4187_v5 = vpop.permute.xlu0 %4186  ;;  %4940 = vst.msk [vmem:[%s6832_s28] sm:$0xf] %vm920_vm3, %v5245_v3  ;;  %v5248_v7 = vpack.c.bf16 %v5311_v4, %v5311_v4  ;;  %v4739_v17 = vsel %vm4637_vm4, %v4707_v6, 0.0  ;;  %v4710_v18 = vmul.f32 %v5311_v4, %v5311_v4  ;;  %v4643_v26 = vsel %vm4637_vm4, %v5311_v4, 0.0 }
 0x271   : > { %4263 = vst.msk [vmem:[#allocation3 + $0x50] sm:$0xf] %vm4242_vm13, %v4187_v5  ;;  %v4513_v9 = vpop.f32.mrf.mxu0 }
 0x272   : > { %v3856_v8 = vpop.permute.xlu1 %3855  ;;  %4943 = vst.msk [vmem:[%s6832_s28 + $0xc] sm:$0xf] %vm920_vm3, %v5248_v7  ;;  %v4639_v12 = vsel %vm4637_vm4, %v4513_v9, 0.0  ;;  %v4708_v13 = vmul.f32 %v4513_v9, %v4513_v9  ;;  %v5246_v55 = vpack.c.bf16 %v4513_v9, %v4513_v9  ;;  %v4744_v32 = vsel %vm4637_vm4, %v4710_v18, 0.0 }
 0x273   : > { %3929 = vst.msk [vmem:[#allocation3 + $0x5c] sm:$0xf] %vm3905_vm12, %v3856_v8  ;;  %v4640_v10 = vadd.f32 %v4639_v12, %v4638_v11 }
 0x274   : > { %v4191_v14 = vpop.permute.xlu0 %4190  ;;  %v4740_v19 = vsel %vm4637_vm4, %v4708_v13, 0.0  ;;  %4941 = vst.msk [vmem:[%s6832_s28 + $0x4] sm:$0xf] %vm920_vm3, %v5246_v55 }
 0x275   : > { %4265 = vst.msk [vmem:[#allocation3 + $0x58] sm:$0xf] %vm4242_vm13, %v4191_v14  ;;  %v4642_v35 = vadd.f32 %v4641_v16, %v4640_v10  ;;  %v4741_v0 = vadd.f32 %v4740_v19, %v4739_v17 }
 0x276   : > { %v4189_v22 = vpop.permute.xlu1 %4188 }
 0x277   : > { %4264 = vst.msk [vmem:[#allocation3 + $0x54] sm:$0xf] %vm4242_vm13, %v4189_v22  ;;  %v4743_v29 = vadd.f32 %v4742_v15, %v4741_v0  ;;  %v4644_v31 = vadd.f32 %v4643_v26, %v4642_v35 }
 0x278   : > { %v2205_v30 = vpop.permute.xlu0 %2204 }
 0x279   : > { %2277 = vst.msk [vmem:[#allocation3 + $0x60] sm:$0xf] %vm2252_vm2, %v2205_v30  ;;  %v4745_v37 = vadd.f32 %v4744_v32, %v4743_v29 }
 0x27a   : > { %v4193_v34 = vpop.permute.xlu1 %4192 }
 0x27b   : > { %4266 = vst.msk [vmem:[#allocation3 + $0x5c] sm:$0xf] %vm4242_vm13, %v4193_v34 }
 0x27c   : > { %v2209_v27 = vpop.permute.xlu0 %2208 }
 0x27d   : > { %2279 = vst.msk [vmem:[#allocation3 + $0x68] sm:$0xf] %vm2252_vm2, %v2209_v27 }
 0x27e   : > { %v2207_v39 = vpop.permute.xlu1 %2206  ;;  %v5400_v38 = vld [vmem:[#allocation3 + $0x50] sm:$0xff]  }
 0x27f   : > { %2278 = vst.msk [vmem:[#allocation3 + $0x64] sm:$0xf] %vm2252_vm2, %v2207_v39  ;;  %5328 = vmatprep.mubr.msk.bf16.mxu1 %vm4423_vm15, %v5400_v38 }
 0x280   : > { %v2766_v41 = vpop.permute.xlu0 %2765 }
 0x281   : > { %2838 = vst.msk [vmem:[#allocation3 + $0x60] sm:$0xf] %vm2813_vm7, %v2766_v41 }
 0x282   : > { %v2211_v33 = vpop.permute.xlu1 %2210  ;;  %v5401_v42 = vld [vmem:[#allocation3 + $0x58] sm:$0xff]  }
 0x283   : > { %2280 = vst.msk [vmem:[#allocation3 + $0x6c] sm:$0xf] %vm2252_vm2, %v2211_v33  ;;  %5329 = vmatmul.mubr.msk.bf16.gmra.mxu1 %vm4423_vm15, %v5401_v42 }
 0x284   : > { %v2770_v21 = vpop.permute.xlu0 %2769 }
 0x285   : > { %2840 = vst.msk [vmem:[#allocation3 + $0x68] sm:$0xf] %vm2813_vm7, %v2770_v21 }
 0x286   : > { %v2768_v45 = vpop.permute.xlu1 %2767 }
 0x287   : > { %2839 = vst.msk [vmem:[#allocation3 + $0x64] sm:$0xf] %vm2813_vm7, %v2768_v45 }
 0x288   : > { %v3103_v47 = vpop.permute.xlu0 %3102 }
 0x289   : > { %3175 = vst.msk [vmem:[#allocation3 + $0x60] sm:$0xf] %vm3150_vm8, %v3103_v47 }
 0x28a   : > { %v2772_v43 = vpop.permute.xlu1 %2771 }
 0x28b   : > { %2841 = vst.msk [vmem:[#allocation3 + $0x6c] sm:$0xf] %vm2813_vm7, %v2772_v43 }
 0x28c   : > { %v3107_v2 = vpop.permute.xlu0 %3106 }
 0x28d   : > { %3177 = vst.msk [vmem:[#allocation3 + $0x68] sm:$0xf] %vm3150_vm8, %v3107_v2 }
 0x28e   : > { %v3105_v48 = vpop.permute.xlu1 %3104 }
 0x28f   : > { %3176 = vst.msk [vmem:[#allocation3 + $0x64] sm:$0xf] %vm3150_vm8, %v3105_v48 }
 0x290   : > { %v3297_v44 = vpop.permute.xlu0 %3296 }
 0x291   : > { %3369 = vst.msk [vmem:[#allocation3 + $0x60] sm:$0xf] %vm3344_vm9, %v3297_v44 }
 0x292   : > { %v3109_v36 = vpop.permute.xlu1 %3108 }
 0x293   : > { %3178 = vst.msk [vmem:[#allocation3 + $0x6c] sm:$0xf] %vm3150_vm8, %v3109_v36  ;;  %v5314_v40 = vpop.f32.mrf.mxu0 }
 0x294   : > { %v3301_v50 = vpop.permute.xlu0 %3300  ;;  %v5251_v49 = vpack.c.bf16 %v5314_v40, %v5314_v40  ;;  %v4713_v28 = vmul.f32 %v5314_v40, %v5314_v40  ;;  %v4649_v4 = vsel %vm4637_vm4, %v5314_v40, 0.0 }
 0x295   : > { %3371 = vst.msk [vmem:[#allocation3 + $0x68] sm:$0xf] %vm3344_vm9, %v3301_v50  ;;  %v4526_v52 = vpop.f32.mrf.mxu0 }
 0x296   : > { %v3299_v51 = vpop.permute.xlu1 %3298  ;;  %4946 = vst.msk [vmem:[%s6832_s28 + $0x18] sm:$0xf] %vm920_vm3, %v5251_v49  ;;  %v4645_v53 = vsel %vm4637_vm4, %v4526_v52, 0.0  ;;  %v4711_v23 = vmul.f32 %v4526_v52, %v4526_v52  ;;  %v5249_v25 = vpack.c.bf16 %v4526_v52, %v4526_v52  ;;  %v4750_v9 = vsel %vm4637_vm4, %v4713_v28, 0.0 }
 0x297   : > { %3370 = vst.msk [vmem:[#allocation3 + $0x64] sm:$0xf] %vm3344_vm9, %v3299_v51  ;;  %v4646_v24 = vadd.f32 %v4645_v53, %v4644_v31  ;;  %v5315_v46 = vpop.f32.mrf.mxu0 }
 0x298   : > { %v3858_v56 = vpop.permute.xlu0 %3857  ;;  %v4746_v57 = vsel %vm4637_vm4, %v4711_v23, 0.0  ;;  %4944 = vst.msk [vmem:[%s6832_s28 + $0x10] sm:$0xf] %vm920_vm3, %v5249_v25  ;;  %v5252_v59 = vpack.c.bf16 %v5315_v46, %v5315_v46  ;;  %v4714_v5 = vmul.f32 %v5315_v46, %v5315_v46  ;;  %v4651_v11 = vsel %vm4637_vm4, %v5315_v46, 0.0 }
 0x299   : > { %3930 = vst.msk [vmem:[#allocation3 + $0x60] sm:$0xf] %vm3905_vm12, %v3858_v56  ;;  %v4747_v20 = vadd.f32 %v4746_v57, %v4745_v37  ;;  %v4529_v61 = vpop.f32.mrf.mxu0 }
 0x29a   : > { %v3303_v60 = vpop.permute.xlu1 %3302  ;;  %4947 = vst.msk [vmem:[%s6832_s28 + $0x1c] sm:$0xf] %vm920_vm3, %v5252_v59  ;;  %v4647_v54 = vsel %vm4637_vm4, %v4529_v61, 0.0  ;;  %v4712_v58 = vmul.f32 %v4529_v61, %v4529_v61  ;;  %v5250_v63 = vpack.c.bf16 %v4529_v61, %v4529_v61  ;;  %v4752_v10 = vsel %vm4637_vm4, %v4714_v5, 0.0 }
 0x29b   : > { %3372 = vst.msk [vmem:[#allocation3 + $0x6c] sm:$0xf] %vm3344_vm9, %v3303_v60  ;;  %v4648_v1 = vadd.f32 %v4647_v54, %v4646_v24 }
 0x29c   : > { %v3862_v3 = vpop.permute.xlu0 %3861  ;;  %v4748_v6 = vsel %vm4637_vm4, %v4712_v58, 0.0  ;;  %4945 = vst.msk [vmem:[%s6832_s28 + $0x14] sm:$0xf] %vm920_vm3, %v5250_v63 }
 0x29d   : > { %3932 = vst.msk [vmem:[#allocation3 + $0x68] sm:$0xf] %vm3905_vm12, %v3862_v3  ;;  %v4650_v7 = vadd.f32 %v4649_v4, %v4648_v1  ;;  %v4749_v62 = vadd.f32 %v4748_v6, %v4747_v20 }
 0x29e   : > { %v3860_v8 = vpop.permute.xlu1 %3859 }
 0x29f   : > { %3931 = vst.msk [vmem:[#allocation3 + $0x64] sm:$0xf] %vm3905_vm12, %v3860_v8  ;;  %v4751_v12 = vadd.f32 %v4750_v9, %v4749_v62  ;;  %v4652_v55 = vadd.f32 %v4651_v11, %v4650_v7 }
 0x2a0   : > { %v4195_v13 = vpop.permute.xlu0 %4194 }
 0x2a1   : > { %4267 = vst.msk [vmem:[#allocation3 + $0x60] sm:$0xf] %vm4242_vm13, %v4195_v13  ;;  %v4753_v16 = vadd.f32 %v4752_v10, %v4751_v12 }
 0x2a2   : > { %v3864_v14 = vpop.permute.xlu1 %3863 }
 0x2a3   : > { %3933 = vst.msk [vmem:[#allocation3 + $0x6c] sm:$0xf] %vm3905_vm12, %v3864_v14 }
 0x2a4   : > { %v4199_v17 = vpop.permute.xlu0 %4198 }
 0x2a5   : > { %4269 = vst.msk [vmem:[#allocation3 + $0x68] sm:$0xf] %vm4242_vm13, %v4199_v17 }
 0x2a6   : > { %v4197_v18 = vpop.permute.xlu1 %4196 }
 0x2a7   : > { %4268 = vst.msk [vmem:[#allocation3 + $0x64] sm:$0xf] %vm4242_vm13, %v4197_v18 }
 0x2a8   : > { %v2213_v19 = vpop.permute.xlu0 %2212 }
 0x2a9   : > { %2281 = vst.msk [vmem:[#allocation3 + $0x70] sm:$0xf] %vm2252_vm2, %v2213_v19 }
 0x2aa   : > { %v4201_v35 = vpop.permute.xlu1 %4200 }
 0x2ab   : > { %4270 = vst.msk [vmem:[#allocation3 + $0x6c] sm:$0xf] %vm4242_vm13, %v4201_v35 }
 0x2ac   : > { %v2217_v0 = vpop.permute.xlu0 %2216 }
 0x2ad   : > { %2283 = vst.msk [vmem:[#allocation3 + $0x78] sm:$0xf] %vm2252_vm2, %v2217_v0 }
 0x2ae   : > { %v2215_v22 = vpop.permute.xlu1 %2214  ;;  %v5402_v15 = vld [vmem:[#allocation3 + $0x60] sm:$0xff]  }
 0x2af   : > { %2282 = vst.msk [vmem:[#allocation3 + $0x74] sm:$0xf] %vm2252_vm2, %v2215_v22  ;;  %5332 = vmatprep.mubr.msk.bf16.mxu1 %vm4423_vm15, %v5402_v15 }
 0x2b0   : > { %v2774_v26 = vpop.permute.xlu0 %2773 }
 0x2b1   : > { %2842 = vst.msk [vmem:[#allocation3 + $0x70] sm:$0xf] %vm2813_vm7, %v2774_v26 }
 0x2b2   : > { %v2219_v29 = vpop.permute.xlu1 %2218  ;;  %v5403_v30 = vld [vmem:[#allocation3 + $0x68] sm:$0xff]  }
 0x2b3   : > { %2284 = vst.msk [vmem:[#allocation3 + $0x7c] sm:$0xf] %vm2252_vm2, %v2219_v29  ;;  %5333 = vmatmul.mubr.msk.bf16.gmra.mxu1 %vm4423_vm15, %v5403_v30 }
 0x2b4   : > { %v2778_v31 = vpop.permute.xlu0 %2777 }
 0x2b5   : > { %2844 = vst.msk [vmem:[#allocation3 + $0x78] sm:$0xf] %vm2813_vm7, %v2778_v31 }
 0x2b6   : > { %v2776_v32 = vpop.permute.xlu1 %2775 }
 0x2b7   : > { %2843 = vst.msk [vmem:[#allocation3 + $0x74] sm:$0xf] %vm2813_vm7, %v2776_v32 }
 0x2b8   : > { %v3111_v34 = vpop.permute.xlu0 %3110 }
 0x2b9   : > { %3179 = vst.msk [vmem:[#allocation3 + $0x70] sm:$0xf] %vm3150_vm8, %v3111_v34 }
 0x2ba   : > { %v2780_v37 = vpop.permute.xlu1 %2779 }
 0x2bb   : > { %2845 = vst.msk [vmem:[#allocation3 + $0x7c] sm:$0xf] %vm2813_vm7, %v2780_v37  ;;  %v5318_v27 = vpop.f32.mrf.mxu0 }
 0x2bc   : > { %v3115_v39 = vpop.permute.xlu0 %3114  ;;  %v5255_v38 = vpack.c.bf16 %v5318_v27, %v5318_v27  ;;  %v4717_v49 = vmul.f32 %v5318_v27, %v5318_v27  ;;  %v4657_v24 = vsel %vm4637_vm4, %v5318_v27, 0.0 }
 0x2bd   : > { %3181 = vst.msk [vmem:[#allocation3 + $0x78] sm:$0xf] %vm3150_vm8, %v3115_v39  ;;  %v4542_v33 = vpop.f32.mrf.mxu0 }
 0x2be   : > { %v3113_v41 = vpop.permute.xlu1 %3112  ;;  %4950 = vst.msk [vmem:[%s6832_s28 + $0x28] sm:$0xf] %vm920_vm3, %v5255_v38  ;;  %v4653_v42 = vsel %vm4637_vm4, %v4542_v33, 0.0  ;;  %v4715_v21 = vmul.f32 %v4542_v33, %v4542_v33  ;;  %v5253_v45 = vpack.c.bf16 %v4542_v33, %v4542_v33  ;;  %v4758_v60 = vsel %vm4637_vm4, %v4717_v49, 0.0 }
 0x2bf   : > { %3180 = vst.msk [vmem:[#allocation3 + $0x74] sm:$0xf] %vm3150_vm8, %v3113_v41  ;;  %v4654_v47 = vadd.f32 %v4653_v42, %v4652_v55  ;;  %v5319_v43 = vpop.f32.mrf.mxu0 }
 0x2c0   : > { %v3305_v2 = vpop.permute.xlu0 %3304  ;;  %v4754_v48 = vsel %vm4637_vm4, %v4715_v21, 0.0  ;;  %4948 = vst.msk [vmem:[%s6832_s28 + $0x20] sm:$0xf] %vm920_vm3, %v5253_v45  ;;  %v5256_v44 = vpack.c.bf16 %v5319_v43, %v5319_v43  ;;  %v4718_v46 = vmul.f32 %v5319_v43, %v5319_v43  ;;  %v4659_v61 = vsel %vm4637_vm4, %v5319_v43, 0.0 }
 0x2c1   : > { %3373 = vst.msk [vmem:[#allocation3 + $0x70] sm:$0xf] %vm3344_vm9, %v3305_v2  ;;  %v4755_v36 = vadd.f32 %v4754_v48, %v4753_v16  ;;  %v4545_v50 = vpop.f32.mrf.mxu0 }
 0x2c2   : > { %v3117_v40 = vpop.permute.xlu1 %3116  ;;  %4951 = vst.msk [vmem:[%s6832_s28 + $0x2c] sm:$0xf] %vm920_vm3, %v5256_v44  ;;  %v4655_v51 = vsel %vm4637_vm4, %v4545_v50, 0.0  ;;  %v4716_v52 = vmul.f32 %v4545_v50, %v4545_v50  ;;  %v5254_v53 = vpack.c.bf16 %v4545_v50, %v4545_v50  ;;  %v4760_v63 = vsel %vm4637_vm4, %v4718_v46, 0.0 }
 0x2c3   : > { %3182 = vst.msk [vmem:[#allocation3 + $0x7c] sm:$0xf] %vm3150_vm8, %v3117_v40  ;;  %v4656_v23 = vadd.f32 %v4655_v51, %v4654_v47 }
 0x2c4   : > { %v3309_v25 = vpop.permute.xlu0 %3308  ;;  %v4756_v56 = vsel %vm4637_vm4, %v4716_v52, 0.0  ;;  %4949 = vst.msk [vmem:[%s6832_s28 + $0x24] sm:$0xf] %vm920_vm3, %v5254_v53 }
 0x2c5   : > { %3375 = vst.msk [vmem:[#allocation3 + $0x78] sm:$0xf] %vm3344_vm9, %v3309_v25  ;;  %v4658_v57 = vadd.f32 %v4657_v24, %v4656_v23  ;;  %v4757_v59 = vadd.f32 %v4756_v56, %v4755_v36 }
 0x2c6   : > { %v3307_v20 = vpop.permute.xlu1 %3306 }
 0x2c7   : > { %3374 = vst.msk [vmem:[#allocation3 + $0x74] sm:$0xf] %vm3344_vm9, %v3307_v20  ;;  %v4759_v28 = vadd.f32 %v4758_v60, %v4757_v59  ;;  %v4660_v58 = vadd.f32 %v4659_v61, %v4658_v57 }
 0x2c8   : > { %v3866_v54 = vpop.permute.xlu0 %3865 }
 0x2c9   : > { %3934 = vst.msk [vmem:[#allocation3 + $0x70] sm:$0xf] %vm3905_vm12, %v3866_v54  ;;  %v4761_v3 = vadd.f32 %v4760_v63, %v4759_v28 }
 0x2ca   : > { %v3311_v1 = vpop.permute.xlu1 %3310 }
 0x2cb   : > { %3376 = vst.msk [vmem:[#allocation3 + $0x7c] sm:$0xf] %vm3344_vm9, %v3311_v1 }
 0x2cc   : > { %v3870_v4 = vpop.permute.xlu0 %3869 }
 0x2cd   : > { %3936 = vst.msk [vmem:[#allocation3 + $0x78] sm:$0xf] %vm3905_vm12, %v3870_v4 }
 0x2ce   : > { %v3868_v5 = vpop.permute.xlu1 %3867 }
 0x2cf   : > { %3935 = vst.msk [vmem:[#allocation3 + $0x74] sm:$0xf] %vm3905_vm12, %v3868_v5 }
 0x2d0   : > { %v4203_v6 = vpop.permute.xlu0 %4202 }
 0x2d1   : > { %4271 = vst.msk [vmem:[#allocation3 + $0x70] sm:$0xf] %vm4242_vm13, %v4203_v6 }
 0x2d2   : > { %v3872_v7 = vpop.permute.xlu1 %3871 }
 0x2d3   : > { %3937 = vst.msk [vmem:[#allocation3 + $0x7c] sm:$0xf] %vm3905_vm12, %v3872_v7 }
 0x2d4   : > { %v4207_v62 = vpop.permute.xlu0 %4206 }
 0x2d5   : > { %4273 = vst.msk [vmem:[#allocation3 + $0x78] sm:$0xf] %vm4242_vm13, %v4207_v62 }
 0x2d6   : > { %v4205_v8 = vpop.permute.xlu1 %4204 }
 0x2d7   : > { %4272 = vst.msk [vmem:[#allocation3 + $0x74] sm:$0xf] %vm4242_vm13, %v4205_v8 }
 0x2da   : > { %v4209_v9 = vpop.permute.xlu1 %4208 }
 0x2db   : > { %4274 = vst.msk [vmem:[#allocation3 + $0x7c] sm:$0xf] %vm4242_vm13, %v4209_v9 }
 0x2de   : > { %v5404_v11 = vld [vmem:[#allocation3 + $0x70] sm:$0xff]  }
 0x2df   : > { %5336 = vmatprep.mubr.msk.bf16.mxu1 %vm4423_vm15, %v5404_v11 }
 0x2e2   : > { %v5405_v12 = vld [vmem:[#allocation3 + $0x78] sm:$0xff]  }
 0x2e3   : > { %v5322_v13 = vpop.f32.mrf.mxu0  ;;  %5337 = vmatmul.mubr.msk.bf16.gmra.mxu1 %vm4423_vm15, %v5405_v12 }
 0x2e4   : > { %v5259_v55 = vpack.c.bf16 %v5322_v13, %v5322_v13  ;;  %v4721_v26 = vmul.f32 %v5322_v13, %v5322_v13  ;;  %v4665_v34 = vsel %vm4637_vm4, %v5322_v13, 0.0 }
 0x2e5   : > { %v4558_v10 = vpop.f32.mrf.mxu0 }
 0x2e6   : > { %4954 = vst.msk [vmem:[%s6832_s28 + $0x38] sm:$0xf] %vm920_vm3, %v5259_v55  ;;  %v4661_v14 = vsel %vm4637_vm4, %v4558_v10, 0.0  ;;  %v4719_v16 = vmul.f32 %v4558_v10, %v4558_v10  ;;  %v5257_v17 = vpack.c.bf16 %v4558_v10, %v4558_v10  ;;  %v4766_v41 = vsel %vm4637_vm4, %v4721_v26, 0.0 }
 0x2e7   : > { %v4662_v18 = vadd.f32 %v4661_v14, %v4660_v58  ;;  %v5323_v19 = vpop.f32.mrf.mxu0 }
 0x2e8   : > { %v4762_v35 = vsel %vm4637_vm4, %v4719_v16, 0.0  ;;  %4952 = vst.msk [vmem:[%s6832_s28 + $0x30] sm:$0xf] %vm920_vm3, %v5257_v17  ;;  %v5260_v0 = vpack.c.bf16 %v5323_v19, %v5323_v19  ;;  %v4722_v37 = vmul.f32 %v5323_v19, %v5323_v19  ;;  %v4667_v33 = vsel %vm4637_vm4, %v5323_v19, 0.0 }
 0x2e9   : > { %v4763_v22 = vadd.f32 %v4762_v35, %v4761_v3  ;;  %v4561_v15 = vpop.f32.mrf.mxu0 }
 0x2ea   : > { %4955 = vst.msk [vmem:[%s6832_s28 + $0x3c] sm:$0xf] %vm920_vm3, %v5260_v0  ;;  %v4663_v29 = vsel %vm4637_vm4, %v4561_v15, 0.0  ;;  %v4720_v30 = vmul.f32 %v4561_v15, %v4561_v15  ;;  %v5258_v31 = vpack.c.bf16 %v4561_v15, %v4561_v15  ;;  %v4768_v45 = vsel %vm4637_vm4, %v4722_v37, 0.0 }
 0x2eb   : > { %v4664_v32 = vadd.f32 %v4663_v29, %v4662_v18 }
 0x2ec   : > { %v4764_v27 = vsel %vm4637_vm4, %v4720_v30, 0.0  ;;  %4953 = vst.msk [vmem:[%s6832_s28 + $0x34] sm:$0xf] %vm920_vm3, %v5258_v31 }
 0x2ed   : > { %v4666_v39 = vadd.f32 %v4665_v34, %v4664_v32  ;;  %v4765_v38 = vadd.f32 %v4764_v27, %v4763_v22 }
 0x2ef   : > { %v4767_v42 = vadd.f32 %v4766_v41, %v4765_v38  ;;  %v4668_v21 = vadd.f32 %v4667_v33, %v4666_v39 }
 0x2f1   : > { %v4769_v47 = vadd.f32 %v4768_v45, %v4767_v42 }
 0x313   : > { %v5326_v43 = vpop.f32.mrf.mxu1 }
 0x314   : > { %v5263_v2 = vpack.c.bf16 %v5326_v43, %v5326_v43  ;;  %v4725_v25 = vmul.f32 %v5326_v43, %v5326_v43  ;;  %v4673_v59 = vsel %vm4637_vm4, %v5326_v43, 0.0 }
 0x315   : > { %v4574_v48 = vpop.f32.mrf.mxu1 }
 0x316   : > { %4958 = vst.msk [vmem:[%s6832_s28 + $0x48] sm:$0xf] %vm920_vm3, %v5263_v2  ;;  %v4669_v44 = vsel %vm4637_vm4, %v4574_v48, 0.0  ;;  %v4723_v36 = vmul.f32 %v4574_v48, %v4574_v48  ;;  %v5261_v40 = vpack.c.bf16 %v4574_v48, %v4574_v48  ;;  %v4774_v54 = vsel %vm4637_vm4, %v4725_v25, 0.0 }
 0x317   : > { %v4670_v50 = vadd.f32 %v4669_v44, %v4668_v21  ;;  %v5327_v49 = vpop.f32.mrf.mxu1 }
 0x318   : > { %v4770_v51 = vsel %vm4637_vm4, %v4723_v36, 0.0  ;;  %4956 = vst.msk [vmem:[%s6832_s28 + $0x40] sm:$0xf] %vm920_vm3, %v5261_v40  ;;  %v5264_v52 = vpack.c.bf16 %v5327_v49, %v5327_v49  ;;  %v4726_v20 = vmul.f32 %v5327_v49, %v5327_v49  ;;  %v4675_v58 = vsel %vm4637_vm4, %v5327_v49, 0.0 }
 0x319   : > { %v4771_v53 = vadd.f32 %v4770_v51, %v4769_v47  ;;  %v4577_v23 = vpop.f32.mrf.mxu1 }
 0x31a   : > { %4959 = vst.msk [vmem:[%s6832_s28 + $0x4c] sm:$0xf] %vm920_vm3, %v5264_v52  ;;  %v4671_v24 = vsel %vm4637_vm4, %v4577_v23, 0.0  ;;  %v4724_v46 = vmul.f32 %v4577_v23, %v4577_v23  ;;  %v5262_v56 = vpack.c.bf16 %v4577_v23, %v4577_v23  ;;  %v4776_v3 = vsel %vm4637_vm4, %v4726_v20, 0.0 }
 0x31b   : > { %v4672_v57 = vadd.f32 %v4671_v24, %v4670_v50 }
 0x31c   : > { %v4772_v60 = vsel %vm4637_vm4, %v4724_v46, 0.0  ;;  %4957 = vst.msk [vmem:[%s6832_s28 + $0x44] sm:$0xf] %vm920_vm3, %v5262_v56 }
 0x31d   : > { %v4674_v61 = vadd.f32 %v4673_v59, %v4672_v57  ;;  %v4773_v28 = vadd.f32 %v4772_v60, %v4771_v53 }
 0x31f   : > { %v4775_v63 = vadd.f32 %v4774_v54, %v4773_v28  ;;  %v4676_v1 = vadd.f32 %v4675_v58, %v4674_v61 }
 0x321   : > { %v4777_v4 = vadd.f32 %v4776_v3, %v4775_v63 }
 0x343   : > { %v5330_v5 = vpop.f32.mrf.mxu1 }
 0x344   : > { %v5267_v6 = vpack.c.bf16 %v5330_v5, %v5330_v5  ;;  %v4729_v16 = vmul.f32 %v5330_v5, %v5330_v5  ;;  %v4681_v0 = vsel %vm4637_vm4, %v5330_v5, 0.0 }
 0x345   : > { %v4590_v7 = vpop.f32.mrf.mxu1 }
 0x346   : > { %4962 = vst.msk [vmem:[%s6832_s28 + $0x58] sm:$0xf] %vm920_vm3, %v5267_v6  ;;  %v4677_v62 = vsel %vm4637_vm4, %v4590_v7, 0.0  ;;  %v4727_v8 = vmul.f32 %v4590_v7, %v4590_v7  ;;  %v5265_v9 = vpack.c.bf16 %v4590_v7, %v4590_v7  ;;  %v4782_v30 = vsel %vm4637_vm4, %v4729_v16, 0.0 }
 0x347   : > { %v4678_v11 = vadd.f32 %v4677_v62, %v4676_v1  ;;  %v5331_v12 = vpop.f32.mrf.mxu1 }
 0x348   : > { %v4778_v13 = vsel %vm4637_vm4, %v4727_v8, 0.0  ;;  %4960 = vst.msk [vmem:[%s6832_s28 + $0x50] sm:$0xf] %vm920_vm3, %v5265_v9  ;;  %v5268_v55 = vpack.c.bf16 %v5331_v12, %v5331_v12  ;;  %v4730_v22 = vmul.f32 %v5331_v12, %v5331_v12  ;;  %v4683_v31 = vsel %vm4637_vm4, %v5331_v12, 0.0 }
 0x349   : > { %v4779_v10 = vadd.f32 %v4778_v13, %v4777_v4  ;;  %v4593_v14 = vpop.f32.mrf.mxu1 }
 0x34a   : > { %4963 = vst.msk [vmem:[%s6832_s28 + $0x5c] sm:$0xf] %vm920_vm3, %v5268_v55  ;;  %v4679_v17 = vsel %vm4637_vm4, %v4593_v14, 0.0  ;;  %v4728_v18 = vmul.f32 %v4593_v14, %v4593_v14  ;;  %v5266_v19 = vpack.c.bf16 %v4593_v14, %v4593_v14  ;;  %v4784_v37 = vsel %vm4637_vm4, %v4730_v22, 0.0 }
 0x34b   : > { %v4680_v35 = vadd.f32 %v4679_v17, %v4678_v11 }
 0x34c   : > { %v4780_v15 = vsel %vm4637_vm4, %v4728_v18, 0.0  ;;  %4961 = vst.msk [vmem:[%s6832_s28 + $0x54] sm:$0xf] %vm920_vm3, %v5266_v19 }
 0x34d   : > { %v4682_v26 = vadd.f32 %v4681_v0, %v4680_v35  ;;  %v4781_v29 = vadd.f32 %v4780_v15, %v4779_v10 }
 0x34f   : > { %v4783_v32 = vadd.f32 %v4782_v30, %v4781_v29  ;;  %v4684_v34 = vadd.f32 %v4683_v31, %v4682_v26 }
 0x351   : > { %v4785_v27 = vadd.f32 %v4784_v37, %v4783_v32 }
 0x373   : > { %v5334_v39 = vpop.f32.mrf.mxu1 }
 0x374   : > { %v5271_v38 = vpack.c.bf16 %v5334_v39, %v5334_v39  ;;  %v4733_v52 = vmul.f32 %v5334_v39, %v5334_v39  ;;  %v4689_v23 = vsel %vm4637_vm4, %v5334_v39, 0.0 }
 0x375   : > { %v4606_v41 = vpop.f32.mrf.mxu1 }
 0x376   : > { %4966 = vst.msk [vmem:[%s6832_s28 + $0x68] sm:$0xf] %vm920_vm3, %v5271_v38  ;;  %v5269_v33 = vpack.c.bf16 %v4606_v41, %v4606_v41  ;;  %v4731_v43 = vmul.f32 %v4606_v41, %v4606_v41  ;;  %v4685_v2 = vsel %vm4637_vm4, %v4606_v41, 0.0  ;;  %v4790_v46 = vsel %vm4637_vm4, %v4733_v52, 0.0 }
 0x377   : > { %v5335_v42 = vpop.f32.mrf.mxu1  ;;  %v4686_v40 = vadd.f32 %v4685_v2, %v4684_v34 }
 0x378   : > { %4964 = vst.msk [vmem:[%s6832_s28 + $0x60] sm:$0xf] %vm920_vm3, %v5269_v33  ;;  %v5272_v21 = vpack.c.bf16 %v5335_v42, %v5335_v42  ;;  %v4786_v44 = vsel %vm4637_vm4, %v4731_v43, 0.0  ;;  %v4734_v56 = vmul.f32 %v5335_v42, %v5335_v42  ;;  %v4691_v60 = vsel %vm4637_vm4, %v5335_v42, 0.0 }
 0x379   : > { %v4609_v45 = vpop.f32.mrf.mxu1  ;;  %v4787_v49 = vadd.f32 %v4786_v44, %v4785_v27 }
 0x37a   : > { %4967 = vst.msk [vmem:[%s6832_s28 + $0x6c] sm:$0xf] %vm920_vm3, %v5272_v21  ;;  %v5270_v47 = vpack.c.bf16 %v4609_v45, %v4609_v45  ;;  %v4732_v48 = vmul.f32 %v4609_v45, %v4609_v45  ;;  %v4687_v36 = vsel %vm4637_vm4, %v4609_v45, 0.0  ;;  %v4792_v1 = vsel %vm4637_vm4, %v4734_v56, 0.0 }
 0x37b   : > { %v4688_v51 = vadd.f32 %v4687_v36, %v4686_v40 }
 0x37c   : > { %4965 = vst.msk [vmem:[%s6832_s28 + $0x64] sm:$0xf] %vm920_vm3, %v5270_v47  ;;  %v4788_v50 = vsel %vm4637_vm4, %v4732_v48, 0.0 }
 0x37d   : > { %v4789_v53 = vadd.f32 %v4788_v50, %v4787_v49  ;;  %v4690_v25 = vadd.f32 %v4689_v23, %v4688_v51 }
 0x37f   : > { %v4791_v59 = vadd.f32 %v4790_v46, %v4789_v53  ;;  %v4692_v58 = vadd.f32 %v4691_v60, %v4690_v25 }
 0x381   : > { %v4793_v6 = vadd.f32 %v4792_v1, %v4791_v59 }
 0x3a3   : > { %v5338_v24 = vpop.f32.mrf.mxu1 }
 0x3a4   : > { %v5275_v57 = vpack.c.bf16 %v5338_v24, %v5338_v24  ;;  %v4737_v62 = vmul.f32 %v5338_v24, %v5338_v24  ;;  %v4697_v55 = vsel %vm4637_vm4, %v5338_v24, 0.0 }
 0x3a5   : > { %v4622_v20 = vpop.f32.mrf.mxu1 }
 0x3a6   : > { %4970 = vst.msk [vmem:[%s6832_s28 + $0x78] sm:$0xf] %vm920_vm3, %v5275_v57  ;;  %v4693_v61 = vsel %vm4637_vm4, %v4622_v20, 0.0  ;;  %v4735_v28 = vmul.f32 %v4622_v20, %v4622_v20  ;;  %v5273_v54 = vpack.c.bf16 %v4622_v20, %v4622_v20  ;;  %v4798_v18 = vsel %vm4637_vm4, %v4737_v62, 0.0 }
 0x3a7   : > { %v5339_v63 = vpop.f32.mrf.mxu1  ;;  %v4694_v5 = vadd.f32 %v4693_v61, %v4692_v58 }
 0x3a8   : > { %v4794_v3 = vsel %vm4637_vm4, %v4735_v28, 0.0  ;;  %4968 = vst.msk [vmem:[%s6832_s28 + $0x70] sm:$0xf] %vm920_vm3, %v5273_v54  ;;  %v5276_v4 = vpack.c.bf16 %v5339_v63, %v5339_v63  ;;  %v4738_v10 = vmul.f32 %v5339_v63, %v5339_v63  ;;  %v4699_v19 = vsel %vm4637_vm4, %v5339_v63, 0.0 }
 0x3a9   : > { %v4625_v7 = vpop.f32.mrf.mxu1  ;;  %v4795_v12 = vadd.f32 %v4794_v3, %v4793_v6 }
 0x3aa   : > { %4971 = vst.msk [vmem:[%s6832_s28 + $0x7c] sm:$0xf] %vm920_vm3, %v5276_v4  ;;  %v4695_v8 = vsel %vm4637_vm4, %v4625_v7, 0.0  ;;  %v4736_v9 = vmul.f32 %v4625_v7, %v4625_v7  ;;  %v5274_v11 = vpack.c.bf16 %v4625_v7, %v4625_v7  ;;  %v4800_v22 = vsel %vm4637_vm4, %v4738_v10, 0.0 }
 0x3ab   : > { %v4696_v13 = vadd.f32 %v4695_v8, %v4694_v5 }
 0x3ac   : > { %v4796_v14 = vsel %vm4637_vm4, %v4736_v9, 0.0  ;;  %4969 = vst.msk [vmem:[%s6832_s28 + $0x74] sm:$0xf] %vm920_vm3, %v5274_v11  ;;  %vm4808_vm3 = vcmask 1040384  }
 0x3ad   : > { %v4698_v16 = vadd.f32 %v4697_v55, %v4696_v13  ;;  %v4797_v17 = vadd.f32 %v4796_v14, %v4795_v12 }
 0x3af   : > { %v4700_v35 = vadd.f32 %v4699_v19, %v4698_v16  ;;  %v4799_v0 = vadd.f32 %v4798_v18, %v4797_v17 }
 0x3b1   : > { %v4701_v15 = vrot.slane %v4700_v35, 4  ;;  %v4801_v26 = vadd.f32 %v4800_v22, %v4799_v0 }
 0x3b3   : > { %v4702_v29 = vadd.f32 %v4701_v15, %v4700_v35  ;;  %v4802_v30 = vrot.slane %v4801_v26, 4 }
 0x3b5   : > { %v4703_v31 = vrot.slane %v4702_v29, 2  ;;  %v4803_v32 = vadd.f32 %v4802_v30, %v4801_v26 }
 0x3b7   : > { %v4704_v34 = vadd.f32 %v4703_v31, %v4702_v29  ;;  %v4804_v37 = vrot.slane %v4803_v32, 2 }
 0x3b9   : > { %v4705_v27 = vrot.slane %v4704_v34, 1  ;;  %v4805_v39 = vadd.f32 %v4804_v37, %v4803_v32 }
 0x3bb   : > { %v4806_v38 = vrot.slane %v4805_v39, 1  ;;  %v4706_v41 = vadd.f32 %v4705_v27, %v4704_v34 }
 0x3bd   : > { %v4807_v33 = vadd.f32 %v4806_v38, %v4805_v39 }
 0x3bf   : > { %v4809_v42 = vsel %vm4808_vm3, %v4706_v41, %v4807_v33 }
 0x3c0   : > { %4811 = vst.msk [vmem:[%s449_s30] sm:$0x3] %vm4810_vm5, %v4809_v42 }
 0x3c1 PF: > { %s18_s2 = sadd.s32 1, %s5428_s2   ;;  %s7057_s23 = smov %s5424_s24 }
 0x3c2   : > { %p15_p6 = scmp.ge.s32.totalorder %s18_s2, 4   ;;  %s7058_s24 = smov %s7060_s3 }
 0x3c4   :  { %17 = sbr.rel (!%p15_p6) target bundleno = 2 (0x2), region = 112 }

// kernel: unet_up_block_forward.5
= control target key start
LH: loop header
LB: loop body
LE: loop exit
PB: predicated region body
PF: predicated region fallthrough
CT: control target
= control target key end

     0   :  { %s5902_s23 = smov 0   ;;  %s5904_s24 = smov 0   ;;  %s7466_s0 = inlined_call_operand.vmem [shape: bf16[32,16,8], index: 0, kind: input, shape index: {}, may-alias: {0,1,2}]   ;;  %s7467_s1 = inlined_call_operand.vmem [shape: bf16[32,16,8], index: 1, kind: input, shape index: {}, may-alias: {0,1,2}]   ;;  %s7468_s2 = inlined_call_operand.vmem [shape: bf16[32,16,8], index: 2, kind: input, shape index: {}, may-alias: {0,1,2}]   ;;  %s7469_s3 = inlined_call_operand.vmem [shape: f32[1,1,8], index: 3, kind: input, shape index: {}]   ;;  %s7470_s4 = inlined_call_operand.vmem [shape: f32[1,1,8], index: 4, kind: input, shape index: {}]   ;;  %s7471_s5 = inlined_call_operand.vmem [shape: bf16[72,8], index: 5, kind: input, shape index: {}]   ;;  %s7472_s6 = inlined_call_operand.vmem [shape: bf16[32,16,8], index: 6, kind: output, shape index: {0}]   ;;  %s7473_s7 = inlined_call_operand.vmem [shape: f32[2,2,8], index: 7, kind: output, shape index: {1}]  }
   0x1   :  { %s5906_s2 = smov 0  }
   0x2 LB: > { %s30_s25 = sadd.s32 1, %s5847_s24  ;;  %p5374_p0 = scmp.ge.s32.totalorder %s5851_s2, 1  ;;  %s5851_s2 = sphi %s5906_s2, %s18_s2   ;;  %s5847_s24 = sphi %s5904_s24, %s7487_s24   ;;  %s5843_s23 = sphi %s5902_s23, %s7486_s23  }
   0x3   : > { %p32_p1 = scmp.ge.s32.totalorder %s30_s25, 2  ;;  %p330_p2 = scmp.lt.s32.totalorder %s5851_s2, 3 }
   0x5   : > { %s7489_s25 = smov (%p32_p1, %s30_s25), 0  ;;  %p331_p3 = pnand %p5374_p0, %p330_p2 }
   0x6   : > { %s5378_s26 = sshll.u32 (!%p331_p3), %s5843_s23, 4  ;;  %s5854_s12 = smov (!%p331_p3), 8  }
   0x7   : > { %334 = sbr.rel (%p331_p3) target bundleno = 990 (0x3de), region = 44  ;;  %p412_p4 = scmp.lt.s32.totalorder (!%p331_p3), %s5378_s26, 31 }
   0x8   : > { %s5855_s17 = smov (!%p331_p3), 16   ;;  %s5856_s18 = smov (!%p331_p3), 24  }
   0x9   : > { %s5857_s19 = smov (!%p331_p3), 32   ;;  %s5858_s20 = smov (!%p331_p3), 40  }
   0xa   : > { %s5859_s0 = smov (!%p331_p3), 48   ;;  %s5860_s10 = smov (!%p331_p3), 56  }
   0xb   : > { %s5861_s15 = smov (!%p331_p3), 64   ;;  %p446_p5 = scmp.lt.s32.totalorder (!%p331_p3), %s5843_s23, 1 }
   0xc   : > { %vm454_vm0 = vcmask 57344   ;;  %vm455_vm1 = vsmask.f32 256  ;;  %vm511_vm2 = vsmask.f32 7938  ;;  %vm1158_vm3 = vcmask 60416  }
   0xd   : > { %vm5923_vm4 = vmand %vm454_vm0, %vm455_vm1  ;;  %v513_v1 = vld [vmem:[#allocation2 + $0x8] sm:$0x1]  ;;  %v5853_v3 = vmov 0   ;;  %v457_v4 = vld [vmem:[#allocation2] sm:$0x1]  ;;  %s7491_s26 = smov (!%p412_p4, %s5378_s26), 31 }
   0xe   : > { %vm5928_vm5 = vmand %vm454_vm0, %vm511_vm2  ;;  %1327 = vst.msk [vmem:[#allocation2 + $0x4] sm:$0xf] %vm1158_vm3, %v5853_v3  ;;  %v458_v6 = vsel %vm5923_vm4, 0, %v457_v4  ;;  %v460_v7 = vld [vmem:[#allocation2 + $0xc] sm:$0x1]  ;;  %s5546_s27 = sshll.u32 %s7491_s26, 3 }
   0xf   : > { %1386 = vst.msk [vmem:[#allocation2 + $0xd0] sm:$0xf] %vm1158_vm3, %v5853_v3  ;;  %v514_v5 = vsel %vm5928_vm5, 0, %v513_v1  ;;  %459 = vst [vmem:[#allocation2] sm:$0x1] %v458_v6  ;;  %v461_v8 = vsel %vm5923_vm4, 0, %v460_v7  ;;  %s5963_s30 = scalar_lea.vmem %s7467_s1, %s5546_s27 }
  0x10   : > { %515 = vst [vmem:[#allocation2 + $0x8] sm:$0x1] %v514_v5  ;;  %v463_v9 = vld [vmem:[#allocation2 + $0x18] sm:$0x1]  ;;  %v516_v10 = vld [vmem:[#allocation2 + $0x14] sm:$0x1]  ;;  %vm5954_vm6 = vmand %vm1158_vm3, %vm511_vm2 }
  0x11   : > { %462 = vst [vmem:[#allocation2 + $0xc] sm:$0x1] %v461_v8  ;;  %v464_v11 = vsel %vm5923_vm4, 0, %v463_v9  ;;  %v517_v12 = vsel %vm5928_vm5, 0, %v516_v10  ;;  %v466_v13 = vld [vmem:[#allocation2 + $0x24] sm:$0x1] }
  0x12   : > { %v519_v14 = vld [vmem:[#allocation2 + $0x20] sm:$0x1]  ;;  %465 = vst [vmem:[#allocation2 + $0x18] sm:$0x1] %v464_v11  ;;  %518 = vst [vmem:[#allocation2 + $0x14] sm:$0x1] %v517_v12 }
  0x13   : > { %v467_v15 = vsel %vm5923_vm4, 0, %v466_v13  ;;  %v520_v16 = vsel %vm5928_vm5, 0, %v519_v14  ;;  %v469_v17 = vld [vmem:[#allocation2 + $0x30] sm:$0x1]  ;;  %v522_v20 = vld [vmem:[#allocation2 + $0x2c] sm:$0x1] }
  0x14   : > { %468 = vst [vmem:[#allocation2 + $0x24] sm:$0x1] %v467_v15  ;;  %521 = vst [vmem:[#allocation2 + $0x20] sm:$0x1] %v520_v16  ;;  %v470_v19 = vsel %vm5923_vm4, 0, %v469_v17  ;;  %v5618_v23 = vld [vmem:[%s5963_s30] sm:$0xff]  }
  0x15   : > { %v472_v21 = vld [vmem:[#allocation2 + $0x3c] sm:$0x1]  ;;  %v1455_v22 = vld [vmem:[#allocation2 + $0x4] sm:$0xf]  ;;  %v5681_v24 = vld [vmem:[%s5963_s30 + $0x8] sm:$0xff]   ;;  %v523_v25 = vsel %vm5928_vm5, 0, %v522_v20  ;;  %v5619_v30 = vunpack.c.l.bf16 %v5618_v23  ;;  %v5620_v31 = vunpack.c.h.bf16 %v5618_v23 }
  0x16   : > { %471 = vst [vmem:[#allocation2 + $0x30] sm:$0x1] %v470_v19  ;;  %v473_v26 = vsel %vm5923_vm4, 0, %v472_v21  ;;  %v1515_v27 = vshll.u32 %v1455_v22, 16  ;;  %v1519_v28 = vshrl.u32 %v1455_v22, 16  ;;  %v5682_v32 = vld [vmem:[%s5963_s30 + $0x10] sm:$0xff]   ;;  %v5623_v35 = vunpack.c.l.bf16 %v5681_v24 }
  0x17   : > { %v5976_v29 = vld [vmem:[%s7469_s3] ss:$0 sm:$0xff]  ;;  %524 = vst [vmem:[#allocation2 + $0x2c] sm:$0x1] %v523_v25  ;;  %474 = vst [vmem:[#allocation2 + $0x3c] sm:$0x1] %v473_v26  ;;  %v5624_v36 = vunpack.c.h.bf16 %v5681_v24  ;;  %v5627_v37 = vunpack.c.l.bf16 %v5682_v32  ;;  %v5628_v38 = vunpack.c.h.bf16 %v5682_v32 }
  0x18   : > { %v1328_v33 = vld [vmem:[#allocation2 + $0x8] sm:$0x1]  ;;  %vm1502_vm7 = vsmask.f32 3328  ;;  %vm1503_vm8 = vsmask.f32 7440  ;;  %v637_v45 = vmul.f32 %v5619_v30, %v5976_v29  ;;  %v638_v46 = vmul.f32 %v5620_v31, %v5976_v29 }
  0x19   : > { %v1324_v34 = vld [vmem:[#allocation2] sm:$0xf]  ;;  %v5683_v39 = vld [vmem:[%s5963_s30 + $0x18] sm:$0xff]   ;;  %v1329_v40 = vsel %vm5923_vm4, 0, %v1328_v33  ;;  %v5982_v41 = vrot.slane %v1515_v27, 5  ;;  %v1521_v42 = vrot.slane %v1519_v28, 4  ;;  %v639_v47 = vmul.f32 %v5623_v35, %v5976_v29  ;;  %vm6018_vm10 = vmor %vm1502_vm7, %vm1503_vm8 }
  0x1a   : > { %v1325_v43 = vsel %vm5954_vm6, 0, %v1324_v34  ;;  %v5989_v44 = vld [vmem:[%s7470_s4] ss:$0 sm:$0xff]  ;;  %1330 = vst [vmem:[#allocation2 + $0x8] sm:$0x1] %v1329_v40  ;;  %v640_v48 = vmul.f32 %v5624_v36, %v5976_v29  ;;  %v641_v50 = vmul.f32 %v5627_v37, %v5976_v29  ;;  %v642_v51 = vmul.f32 %v5628_v38, %v5976_v29  ;;  %s7493_s23 = smov (!%p446_p5, %s5843_s23), 1 }
  0x1b   : > { %1326 = vst [vmem:[#allocation2] sm:$0xf] %v1325_v43  ;;  %v1522_v49 = vor.u32 %v1521_v42, %v5982_v41  ;;  %vm835_vm9 = vsmask.f32 4368  ;;  %v5631_v52 = vunpack.c.l.bf16 %v5683_v39  ;;  %v675_v53 = vadd.f32 %v5989_v44, %v637_v45  ;;  %v1160_v33 = vld [vmem:[#allocation2 + $0xc] sm:$0xf] }
  0x1c   : > { %v676_v54 = vadd.f32 %v5989_v44, %v638_v46  ;;  %v677_v55 = vadd.f32 %v5989_v44, %v639_v47  ;;  %v678_v56 = vadd.f32 %v5989_v44, %v640_v48  ;;  %v679_v58 = vadd.f32 %v5989_v44, %v641_v50  ;;  %vm6026_vm11 = vmor %vm455_vm1, %vm835_vm9  ;;  %v1168_v43 = vld [vmem:[#allocation2 + $0x18] sm:$0xf]  ;;  %s5387_s26 = sshll.u32 %s7493_s23, 1 }
  0x1d   : > { %v1523_v57 = vrot.slane %v1522_v49, 4  ;;  %v680_v59 = vadd.f32 %v5989_v44, %v642_v51  ;;  %v5632_v60 = vunpack.c.h.bf16 %v5683_v39  ;;  %v707_v61 = vmax.f32 %v675_v53, 0.0  ;;  %v1165_v49 = vld [vmem:[#allocation2 + $0x14] sm:$0x1] }
  0x1e   : > { %v708_v62 = vmax.f32 %v676_v54, 0.0  ;;  %v709_v63 = vmax.f32 %v677_v55, 0.0  ;;  %v710_v1 = vmax.f32 %v678_v56, 0.0  ;;  %v711_v3 = vmax.f32 %v679_v58, 0.0  ;;  %v5684_v58 = vld [vmem:[%s5963_s30 + $0x20] sm:$0xff]  }
  0x1f   : > { %v712_v4 = vmax.f32 %v680_v59, 0.0  ;;  %v643_v5 = vmul.f32 %v5631_v52, %v5976_v29  ;;  %v644_v6 = vmul.f32 %v5632_v60, %v5976_v29  ;;  %v5549_v7 = vpack.c.bf16 %v707_v61, %v707_v61 }
  0x20   : > { %v5550_v8 = vpack.c.bf16 %v708_v62, %v708_v62  ;;  %v5551_v9 = vpack.c.bf16 %v709_v63, %v709_v63  ;;  %v5552_v10 = vpack.c.bf16 %v710_v1, %v710_v1  ;;  %v6006_v13 = vpack.c.bf16 %v711_v3, %v711_v3  ;;  %v1172_v63 = vld [vmem:[#allocation2 + $0x20] sm:$0x1] }
  0x21   : > { %v1456_v11 = vld [vmem:[#allocation2 + $0x8] sm:$0x1]  ;;  %v6008_v14 = vpack.c.bf16 %v712_v4, %v712_v4  ;;  %v6011_v15 = vadd.f32 %v5989_v44, %v643_v5  ;;  %v6014_v16 = vadd.f32 %v5989_v44, %v644_v6  ;;  %v838_v21 = vshrl.u32 %v5549_v7, 16  ;;  %v1175_v4 = vld [vmem:[#allocation2 + $0x24] sm:$0xf] }
  0x22   : > { %v1454_v12 = vld [vmem:[#allocation2] sm:$0xf]  ;;  %v1525_v17 = vshll.u32 %v1456_v11, 16  ;;  %v841_v23 = vshll.u32 %v5549_v7, 16  ;;  %v846_v24 = vshrl.u32 %v5550_v8, 16  ;;  %v849_v25 = vshll.u32 %v5550_v8, 16 }
  0x23   : > { %v1506_v19 = vshrl.u32 %v1454_v12, 16  ;;  %v1509_v20 = vshll.u32 %v1454_v12, 16  ;;  %v855_v26 = vshrl.u32 %v5551_v9, 16  ;;  %v840_v31 = vrot.slane %v838_v21, 7 }
  0x24   : > { %v1527_v27 = vrot.slane %v1525_v17, 5  ;;  %v848_v32 = vrot.slane %v846_v24, 7  ;;  %v858_v35 = vshll.u32 %v5551_v9, 16  ;;  %v863_v36 = vshrl.u32 %v5552_v10, 16  ;;  %v1179_v9 = vld [vmem:[#allocation2 + $0x2c] sm:$0x1] }
  0x25   : > { %v1508_v28 = vrot.slane %v1506_v19, 4  ;;  %v1511_v30 = vrot.slane %v1509_v20, 5  ;;  %v857_v34 = vrot.slane %v855_v26, 7  ;;  %v843_v40 = vor.u32 %v841_v23, %v840_v31 }
  0x26   : > { %v1528_v37 = vsel %vm6018_vm10, %v1523_v57, %v1527_v27  ;;  %v844_v42 = vrot.slane %v840_v31, 4  ;;  %v851_v45 = vor.u32 %v849_v25, %v848_v32  ;;  %v865_v48 = vrot.slane %v863_v36, 7 }
  0x27   : > { %v1512_v38 = vor.u32 %v1511_v30, %v1508_v28  ;;  %1891 = vrot.lane.b32.xlu0 %v1528_v37, %s5854_s12  ;;  %v860_v46 = vor.u32 %v858_v35, %v857_v34  ;;  %v861_v47 = vrot.slane %v857_v34, 4  ;;  %v1161_v51 = vsel %vm5954_vm6, %v843_v40, %v1160_v33 }
  0x28   : > { %v866_v52 = vshll.u32 %v5552_v10, 16  ;;  %v853_v53 = vrot.slane %v848_v32, 4  ;;  %v852_v54 = vsel %vm6026_vm11, %v844_v42, %v851_v45  ;;  %1162 = vst [vmem:[#allocation2 + $0xc] sm:$0xf] %v1161_v51  ;;  %v872_v56 = vshrl.u32 %v6006_v13, 16 }
  0x29   : > { %v1513_v50 = vrot.slane %v1512_v38, 4  ;;  %v1169_v55 = vsel %vm5954_vm6, %v860_v46, %v1168_v43  ;;  %v875_v57 = vshll.u32 %v6006_v13, 16  ;;  %1164 = vst.msk [vmem:[#allocation2 + $0x10] sm:$0xf] %vm1158_vm3, %v852_v54  ;;  %v880_v62 = vshrl.u32 %v6008_v14, 16 }
  0x2a   : > { %v868_v60 = vor.u32 %v866_v52, %v865_v48  ;;  %1170 = vst [vmem:[#allocation2 + $0x18] sm:$0xf] %v1169_v55  ;;  %v1166_v61 = vsel %vm5923_vm4, %v853_v53, %v1165_v49  ;;  %v874_v1 = vrot.slane %v872_v56, 7  ;;  %v883_v3 = vshll.u32 %v6008_v14, 16 }
  0x2b   : > { %v1518_v59 = vsel %vm6018_vm10, %v1513_v50, %v5982_v41  ;;  %1167 = vst [vmem:[#allocation2 + $0x14] sm:$0x1] %v1166_v61  ;;  %v870_v5 = vrot.slane %v865_v48, 4  ;;  %v713_v41 = vmax.f32 %v6011_v15, 0.0  ;;  %v882_v7 = vrot.slane %v880_v62, 7 }
  0x2c   : > { %1889 = vrot.lane.b32.xlu0 %v1518_v59, %s5854_s12  ;;  %v869_v6 = vsel %vm6026_vm11, %v861_v47, %v868_v60  ;;  %v714_v8 = vmax.f32 %v6014_v16, 0.0  ;;  %v5635_v10 = vunpack.c.l.bf16 %v5684_v58  ;;  %v877_v11 = vor.u32 %v875_v57, %v874_v1 }
  0x2d   : > { %1171 = vst.msk [vmem:[#allocation2 + $0x1c] sm:$0xf] %vm1158_vm3, %v869_v6  ;;  %v878_v12 = vrot.slane %v874_v1, 4  ;;  %v1173_v13 = vsel %vm5923_vm4, %v870_v5, %v1172_v63  ;;  %v5555_v14 = vpack.c.bf16 %v713_v41, %v713_v41  ;;  %v885_v17 = vor.u32 %v883_v3, %v882_v7 }
  0x2e   : > { %1174 = vst [vmem:[#allocation2 + $0x20] sm:$0x1] %v1173_v13  ;;  %v6056_v19 = vpack.c.bf16 %v714_v8, %v714_v8  ;;  %v887_v15 = vrot.slane %v882_v7, 4  ;;  %v5636_v20 = vunpack.c.h.bf16 %v5684_v58  ;;  %v1176_v21 = vsel %vm5954_vm6, %v877_v11, %v1175_v4 }
  0x2f   : > { %v889_v16 = vshrl.u32 %v5555_v14, 16  ;;  %v892_v23 = vshll.u32 %v5555_v14, 16  ;;  %v645_v24 = vmul.f32 %v5635_v10, %v5976_v29  ;;  %v1457_v25 = vld [vmem:[#allocation2 + $0xc] sm:$0xf]  ;;  %v886_v26 = vsel %vm6026_vm11, %v878_v12, %v885_v17  ;;  %1177 = vst [vmem:[#allocation2 + $0x24] sm:$0xf] %v1176_v21 }
  0x30   : > { %v897_v27 = vshrl.u32 %v6056_v19, 16  ;;  %v900_v28 = vshll.u32 %v6056_v19, 16  ;;  %v1180_v30 = vsel %vm5923_vm4, %v887_v15, %v1179_v9  ;;  %v1458_v31 = vld [vmem:[#allocation2 + $0x10] sm:$0xf]  ;;  %v1530_v32 = vshrl.u32 %v1457_v25, 16 }
  0x31   : > { %v1533_v33 = vshll.u32 %v1457_v25, 16  ;;  %v1460_v34 = vld [vmem:[#allocation2 + $0x18] sm:$0xf]  ;;  %1178 = vst.msk [vmem:[#allocation2 + $0x28] sm:$0xf] %vm1158_vm3, %v886_v26  ;;  %v646_v35 = vmul.f32 %v5636_v20, %v5976_v29  ;;  %v6070_v36 = vadd.f32 %v5989_v44, %v645_v24  ;;  %v1539_v37 = vshll.u32 %v1458_v31, 16 }
  0x32   : > { %1181 = vst [vmem:[#allocation2 + $0x2c] sm:$0x1] %v1180_v30  ;;  %v1543_v38 = vshrl.u32 %v1458_v31, 16  ;;  %v1554_v40 = vshrl.u32 %v1460_v34, 16  ;;  %v1557_v42 = vshll.u32 %v1460_v34, 16  ;;  %v1532_v45 = vrot.slane %v1530_v32, 4 }
  0x33   : > { %v1459_v43 = vld [vmem:[#allocation2 + $0x14] sm:$0x1]  ;;  %v1535_v46 = vrot.slane %v1533_v33, 5  ;;  %v891_v48 = vrot.slane %v889_v16, 7  ;;  %v1541_v49 = vrot.slane %v1539_v37, 5  ;;  %v6080_v26 = vrot.slane %v897_v27, 7 }
  0x34   : > { %v1549_v47 = vshll.u32 %v1459_v43, 16  ;;  %v1545_v50 = vrot.slane %v1543_v38, 4  ;;  %v1461_v51 = vld [vmem:[#allocation2 + $0x1c] sm:$0xf]  ;;  %v1556_v52 = vrot.slane %v1554_v40, 4  ;;  %v1559_v53 = vrot.slane %v1557_v42, 5 }
  0x35   : > { %v1536_v54 = vor.u32 %v1535_v46, %v1532_v45  ;;  %v1563_v55 = vshll.u32 %v1461_v51, 16  ;;  %v1567_v56 = vshrl.u32 %v1461_v51, 16  ;;  %v1462_v58 = vld [vmem:[#allocation2 + $0x20] sm:$0x1]  ;;  %v894_v62 = vor.u32 %v892_v23, %v891_v48  ;;  %v1182_v14 = vld [vmem:[#allocation2 + $0x30] sm:$0xf] }
  0x36   : > { %v1551_v57 = vrot.slane %v1549_v47, 5  ;;  %v1560_v59 = vor.u32 %v1559_v53, %v1556_v52  ;;  %v1546_v60 = vor.u32 %v1545_v50, %v1541_v49  ;;  %v1573_v61 = vshll.u32 %v1462_v58, 16  ;;  %v1463_v3 = vld [vmem:[#allocation2 + $0x24] sm:$0xf]  ;;  %v525_v30 = vld [vmem:[#allocation2 + $0x38] sm:$0x1] }
  0x37   : > { %v1537_v63 = vrot.slane %v1536_v54, 4  ;;  %v1565_v1 = vrot.slane %v1563_v55, 5  ;;  %v1569_v4 = vrot.slane %v1567_v56, 4  ;;  %v895_v5 = vrot.slane %v891_v48, 4  ;;  %v475_v42 = vld [vmem:[#allocation2 + $0x48] sm:$0x1] }
  0x38   : > { %v1561_v41 = vrot.slane %v1560_v59, 4  ;;  %v1547_v6 = vrot.slane %v1546_v60, 4  ;;  %v1464_v7 = vld [vmem:[#allocation2 + $0x28] sm:$0xf]  ;;  %v1578_v8 = vshrl.u32 %v1463_v3, 16  ;;  %v1581_v9 = vshll.u32 %v1463_v3, 16 }
  0x39   : > { %v1542_v10 = vsel %vm6018_vm10, %v1537_v63, %v1541_v49  ;;  %v1587_v11 = vshll.u32 %v1464_v7, 16  ;;  %v1591_v12 = vshrl.u32 %v1464_v7, 16  ;;  %v1570_v13 = vor.u32 %v1569_v4, %v1565_v1  ;;  %v1465_v17 = vld [vmem:[#allocation2 + $0x2c] sm:$0x1]  ;;  %v478_v50 = vld [vmem:[#allocation2 + $0x54] sm:$0x1] }
  0x3a   : > { %1893 = vrot.lane.b32.xlu1 %v1542_v10, %s5854_s12  ;;  %v1566_v15 = vsel %vm6018_vm10, %v1561_v41, %v1565_v1  ;;  %v1552_v20 = vsel %vm6018_vm10, %v1547_v6, %v1551_v57  ;;  %v1580_v21 = vrot.slane %v1578_v8, 4  ;;  %v1583_v16 = vrot.slane %v1581_v9, 5  ;;  %v5685_v43 = vld [vmem:[%s5963_s30 + $0x28] sm:$0xff]   ;;  %v5686_v59 = vld [vmem:[%s5963_s30 + $0x30] sm:$0xff]   ;;  %v1189_v7 = vld [vmem:[#allocation2 + $0x3c] sm:$0xf] }
  0x3b   : > { %1897 = vrot.lane.b32.xlu0 %v1566_v15, %s5854_s12  ;;  %v1589_v23 = vrot.slane %v1587_v11, 5  ;;  %v1571_v24 = vrot.slane %v1570_v13, 4  ;;  %v1575_v25 = vrot.slane %v1573_v61, 5  ;;  %v1183_v32 = vsel %vm5954_vm6, %v894_v62, %v1182_v14  ;;  %v531_v60 = vld [vmem:[#allocation2 + $0x50] sm:$0x1] }
  0x3c   : > { %v1584_v31 = vor.u32 %v1583_v16, %v1580_v21  ;;  %v1593_v33 = vrot.slane %v1591_v12, 4  ;;  %v1597_v34 = vshll.u32 %v1465_v17, 16  ;;  %v902_v38 = vor.u32 %v900_v28, %v6080_v26  ;;  %1184 = vst [vmem:[#allocation2 + $0x30] sm:$0xf] %v1183_v32 }
  0x3d   : > { %v1576_v37 = vsel %vm6018_vm10, %v1571_v24, %v1575_v25  ;;  %v684_v40 = vadd.f32 %v5989_v44, %v646_v35  ;;  %v715_v27 = vmax.f32 %v6070_v36, 0.0  ;;  %v526_v48 = vsel %vm5928_vm5, 0, %v525_v30  ;;  %v528_v36 = vld [vmem:[#allocation2 + $0x44] sm:$0x1] }
  0x3e   : > { %1895 = vrot.lane.b32.xlu1 %v1552_v20, %s5854_s12  ;;  %v1585_v45 = vrot.slane %v1584_v31, 4  ;;  %v1594_v46 = vor.u32 %v1593_v33, %v1589_v23  ;;  %v1599_v47 = vrot.slane %v1597_v34, 5  ;;  %v903_v49 = vsel %vm6026_vm11, %v895_v5, %v902_v38  ;;  %527 = vst [vmem:[#allocation2 + $0x38] sm:$0x1] %v526_v48 }
  0x3f   : > { %v716_v19 = vmax.f32 %v684_v40, 0.0  ;;  %v5557_v28 = vpack.c.bf16 %v715_v27, %v715_v27  ;;  %v904_v35 = vrot.slane %v6080_v26, 4  ;;  %1185 = vst.msk [vmem:[#allocation2 + $0x34] sm:$0xf] %vm1158_vm3, %v903_v49  ;;  %v476_v53 = vsel %vm5923_vm4, 0, %v475_v42 }
  0x40   : > { %v1590_v51 = vsel %vm6018_vm10, %v1585_v45, %v1589_v23  ;;  %v1595_v52 = vrot.slane %v1594_v46, 4  ;;  %v5639_v54 = vunpack.c.l.bf16 %v5685_v43  ;;  %477 = vst [vmem:[#allocation2 + $0x48] sm:$0x1] %v476_v53  ;;  %v5640_v58 = vunpack.c.h.bf16 %v5685_v43  ;;  %v481_v49 = vld [vmem:[#allocation2 + $0x60] sm:$0x1] }
  0x41   : > { %1901 = vrot.lane.b32.xlu0 %v1590_v51, %s5854_s12  ;;  %v5558_v55 = vpack.c.bf16 %v716_v19, %v716_v19  ;;  %v906_v56 = vshrl.u32 %v5557_v28, 16  ;;  %v909_v57 = vshll.u32 %v5557_v28, 16  ;;  %v529_v63 = vsel %vm5928_vm5, 0, %v528_v36 }
  0x42   : > { %1899 = vrot.lane.b32.xlu1 %v1576_v37, %s5854_s12  ;;  %v1600_v61 = vsel %vm6018_vm10, %v1595_v52, %v1599_v47  ;;  %v647_v62 = vmul.f32 %v5639_v54, %v5976_v29  ;;  %v479_v1 = vsel %vm5923_vm4, 0, %v478_v50  ;;  %v648_v41 = vmul.f32 %v5640_v58, %v5976_v29  ;;  %530 = vst [vmem:[#allocation2 + $0x44] sm:$0x1] %v529_v63  ;;  %v6131_v50 = vld [vmem:[%s5963_s30 + $0x38] sm:$0xff]  }
  0x43   : > { %v908_v3 = vrot.slane %v906_v56, 7  ;;  %v914_v4 = vshrl.u32 %v5558_v55, 16  ;;  %v917_v5 = vshll.u32 %v5558_v55, 16  ;;  %480 = vst [vmem:[#allocation2 + $0x54] sm:$0x1] %v479_v1  ;;  %v5643_v9 = vunpack.c.l.bf16 %v5686_v59 }
  0x44   : > { %v1466_v6 = vld [vmem:[#allocation2 + $0x30] sm:$0xf]  ;;  %v685_v8 = vadd.f32 %v5989_v44, %v647_v62  ;;  %v5644_v10 = vunpack.c.h.bf16 %v5686_v59  ;;  %v532_v11 = vsel %vm5928_vm5, 0, %v531_v60  ;;  %v686_v21 = vadd.f32 %v5989_v44, %v648_v41 }
  0x45   : > { %v1602_v12 = vshrl.u32 %v1466_v6, 16  ;;  %v1605_v13 = vshll.u32 %v1466_v6, 16  ;;  %v911_v14 = vor.u32 %v909_v57, %v908_v3  ;;  %v912_v17 = vrot.slane %v908_v3, 4  ;;  %533 = vst [vmem:[#allocation2 + $0x50] sm:$0x1] %v532_v11 }
  0x46   : > { %1903 = vrot.lane.b32.xlu1 %v1600_v61, %s5854_s12  ;;  %v916_v15 = vrot.slane %v914_v4, 7  ;;  %v1186_v20 = vld [vmem:[#allocation2 + $0x38] sm:$0x1]  ;;  %v717_v16 = vmax.f32 %v685_v8, 0.0  ;;  %v649_v23 = vmul.f32 %v5643_v9, %v5976_v29  ;;  %v1467_v24 = vld [vmem:[#allocation2 + $0x34] sm:$0xf]  ;;  %v650_v42 = vmul.f32 %v5644_v10, %v5976_v29 }
  0x47   : > { %v1604_v25 = vrot.slane %v1602_v12, 4  ;;  %v1607_v26 = vrot.slane %v1605_v13, 5  ;;  %v1190_v30 = vsel %vm5954_vm6, %v911_v14, %v1189_v7  ;;  %v1187_v31 = vsel %vm5923_vm4, %v904_v35, %v1186_v20  ;;  %v1196_v61 = vld [vmem:[#allocation2 + $0x48] sm:$0xf] }
  0x48   : > { %v1611_v32 = vshll.u32 %v1467_v24, 16  ;;  %v1615_v33 = vshrl.u32 %v1467_v24, 16  ;;  %v919_v34 = vor.u32 %v917_v5, %v916_v15  ;;  %1191 = vst [vmem:[#allocation2 + $0x3c] sm:$0xf] %v1190_v30  ;;  %1188 = vst [vmem:[#allocation2 + $0x38] sm:$0x1] %v1187_v31  ;;  %v5559_v40 = vpack.c.bf16 %v717_v16, %v717_v16 }
  0x49   : > { %v718_v37 = vmax.f32 %v686_v21, 0.0  ;;  %v1608_v38 = vor.u32 %v1607_v26, %v1604_v25  ;;  %v921_v27 = vrot.slane %v916_v15, 4  ;;  %v1193_v48 = vld [vmem:[#allocation2 + $0x44] sm:$0x1]  ;;  %v687_v54 = vadd.f32 %v5989_v44, %v649_v23 }
  0x4a   : > { %v1613_v43 = vrot.slane %v1611_v32, 5  ;;  %v920_v45 = vsel %vm6026_vm11, %v912_v17, %v919_v34  ;;  %v1617_v46 = vrot.slane %v1615_v33, 4  ;;  %v923_v28 = vshrl.u32 %v5559_v40, 16 }
  0x4b   : > { %v5560_v47 = vpack.c.bf16 %v718_v37, %v718_v37  ;;  %v1609_v19 = vrot.slane %v1608_v38, 4  ;;  %1192 = vst.msk [vmem:[#allocation2 + $0x40] sm:$0xf] %vm1158_vm3, %v920_v45  ;;  %v926_v35 = vshll.u32 %v5559_v40, 16  ;;  %v1194_v36 = vsel %vm5923_vm4, %v921_v27, %v1193_v48  ;;  %v1203_v48 = vld [vmem:[#allocation2 + $0x54] sm:$0xf] }
  0x4c   : > { %v1618_v51 = vor.u32 %v1617_v46, %v1613_v43  ;;  %1195 = vst [vmem:[#allocation2 + $0x44] sm:$0x1] %v1194_v36  ;;  %v925_v56 = vrot.slane %v923_v28, 7  ;;  %v688_v57 = vadd.f32 %v5989_v44, %v650_v42  ;;  %v482_v58 = vsel %vm5923_vm4, 0, %v481_v49  ;;  %v1200_v17 = vld [vmem:[#allocation2 + $0x50] sm:$0x1] }
  0x4d   : > { %v931_v52 = vshrl.u32 %v5560_v47, 16  ;;  %v934_v53 = vshll.u32 %v5560_v47, 16  ;;  %v1614_v55 = vsel %vm6018_vm10, %v1609_v19, %v1613_v43  ;;  %v719_v62 = vmax.f32 %v687_v54, 0.0  ;;  %483 = vst [vmem:[#allocation2 + $0x60] sm:$0x1] %v482_v58 }
  0x4e   : > { %1905 = vrot.lane.b32.xlu0 %v1614_v55, %s5854_s12  ;;  %v1619_v59 = vrot.slane %v1618_v51, 4  ;;  %v5647_v63 = vunpack.c.l.bf16 %v6131_v50  ;;  %v928_v4 = vor.u32 %v926_v35, %v925_v56  ;;  %v929_v5 = vrot.slane %v925_v56, 4  ;;  %v534_v43 = vld [vmem:[#allocation2 + $0x5c] sm:$0x1] }
  0x4f   : > { %v933_v60 = vrot.slane %v931_v52, 7  ;;  %v1469_v1 = vld [vmem:[#allocation2 + $0x3c] sm:$0xf]  ;;  %v1468_v3 = vld [vmem:[#allocation2 + $0x38] sm:$0x1]  ;;  %v720_v41 = vmax.f32 %v688_v57, 0.0  ;;  %v5648_v6 = vunpack.c.h.bf16 %v6131_v50  ;;  %v5561_v12 = vpack.c.bf16 %v719_v62, %v719_v62 }
  0x50   : > { %v1626_v7 = vshrl.u32 %v1469_v1, 16  ;;  %v1629_v8 = vshll.u32 %v1469_v1, 16  ;;  %v1621_v9 = vshll.u32 %v1468_v3, 16  ;;  %v1197_v11 = vsel %vm5954_vm6, %v928_v4, %v1196_v61  ;;  %v5688_v3 = vld [vmem:[%s5963_s30 + $0x40] sm:$0xff]  }
  0x51   : > { %v936_v10 = vor.u32 %v934_v53, %v933_v60  ;;  %v5562_v13 = vpack.c.bf16 %v720_v41, %v720_v41  ;;  %v938_v14 = vrot.slane %v933_v60, 4  ;;  %1198 = vst [vmem:[#allocation2 + $0x48] sm:$0xf] %v1197_v11  ;;  %v940_v30 = vshrl.u32 %v5561_v12, 16 }
  0x52   : > { %v1470_v15 = vld [vmem:[#allocation2 + $0x40] sm:$0xf]  ;;  %v1628_v20 = vrot.slane %v1626_v7, 4  ;;  %v1631_v21 = vrot.slane %v1629_v8, 5  ;;  %v1623_v16 = vrot.slane %v1621_v9, 5  ;;  %v943_v31 = vshll.u32 %v5561_v12, 16 }
  0x53   : > { %v937_v23 = vsel %vm6026_vm11, %v929_v5, %v936_v10  ;;  %v1635_v24 = vshll.u32 %v1470_v15, 16  ;;  %v1639_v25 = vshrl.u32 %v1470_v15, 16  ;;  %v1471_v26 = vld [vmem:[#allocation2 + $0x44] sm:$0x1]  ;;  %v948_v37 = vshrl.u32 %v5562_v13, 16 }
  0x54   : > { %1199 = vst.msk [vmem:[#allocation2 + $0x4c] sm:$0xf] %vm1158_vm3, %v937_v23  ;;  %v1632_v32 = vor.u32 %v1631_v21, %v1628_v20  ;;  %v1624_v33 = vsel %vm6018_vm10, %v1619_v59, %v1623_v16  ;;  %v1645_v34 = vshll.u32 %v1471_v26, 16  ;;  %v942_v27 = vrot.slane %v940_v30, 7  ;;  %v484_v59 = vld [vmem:[#allocation2 + $0x6c] sm:$0x1] }
  0x55   : > { %v1637_v38 = vrot.slane %v1635_v24, 5  ;;  %1907 = vrot.lane.b32.xlu1 %v1624_v33, %s5854_s12  ;;  %v1641_v40 = vrot.slane %v1639_v25, 4  ;;  %v951_v42 = vshll.u32 %v5562_v13, 16  ;;  %v6150_v47 = vrot.slane %v948_v37, 7  ;;  %v537_v7 = vld [vmem:[#allocation2 + $0x68] sm:$0x1] }
  0x56   : > { %v1633_v45 = vrot.slane %v1632_v32, 4  ;;  %v1647_v46 = vrot.slane %v1645_v34, 5  ;;  %v1201_v49 = vsel %vm5923_vm4, %v938_v14, %v1200_v17  ;;  %v945_v28 = vor.u32 %v943_v31, %v942_v27  ;;  %v1210_v34 = vld [vmem:[#allocation2 + $0x60] sm:$0xf] }
  0x57   : > { %v1642_v19 = vor.u32 %v1641_v40, %v1637_v38  ;;  %v946_v35 = vrot.slane %v942_v27, 4  ;;  %1202 = vst [vmem:[#allocation2 + $0x50] sm:$0x1] %v1201_v49  ;;  %v651_v36 = vmul.f32 %v5647_v63, %v5976_v29  ;;  %v953_v51 = vor.u32 %v951_v42, %v6150_v47 }
  0x58   : > { %v1638_v50 = vsel %vm6018_vm10, %v1633_v45, %v1637_v38  ;;  %v652_v52 = vmul.f32 %v5648_v6, %v5976_v29  ;;  %v535_v53 = vsel %vm5928_vm5, 0, %v534_v43  ;;  %v1472_v54 = vld [vmem:[#allocation2 + $0x48] sm:$0xf]  ;;  %v1204_v56 = vsel %vm5954_vm6, %v945_v28, %v1203_v48 }
  0x59   : > { %1909 = vrot.lane.b32.xlu0 %v1638_v50, %s5854_s12  ;;  %v1643_v55 = vrot.slane %v1642_v19, 4  ;;  %v689_v57 = vadd.f32 %v5989_v44, %v651_v36  ;;  %536 = vst [vmem:[#allocation2 + $0x5c] sm:$0x1] %v535_v53  ;;  %v955_v58 = vrot.slane %v6150_v47, 4  ;;  %v1650_v61 = vshrl.u32 %v1472_v54, 16 }
  0x5a   : > { %v1653_v62 = vshll.u32 %v1472_v54, 16  ;;  %v954_v63 = vsel %vm6026_vm11, %v946_v35, %v953_v51  ;;  %1205 = vst [vmem:[#allocation2 + $0x54] sm:$0xf] %v1204_v56  ;;  %v690_v1 = vadd.f32 %v5989_v44, %v652_v52  ;;  %v485_v11 = vsel %vm5923_vm4, 0, %v484_v59  ;;  %v5689_v56 = vld [vmem:[%s5963_s30 + $0x48] sm:$0xff]  }
  0x5b   : > { %v1473_v60 = vld [vmem:[#allocation2 + $0x4c] sm:$0xf]  ;;  %v1648_v41 = vsel %vm6018_vm10, %v1643_v55, %v1647_v46  ;;  %1206 = vst.msk [vmem:[#allocation2 + $0x58] sm:$0xf] %vm1158_vm3, %v954_v63  ;;  %v721_v6 = vmax.f32 %v689_v57, 0.0  ;;  %v1652_v8 = vrot.slane %v1650_v61, 4  ;;  %v5651_v17 = vunpack.c.l.bf16 %v5688_v3 }
  0x5c   : > { %v1659_v4 = vshll.u32 %v1473_v60, 16  ;;  %v1663_v5 = vshrl.u32 %v1473_v60, 16  ;;  %v1655_v9 = vrot.slane %v1653_v62, 5  ;;  %1911 = vrot.lane.b32.xlu1 %v1648_v41, %s5854_s12  ;;  %v722_v10 = vmax.f32 %v690_v1, 0.0  ;;  %486 = vst [vmem:[#allocation2 + $0x6c] sm:$0x1] %v485_v11 }
  0x5d   : > { %v5563_v14 = vpack.c.bf16 %v721_v6, %v721_v6  ;;  %v5652_v16 = vunpack.c.h.bf16 %v5688_v3  ;;  %v538_v23 = vsel %vm5928_vm5, 0, %v537_v7  ;;  %v653_v38 = vmul.f32 %v5651_v17, %v5976_v29  ;;  %v487_v55 = vld [vmem:[#allocation2 + $0x78] sm:$0x1] }
  0x5e   : > { %v1661_v12 = vrot.slane %v1659_v4, 5  ;;  %v1665_v13 = vrot.slane %v1663_v5, 4  ;;  %v1656_v15 = vor.u32 %v1655_v9, %v1652_v8  ;;  %v1474_v20 = vld [vmem:[#allocation2 + $0x50] sm:$0x1]  ;;  %v5564_v21 = vpack.c.bf16 %v722_v10, %v722_v10  ;;  %539 = vst [vmem:[#allocation2 + $0x68] sm:$0x1] %v538_v23 }
  0x5f   : > { %v1669_v25 = vshll.u32 %v1474_v20, 16  ;;  %v957_v26 = vshrl.u32 %v5563_v14, 16  ;;  %v960_v30 = vshll.u32 %v5563_v14, 16  ;;  %v654_v60 = vmul.f32 %v5652_v16, %v5976_v29  ;;  %v540_v4 = vld [vmem:[#allocation2 + $0x74] sm:$0x1] }
  0x60   : > { %v1666_v24 = vor.u32 %v1665_v13, %v1661_v12  ;;  %v1657_v31 = vrot.slane %v1656_v15, 4  ;;  %v965_v32 = vshrl.u32 %v5564_v21, 16  ;;  %v968_v33 = vshll.u32 %v5564_v21, 16  ;;  %v1207_v37 = vld [vmem:[#allocation2 + $0x5c] sm:$0x1]  ;;  %v6201_v13 = vld [vmem:[%s5963_s30 + $0x50] sm:$0xff]  }
  0x61   : > { %v1475_v40 = vld [vmem:[#allocation2 + $0x54] sm:$0xf]  ;;  %v1671_v42 = vrot.slane %v1669_v25, 5  ;;  %v959_v43 = vrot.slane %v957_v26, 7  ;;  %v1208_v45 = vsel %vm5923_vm4, %v955_v58, %v1207_v37  ;;  %v691_v63 = vadd.f32 %v5989_v44, %v653_v38 }
  0x62   : > { %v1667_v27 = vrot.slane %v1666_v24, 4  ;;  %v1662_v46 = vsel %vm6018_vm10, %v1657_v31, %v1661_v12  ;;  %v1476_v47 = vld [vmem:[#allocation2 + $0x58] sm:$0xf]  ;;  %v1674_v48 = vshrl.u32 %v1475_v40, 16  ;;  %v1677_v49 = vshll.u32 %v1475_v40, 16 }
  0x63   : > { %v967_v19 = vrot.slane %v965_v32, 7  ;;  %1209 = vst [vmem:[#allocation2 + $0x5c] sm:$0x1] %v1208_v45  ;;  %1913 = vrot.lane.b32.xlu0 %v1662_v46, %s5854_s12  ;;  %v1683_v28 = vshll.u32 %v1476_v47, 16  ;;  %v1687_v35 = vshrl.u32 %v1476_v47, 16  ;;  %v962_v50 = vor.u32 %v960_v30, %v959_v43 }
  0x64   : > { %v1672_v36 = vsel %vm6018_vm10, %v1667_v27, %v1671_v42  ;;  %v1676_v51 = vrot.slane %v1674_v48, 4  ;;  %v1679_v52 = vrot.slane %v1677_v49, 5  ;;  %v963_v53 = vrot.slane %v959_v43, 4  ;;  %v490_v12 = vld [vmem:[#allocation2 + $0x84] sm:$0x1] }
  0x65   : > { %1915 = vrot.lane.b32.xlu1 %v1672_v36, %s5854_s12  ;;  %v970_v54 = vor.u32 %v968_v33, %v967_v19  ;;  %v1685_v57 = vrot.slane %v1683_v28, 5  ;;  %v1211_v58 = vsel %vm5954_vm6, %v962_v50, %v1210_v34  ;;  %v1689_v59 = vrot.slane %v1687_v35, 4  ;;  %v1214_v3 = vld [vmem:[#allocation2 + $0x68] sm:$0x1] }
  0x66   : > { %v1680_v61 = vor.u32 %v1679_v52, %v1676_v51  ;;  %1212 = vst [vmem:[#allocation2 + $0x60] sm:$0xf] %v1211_v58  ;;  %v972_v1 = vrot.slane %v967_v19, 4  ;;  %v692_v41 = vadd.f32 %v5989_v44, %v654_v60  ;;  %v488_v6 = vsel %vm5923_vm4, 0, %v487_v55 }
  0x67   : > { %v971_v62 = vsel %vm6026_vm11, %v963_v53, %v970_v54  ;;  %v1690_v5 = vor.u32 %v1689_v59, %v1685_v57  ;;  %v5655_v7 = vunpack.c.l.bf16 %v5689_v56  ;;  %v723_v9 = vmax.f32 %v691_v63, 0.0  ;;  %489 = vst [vmem:[#allocation2 + $0x78] sm:$0x1] %v488_v6  ;;  %v493_v6 = vld [vmem:[#allocation2 + $0x90] sm:$0x1] }
  0x68   : > { %1213 = vst.msk [vmem:[#allocation2 + $0x64] sm:$0xf] %vm1158_vm3, %v971_v62  ;;  %v1681_v8 = vrot.slane %v1680_v61, 4  ;;  %v1215_v10 = vsel %vm5923_vm4, %v972_v1, %v1214_v3  ;;  %v5656_v11 = vunpack.c.h.bf16 %v5689_v56  ;;  %v724_v15 = vmax.f32 %v692_v41, 0.0  ;;  %v543_v41 = vld [vmem:[#allocation2 + $0x80] sm:$0x1] }
  0x69   : > { %v1691_v17 = vrot.slane %v1690_v5, 4  ;;  %1216 = vst [vmem:[#allocation2 + $0x68] sm:$0x1] %v1215_v10  ;;  %v655_v20 = vmul.f32 %v5655_v7, %v5976_v29  ;;  %v541_v21 = vsel %vm5928_vm5, 0, %v540_v4  ;;  %v5565_v24 = vpack.c.bf16 %v723_v9, %v723_v9 }
  0x6a   : > { %v1477_v14 = vld [vmem:[#allocation2 + $0x5c] sm:$0x1]  ;;  %v1686_v16 = vsel %vm6018_vm10, %v1681_v8, %v1685_v57  ;;  %v656_v25 = vmul.f32 %v5656_v11, %v5976_v29  ;;  %542 = vst [vmem:[#allocation2 + $0x74] sm:$0x1] %v541_v21  ;;  %v5566_v26 = vpack.c.bf16 %v724_v15, %v724_v15  ;;  %v491_v31 = vsel %vm5923_vm4, 0, %v490_v12 }
  0x6b   : > { %v1693_v23 = vshll.u32 %v1477_v14, 16  ;;  %1917 = vrot.lane.b32.xlu0 %v1686_v16, %s5854_s12  ;;  %v693_v30 = vadd.f32 %v5989_v44, %v655_v20  ;;  %v5659_v32 = vunpack.c.l.bf16 %v6201_v13  ;;  %v974_v34 = vshrl.u32 %v5565_v24, 16  ;;  %492 = vst [vmem:[#allocation2 + $0x84] sm:$0x1] %v491_v31  ;;  %v1391_v11 = vld [vmem:[#allocation2 + $0x4] sm:$0xf] }
  0x6c   : > { %v977_v37 = vshll.u32 %v5565_v24, 16  ;;  %v694_v38 = vadd.f32 %v5989_v44, %v656_v25  ;;  %v982_v27 = vshrl.u32 %v5566_v26, 16  ;;  %v985_v29 = vshll.u32 %v5566_v26, 16  ;;  %v1217_v44 = vld [vmem:[#allocation2 + $0x6c] sm:$0xf]  ;;  %v5691_v24 = vld [vmem:[%s5963_s30 + $0x58] sm:$0xff]  }
  0x6d   : > { %v1695_v33 = vrot.slane %v1693_v23, 5  ;;  %v1478_v40 = vld [vmem:[#allocation2 + $0x60] sm:$0xf]  ;;  %v725_v42 = vmax.f32 %v693_v30, 0.0  ;;  %v5660_v43 = vunpack.c.h.bf16 %v6201_v13  ;;  %v976_v49 = vrot.slane %v974_v34, 7 }
  0x6e   : > { %v1698_v46 = vshrl.u32 %v1478_v40, 16  ;;  %v1701_v47 = vshll.u32 %v1478_v40, 16  ;;  %v984_v35 = vrot.slane %v982_v27, 7  ;;  %v726_v36 = vmax.f32 %v694_v38, 0.0  ;;  %1423 = vst.msk [vmem:[#allocation3 + $0x4] sm:$0xf] %vm1158_vm3, %v1391_v11 }
  0x6f   : > { %v1479_v45 = vld [vmem:[#allocation2 + $0x64] sm:$0xf]  ;;  %v1696_v48 = vsel %vm6018_vm10, %v1691_v17, %v1695_v33  ;;  %v979_v52 = vor.u32 %v977_v37, %v976_v49  ;;  %v980_v53 = vrot.slane %v976_v49, 4  ;;  %v5567_v61 = vpack.c.bf16 %v725_v42, %v725_v42  ;;  %v6229_v17 = vld [vmem:[%s7469_s3] ss:$0 sm:$0xff] }
  0x70   : > { %v1707_v19 = vshll.u32 %v1479_v45, 16  ;;  %v1711_v28 = vshrl.u32 %v1479_v45, 16  ;;  %1919 = vrot.lane.b32.xlu1 %v1696_v48, %s5854_s12  ;;  %v1700_v50 = vrot.slane %v1698_v46, 4  ;;  %v1703_v51 = vrot.slane %v1701_v47, 5  ;;  %v1480_v54 = vld [vmem:[#allocation2 + $0x68] sm:$0x1] }
  0x71   : > { %v987_v56 = vor.u32 %v985_v29, %v984_v35  ;;  %v1717_v58 = vshll.u32 %v1480_v54, 16  ;;  %v1218_v60 = vsel %vm5954_vm6, %v979_v52, %v1217_v44  ;;  %v5568_v62 = vpack.c.bf16 %v726_v36, %v726_v36  ;;  %v1221_v63 = vld [vmem:[#allocation2 + $0x74] sm:$0x1]  ;;  %v1224_v26 = vld [vmem:[#allocation2 + $0x78] sm:$0xf] }
  0x72   : > { %v1709_v55 = vrot.slane %v1707_v19, 5  ;;  %v1713_v57 = vrot.slane %v1711_v28, 4  ;;  %v1704_v59 = vor.u32 %v1703_v51, %v1700_v50  ;;  %1219 = vst [vmem:[#allocation2 + $0x6c] sm:$0xf] %v1218_v60  ;;  %v989_v5 = vrot.slane %v984_v35, 4 }
  0x73   : > { %v988_v1 = vsel %vm6026_vm11, %v980_v53, %v987_v56  ;;  %v1719_v4 = vrot.slane %v1717_v58, 5  ;;  %v991_v8 = vshrl.u32 %v5567_v61, 16  ;;  %v994_v9 = vshll.u32 %v5567_v61, 16  ;;  %v6245_v30 = vld [vmem:[%s7470_s4] ss:$0 sm:$0xff] }
  0x74   : > { %v1714_v3 = vor.u32 %v1713_v57, %v1709_v55  ;;  %v1705_v7 = vrot.slane %v1704_v59, 4  ;;  %1220 = vst.msk [vmem:[#allocation2 + $0x70] sm:$0xf] %vm1158_vm3, %v988_v1  ;;  %v999_v10 = vshrl.u32 %v5568_v62, 16  ;;  %v1002_v13 = vshll.u32 %v5568_v62, 16 }
  0x75   : > { %v1222_v14 = vsel %vm5923_vm4, %v989_v5, %v1221_v63  ;;  %v657_v15 = vmul.f32 %v6229_v17, %v5659_v32  ;;  %v993_v21 = vrot.slane %v991_v8, 7  ;;  %v658_v23 = vmul.f32 %v6229_v17, %v5660_v43  ;;  %v546_v34 = vld [vmem:[#allocation2 + $0x8c] sm:$0x1]  ;;  %v1390_v29 = vld [vmem:[#allocation2] sm:$0xf] }
  0x76   : > { %v1715_v12 = vrot.slane %v1714_v3, 4  ;;  %v1710_v20 = vsel %vm6018_vm10, %v1705_v7, %v1709_v55  ;;  %v6235_v16 = vrot.slane %v999_v10, 7  ;;  %1223 = vst [vmem:[#allocation2 + $0x74] sm:$0x1] %v1222_v14  ;;  %v544_v32 = vsel %vm5928_vm5, 0, %v543_v41  ;;  %v6271_v10 = vld [vmem:[%s5963_s30 + $0x60] sm:$0xff]  }
  0x77   : > { %1921 = vrot.lane.b32.xlu0 %v1710_v20, %s5854_s12  ;;  %v695_v31 = vadd.f32 %v6245_v30, %v657_v15  ;;  %v494_v33 = vsel %vm5923_vm4, 0, %v493_v6  ;;  %v996_v37 = vor.u32 %v994_v9, %v993_v21  ;;  %v997_v38 = vrot.slane %v993_v21, 4  ;;  %545 = vst [vmem:[#allocation2 + $0x80] sm:$0x1] %v544_v32  ;;  %v1392_v42 = vld [vmem:[#allocation2 + $0xc] sm:$0xf] }
  0x78   : > { %v1720_v25 = vsel %vm6018_vm10, %v1715_v12, %v1719_v4  ;;  %v1004_v40 = vor.u32 %v1002_v13, %v6235_v16  ;;  %v696_v27 = vadd.f32 %v6245_v30, %v658_v23  ;;  %495 = vst [vmem:[#allocation2 + $0x90] sm:$0x1] %v494_v33  ;;  %v1006_v45 = vrot.slane %v6235_v16, 4  ;;  %1422 = vst.msk [vmem:[#allocation3] sm:$0xf] %vm1158_vm3, %v1390_v29 }
  0x79   : > { %1923 = vrot.lane.b32.xlu1 %v1720_v25, %s5854_s12  ;;  %v727_v43 = vmax.f32 %v695_v31, 0.0  ;;  %v5663_v46 = vunpack.c.l.bf16 %v5691_v24  ;;  %v5664_v47 = vunpack.c.h.bf16 %v5691_v24  ;;  %1424 = vst.msk [vmem:[#allocation3 + $0x8] sm:$0xf] %vm1158_vm3, %v1392_v42  ;;  %v1481_v48 = vld [vmem:[#allocation2 + $0x6c] sm:$0xf]  ;;  %v1225_v19 = vsel %vm5954_vm6, %v996_v37, %v1224_v26 }
  0x7a   : > { %v1005_v49 = vsel %vm6026_vm11, %v997_v38, %v1004_v40  ;;  %v728_v28 = vmax.f32 %v696_v27, 0.0  ;;  %v547_v35 = vsel %vm5928_vm5, 0, %v546_v34  ;;  %v1722_v36 = vshrl.u32 %v1481_v48, 16  ;;  %1226 = vst [vmem:[#allocation2 + $0x78] sm:$0xf] %v1225_v19 }
  0x7b   : > { %v1482_v44 = vld [vmem:[#allocation2 + $0x70] sm:$0xf]  ;;  %v1725_v50 = vshll.u32 %v1481_v48, 16  ;;  %1227 = vst.msk [vmem:[#allocation2 + $0x7c] sm:$0xf] %vm1158_vm3, %v1005_v49  ;;  %v5569_v51 = vpack.c.bf16 %v727_v43, %v727_v43  ;;  %v659_v52 = vmul.f32 %v6229_v17, %v5663_v46  ;;  %v660_v56 = vmul.f32 %v6229_v17, %v5664_v47 }
  0x7c   : > { %548 = vst [vmem:[#allocation2 + $0x8c] sm:$0x1] %v547_v35  ;;  %v1731_v53 = vshll.u32 %v1482_v44, 16  ;;  %v1735_v54 = vshrl.u32 %v1482_v44, 16  ;;  %v5570_v55 = vpack.c.bf16 %v728_v28, %v728_v28  ;;  %v1394_v57 = vld [vmem:[#allocation2 + $0x18] sm:$0xf]  ;;  %v5667_v37 = vunpack.c.l.bf16 %v6271_v10 }
  0x7d   : > { %v1393_v58 = vld [vmem:[#allocation2 + $0x10] sm:$0xf]  ;;  %v1724_v59 = vrot.slane %v1722_v36, 4  ;;  %v1727_v60 = vrot.slane %v1725_v50, 5  ;;  %v1483_v61 = vld [vmem:[#allocation2 + $0x74] sm:$0x1]  ;;  %v697_v9 = vadd.f32 %v6245_v30, %v659_v52  ;;  %v698_v25 = vadd.f32 %v6245_v30, %v660_v56 }
  0x7e   : > { %v1008_v62 = vshrl.u32 %v5569_v51, 16  ;;  %v1011_v63 = vshll.u32 %v5569_v51, 16  ;;  %1426 = vst.msk [vmem:[#allocation3 + $0x10] sm:$0xf] %vm1158_vm3, %v1394_v57  ;;  %1425 = vst.msk [vmem:[#allocation3 + $0xc] sm:$0xf] %vm1158_vm3, %v1393_v58  ;;  %v5668_v56 = vunpack.c.h.bf16 %v6271_v10  ;;  %v661_v57 = vmul.f32 %v6229_v17, %v5667_v37 }
  0x7f   : > { %v1733_v1 = vrot.slane %v1731_v53, 5  ;;  %v1737_v3 = vrot.slane %v1735_v54, 4  ;;  %v1741_v4 = vshll.u32 %v1483_v61, 16  ;;  %v1016_v5 = vshrl.u32 %v5570_v55, 16  ;;  %v1228_v8 = vld [vmem:[#allocation2 + $0x80] sm:$0x1] }
  0x80   : > { %v1728_v41 = vor.u32 %v1727_v60, %v1724_v59  ;;  %v1010_v6 = vrot.slane %v1008_v62, 7  ;;  %v1019_v7 = vshll.u32 %v5570_v55, 16  ;;  %v1229_v14 = vsel %vm5923_vm4, %v1006_v45, %v1228_v8  ;;  %v1396_v15 = vld [vmem:[#allocation2 + $0x24] sm:$0xf]  ;;  %v1395_v20 = vld [vmem:[#allocation2 + $0x1c] sm:$0xf] }
  0x81   : > { %v1738_v11 = vor.u32 %v1737_v3, %v1733_v1  ;;  %v1743_v12 = vrot.slane %v1741_v4, 5  ;;  %v1018_v13 = vrot.slane %v1016_v5, 7  ;;  %v1231_v24 = vld [vmem:[#allocation2 + $0x84] sm:$0xf]  ;;  %1230 = vst [vmem:[#allocation2 + $0x80] sm:$0x1] %v1229_v14  ;;  %v662_v8 = vmul.f32 %v6229_v17, %v5668_v56 }
  0x82   : > { %v1729_v21 = vrot.slane %v1728_v41, 4  ;;  %v1013_v16 = vor.u32 %v1011_v63, %v1010_v6  ;;  %v1014_v23 = vrot.slane %v1010_v6, 4  ;;  %1428 = vst.msk [vmem:[#allocation3 + $0x18] sm:$0xf] %vm1158_vm3, %v1396_v15  ;;  %1427 = vst.msk [vmem:[#allocation3 + $0x14] sm:$0xf] %vm1158_vm3, %v1395_v20 }
  0x83   : > { %v1484_v26 = vld [vmem:[#allocation2 + $0x78] sm:$0xf]  ;;  %v1485_v31 = vld [vmem:[#allocation2 + $0x7c] sm:$0xf]  ;;  %v1739_v32 = vrot.slane %v1738_v11, 4  ;;  %v1021_v33 = vor.u32 %v1019_v7, %v1018_v13  ;;  %v729_v34 = vmax.f32 %v697_v9, 0.0  ;;  %v699_v9 = vadd.f32 %v6245_v30, %v661_v57 }
  0x84   : > { %v1734_v38 = vsel %vm6018_vm10, %v1729_v21, %v1733_v1  ;;  %v1746_v40 = vshrl.u32 %v1484_v26, 16  ;;  %v1749_v27 = vshll.u32 %v1484_v26, 16  ;;  %v1755_v29 = vshll.u32 %v1485_v31, 16  ;;  %v496_v42 = vld [vmem:[#allocation2 + $0x9c] sm:$0x1] }
  0x85   : > { %1925 = vrot.lane.b32.xlu0 %v1734_v38, %s5854_s12  ;;  %v1759_v43 = vshrl.u32 %v1485_v31, 16  ;;  %v1744_v45 = vsel %vm6018_vm10, %v1739_v32, %v1743_v12  ;;  %v1022_v46 = vsel %vm6026_vm11, %v1014_v23, %v1021_v33  ;;  %v1232_v47 = vsel %vm5954_vm6, %v1013_v16, %v1231_v24  ;;  %v1235_v48 = vld [vmem:[#allocation2 + $0x8c] sm:$0x1]  ;;  %v1398_v44 = vld [vmem:[#allocation2 + $0x30] sm:$0xf] }
  0x86   : > { %v1748_v49 = vrot.slane %v1746_v40, 4  ;;  %v1751_v19 = vrot.slane %v1749_v27, 5  ;;  %v1757_v28 = vrot.slane %v1755_v29, 5  ;;  %1927 = vrot.lane.b32.xlu1 %v1744_v45, %s5854_s12  ;;  %1233 = vst [vmem:[#allocation2 + $0x84] sm:$0xf] %v1232_v47  ;;  %v730_v35 = vmax.f32 %v698_v25, 0.0 }
  0x87   : > { %1234 = vst.msk [vmem:[#allocation2 + $0x88] sm:$0xf] %vm1158_vm3, %v1022_v46  ;;  %v1761_v36 = vrot.slane %v1759_v43, 4  ;;  %v5571_v50 = vpack.c.bf16 %v729_v34, %v729_v34  ;;  %v1023_v51 = vrot.slane %v1018_v13, 4  ;;  %v497_v52 = vsel %vm5923_vm4, 0, %v496_v42 }
  0x88   : > { %1430 = vst.msk [vmem:[#allocation3 + $0x20] sm:$0xf] %vm1158_vm3, %v1398_v44  ;;  %v1397_v53 = vld [vmem:[#allocation2 + $0x28] sm:$0xf]  ;;  %v1752_v54 = vor.u32 %v1751_v19, %v1748_v49  ;;  %v5572_v55 = vpack.c.bf16 %v730_v35, %v730_v35  ;;  %498 = vst [vmem:[#allocation2 + $0x9c] sm:$0x1] %v497_v52  ;;  %v700_v24 = vadd.f32 %v6245_v30, %v662_v8 }
  0x89   : > { %1429 = vst.msk [vmem:[#allocation3 + $0x1c] sm:$0xf] %vm1158_vm3, %v1397_v53  ;;  %v1486_v58 = vld [vmem:[#allocation2 + $0x80] sm:$0x1]  ;;  %v1762_v59 = vor.u32 %v1761_v36, %v1757_v28  ;;  %v1025_v60 = vshrl.u32 %v5571_v50, 16  ;;  %v1028_v61 = vshll.u32 %v5571_v50, 16  ;;  %v1236_v62 = vsel %vm5923_vm4, %v1023_v51, %v1235_v48 }
  0x8a   : > { %v549_v63 = vld [vmem:[#allocation2 + $0x98] sm:$0x1]  ;;  %v1753_v1 = vrot.slane %v1752_v54, 4  ;;  %v1765_v3 = vshll.u32 %v1486_v58, 16  ;;  %v1033_v4 = vshrl.u32 %v5572_v55, 16  ;;  %v1036_v5 = vshll.u32 %v5572_v55, 16 }
  0x8b   : > { %1237 = vst [vmem:[#allocation2 + $0x8c] sm:$0x1] %v1236_v62  ;;  %v1400_v41 = vld [vmem:[#allocation2 + $0x3c] sm:$0xf]  ;;  %v1763_v6 = vrot.slane %v1762_v59, 4  ;;  %v1027_v7 = vrot.slane %v1025_v60, 7 }
  0x8c   : > { %1432 = vst.msk [vmem:[#allocation3 + $0x28] sm:$0xf] %vm1158_vm3, %v1400_v41  ;;  %v1399_v10 = vld [vmem:[#allocation2 + $0x34] sm:$0xf]  ;;  %v1758_v11 = vsel %vm6018_vm10, %v1753_v1, %v1757_v28  ;;  %v1767_v12 = vrot.slane %v1765_v3, 5  ;;  %v1035_v13 = vrot.slane %v1033_v4, 7 }
  0x8d   : > { %v1238_v14 = vld [vmem:[#allocation2 + $0x90] sm:$0xf]  ;;  %v550_v15 = vsel %vm5928_vm5, 0, %v549_v63  ;;  %1431 = vst.msk [vmem:[#allocation3 + $0x24] sm:$0xf] %vm1158_vm3, %v1399_v10  ;;  %1929 = vrot.lane.b32.xlu0 %v1758_v11, %s5854_s12  ;;  %v1030_v16 = vor.u32 %v1028_v61, %v1027_v7  ;;  %v1031_v23 = vrot.slane %v1027_v7, 4 }
  0x8e   : > { %v1487_v20 = vld [vmem:[#allocation2 + $0x84] sm:$0xf]  ;;  %v1488_v21 = vld [vmem:[#allocation2 + $0x88] sm:$0xf]  ;;  %v731_v25 = vmax.f32 %v699_v9, 0.0  ;;  %v1768_v34 = vsel %vm6018_vm10, %v1763_v6, %v1767_v12  ;;  %v1038_v37 = vor.u32 %v1036_v5, %v1035_v13  ;;  %v732_v40 = vmax.f32 %v700_v24, 0.0 }
  0x8f   : > { %551 = vst [vmem:[#allocation2 + $0x98] sm:$0x1] %v550_v15  ;;  %v1770_v26 = vshrl.u32 %v1487_v20, 16  ;;  %v1773_v31 = vshll.u32 %v1487_v20, 16  ;;  %v1779_v32 = vshll.u32 %v1488_v21, 16  ;;  %v1783_v33 = vshrl.u32 %v1488_v21, 16  ;;  %1931 = vrot.lane.b32.xlu1 %v1768_v34, %s5854_s12 }
  0x90   : > { %v1239_v38 = vsel %vm5954_vm6, %v1030_v16, %v1238_v14  ;;  %v499_v27 = vld [vmem:[#allocation2 + $0xa8] sm:$0x1]  ;;  %v1039_v47 = vsel %vm6026_vm11, %v1031_v23, %v1038_v37  ;;  %v5573_v49 = vpack.c.bf16 %v731_v25, %v731_v25  ;;  %v5574_v19 = vpack.c.bf16 %v732_v40, %v732_v40  ;;  %v1401_v52 = vld [vmem:[#allocation2 + $0x40] sm:$0xf]  ;;  %v552_v57 = vld [vmem:[#allocation2 + $0xa4] sm:$0x1] }
  0x91   : > { %v1772_v29 = vrot.slane %v1770_v26, 4  ;;  %v1775_v42 = vrot.slane %v1773_v31, 5  ;;  %v1781_v43 = vrot.slane %v1779_v32, 5  ;;  %1240 = vst [vmem:[#allocation2 + $0x90] sm:$0xf] %v1239_v38  ;;  %v1785_v45 = vrot.slane %v1783_v33, 4 }
  0x92   : > { %v1402_v46 = vld [vmem:[#allocation2 + $0x48] sm:$0xf]  ;;  %v1489_v48 = vld [vmem:[#allocation2 + $0x8c] sm:$0x1]  ;;  %v1040_v28 = vrot.slane %v1035_v13, 4  ;;  %v500_v51 = vsel %vm5923_vm4, 0, %v499_v27 }
  0x93   : > { %v5693_v35 = vld [vmem:[%s5963_s30 + $0x68] sm:$0xff]   ;;  %1434 = vst.msk [vmem:[#allocation3 + $0x30] sm:$0xf] %vm1158_vm3, %v1402_v46  ;;  %v1776_v44 = vor.u32 %v1775_v42, %v1772_v29  ;;  %1241 = vst.msk [vmem:[#allocation2 + $0x94] sm:$0xf] %vm1158_vm3, %v1039_v47  ;;  %v1786_v36 = vor.u32 %v1785_v45, %v1781_v43  ;;  %v1789_v50 = vshll.u32 %v1489_v48, 16 }
  0x94   : > { %v1042_v53 = vshrl.u32 %v5573_v49, 16  ;;  %v1045_v54 = vshll.u32 %v5573_v49, 16  ;;  %v1050_v55 = vshrl.u32 %v5574_v19, 16  ;;  %v1053_v56 = vshll.u32 %v5574_v19, 16  ;;  %501 = vst [vmem:[#allocation2 + $0xa8] sm:$0x1] %v500_v51 }
  0x95   : > { %1433 = vst.msk [vmem:[#allocation3 + $0x2c] sm:$0xf] %vm1158_vm3, %v1401_v52  ;;  %v1777_v58 = vrot.slane %v1776_v44, 4  ;;  %v1787_v59 = vrot.slane %v1786_v36, 4  ;;  %v1791_v60 = vrot.slane %v1789_v50, 5  ;;  %v5671_v62 = vunpack.c.l.bf16 %v5693_v35  ;;  %v5694_v25 = vld [vmem:[%s5963_s30 + $0x70] sm:$0xff]  }
  0x96   : > { %v1242_v61 = vld [vmem:[#allocation2 + $0x98] sm:$0x1]  ;;  %v1044_v63 = vrot.slane %v1042_v53, 7  ;;  %v6321_v1 = vrot.slane %v1050_v55, 7  ;;  %v5672_v4 = vunpack.c.h.bf16 %v5693_v35  ;;  %v1404_v5 = vld [vmem:[#allocation2 + $0x54] sm:$0xf]  ;;  %v5675_v46 = vunpack.c.l.bf16 %v5694_v25 }
  0x97   : > { %v1243_v3 = vsel %vm5923_vm4, %v1040_v28, %v1242_v61  ;;  %v1403_v41 = vld [vmem:[#allocation2 + $0x4c] sm:$0xf]  ;;  %v1782_v6 = vsel %vm6018_vm10, %v1777_v58, %v1781_v43  ;;  %v1792_v7 = vsel %vm6018_vm10, %v1787_v59, %v1791_v60  ;;  %v1245_v8 = vld [vmem:[#allocation2 + $0x9c] sm:$0xf]  ;;  %v663_v9 = vmul.f32 %v6229_v17, %v5671_v62  ;;  %v502_v11 = vld [vmem:[#allocation2 + $0xb4] sm:$0x1] }
  0x98   : > { %1244 = vst [vmem:[#allocation2 + $0x98] sm:$0x1] %v1243_v3  ;;  %v553_v10 = vsel %vm5928_vm5, 0, %v552_v57  ;;  %1436 = vst.msk [vmem:[#allocation3 + $0x38] sm:$0xf] %vm1158_vm3, %v1404_v5  ;;  %1933 = vrot.lane.b32.xlu0 %v1782_v6, %s5854_s12  ;;  %1935 = vrot.lane.b32.xlu1 %v1792_v7, %s5854_s12  ;;  %v1047_v13 = vor.u32 %v1045_v54, %v1044_v63  ;;  %v1048_v14 = vrot.slane %v1044_v63, 4  ;;  %v5676_v47 = vunpack.c.h.bf16 %v5694_v25 }
  0x99   : > { %1435 = vst.msk [vmem:[#allocation3 + $0x34] sm:$0xf] %vm1158_vm3, %v1403_v41  ;;  %v1490_v12 = vld [vmem:[#allocation2 + $0x90] sm:$0xf]  ;;  %v1055_v15 = vor.u32 %v1053_v56, %v6321_v1  ;;  %v664_v20 = vmul.f32 %v6229_v17, %v5672_v4  ;;  %554 = vst [vmem:[#allocation2 + $0xa4] sm:$0x1] %v553_v10  ;;  %v701_v23 = vadd.f32 %v6245_v30, %v663_v9 }
  0x9a   : > { %v1794_v21 = vshrl.u32 %v1490_v12, 16  ;;  %v1797_v16 = vshll.u32 %v1490_v12, 16  ;;  %v1057_v24 = vrot.slane %v6321_v1, 4  ;;  %v1406_v26 = vld [vmem:[#allocation2 + $0x60] sm:$0xf]  ;;  %v1246_v33 = vsel %vm5954_vm6, %v1047_v13, %v1245_v8 }
  0x9b   : > { %v1491_v31 = vld [vmem:[#allocation2 + $0x94] sm:$0xf]  ;;  %v1056_v32 = vsel %vm6026_vm11, %v1048_v14, %v1055_v15  ;;  %v702_v34 = vadd.f32 %v6245_v30, %v664_v20  ;;  %v503_v37 = vsel %vm5923_vm4, 0, %v502_v11  ;;  %v555_v38 = vld [vmem:[#allocation2 + $0xb0] sm:$0x1]  ;;  %v733_v43 = vmax.f32 %v701_v23, 0.0 }
  0x9c   : > { %1438 = vst.msk [vmem:[#allocation3 + $0x40] sm:$0xf] %vm1158_vm3, %v1406_v26  ;;  %v1796_v40 = vrot.slane %v1794_v21, 4  ;;  %v1799_v27 = vrot.slane %v1797_v16, 5  ;;  %v1803_v29 = vshll.u32 %v1491_v31, 16  ;;  %v1807_v42 = vshrl.u32 %v1491_v31, 16 }
  0x9d   : > { %1247 = vst [vmem:[#allocation2 + $0x9c] sm:$0xf] %v1246_v33  ;;  %1248 = vst.msk [vmem:[#allocation2 + $0xa0] sm:$0xf] %vm1158_vm3, %v1056_v32  ;;  %v734_v45 = vmax.f32 %v702_v34, 0.0  ;;  %v556_v35 = vsel %vm5928_vm5, 0, %v555_v38  ;;  %v5575_v36 = vpack.c.bf16 %v733_v43, %v733_v43  ;;  %v665_v51 = vmul.f32 %v6229_v17, %v5675_v46 }
  0x9e   : > { %504 = vst [vmem:[#allocation2 + $0xb4] sm:$0x1] %v503_v37  ;;  %v1405_v48 = vld [vmem:[#allocation2 + $0x58] sm:$0xf]  ;;  %v1800_v49 = vor.u32 %v1799_v27, %v1796_v40  ;;  %v1805_v19 = vrot.slane %v1803_v29, 5  ;;  %v1809_v28 = vrot.slane %v1807_v42, 4  ;;  %v666_v52 = vmul.f32 %v6229_v17, %v5676_v47 }
  0x9f   : > { %1437 = vst.msk [vmem:[#allocation3 + $0x3c] sm:$0xf] %vm1158_vm3, %v1405_v48  ;;  %v1492_v44 = vld [vmem:[#allocation2 + $0x98] sm:$0x1]  ;;  %v5576_v50 = vpack.c.bf16 %v734_v45, %v734_v45  ;;  %557 = vst [vmem:[#allocation2 + $0xb0] sm:$0x1] %v556_v35  ;;  %v703_v7 = vadd.f32 %v6245_v30, %v665_v51 }
  0xa0   : > { %v1408_v53 = vld [vmem:[#allocation2 + $0x6c] sm:$0xf]  ;;  %v1801_v54 = vrot.slane %v1800_v49, 4  ;;  %v1810_v55 = vor.u32 %v1809_v28, %v1805_v19  ;;  %v1813_v56 = vshll.u32 %v1492_v44, 16  ;;  %v1249_v57 = vld [vmem:[#allocation2 + $0xa4] sm:$0x1]  ;;  %v704_v8 = vadd.f32 %v6245_v30, %v666_v52 }
  0xa1   : > { %1440 = vst.msk [vmem:[#allocation3 + $0x48] sm:$0xf] %vm1158_vm3, %v1408_v53  ;;  %v1059_v58 = vshrl.u32 %v5575_v36, 16  ;;  %v1062_v59 = vshll.u32 %v5575_v36, 16  ;;  %v1067_v60 = vshrl.u32 %v5576_v50, 16  ;;  %v1070_v61 = vshll.u32 %v5576_v50, 16 }
  0xa2   : > { %v1407_v62 = vld [vmem:[#allocation2 + $0x64] sm:$0xf]  ;;  %v1806_v63 = vsel %vm6018_vm10, %v1801_v54, %v1805_v19  ;;  %v1811_v1 = vrot.slane %v1810_v55, 4  ;;  %v1815_v3 = vrot.slane %v1813_v56, 5  ;;  %v1250_v17 = vsel %vm5923_vm4, %v1057_v24, %v1249_v57  ;;  %v1252_v13 = vld [vmem:[#allocation2 + $0xa8] sm:$0xf] }
  0xa3   : > { %1439 = vst.msk [vmem:[#allocation3 + $0x44] sm:$0xf] %vm1158_vm3, %v1407_v62  ;;  %1937 = vrot.lane.b32.xlu0 %v1806_v63, %s5854_s12  ;;  %v1061_v41 = vrot.slane %v1059_v58, 7  ;;  %v1069_v6 = vrot.slane %v1067_v60, 7  ;;  %1251 = vst [vmem:[#allocation2 + $0xa4] sm:$0x1] %v1250_v17 }
  0xa4   : > { %v1493_v4 = vld [vmem:[#allocation2 + $0x9c] sm:$0xf]  ;;  %v1494_v5 = vld [vmem:[#allocation2 + $0xa0] sm:$0xf]  ;;  %v1816_v14 = vsel %vm6018_vm10, %v1811_v1, %v1815_v3  ;;  %v735_v33 = vmax.f32 %v703_v7, 0.0  ;;  %v736_v34 = vmax.f32 %v704_v8, 0.0 }
  0xa5   : > { %v1818_v9 = vshrl.u32 %v1493_v4, 16  ;;  %v1821_v10 = vshll.u32 %v1493_v4, 16  ;;  %v1827_v11 = vshll.u32 %v1494_v5, 16  ;;  %v1831_v12 = vshrl.u32 %v1494_v5, 16  ;;  %v558_v16 = vld [vmem:[#allocation2 + $0xbc] sm:$0x1]  ;;  %1939 = vrot.lane.b32.xlu1 %v1816_v14, %s5854_s12 }
  0xa6   : > { %v1064_v15 = vor.u32 %v1062_v59, %v1061_v41  ;;  %v1065_v20 = vrot.slane %v1061_v41, 4  ;;  %v1072_v21 = vor.u32 %v1070_v61, %v1069_v6  ;;  %v1256_v31 = vld [vmem:[#allocation2 + $0xb0] sm:$0x1]  ;;  %v1410_v37 = vld [vmem:[#allocation2 + $0x78] sm:$0xf]  ;;  %v1074_v29 = vrot.slane %v1069_v6, 4  ;;  %v6388_v41 = vpop.permute.xlu0 %1891 }
  0xa7   : > { %v1820_v23 = vrot.slane %v1818_v9, 4  ;;  %v1823_v24 = vrot.slane %v1821_v10, 5  ;;  %v1829_v25 = vrot.slane %v1827_v11, 5  ;;  %v1833_v26 = vrot.slane %v1831_v12, 4  ;;  %v1409_v38 = vld [vmem:[#allocation2 + $0x70] sm:$0xf] }
  0xa8   : > { %v1073_v30 = vsel %vm6026_vm11, %v1065_v20, %v1072_v21  ;;  %v1253_v32 = vsel %vm5954_vm6, %v1064_v15, %v1252_v13  ;;  %1442 = vst.msk [vmem:[#allocation3 + $0x50] sm:$0xf] %vm1158_vm3, %v1410_v37  ;;  %1441 = vst.msk [vmem:[#allocation3 + $0x4c] sm:$0xf] %vm1158_vm3, %v1409_v38  ;;  %v5577_v42 = vpack.c.bf16 %v735_v33, %v735_v33  ;;  %v1412_v45 = vld [vmem:[#allocation2 + $0x84] sm:$0xf] }
  0xa9   : > { %v1824_v40 = vor.u32 %v1823_v24, %v1820_v23  ;;  %1254 = vst [vmem:[#allocation2 + $0xa8] sm:$0xf] %v1253_v32  ;;  %1255 = vst.msk [vmem:[#allocation2 + $0xac] sm:$0xf] %vm1158_vm3, %v1073_v30  ;;  %v1834_v27 = vor.u32 %v1833_v26, %v1829_v25  ;;  %v5578_v43 = vpack.c.bf16 %v736_v34, %v736_v34  ;;  %v1411_v46 = vld [vmem:[#allocation2 + $0x7c] sm:$0xf] }
  0xaa   : > { %v1495_v48 = vld [vmem:[#allocation2 + $0xa4] sm:$0x1]  ;;  %v1257_v19 = vsel %vm5923_vm4, %v1074_v29, %v1256_v31  ;;  %v559_v28 = vsel %vm5928_vm5, 0, %v558_v16  ;;  %1444 = vst.msk [vmem:[#allocation3 + $0x58] sm:$0xf] %vm1158_vm3, %v1412_v45  ;;  %v1076_v44 = vshrl.u32 %v5577_v42, 16  ;;  %v6399_v30 = vpop.permute.xlu0 %1889 }
  0xab   : > { %v1825_v47 = vrot.slane %v1824_v40, 4  ;;  %v1835_v49 = vrot.slane %v1834_v27, 4  ;;  %1443 = vst.msk [vmem:[#allocation3 + $0x54] sm:$0xf] %vm1158_vm3, %v1411_v46  ;;  %v1837_v35 = vshll.u32 %v1495_v48, 16  ;;  %v1079_v36 = vshll.u32 %v5577_v42, 16 }
  0xac   : > { %v1084_v50 = vshrl.u32 %v5578_v43, 16  ;;  %1258 = vst [vmem:[#allocation2 + $0xb0] sm:$0x1] %v1257_v19  ;;  %560 = vst [vmem:[#allocation2 + $0xbc] sm:$0x1] %v559_v28  ;;  %v1087_v52 = vshll.u32 %v5578_v43, 16  ;;  %v6395_v14 = vpop.permute.xlu1 %1893 }
  0xad   : > { %v1830_v51 = vsel %vm6018_vm10, %v1825_v47, %v1829_v25  ;;  %v1839_v53 = vrot.slane %v1837_v35, 5  ;;  %v1078_v54 = vrot.slane %v1076_v44, 7  ;;  %v1414_v56 = vld [vmem:[#allocation2 + $0x90] sm:$0xf]  ;;  %v1259_v57 = vld [vmem:[#allocation2 + $0xb4] sm:$0xf] }
  0xae   : > { %1941 = vrot.lane.b32.xlu0 %v1830_v51, %s5854_s12  ;;  %v1086_v55 = vrot.slane %v1084_v50, 7  ;;  %1446 = vst.msk [vmem:[#allocation3 + $0x60] sm:$0xf] %vm1158_vm3, %v1414_v56  ;;  %v1413_v58 = vld [vmem:[#allocation2 + $0x88] sm:$0xf]  ;;  %v1898_v44 = vpop.permute.xlu0 %1897  ;;  %vm2114_vm12 = vcmask 1042432  }
  0xaf   : > { %v1840_v61 = vsel %vm6018_vm10, %v1835_v49, %v1839_v53  ;;  %v1081_v62 = vor.u32 %v1079_v36, %v1078_v54  ;;  %v1082_v63 = vrot.slane %v1078_v54, 4  ;;  %1445 = vst.msk [vmem:[#allocation3 + $0x5c] sm:$0xf] %vm1158_vm3, %v1413_v58  ;;  %v1416_v25 = vld [vmem:[#allocation2 + $0x9c] sm:$0xf]  ;;  %vm2115_vm13 = vcmask 1046532  }
  0xb0   : > { %v1496_v59 = vld [vmem:[#allocation2 + $0xa8] sm:$0xf]  ;;  %v1497_v60 = vld [vmem:[#allocation2 + $0xac] sm:$0xf]  ;;  %v1089_v1 = vor.u32 %v1087_v52, %v1086_v55  ;;  %1943 = vrot.lane.b32.xlu1 %v1840_v61, %s5854_s12  ;;  %v1091_v8 = vrot.slane %v1086_v55, 4  ;;  %v6407_v37 = vpop.permute.xlu1 %1895  ;;  %vm6413_vm14 = vmor %vm2114_vm12, %vm2115_vm13  ;;  %vm1985_vm15 = vcmask 126016  }
  0xb1   : > { %v1842_v3 = vshrl.u32 %v1496_v59, 16  ;;  %v1845_v17 = vshll.u32 %v1496_v59, 16  ;;  %v1851_v4 = vshll.u32 %v1497_v60, 16  ;;  %v1855_v5 = vshrl.u32 %v1497_v60, 16  ;;  %1448 = vst.msk [vmem:[#allocation3 + $0x68] sm:$0xf] %vm1158_vm3, %v1416_v25 }
  0xb2   : > { %v1090_v6 = vsel %vm6026_vm11, %v1082_v63, %v1089_v1  ;;  %v1260_v7 = vsel %vm5954_vm6, %v1081_v62, %v1259_v57  ;;  %v1415_v32 = vld [vmem:[#allocation2 + $0x94] sm:$0xf]  ;;  %v2018_v45 = vld [vmem:[#allocation2] sm:$0xe]  ;;  %v2019_v46 = vld [vmem:[#allocation2 + $0x4] sm:$0xf] }
  0xb3   : > { %v1844_v9 = vrot.slane %v1842_v3, 4  ;;  %v1847_v10 = vrot.slane %v1845_v17, 5  ;;  %v1853_v11 = vrot.slane %v1851_v4, 5  ;;  %1261 = vst [vmem:[#allocation2 + $0xb4] sm:$0xf] %v1260_v7  ;;  %v1857_v13 = vrot.slane %v1855_v5, 4  ;;  %v1902_v7 = vpop.permute.xlu0 %1901 }
  0xb4   : > { %1262 = vst.msk [vmem:[#allocation2 + $0xb8] sm:$0xf] %vm1158_vm3, %v1090_v6  ;;  %v1498_v12 = vld [vmem:[#allocation2 + $0xb0] sm:$0x1]  ;;  %v1263_v20 = vld [vmem:[#allocation2 + $0xbc] sm:$0x1]  ;;  %v1900_v54 = vpop.permute.xlu1 %1899 }
  0xb5   : > { %v1861_v15 = vshll.u32 %v1498_v12, 16  ;;  %v1848_v21 = vor.u32 %v1847_v10, %v1844_v9  ;;  %v1858_v16 = vor.u32 %v1857_v13, %v1853_v11  ;;  %v1264_v23 = vsel %vm5923_vm4, %v1091_v8, %v1263_v20  ;;  %1447 = vst.msk [vmem:[#allocation3 + $0x64] sm:$0xf] %vm1158_vm3, %v1415_v32  ;;  %v1418_v47 = vld [vmem:[#allocation2 + $0xa8] sm:$0xf] }
  0xb6   : > { %1265 = vst [vmem:[#allocation2 + $0xbc] sm:$0x1] %v1264_v23  ;;  %1450 = vst.msk [vmem:[#allocation3 + $0x70] sm:$0xf] %vm1158_vm3, %v1418_v47  ;;  %v2020_v50 = vld [vmem:[#allocation2 + $0x8] sm:$0x1] }
  0xb7   : > { %v1863_v24 = vrot.slane %v1861_v15, 5  ;;  %v1849_v26 = vrot.slane %v1848_v21, 4  ;;  %v1859_v31 = vrot.slane %v1858_v16, 4  ;;  %v2119_v52 = vrot.slane %v2019_v46, 5  ;;  %v1417_v55 = vld [vmem:[#allocation2 + $0xa0] sm:$0xf] }
  0xb8   : > { %v5426_v56 = vrot.slane %v2018_v45, 9  ;;  %v2022_v58 = vld [vmem:[#allocation2 + $0x10] sm:$0xf]  ;;  %1449 = vst.msk [vmem:[#allocation3 + $0x6c] sm:$0xf] %vm1158_vm3, %v1417_v55  ;;  %v2122_v63 = vrot.slane %v2020_v50, 5  ;;  %v1904_v21 = vpop.permute.xlu1 %1903 }
  0xb9   : > { %v1854_v33 = vsel %vm6018_vm10, %v1849_v26, %v1853_v11  ;;  %v1864_v34 = vsel %vm6018_vm10, %v1859_v31, %v1863_v24  ;;  %v2121_v62 = vrot.slane %v2119_v52, 4  ;;  %v2021_v1 = vld [vmem:[#allocation2 + $0xc] sm:$0xe]  ;;  %v2023_v3 = vld [vmem:[#allocation2 + $0x14] sm:$0x1]  ;;  %v2126_v6 = vrot.slane %v2022_v58, 5 }
  0xba   : > { %1945 = vrot.lane.b32.xlu0 %v1854_v33, %s5854_s12  ;;  %v1499_v38 = vld [vmem:[#allocation2 + $0xb4] sm:$0xf]  ;;  %1947 = vrot.lane.b32.xlu1 %v1864_v34, %s5854_s12  ;;  %v1419_v8 = vld [vmem:[#allocation2 + $0xac] sm:$0xf]  ;;  %v2120_v9 = vsel %vm6413_vm14, %v5426_v56, %v2119_v52  ;;  %v2024_v10 = vld [vmem:[#allocation2 + $0x18] sm:$0xe] }
  0xbb   : > { %v1500_v40 = vld [vmem:[#allocation2 + $0xb8] sm:$0xf]  ;;  %v1866_v27 = vshrl.u32 %v1499_v38, 16  ;;  %v1869_v29 = vshll.u32 %v1499_v38, 16  ;;  %v1420_v17 = vld [vmem:[#allocation2 + $0xb4] sm:$0xf]  ;;  %v2123_v13 = vsel %vm6413_vm14, %v2121_v62, %v2122_v63 }
  0xbc   : > { %v1875_v42 = vshll.u32 %v1500_v40, 16  ;;  %v1879_v43 = vshrl.u32 %v1500_v40, 16  ;;  %1452 = vst.msk [vmem:[#allocation3 + $0x78] sm:$0xf] %vm1158_vm3, %v1420_v17  ;;  %v2025_v11 = vld [vmem:[#allocation2 + $0x1c] sm:$0xf] }
  0xbd   : > { %v1868_v48 = vrot.slane %v1866_v27, 4  ;;  %v1871_v49 = vrot.slane %v1869_v29, 5  ;;  %v1501_v28 = vld [vmem:[#allocation2 + $0xbc] sm:$0x1]  ;;  %1451 = vst.msk [vmem:[#allocation3 + $0x74] sm:$0xf] %vm1158_vm3, %v1419_v8 }
  0xbe   : > { %v1877_v19 = vrot.slane %v1875_v42, 5  ;;  %v1881_v35 = vrot.slane %v1879_v43, 4  ;;  %v1885_v36 = vshll.u32 %v1501_v28, 16  ;;  %v5427_v12 = vrot.slane %v2021_v1, 9  ;;  %v1421_v16 = vld [vmem:[#allocation2 + $0xb8] sm:$0xf] }
  0xbf   : > { %v1872_v51 = vor.u32 %v1871_v49, %v1868_v48  ;;  %v2128_v15 = vrot.slane %v2126_v6, 4  ;;  %v2129_v20 = vrot.slane %v2023_v3, 5  ;;  %v2026_v23 = vld [vmem:[#allocation2 + $0x20] sm:$0x1]  ;;  %1453 = vst.msk [vmem:[#allocation3 + $0x7c] sm:$0xf] %vm1158_vm3, %v1421_v16 }
  0xc0   : > { %v1882_v53 = vor.u32 %v1881_v35, %v1877_v19  ;;  %v1887_v57 = vrot.slane %v1885_v36, 5  ;;  %v2133_v24 = vrot.slane %v2025_v11, 5  ;;  %v5428_v25 = vrot.slane %v2024_v10, 9  ;;  %v2028_v26 = vld [vmem:[#allocation2 + $0x28] sm:$0xf]  ;;  %v1906_v38 = vpop.permute.xlu0 %1905 }
  0xc1   : > { %v1873_v59 = vrot.slane %v1872_v51, 4  ;;  %v2127_v31 = vsel %vm6413_vm14, %v5427_v12, %v2126_v6  ;;  %v2130_v32 = vsel %vm6413_vm14, %v2128_v15, %v2129_v20  ;;  %v2136_v34 = vrot.slane %v2026_v23, 5  ;;  %v2027_v40 = vld [vmem:[#allocation2 + $0x24] sm:$0xe]  ;;  %v2029_v27 = vld [vmem:[#allocation2 + $0x2c] sm:$0x1] }
  0xc2   : > { %v1883_v61 = vrot.slane %v1882_v53, 4  ;;  %v2135_v33 = vrot.slane %v2133_v24, 4  ;;  %v2140_v29 = vrot.slane %v2028_v26, 5  ;;  %1987 = vst.msk [vmem:[#allocation3 + $0x4] sm:$0xf] %vm1985_vm15, %v6388_v41  ;;  %v2143_v46 = vrot.slane %v2029_v27, 5 }
  0xc3   : > { %v1878_v4 = vsel %vm6018_vm10, %v1873_v59, %v1877_v19  ;;  %1986 = vst.msk [vmem:[#allocation3] sm:$0xf] %vm1985_vm15, %v6399_v30  ;;  %1988 = vst.msk [vmem:[#allocation3 + $0x8] sm:$0xf] %vm1985_vm15, %v6395_v14  ;;  %v2134_v30 = vsel %vm6413_vm14, %v5428_v25, %v2133_v24  ;;  %v2031_v14 = vld [vmem:[#allocation2 + $0x34] sm:$0xf] }
  0xc4   : > { %v1888_v5 = vsel %vm6018_vm10, %v1883_v61, %v1887_v57  ;;  %1949 = vrot.lane.b32.xlu0 %v1878_v4, %s5854_s12  ;;  %1990 = vst.msk [vmem:[#allocation3 + $0x10] sm:$0xf] %vm1985_vm15, %v1898_v44  ;;  %1989 = vst.msk [vmem:[#allocation3 + $0xc] sm:$0xf] %vm1985_vm15, %v6407_v37  ;;  %v5429_v37 = vrot.slane %v2027_v40, 9  ;;  %v2137_v42 = vsel %vm6413_vm14, %v2135_v33, %v2136_v34  ;;  %v2142_v45 = vrot.slane %v2140_v29, 4 }
  0xc5   : > { %1951 = vrot.lane.b32.xlu1 %v1888_v5, %s5854_s12  ;;  %1992 = vst.msk [vmem:[#allocation3 + $0x18] sm:$0xf] %vm1985_vm15, %v1902_v7  ;;  %1991 = vst.msk [vmem:[#allocation3 + $0x14] sm:$0xf] %vm1985_vm15, %v1900_v54  ;;  %v2030_v43 = vld [vmem:[#allocation2 + $0x30] sm:$0xe] }
  0xc6   : > { %1994 = vst.msk [vmem:[#allocation3 + $0x20] sm:$0xf] %vm1985_vm15, %v1906_v38  ;;  %1993 = vst.msk [vmem:[#allocation3 + $0x1c] sm:$0xf] %vm1985_vm15, %v1904_v21  ;;  %v2032_v47 = vld [vmem:[#allocation2 + $0x38] sm:$0x1]  ;;  %v2141_v35 = vsel %vm6413_vm14, %v5429_v37, %v2140_v29  ;;  %v2144_v44 = vsel %vm6413_vm14, %v2142_v45, %v2143_v46 }
  0xc7   : > { %v1908_v41 = vpop.permute.xlu1 %1907  ;;  %v2147_v48 = vrot.slane %v2031_v14, 5  ;;  %v5430_v19 = vrot.slane %v2030_v43, 9  ;;  %v2034_v28 = vld [vmem:[#allocation2 + $0x40] sm:$0xf]  ;;  %v2150_v50 = vrot.slane %v2032_v47, 5  ;;  %vm2325_vm0 = vcmask 191616  }
  0xc8   : > { %2229 = vrot.lane.b32.xlu0 %v2120_v9, %s5855_s17  ;;  %1995 = vst.msk [vmem:[#allocation3 + $0x24] sm:$0xf] %vm1985_vm15, %v1908_v41  ;;  %v2033_v51 = vld [vmem:[#allocation2 + $0x3c] sm:$0xe]  ;;  %v2035_v52 = vld [vmem:[#allocation2 + $0x44] sm:$0x1] }
  0xc9   : > { %2231 = vrot.lane.b32.xlu1 %v2123_v13, %s5855_s17  ;;  %v2149_v36 = vrot.slane %v2147_v48, 4  ;;  %v2154_v54 = vrot.slane %v2034_v28, 5  ;;  %v2148_v55 = vsel %vm6413_vm14, %v5430_v19, %v2147_v48  ;;  %v2037_v56 = vld [vmem:[#allocation2 + $0x4c] sm:$0xf]  ;;  %v5431_v57 = vrot.slane %v2033_v51, 9 }
  0xca   : > { %v2036_v59 = vld [vmem:[#allocation2 + $0x48] sm:$0xe]  ;;  %v2157_v62 = vrot.slane %v2035_v52, 5  ;;  %v2038_v63 = vld [vmem:[#allocation2 + $0x50] sm:$0x1]  ;;  %v2161_v1 = vrot.slane %v2037_v56, 5 }
  0xcb   : > { %v1910_v49 = vpop.permute.xlu0 %1909  ;;  %v2151_v58 = vsel %vm6413_vm14, %v2149_v36, %v2150_v50  ;;  %v2156_v61 = vrot.slane %v2154_v54, 4  ;;  %v5432_v3 = vrot.slane %v2036_v59, 9  ;;  %v2040_v17 = vld [vmem:[#allocation2 + $0x58] sm:$0xf]  ;;  %v2155_v4 = vsel %vm6413_vm14, %v5431_v57, %v2154_v54  ;;  %v2039_v9 = vld [vmem:[#allocation2 + $0x54] sm:$0xe] }
  0xcc   : > { %2233 = vrot.lane.b32.xlu0 %v2127_v31, %s5855_s17  ;;  %1996 = vst.msk [vmem:[#allocation3 + $0x28] sm:$0xf] %vm1985_vm15, %v1910_v49  ;;  %v2163_v6 = vrot.slane %v2161_v1, 4  ;;  %v2164_v7 = vrot.slane %v2038_v63, 5  ;;  %v2041_v10 = vld [vmem:[#allocation2 + $0x5c] sm:$0x1] }
  0xcd   : > { %2235 = vrot.lane.b32.xlu1 %v2130_v32, %s5855_s17  ;;  %v2158_v5 = vsel %vm6413_vm14, %v2156_v61, %v2157_v62  ;;  %v2168_v12 = vrot.slane %v2040_v17, 5  ;;  %v2162_v13 = vsel %vm6413_vm14, %v5432_v3, %v2161_v1  ;;  %v2043_v15 = vld [vmem:[#allocation2 + $0x64] sm:$0xf]  ;;  %v5433_v20 = vrot.slane %v2039_v9, 9  ;;  %v2042_v16 = vld [vmem:[#allocation2 + $0x60] sm:$0xe] }
  0xce   : > { %v1912_v53 = vpop.permute.xlu1 %1911  ;;  %v2165_v21 = vsel %vm6413_vm14, %v2163_v6, %v2164_v7  ;;  %v2171_v24 = vrot.slane %v2041_v10, 5  ;;  %v2044_v25 = vld [vmem:[#allocation2 + $0x68] sm:$0x1]  ;;  %v2175_v26 = vrot.slane %v2043_v15, 5  ;;  %v5434_v31 = vrot.slane %v2042_v16, 9 }
  0xcf   : > { %1997 = vst.msk [vmem:[#allocation3 + $0x2c] sm:$0xf] %vm1985_vm15, %v1912_v53  ;;  %v2170_v23 = vrot.slane %v2168_v12, 4  ;;  %v2046_v32 = vld [vmem:[#allocation2 + $0x70] sm:$0xf]  ;;  %v2169_v33 = vsel %vm6413_vm14, %v5433_v20, %v2168_v12  ;;  %v2178_v40 = vrot.slane %v2044_v25, 5 }
  0xd0   : > { %2237 = vrot.lane.b32.xlu0 %v2134_v30, %s5855_s17  ;;  %v2177_v38 = vrot.slane %v2175_v26, 4  ;;  %v2045_v29 = vld [vmem:[#allocation2 + $0x6c] sm:$0xe]  ;;  %v2047_v41 = vld [vmem:[#allocation2 + $0x74] sm:$0x1]  ;;  %v2182_v30 = vrot.slane %v2046_v32, 5  ;;  %v2176_v14 = vsel %vm6413_vm14, %v5434_v31, %v2175_v26 }
  0xd1   : > { %2239 = vrot.lane.b32.xlu1 %v2137_v42, %s5855_s17  ;;  %v2172_v34 = vsel %vm6413_vm14, %v2170_v23, %v2171_v24  ;;  %v2049_v37 = vld [vmem:[#allocation2 + $0x7c] sm:$0xf]  ;;  %v5435_v42 = vrot.slane %v2045_v29, 9  ;;  %v2048_v45 = vld [vmem:[#allocation2 + $0x78] sm:$0xe]  ;;  %v2185_v47 = vrot.slane %v2047_v41, 5 }
  0xd2   : > { %v2179_v43 = vsel %vm6413_vm14, %v2177_v38, %v2178_v40  ;;  %v2184_v46 = vrot.slane %v2182_v30, 4  ;;  %v2050_v49 = vld [vmem:[#allocation2 + $0x80] sm:$0x1]  ;;  %v2189_v19 = vrot.slane %v2049_v37, 5  ;;  %v5436_v28 = vrot.slane %v2048_v45, 9 }
  0xd3   : > { %v2051_v50 = vld [vmem:[#allocation2 + $0x84] sm:$0xe]  ;;  %v2192_v52 = vrot.slane %v2050_v49, 5  ;;  %v2053_v53 = vld [vmem:[#allocation2 + $0x8c] sm:$0x1]  ;;  %vm4738_vm1 = vcmask 1043456  }
  0xd4   : > { %2241 = vrot.lane.b32.xlu0 %v2141_v35, %s5855_s17  ;;  %v2052_v35 = vld [vmem:[#allocation2 + $0x88] sm:$0xf]  ;;  %v2186_v36 = vsel %vm6413_vm14, %v2184_v46, %v2185_v47  ;;  %v2191_v51 = vrot.slane %v2189_v19, 4  ;;  %v2055_v56 = vld [vmem:[#allocation2 + $0x94] sm:$0xf]  ;;  %v2190_v57 = vsel %vm6413_vm14, %v5436_v28, %v2189_v19  ;;  %v2199_v62 = vrot.slane %v2053_v53, 5 }
  0xd5   : > { %2243 = vrot.lane.b32.xlu1 %v2144_v44, %s5855_s17  ;;  %v1914_v8 = vpop.permute.xlu0 %1913  ;;  %v2183_v44 = vsel %vm6413_vm14, %v5435_v42, %v2182_v30  ;;  %v2196_v54 = vrot.slane %v2052_v35, 5  ;;  %v2054_v59 = vld [vmem:[#allocation2 + $0x90] sm:$0xe]  ;;  %v2056_v1 = vld [vmem:[#allocation2 + $0x98] sm:$0x1]  ;;  %v2203_v17 = vrot.slane %v2055_v56, 5 }
  0xd6   : > { %1998 = vst.msk [vmem:[#allocation3 + $0x30] sm:$0xf] %vm1985_vm15, %v1914_v8  ;;  %v2057_v8 = vld [vmem:[#allocation2 + $0x9c] sm:$0xe]  ;;  %v2206_v10 = vrot.slane %v2056_v1, 5  ;;  %vm2518_vm2 = vcmask 257216  }
  0xd7   : > { %v1916_v11 = vpop.permute.xlu1 %1915  ;;  %v2198_v61 = vrot.slane %v2196_v54, 4  ;;  %v2205_v9 = vrot.slane %v2203_v17, 4  ;;  %v2061_v15 = vld [vmem:[#allocation2 + $0xac] sm:$0xf]  ;;  %v2060_v24 = vld [vmem:[#allocation2 + $0xa8] sm:$0xe] }
  0xd8   : > { %2245 = vrot.lane.b32.xlu0 %v2148_v55, %s5855_s17  ;;  %1999 = vst.msk [vmem:[#allocation3 + $0x34] sm:$0xf] %vm1985_vm15, %v1916_v11  ;;  %v5437_v55 = vrot.slane %v2051_v50, 9  ;;  %v2059_v11 = vld [vmem:[#allocation2 + $0xa4] sm:$0x1]  ;;  %v2217_v26 = vrot.slane %v2061_v15, 5 }
  0xd9   : > { %2247 = vrot.lane.b32.xlu1 %v2151_v58, %s5855_s17  ;;  %v2193_v58 = vsel %vm6413_vm14, %v2191_v51, %v2192_v52  ;;  %v2200_v7 = vsel %vm6413_vm14, %v2198_v61, %v2199_v62  ;;  %v2213_v23 = vrot.slane %v2059_v11, 5  ;;  %v2062_v25 = vld [vmem:[#allocation2 + $0xb0] sm:$0x1]  ;;  %v2064_v32 = vld [vmem:[#allocation2 + $0xb8] sm:$0xf]  ;;  %vm3079_vm7 = vcmask 322816  }
  0xda   : > { %v2197_v6 = vsel %vm6413_vm14, %v5437_v55, %v2196_v54  ;;  %v2063_v38 = vld [vmem:[#allocation2 + $0xb4] sm:$0xe]  ;;  %v2219_v40 = vrot.slane %v2217_v26, 4  ;;  %v2065_v29 = vld [vmem:[#allocation2 + $0xbc] sm:$0x1]  ;;  %v2224_v30 = vrot.slane %v2064_v32, 5 }
  0xdb   : > { %v5441_v37 = vrot.slane %v2063_v38, 9  ;;  %v2227_v46 = vrot.slane %v2065_v29, 5  ;;  %v2358_v19 = vld [vmem:[#allocation2 + $0xc] sm:$0xf]  ;;  %v2359_v28 = vld [vmem:[#allocation2 + $0x10] sm:$0xf] }
  0xdc   : > { %2249 = vrot.lane.b32.xlu0 %v2155_v4, %s5855_s17  ;;  %v5438_v4 = vrot.slane %v2054_v59, 9  ;;  %v2226_v45 = vrot.slane %v2224_v30, 4  ;;  %v2362_v52 = vld [vmem:[#allocation2 + $0x24] sm:$0xf]  ;;  %v2363_v53 = vld [vmem:[#allocation2 + $0x28] sm:$0xf] }
  0xdd   : > { %2251 = vrot.lane.b32.xlu1 %v2158_v5, %s5855_s17  ;;  %v1918_v27 = vpop.permute.xlu0 %1917  ;;  %v2058_v5 = vld [vmem:[#allocation2 + $0xa0] sm:$0xf]  ;;  %v2225_v47 = vsel %vm6413_vm14, %v5441_v37, %v2224_v30  ;;  %v2364_v54 = vld [vmem:[#allocation2 + $0x30] sm:$0xf]  ;;  %v2365_v55 = vld [vmem:[#allocation2 + $0x34] sm:$0xf] }
  0xde   : > { %2000 = vst.msk [vmem:[#allocation3 + $0x38] sm:$0xf] %vm1985_vm15, %v1918_v27  ;;  %v2210_v12 = vrot.slane %v2058_v5, 5  ;;  %v2204_v20 = vsel %vm6413_vm14, %v5438_v4, %v2203_v17  ;;  %v2220_v27 = vrot.slane %v2062_v25, 5  ;;  %v2551_v56 = vld [vmem:[#allocation2 + $0xc] sm:$0xf] }
  0xdf   : > { %v2552_v59 = vld [vmem:[#allocation2 + $0x10] sm:$0xf]  ;;  %v2600_v61 = vshrl.u32 %v2551_v56, 16  ;;  %v2603_v62 = vshll.u32 %v2551_v56, 16  ;;  %v2554_v1 = vld [vmem:[#allocation2 + $0x18] sm:$0xf] }
  0xe0   : > { %2253 = vrot.lane.b32.xlu0 %v2162_v13, %s5855_s17  ;;  %v5439_v13 = vrot.slane %v2057_v8, 9  ;;  %v2212_v16 = vrot.slane %v2210_v12, 4  ;;  %v2369_v17 = vld [vmem:[#allocation2 + $0x4c] sm:$0xf]  ;;  %v2609_v4 = vshll.u32 %v2552_v59, 16  ;;  %v2613_v5 = vshrl.u32 %v2552_v59, 16 }
  0xe1   : > { %2255 = vrot.lane.b32.xlu1 %v2165_v21, %s5855_s17  ;;  %v2207_v21 = vsel %vm6413_vm14, %v2205_v9, %v2206_v10  ;;  %v2555_v9 = vld [vmem:[#allocation2 + $0x1c] sm:$0xf]  ;;  %v2624_v10 = vshrl.u32 %v2554_v1, 16  ;;  %v2627_v11 = vshll.u32 %v2554_v1, 16  ;;  %v2373_v38 = vld [vmem:[#allocation2 + $0x64] sm:$0xf] }
  0xe2   : > { %v1920_v48 = vpop.permute.xlu1 %1919  ;;  %v2211_v31 = vsel %vm6413_vm14, %v5439_v13, %v2210_v12  ;;  %v2370_v12 = vld [vmem:[#allocation2 + $0x54] sm:$0xf]  ;;  %v2371_v13 = vld [vmem:[#allocation2 + $0x58] sm:$0xf]  ;;  %v2611_v15 = vrot.slane %v2609_v4, 5  ;;  %vm3416_vm8 = vcmask 388416  }
  0xe3   : > { %2001 = vst.msk [vmem:[#allocation3 + $0x3c] sm:$0xf] %vm1985_vm15, %v1920_v48  ;;  %v2228_v48 = vsel %vm6413_vm14, %v2226_v45, %v2227_v46  ;;  %v2626_v25 = vrot.slane %v2624_v10, 4  ;;  %v2556_v29 = vld [vmem:[#allocation2 + $0x20] sm:$0x1]  ;;  %vm3610_vm9 = vcmask 454016  }
  0xe4   : > { %2257 = vrot.lane.b32.xlu0 %v2169_v33, %s5855_s17  ;;  %v5440_v33 = vrot.slane %v2060_v24, 9  ;;  %v2637_v24 = vshrl.u32 %v2555_v9, 16  ;;  %v2374_v45 = vld [vmem:[#allocation2 + $0x6c] sm:$0xf]  ;;  %v3644_v1 = vld [vmem:[#allocation2 + $0x1c] sm:$0xf] }
  0xe5   : > { %2259 = vrot.lane.b32.xlu1 %v2172_v34, %s5855_s17  ;;  %v2214_v34 = vsel %vm6413_vm14, %v2212_v16, %v2213_v23  ;;  %v2553_v16 = vld [vmem:[#allocation2 + $0x14] sm:$0x1]  ;;  %v3705_v10 = vshrl.u32 %v3644_v1, 16  ;;  %vm4171_vm12 = vcmask 519616   ;;  %vm4508_vm13 = vcmask 585216  }
  0xe6   : > { %v2218_v42 = vsel %vm6413_vm14, %v5440_v33, %v2217_v26  ;;  %v2629_v26 = vrot.slane %v2627_v11, 5  ;;  %v2619_v32 = vshll.u32 %v2553_v16, 16  ;;  %v3647_v11 = vld [vmem:[#allocation2 + $0x28] sm:$0xf]  ;;  %v2584_v2 = vld [vmem:[#allocation2 + $0x90] sm:$0xf] }
  0xe7   : > { %v2583_v18 = vld [vmem:[#allocation2 + $0x8c] sm:$0x1]  ;;  %v2586_v0 = vld [vmem:[#allocation2 + $0x98] sm:$0x1] }
  0xe8   : > { %2261 = vrot.lane.b32.xlu0 %v2176_v14, %s5855_s17  ;;  %v2630_v30 = vor.u32 %v2629_v26, %v2626_v25  ;;  %v2621_v37 = vrot.slane %v2619_v32, 5  ;;  %v3707_v26 = vrot.slane %v3705_v10, 4  ;;  %v4208_v10 = vld [vmem:[#allocation2 + $0x28] sm:$0xf] }
  0xe9   : > { %2263 = vrot.lane.b32.xlu1 %v2179_v43, %s5855_s17  ;;  %v1922_v63 = vpop.permute.xlu0 %1921  ;;  %v2221_v43 = vsel %vm6413_vm14, %v2219_v40, %v2220_v27 }
  0xea   : > { %2002 = vst.msk [vmem:[#allocation3 + $0x40] sm:$0xf] %vm1985_vm15, %v1922_v63 }
  0xeb   : > { %v1924_v3 = vpop.permute.xlu1 %1923 }
  0xec   : > { %2265 = vrot.lane.b32.xlu0 %v2183_v44, %s5855_s17  ;;  %2003 = vst.msk [vmem:[#allocation3 + $0x44] sm:$0xf] %vm1985_vm15, %v1924_v3  ;;  %v2360_v44 = vld [vmem:[#allocation2 + $0x18] sm:$0xf]  ;;  %v2368_v3 = vld [vmem:[#allocation2 + $0x48] sm:$0xf] }
  0xed   : > { %2267 = vrot.lane.b32.xlu1 %v2186_v36, %s5855_s17  ;;  %v2361_v36 = vld [vmem:[#allocation2 + $0x1c] sm:$0xf] }
  0xf0   : > { %2269 = vrot.lane.b32.xlu0 %v2190_v57, %s5855_s17  ;;  %v2366_v57 = vld [vmem:[#allocation2 + $0x3c] sm:$0xf] }
  0xf1   : > { %2271 = vrot.lane.b32.xlu1 %v2193_v58, %s5855_s17  ;;  %v2367_v58 = vld [vmem:[#allocation2 + $0x40] sm:$0xf] }
  0xf4   : > { %2273 = vrot.lane.b32.xlu0 %v2197_v6, %s5855_s17  ;;  %v2602_v6 = vrot.slane %v2600_v61, 4 }
  0xf5   : > { %2275 = vrot.lane.b32.xlu1 %v2200_v7, %s5855_s17  ;;  %v2605_v7 = vrot.slane %v2603_v62, 5  ;;  %v3117_v62 = vld [vmem:[#allocation2 + $0x20] sm:$0x1] }
  0xf7   : > { %v1926_v41 = vpop.permute.xlu0 %1925  ;;  %v2606_v23 = vor.u32 %v2605_v7, %v2602_v6  ;;  %v3646_v6 = vld [vmem:[#allocation2 + $0x24] sm:$0xf] }
  0xf8   : > { %2277 = vrot.lane.b32.xlu0 %v2204_v20, %s5855_s17  ;;  %2004 = vst.msk [vmem:[#allocation3 + $0x48] sm:$0xf] %vm1985_vm15, %v1926_v41  ;;  %v1928_v14 = vpop.permute.xlu1 %1927  ;;  %v2615_v20 = vrot.slane %v2613_v5, 4  ;;  %v2639_v41 = vrot.slane %v2637_v24, 4  ;;  %v3729_v24 = vshrl.u32 %v3647_v11, 16 }
  0xf9   : > { %2279 = vrot.lane.b32.xlu1 %v2207_v21, %s5855_s17  ;;  %2005 = vst.msk [vmem:[#allocation3 + $0x4c] sm:$0xf] %vm1985_vm15, %v1928_v14  ;;  %v2633_v21 = vshll.u32 %v2555_v9, 16  ;;  %v2607_v27 = vrot.slane %v2606_v23, 4  ;;  %v3701_v9 = vshll.u32 %v3644_v1, 16  ;;  %v3725_v23 = vshll.u32 %v3647_v11, 16 }
  0xfa   : > { %v2616_v40 = vor.u32 %v2615_v20, %v2611_v15  ;;  %v2560_v1 = vld [vmem:[#allocation2 + $0x30] sm:$0xf]  ;;  %v4207_v11 = vld [vmem:[#allocation2 + $0x24] sm:$0xe] }
  0xfb   : > { %v6594_v25 = vrot.slane %v3701_v9, 5 }
  0xfc   : > { %2281 = vrot.lane.b32.xlu0 %v2211_v31, %s5855_s17  ;;  %v2372_v31 = vld [vmem:[#allocation2 + $0x60] sm:$0xf]  ;;  %v2617_v46 = vrot.slane %v2616_v40, 4 }
  0xfd   : > { %2283 = vrot.lane.b32.xlu1 %v2214_v34, %s5855_s17  ;;  %v2635_v34 = vrot.slane %v2633_v21, 5 }
  0xff   : > { %v1930_v49 = vpop.permute.xlu0 %1929 }
 0x100   : > { %2285 = vrot.lane.b32.xlu0 %v2218_v42, %s5855_s17  ;;  %2006 = vst.msk [vmem:[#allocation3 + $0x50] sm:$0xf] %vm1985_vm15, %v1930_v49  ;;  %v2643_v42 = vshll.u32 %v2556_v29, 16  ;;  %v2631_v49 = vrot.slane %v2630_v30, 4  ;;  %v6603_v30 = vrot.slane %v3725_v23, 5  ;;  %v2675_v23 = vshll.u32 %v2560_v1, 16 }
 0x101   : > { %2287 = vrot.lane.b32.xlu1 %v2221_v43, %s5855_s17  ;;  %v1932_v35 = vpop.permute.xlu1 %1931  ;;  %v3113_v43 = vld [vmem:[#allocation2 + $0x10] sm:$0xf] }
 0x102   : > { %2007 = vst.msk [vmem:[#allocation3 + $0x54] sm:$0xf] %vm1985_vm15, %v1932_v35  ;;  %v3114_v35 = vld [vmem:[#allocation2 + $0x14] sm:$0x1] }
 0x104   : > { %2289 = vrot.lane.b32.xlu0 %v2225_v47, %s5855_s17  ;;  %v2612_v47 = vsel %vm6018_vm10, %v2607_v27, %v2611_v15 }
 0x105   : > { %2291 = vrot.lane.b32.xlu1 %v2228_v48, %s5855_s17  ;;  %v2640_v48 = vor.u32 %v2639_v41, %v2635_v34  ;;  %v5804_v41 = vld [vmem:[%s7471_s5 + $0x20] ss:$0 sps:$4 sm:$0xff]  }
 0x106   : > { %5769 = vmatprep.subr.msk.bf16.mxu0 %vm4738_vm1, %v5804_v41  ;;  %5770 = vmatprep.subr.msk.bf16.mxu1 %vm4738_vm1, %v5804_v41 }
 0x108   : > { %2422 = vrot.lane.b32.xlu0 %v2358_v19, %s5856_s18  ;;  %v3112_v19 = vld [vmem:[#allocation2 + $0xc] sm:$0xe] }
 0x109   : > { %2424 = vrot.lane.b32.xlu1 %v2359_v28, %s5856_s18  ;;  %v3210_v28 = vrot.slane %v3113_v43, 5  ;;  %v3648_v43 = vld [vmem:[#allocation2 + $0x2c] sm:$0x1] }
 0x10a   : > { %v1934_v50 = vpop.permute.xlu0 %1933  ;;  %v1936_v51 = vpop.permute.xlu1 %1935 }
 0x10b   : > { %2008 = vst.msk [vmem:[#allocation3 + $0x58] sm:$0xf] %vm1985_vm15, %v1934_v50  ;;  %2009 = vst.msk [vmem:[#allocation3 + $0x5c] sm:$0xf] %vm1985_vm15, %v1936_v51  ;;  %v2641_v50 = vrot.slane %v2640_v48, 4  ;;  %v2645_v51 = vrot.slane %v2643_v42, 5 }
 0x10c   : > { %2426 = vrot.lane.b32.xlu0 %v2360_v44, %s5856_s18  ;;  %v5442_v44 = vrot.slane %v3112_v19, 9  ;;  %v3212_v56 = vrot.slane %v3210_v28, 4  ;;  %v3452_v48 = vld [vmem:[#allocation2 + $0x24] sm:$0xf] }
 0x10d   : > { %2428 = vrot.lane.b32.xlu1 %v2361_v36, %s5856_s18  ;;  %v2622_v36 = vsel %vm6018_vm10, %v2617_v46, %v2621_v37  ;;  %v3708_v37 = vor.u32 %v3707_v26, %v6594_v25  ;;  %v4740_v46 = vsel %vm4738_vm1, %v5804_v41, 0 }
 0x10e   : > { %v3211_v59 = vsel %vm6413_vm14, %v5442_v44, %v3210_v28  ;;  %5718 = vmatpush3.bf16.msra.mxu0 %v4740_v46  ;;  %v5805_v44 = vld [vmem:[%s7471_s5 + $0x18] sm:$0xff]   ;;  %5764 = vmatpush3.bf16.msra.mxu1 %v4740_v46 }
 0x10f   : > { %5719 = vmatprep.subr.bf16.mxu0 %v5805_v44  ;;  %5760 = vmatprep.subr.bf16.mxu1 %v5805_v44 }
 0x110   : > { %2430 = vrot.lane.b32.xlu0 %v2362_v52, %s5856_s18  ;;  %v2636_v52 = vsel %vm6018_vm10, %v2631_v49, %v2635_v34  ;;  %v3450_v34 = vld [vmem:[#allocation2 + $0x18] sm:$0xf] }
 0x111   : > { %2432 = vrot.lane.b32.xlu1 %v2363_v53, %s5856_s18  ;;  %v3116_v53 = vld [vmem:[#allocation2 + $0x1c] sm:$0xf] }
 0x112   : > { %5720 = vmatpush3.bf16.msra.mxu0 %v5805_v44  ;;  %5765 = vmatpush3.bf16.msra.mxu1 %v5805_v44 }
 0x114   : > { %2434 = vrot.lane.b32.xlu0 %v2364_v54, %s5856_s18  ;;  %v3115_v54 = vld [vmem:[#allocation2 + $0x18] sm:$0xe] }
 0x115   : > { %2436 = vrot.lane.b32.xlu1 %v2365_v55, %s5856_s18  ;;  %v1938_v63 = vpop.permute.xlu0 %1937  ;;  %v3643_v55 = vld [vmem:[#allocation2 + $0x18] sm:$0xf] }
 0x116   : > { %2010 = vst.msk [vmem:[#allocation3 + $0x60] sm:$0xf] %vm1985_vm15, %v1938_v63  ;;  %v3217_v63 = vrot.slane %v3116_v53, 5  ;;  %v3692_v4 = vshrl.u32 %v3643_v55, 16  ;;  %v3695_v5 = vshll.u32 %v3643_v55, 16 }
 0x117   : > { %v1940_v8 = vpop.permute.xlu1 %1939  ;;  %v4204_v55 = vld [vmem:[#allocation2 + $0x18] sm:$0xe] }
 0x118   : > { %2438 = vrot.lane.b32.xlu0 %v2366_v57, %s5856_s18  ;;  %2011 = vst.msk [vmem:[#allocation3 + $0x64] sm:$0xf] %vm1985_vm15, %v1940_v8  ;;  %v3213_v57 = vrot.slane %v3114_v35, 5  ;;  %v3220_v8 = vrot.slane %v3117_v62, 5  ;;  %v3219_v15 = vrot.slane %v3217_v63, 4  ;;  %v3694_v21 = vrot.slane %v3692_v4, 4 }
 0x119   : > { %2440 = vrot.lane.b32.xlu1 %v2367_v58, %s5856_s18  ;;  %v3697_v16 = vrot.slane %v3695_v5, 5  ;;  %v2557_v35 = vld [vmem:[#allocation2 + $0x24] sm:$0xf]  ;;  %v4206_v5 = vld [vmem:[#allocation2 + $0x20] sm:$0x1] }
 0x11a   : > { %v3214_v7 = vsel %vm6413_vm14, %v3212_v56, %v3213_v57  ;;  %v3453_v56 = vld [vmem:[#allocation2 + $0x28] sm:$0xf]  ;;  %v4305_v26 = vrot.slane %v4206_v5, 5 }
 0x11b   : > { %v3698_v40 = vor.u32 %v3697_v16, %v3694_v21  ;;  %v2561_v21 = vld [vmem:[#allocation2 + $0x34] sm:$0xf]  ;;  %v2672_v16 = vshrl.u32 %v2560_v1, 16 }
 0x11c   : > { %2442 = vrot.lane.b32.xlu0 %v2368_v3, %s5856_s18  ;;  %v2646_v3 = vsel %vm6018_vm10, %v2641_v50, %v2645_v51  ;;  %v3735_v50 = vshll.u32 %v3648_v43, 16  ;;  %v4205_v51 = vld [vmem:[#allocation2 + $0x1c] sm:$0xf] }
 0x11d   : > { %2444 = vrot.lane.b32.xlu1 %v2369_v17, %s5856_s18  ;;  %v5443_v17 = vrot.slane %v3115_v54, 9  ;;  %v3699_v49 = vrot.slane %v3698_v40, 4  ;;  %v4209_v40 = vld [vmem:[#allocation2 + $0x2c] sm:$0x1]  ;;  %v2674_v43 = vrot.slane %v2672_v16, 4 }
 0x11e   : > { %v3737_v4 = vrot.slane %v3735_v50, 5  ;;  %v3649_v16 = vld [vmem:[#allocation2 + $0x30] sm:$0xf] }
 0x11f   : > { %v3218_v20 = vsel %vm6413_vm14, %v5443_v17, %v3217_v63  ;;  %v3704_v57 = vsel %vm6018_vm10, %v3699_v49, %v6594_v25 }
 0x120   : > { %2446 = vrot.lane.b32.xlu0 %v2370_v12, %s5856_s18  ;;  %v1942_v33 = vpop.permute.xlu0 %1941  ;;  %v3716_v12 = vshrl.u32 %v3646_v6, 16 }
 0x121   : > { %2448 = vrot.lane.b32.xlu1 %v2371_v13, %s5856_s18  ;;  %2012 = vst.msk [vmem:[#allocation3 + $0x68] sm:$0xf] %vm1985_vm15, %v1942_v33  ;;  %v3719_v13 = vshll.u32 %v3646_v6, 16  ;;  %v3221_v33 = vsel %vm6413_vm14, %v3219_v15, %v3220_v8  ;;  %v4302_v6 = vrot.slane %v4205_v51, 5  ;;  %v2562_v51 = vld [vmem:[#allocation2 + $0x38] sm:$0x1] }
 0x122   : > { %v1944_v14 = vpop.permute.xlu1 %1943 }
 0x123   : > { %2013 = vst.msk [vmem:[#allocation3 + $0x6c] sm:$0xf] %vm1985_vm15, %v1944_v14  ;;  %v3721_v32 = vrot.slane %v3719_v13, 5  ;;  %v3731_v14 = vrot.slane %v3729_v24, 4 }
 0x124   : > { %2450 = vrot.lane.b32.xlu0 %v2372_v31, %s5856_s18  ;;  %v3718_v31 = vrot.slane %v3716_v12, 4 }
 0x125   : > { %2452 = vrot.lane.b32.xlu1 %v2373_v38, %s5856_s18  ;;  %v3645_v38 = vld [vmem:[#allocation2 + $0x20] sm:$0x1] }
 0x126   : > { %v3711_v42 = vshll.u32 %v3645_v38, 16  ;;  %v4309_v38 = vrot.slane %v4208_v10, 5 }
 0x128   : > { %2454 = vrot.lane.b32.xlu0 %v2374_v45, %s5856_s18  ;;  %v3722_v45 = vor.u32 %v3721_v32, %v3718_v31  ;;  %v3713_v53 = vrot.slane %v3711_v42, 5  ;;  %v5807_v31 = vld [vmem:[%s7471_s5 + $0x8] sm:$0xff]   ;;  %v2685_v42 = vshrl.u32 %v2561_v21, 16 }
 0x129   : > { %2983 = vrot.lane.b32.xlu1 %v2612_v47, %s5857_s19  ;;  %v3451_v47 = vld [vmem:[#allocation2 + $0x1c] sm:$0xf] }
 0x12a   : > { %v3723_v54 = vrot.slane %v3722_v45, 4  ;;  %v2677_v45 = vrot.slane %v2675_v23, 5  ;;  %v3123_v23 = vld [vmem:[#allocation2 + $0x38] sm:$0x1] }
 0x12c   : > { %2985 = vrot.lane.b32.xlu0 %v2622_v36, %s5857_s19  ;;  %v1946_v58 = vpop.permute.xlu0 %1945  ;;  %v1948_v61 = vpop.permute.xlu1 %1947  ;;  %v3732_v36 = vor.u32 %v3731_v14, %v6603_v30  ;;  %v3728_v9 = vsel %vm6018_vm10, %v3723_v54, %v6603_v30  ;;  %v2681_v30 = vshll.u32 %v2561_v21, 16  ;;  %v2559_v14 = vld [vmem:[#allocation2 + $0x2c] sm:$0x1]  ;;  %v2678_v54 = vor.u32 %v2677_v45, %v2674_v43  ;;  %v3121_v21 = vld [vmem:[#allocation2 + $0x30] sm:$0xe] }
 0x12d   : > { %2987 = vrot.lane.b32.xlu1 %v2636_v52, %s5857_s19  ;;  %2014 = vst.msk [vmem:[#allocation3 + $0x70] sm:$0xf] %vm1985_vm15, %v1946_v58  ;;  %2015 = vst.msk [vmem:[#allocation3 + $0x74] sm:$0xf] %vm1985_vm15, %v1948_v61  ;;  %v3709_v52 = vrot.slane %v3708_v37, 4  ;;  %v2651_v61 = vshll.u32 %v2557_v35, 16 }
 0x12e   : > { %v2558_v58 = vld [vmem:[#allocation2 + $0x28] sm:$0xf]  ;;  %v3733_v17 = vrot.slane %v3732_v36, 4  ;;  %v2667_v36 = vshll.u32 %v2559_v14, 16  ;;  %v2679_v1 = vrot.slane %v2678_v54, 4 }
 0x12f   : > { %v3714_v8 = vsel %vm6018_vm10, %v3709_v52, %v3713_v53  ;;  %v2657_v12 = vshll.u32 %v2558_v58, 16  ;;  %v2661_v13 = vshrl.u32 %v2558_v58, 16  ;;  %v2683_v52 = vrot.slane %v2681_v30, 5 }
 0x130   : > { %2989 = vrot.lane.b32.xlu0 %v2646_v3, %s5857_s19  ;;  %v5806_v3 = vld [vmem:[%s7471_s5 + $0x10] sm:$0xff]   ;;  %v3738_v32 = vsel %vm6018_vm10, %v3733_v17, %v3737_v4  ;;  %v2687_v53 = vrot.slane %v2685_v42, 4  ;;  %v2669_v58 = vrot.slane %v2667_v36, 5  ;;  %v3118_v17 = vld [vmem:[#allocation2 + $0x24] sm:$0xe]  ;;  %v3234_v42 = vrot.slane %v3123_v23, 5 }
 0x131   : > { %3320 = vrot.lane.b32.xlu1 %v3211_v59, %s5858_s20  ;;  %v2648_v59 = vshrl.u32 %v2557_v35, 16  ;;  %5721 = vmatprep.subr.bf16.mxu0 %v5806_v3  ;;  %v2663_v41 = vrot.slane %v2661_v13, 4  ;;  %v3122_v13 = vld [vmem:[#allocation2 + $0x34] sm:$0xf] }
 0x132   : > { %5761 = vmatprep.subr.bf16.mxu1 %v5806_v3  ;;  %5722 = vmatpush3.bf16.msra.mxu0 %v5806_v3 }
 0x133   : > { %v2650_v15 = vrot.slane %v2648_v59, 4  ;;  %5766 = vmatpush3.bf16.msra.mxu1 %v5806_v3  ;;  %5723 = vmatprep.subr.bf16.mxu0 %v5807_v31  ;;  %v2691_v59 = vshll.u32 %v2562_v51, 16  ;;  %v3119_v3 = vld [vmem:[#allocation2 + $0x28] sm:$0xf] }
 0x134   : > { %3322 = vrot.lane.b32.xlu0 %v3214_v7, %s5858_s20  ;;  %v5458_v7 = vrot.slane %v4204_v55, 9  ;;  %5762 = vmatprep.subr.bf16.mxu1 %v5807_v31 }
 0x135   : > { %3324 = vrot.lane.b32.xlu1 %v3218_v20, %s5858_s20  ;;  %v2653_v20 = vrot.slane %v2651_v61, 5  ;;  %v2693_v10 = vrot.slane %v2691_v59, 5 }
 0x136   : > { %v1950_v27 = vpop.permute.xlu0 %1949  ;;  %5724 = vmatpush3.bf16.msra.mxu0 %v5807_v31 }
 0x137   : > { %v1952_v29 = vpop.permute.xlu1 %1951  ;;  %2016 = vst.msk [vmem:[#allocation3 + $0x78] sm:$0xf] %vm1985_vm15, %v1950_v27  ;;  %v5459_v27 = vrot.slane %v4207_v11, 9  ;;  %v2654_v37 = vor.u32 %v2653_v20, %v2650_v15  ;;  %5767 = vmatpush3.bf16.msra.mxu1 %v5807_v31  ;;  %v2684_v11 = vsel %vm6018_vm10, %v2679_v1, %v2683_v52  ;;  %v3231_v31 = vrot.slane %v3122_v13, 5  ;;  %v4211_v13 = vld [vmem:[#allocation2 + $0x34] sm:$0xf] }
 0x138   : > { %2017 = vst.msk [vmem:[#allocation3 + $0x7c] sm:$0xf] %vm1985_vm15, %v1952_v29  ;;  %3326 = vrot.lane.b32.xlu0 %v3221_v33, %s5858_s20  ;;  %v4304_v33 = vrot.slane %v4302_v6, 4  ;;  %v2659_v29 = vrot.slane %v2657_v12, 5  ;;  %v3120_v12 = vld [vmem:[#allocation2 + $0x2c] sm:$0x1] }
 0x139   : > { %3514 = vrot.lane.b32.xlu1 %v3450_v34, %s5859_s0  ;;  %v4303_v34 = vsel %vm6413_vm14, %v5458_v7, %v4302_v6  ;;  %v4310_v35 = vsel %vm6413_vm14, %v5459_v27, %v4309_v38  ;;  %v2655_v50 = vrot.slane %v2654_v37, 4  ;;  %v3224_v6 = vrot.slane %v3119_v3, 5  ;;  %v3652_v27 = vld [vmem:[#allocation2 + $0x3c] sm:$0xf] }
 0x13a   : > { %v2230_v19 = vpop.permute.xlu0 %2229  ;;  %v4306_v49 = vsel %vm6413_vm14, %v4304_v33, %v4305_v26  ;;  %v2664_v44 = vor.u32 %v2663_v41, %v2659_v29  ;;  %v5444_v7 = vrot.slane %v3118_v17, 9  ;;  %v3764_v43 = vshrl.u32 %v3652_v27, 16 }
 0x13b   : > { %v2232_v28 = vpop.permute.xlu1 %2231  ;;  %2326 = vst.msk [vmem:[#allocation3] sm:$0xf] %vm2325_vm0, %v2230_v19  ;;  %v4312_v19 = vrot.slane %v4209_v40, 5  ;;  %v3743_v40 = vshll.u32 %v3649_v16, 16  ;;  %v3767_v45 = vshll.u32 %v3652_v27, 16  ;;  %vm4689_vm15 = vcmask 588800  }
 0x13c   : > { %2327 = vst.msk [vmem:[#allocation3 + $0x4] sm:$0xf] %vm2325_vm0, %v2232_v28  ;;  %3516 = vrot.lane.b32.xlu0 %v3451_v47, %s5859_s0  ;;  %v4311_v28 = vrot.slane %v4309_v38, 4  ;;  %v2665_v61 = vrot.slane %v2664_v44, 4  ;;  %v3225_v26 = vsel %vm6413_vm14, %v5444_v7, %v3224_v6  ;;  %v3740_v38 = vshrl.u32 %v3649_v16, 16 }
 0x13d   : > { %3518 = vrot.lane.b32.xlu1 %v3452_v48, %s5859_s0  ;;  %v5808_v48 = vld [vmem:[%s7471_s5] sm:$0xff]   ;;  %v3769_v54 = vrot.slane %v3767_v45, 5  ;;  %v4212_v27 = vld [vmem:[#allocation2 + $0x38] sm:$0x1] }
 0x13e   : > { %v2234_v62 = vpop.permute.xlu0 %2233  ;;  %5725 = vmatprep.subr.bf16.mxu0 %v5808_v48  ;;  %5763 = vmatprep.subr.bf16.mxu1 %v5808_v48  ;;  %v3457_v16 = vld [vmem:[#allocation2 + $0x40] sm:$0xf] }
 0x13f   : > { %v2236_v63 = vpop.permute.xlu1 %2235  ;;  %2328 = vst.msk [vmem:[#allocation3 + $0x8] sm:$0xf] %vm2325_vm0, %v2234_v62  ;;  %5726 = vmatpush3.bf16.msra.mxu0 %v5808_v48  ;;  %5768 = vmatpush3.bf16.msra.mxu1 %v5808_v48  ;;  %v2660_v62 = vsel %vm6018_vm10, %v2655_v50, %v2659_v29  ;;  %v3742_v48 = vrot.slane %v3740_v38, 4  ;;  %v3651_v50 = vld [vmem:[#allocation2 + $0x38] sm:$0x1] }
 0x140   : > { %2329 = vst.msk [vmem:[#allocation3 + $0xc] sm:$0xf] %vm2325_vm0, %v2236_v63  ;;  %3520 = vrot.lane.b32.xlu0 %v3453_v56, %s5859_s0  ;;  %v2688_v63 = vor.u32 %v2687_v53, %v2683_v52  ;;  %v3766_v53 = vrot.slane %v3764_v43, 4 }
 0x141   : > { %4075 = vrot.lane.b32.xlu1 %v3704_v57, %s5860_s10  ;;  %v4313_v57 = vsel %vm6413_vm14, %v4311_v28, %v4312_v19  ;;  %v3653_v19 = vld [vmem:[#allocation2 + $0x40] sm:$0xf] }
 0x142   : > { %v2238_v24 = vpop.permute.xlu0 %2237  ;;  %v3773_v51 = vshll.u32 %v3653_v19, 16  ;;  %v3777_v52 = vshrl.u32 %v3653_v19, 16  ;;  %v3770_v17 = vor.u32 %v3769_v54, %v3766_v53  ;;  %v4215_v53 = vld [vmem:[#allocation2 + $0x44] sm:$0x1] }
 0x143   : > { %v2240_v25 = vpop.permute.xlu1 %2239  ;;  %2330 = vst.msk [vmem:[#allocation3 + $0x10] sm:$0xf] %vm2325_vm0, %v2238_v24  ;;  %v3226_v24 = vrot.slane %v3224_v6, 4 }
 0x144   : > { %2331 = vst.msk [vmem:[#allocation3 + $0x14] sm:$0xf] %vm2325_vm0, %v2240_v25  ;;  %4077 = vrot.lane.b32.xlu0 %v3714_v8, %s5860_s10  ;;  %v2670_v8 = vsel %vm6018_vm10, %v2665_v61, %v2669_v58  ;;  %v3227_v25 = vrot.slane %v3120_v12, 5  ;;  %v3775_v1 = vrot.slane %v3773_v51, 5  ;;  %v3779_v3 = vrot.slane %v3777_v52, 4 }
 0x145   : > { %4079 = vrot.lane.b32.xlu1 %v3728_v9, %s5860_s10  ;;  %v2689_v9 = vrot.slane %v2688_v63, 4  ;;  %v3654_v63 = vld [vmem:[#allocation2 + $0x44] sm:$0x1] }
 0x146   : > { %v2242_v46 = vpop.permute.xlu0 %2241  ;;  %v3228_v37 = vsel %vm6413_vm14, %v3226_v24, %v3227_v25  ;;  %v3783_v12 = vshll.u32 %v3654_v63, 16  ;;  %v2564_v24 = vld [vmem:[#allocation2 + $0x40] sm:$0xf] }
 0x147   : > { %v2244_v47 = vpop.permute.xlu1 %2243  ;;  %2332 = vst.msk [vmem:[#allocation3 + $0x18] sm:$0xf] %vm2325_vm0, %v2242_v46  ;;  %v2694_v33 = vsel %vm6018_vm10, %v2689_v9, %v2693_v10  ;;  %v3233_v46 = vrot.slane %v3231_v31, 4  ;;  %v2563_v9 = vld [vmem:[#allocation2 + $0x3c] sm:$0xf]  ;;  %v2709_v43 = vshrl.u32 %v2564_v24, 16 }
 0x148   : > { %2333 = vst.msk [vmem:[#allocation3 + $0x1c] sm:$0xf] %vm2325_vm0, %v2244_v47  ;;  %4081 = vrot.lane.b32.xlu0 %v3738_v32, %s5860_s10  ;;  %v3650_v32 = vld [vmem:[#allocation2 + $0x34] sm:$0xf]  ;;  %v2696_v25 = vshrl.u32 %v2563_v9, 16 }
 0x149   : > { %4412 = vrot.lane.b32.xlu1 %v4303_v34, %s5861_s15  ;;  %v5445_v34 = vrot.slane %v3121_v21, 9  ;;  %v3749_v30 = vshll.u32 %v3650_v32, 16  ;;  %v3753_v14 = vshrl.u32 %v3650_v32, 16  ;;  %v4210_v21 = vld [vmem:[#allocation2 + $0x30] sm:$0xe] }
 0x14a   : > { %v2246_v55 = vpop.permute.xlu0 %2245  ;;  %v2698_v45 = vrot.slane %v2696_v25, 4 }
 0x14b   : > { %v2248_v56 = vpop.permute.xlu1 %2247  ;;  %2334 = vst.msk [vmem:[#allocation3 + $0x20] sm:$0xf] %vm2325_vm0, %v2246_v55  ;;  %v3232_v47 = vsel %vm6413_vm14, %v5445_v34, %v3231_v31  ;;  %v3751_v44 = vrot.slane %v3749_v30, 5  ;;  %v3755_v36 = vrot.slane %v3753_v14, 4  ;;  %v3235_v55 = vsel %vm6413_vm14, %v3233_v46, %v3234_v42  ;;  %v2566_v34 = vld [vmem:[#allocation2 + $0x48] sm:$0xf] }
 0x14c   : > { %2335 = vst.msk [vmem:[#allocation3 + $0x24] sm:$0xf] %vm2325_vm0, %v2248_v56  ;;  %4414 = vrot.lane.b32.xlu0 %v4306_v49, %s5861_s15  ;;  %v3745_v49 = vrot.slane %v3743_v40, 5  ;;  %v3454_v56 = vld [vmem:[#allocation2 + $0x30] sm:$0xf]  ;;  %v3785_v40 = vrot.slane %v3783_v12, 5 }
 0x14d   : > { %4416 = vrot.lane.b32.xlu1 %v4310_v35, %s5861_s15  ;;  %v3756_v61 = vor.u32 %v3755_v36, %v3751_v44  ;;  %v2705_v42 = vshll.u32 %v2564_v24, 16 }
 0x14e   : > { %v2250_v4 = vpop.permute.xlu0 %2249 }
 0x14f   : > { %v2252_v5 = vpop.permute.xlu1 %2251  ;;  %2336 = vst.msk [vmem:[#allocation3 + $0x28] sm:$0xf] %vm2325_vm0, %v2250_v4  ;;  %v3455_v4 = vld [vmem:[#allocation2 + $0x34] sm:$0xf]  ;;  %v3757_v10 = vrot.slane %v3756_v61, 4  ;;  %v2707_v54 = vrot.slane %v2705_v42, 5 }
 0x150   : > { %2337 = vst.msk [vmem:[#allocation3 + $0x2c] sm:$0xf] %vm2325_vm0, %v2252_v5  ;;  %4418 = vrot.lane.b32.xlu0 %v4313_v57, %s5861_s15  ;;  %v3746_v57 = vor.u32 %v3745_v49, %v3742_v48  ;;  %v3456_v5 = vld [vmem:[#allocation2 + $0x3c] sm:$0xf]  ;;  %v2720_v48 = vshrl.u32 %v2566_v34, 16  ;;  %v2723_v49 = vshll.u32 %v2566_v34, 16 }
 0x151   : > { %2991 = vrot.lane.b32.xlu1 %v2660_v62, %s5857_s19  ;;  %v3759_v62 = vshll.u32 %v3651_v50, 16 }
 0x152   : > { %v2254_v15 = vpop.permute.xlu0 %2253  ;;  %v3747_v6 = vrot.slane %v3746_v57, 4  ;;  %v2565_v57 = vld [vmem:[#allocation2 + $0x44] sm:$0x1]  ;;  %v2722_v61 = vrot.slane %v2720_v48, 4 }
 0x153   : > { %v2256_v20 = vpop.permute.xlu1 %2255  ;;  %2338 = vst.msk [vmem:[#allocation3 + $0x30] sm:$0xf] %vm2325_vm0, %v2254_v15  ;;  %v3780_v15 = vor.u32 %v3779_v3, %v3775_v1 }
 0x154   : > { %2339 = vst.msk [vmem:[#allocation3 + $0x34] sm:$0xf] %vm2325_vm0, %v2256_v20  ;;  %2993 = vrot.lane.b32.xlu0 %v2670_v8, %s5857_s19  ;;  %v3771_v20 = vrot.slane %v3770_v17, 4  ;;  %v3752_v23 = vsel %vm6018_vm10, %v3747_v6, %v3751_v44  ;;  %v4319_v44 = vrot.slane %v4212_v27, 5  ;;  %v4326_v17 = vrot.slane %v4215_v53, 5 }
 0x155   : > { %2995 = vrot.lane.b32.xlu1 %v2684_v11, %s5857_s19  ;;  %v3761_v11 = vrot.slane %v3759_v62, 5  ;;  %v3781_v30 = vrot.slane %v3780_v15, 4  ;;  %v2725_v62 = vrot.slane %v2723_v49, 5 }
 0x156   : > { %v2258_v29 = vpop.permute.xlu0 %2257  ;;  %v3776_v14 = vsel %vm6018_vm10, %v3771_v20, %v3775_v1 }
 0x157   : > { %v2260_v41 = vpop.permute.xlu1 %2259  ;;  %2340 = vst.msk [vmem:[#allocation3 + $0x38] sm:$0xf] %vm2325_vm0, %v2258_v29  ;;  %v3762_v38 = vsel %vm6018_vm10, %v3757_v10, %v3761_v11  ;;  %v5460_v29 = vrot.slane %v4210_v21, 9  ;;  %v3786_v52 = vsel %vm6018_vm10, %v3781_v30, %v3785_v40  ;;  %v2726_v12 = vor.u32 %v2725_v62, %v2722_v61 }
 0x158   : > { %2341 = vst.msk [vmem:[#allocation3 + $0x3c] sm:$0xf] %vm2325_vm0, %v2260_v41  ;;  %2997 = vrot.lane.b32.xlu0 %v2694_v33, %s5857_s19  ;;  %v4316_v33 = vrot.slane %v4211_v13, 5  ;;  %v4214_v41 = vld [vmem:[#allocation2 + $0x40] sm:$0xf] }
 0x159   : > { %3328 = vrot.lane.b32.xlu1 %v3225_v26, %s5858_s20  ;;  %v2699_v26 = vshll.u32 %v2563_v9, 16  ;;  %v4323_v50 = vrot.slane %v4214_v41, 5  ;;  %v2568_v9 = vld [vmem:[#allocation2 + $0x50] sm:$0x1] }
 0x15a   : > { %v2262_v28 = vpop.permute.xlu0 %2261  ;;  %v4317_v36 = vsel %vm6413_vm14, %v5460_v29, %v4316_v33 }
 0x15b   : > { %v2264_v35 = vpop.permute.xlu1 %2263  ;;  %2342 = vst.msk [vmem:[#allocation3 + $0x40] sm:$0xf] %vm2325_vm0, %v2262_v28  ;;  %v2701_v46 = vrot.slane %v2699_v26, 5  ;;  %v2727_v26 = vrot.slane %v2726_v12, 4 }
 0x15c   : > { %2343 = vst.msk [vmem:[#allocation3 + $0x44] sm:$0xf] %vm2325_vm0, %v2264_v35  ;;  %3330 = vrot.lane.b32.xlu0 %v3228_v37, %s5858_s20  ;;  %v4213_v37 = vld [vmem:[#allocation2 + $0x3c] sm:$0xe]  ;;  %v4318_v35 = vrot.slane %v4316_v33, 4 }
 0x15d   : > { %3332 = vrot.lane.b32.xlu1 %v3232_v47, %s5858_s20  ;;  %v2567_v47 = vld [vmem:[#allocation2 + $0x4c] sm:$0xf]  ;;  %v5461_v51 = vrot.slane %v4213_v37, 9 }
 0x15e   : > { %v2266_v58 = vpop.permute.xlu0 %2265  ;;  %v4320_v3 = vsel %vm6413_vm14, %v4318_v35, %v4319_v44  ;;  %v3128_v37 = vld [vmem:[#allocation2 + $0x4c] sm:$0xf] }
 0x15f   : > { %v2268_v59 = vpop.permute.xlu1 %2267  ;;  %2344 = vst.msk [vmem:[#allocation3 + $0x48] sm:$0xf] %vm2325_vm0, %v2266_v58  ;;  %v2702_v58 = vor.u32 %v2701_v46, %v2698_v45  ;;  %v3127_v45 = vld [vmem:[#allocation2 + $0x48] sm:$0xe] }
 0x160   : > { %2345 = vst.msk [vmem:[#allocation3 + $0x4c] sm:$0xf] %vm2325_vm0, %v2268_v59  ;;  %3334 = vrot.lane.b32.xlu0 %v3235_v55, %s5858_s20  ;;  %v2711_v55 = vrot.slane %v2709_v43, 4  ;;  %v2733_v59 = vshrl.u32 %v2567_v47, 16  ;;  %v3655_v46 = vld [vmem:[#allocation2 + $0x48] sm:$0xf] }
 0x161   : > { %3522 = vrot.lane.b32.xlu1 %v3454_v56, %s5859_s0  ;;  %v2729_v56 = vshll.u32 %v2567_v47, 16  ;;  %v5447_v44 = vrot.slane %v3127_v45, 9  ;;  %v4216_v45 = vld [vmem:[#allocation2 + $0x48] sm:$0xe] }
 0x162   : > { %v2270_v7 = vpop.permute.xlu0 %2269  ;;  %v2712_v6 = vor.u32 %v2711_v55, %v2707_v54  ;;  %v2735_v11 = vrot.slane %v2733_v59, 4 }
 0x163   : > { %v2272_v8 = vpop.permute.xlu1 %2271  ;;  %2346 = vst.msk [vmem:[#allocation3 + $0x50] sm:$0xf] %vm2325_vm0, %v2270_v7  ;;  %v2715_v7 = vshll.u32 %v2565_v57, 16  ;;  %v2731_v10 = vrot.slane %v2729_v56, 5  ;;  %v3659_v57 = vld [vmem:[#allocation2 + $0x58] sm:$0xf] }
 0x164   : > { %2347 = vst.msk [vmem:[#allocation3 + $0x54] sm:$0xf] %vm2325_vm0, %v2272_v8  ;;  %3524 = vrot.lane.b32.xlu0 %v3455_v4, %s5859_s0  ;;  %v4325_v4 = vrot.slane %v4323_v50, 4  ;;  %v2703_v8 = vrot.slane %v2702_v58, 4 }
 0x165   : > { %3526 = vrot.lane.b32.xlu1 %v3456_v5, %s5859_s0  ;;  %v4324_v5 = vsel %vm6413_vm14, %v5461_v51, %v4323_v50  ;;  %v2717_v21 = vrot.slane %v2715_v7, 5  ;;  %v2736_v25 = vor.u32 %v2735_v11, %v2731_v10  ;;  %v2732_v30 = vsel %vm6018_vm10, %v2727_v26, %v2731_v10  ;;  %v3658_v51 = vld [vmem:[#allocation2 + $0x54] sm:$0xf]  ;;  %v3660_v26 = vld [vmem:[#allocation2 + $0x5c] sm:$0x1] }
 0x166   : > { %v2274_v31 = vpop.permute.xlu0 %2273  ;;  %v4327_v20 = vsel %vm6413_vm14, %v4325_v4, %v4326_v17  ;;  %v2708_v24 = vsel %vm6018_vm10, %v2703_v8, %v2707_v54  ;;  %v3791_v50 = vshll.u32 %v3655_v46, 16  ;;  %v3129_v54 = vld [vmem:[#allocation2 + $0x50] sm:$0x1]  ;;  %v3812_v61 = vshrl.u32 %v3658_v51, 16 }
 0x167   : > { %v2276_v32 = vpop.permute.xlu1 %2275  ;;  %2348 = vst.msk [vmem:[#allocation3 + $0x58] sm:$0xf] %vm2325_vm0, %v2274_v31  ;;  %v3125_v31 = vld [vmem:[#allocation2 + $0x40] sm:$0xf]  ;;  %v2737_v29 = vrot.slane %v2736_v25, 4  ;;  %v3815_v62 = vshll.u32 %v3658_v51, 16 }
 0x168   : > { %2349 = vst.msk [vmem:[#allocation3 + $0x5c] sm:$0xf] %vm2325_vm0, %v2276_v32  ;;  %3528 = vrot.lane.b32.xlu0 %v3457_v16, %s5859_s0  ;;  %v2739_v16 = vshll.u32 %v2568_v9, 16  ;;  %v3124_v32 = vld [vmem:[#allocation2 + $0x3c] sm:$0xe]  ;;  %v3793_v17 = vrot.slane %v3791_v50, 5 }
 0x169   : > { %4083 = vrot.lane.b32.xlu1 %v3752_v23, %s5860_s10  ;;  %v2713_v23 = vrot.slane %v2712_v6, 4  ;;  %v5446_v40 = vrot.slane %v3124_v32, 9  ;;  %v3821_v6 = vshll.u32 %v3659_v57, 16  ;;  %v3825_v7 = vshrl.u32 %v3659_v57, 16  ;;  %v2572_v50 = vld [vmem:[#allocation2 + $0x60] sm:$0xf] }
 0x16a   : > { %v2278_v19 = vpop.permute.xlu0 %2277  ;;  %v2741_v41 = vrot.slane %v2739_v16, 5  ;;  %v3814_v10 = vrot.slane %v3812_v61, 4  ;;  %v3817_v11 = vrot.slane %v3815_v62, 5  ;;  %v4218_v51 = vld [vmem:[#allocation2 + $0x50] sm:$0x1] }
 0x16b   : > { %v2280_v28 = vpop.permute.xlu1 %2279  ;;  %2350 = vst.msk [vmem:[#allocation3 + $0x60] sm:$0xf] %vm2325_vm0, %v2278_v19  ;;  %v2718_v27 = vsel %vm6018_vm10, %v2713_v23, %v2717_v21  ;;  %v3245_v19 = vrot.slane %v3128_v37, 5  ;;  %v6763_v23 = vrot.slane %v3821_v6, 5  ;;  %v4219_v57 = vld [vmem:[#allocation2 + $0x54] sm:$0xe] }
 0x16c   : > { %2351 = vst.msk [vmem:[#allocation3 + $0x64] sm:$0xf] %vm2325_vm0, %v2280_v28  ;;  %4085 = vrot.lane.b32.xlu0 %v3762_v38, %s5860_s10  ;;  %v3238_v38 = vrot.slane %v3125_v31, 5  ;;  %v3656_v28 = vld [vmem:[#allocation2 + $0x4c] sm:$0xf]  ;;  %v2742_v35 = vsel %vm6018_vm10, %v2737_v29, %v2741_v41  ;;  %v3818_v32 = vor.u32 %v3817_v11, %v3814_v10  ;;  %v3831_v41 = vshll.u32 %v3660_v26, 16 }
 0x16d   : > { %4087 = vrot.lane.b32.xlu1 %v3776_v14, %s5860_s10  ;;  %v3126_v14 = vld [vmem:[#allocation2 + $0x44] sm:$0x1]  ;;  %v3797_v55 = vshll.u32 %v3656_v28, 16  ;;  %v3801_v56 = vshrl.u32 %v3656_v28, 16  ;;  %v3247_v59 = vrot.slane %v3245_v19, 4  ;;  %v5463_v10 = vrot.slane %v4219_v57, 9 }
 0x16e   : > { %v2282_v63 = vpop.permute.xlu0 %2281  ;;  %v3240_v47 = vrot.slane %v3238_v38, 4  ;;  %v3241_v48 = vrot.slane %v3126_v14, 5  ;;  %v3239_v49 = vsel %vm6413_vm14, %v5446_v40, %v3238_v38  ;;  %v2571_v26 = vld [vmem:[#allocation2 + $0x5c] sm:$0x1]  ;;  %v3661_v57 = vld [vmem:[#allocation2 + $0x60] sm:$0xf] }
 0x16f   : > { %v2284_v1 = vpop.permute.xlu1 %2283  ;;  %2352 = vst.msk [vmem:[#allocation3 + $0x68] sm:$0xf] %vm2325_vm0, %v2282_v63  ;;  %v3248_v63 = vrot.slane %v3129_v54, 5  ;;  %v3799_v8 = vrot.slane %v3797_v55, 5  ;;  %v3803_v9 = vrot.slane %v3801_v56, 4 }
 0x170   : > { %2353 = vst.msk [vmem:[#allocation3 + $0x6c] sm:$0xf] %vm2325_vm0, %v2284_v1  ;;  %4089 = vrot.lane.b32.xlu0 %v3786_v52, %s5860_s10  ;;  %v3242_v58 = vsel %vm6413_vm14, %v3240_v47, %v3241_v48  ;;  %v3246_v1 = vsel %vm6413_vm14, %v5447_v44, %v3245_v19  ;;  %v2570_v48 = vld [vmem:[#allocation2 + $0x58] sm:$0xf] }
 0x171   : > { %4420 = vrot.lane.b32.xlu1 %v4317_v36, %s5861_s15  ;;  %v3788_v36 = vshrl.u32 %v3655_v46, 16  ;;  %v3249_v12 = vsel %vm6413_vm14, %v3247_v59, %v3248_v63  ;;  %v3804_v25 = vor.u32 %v3803_v9, %v3799_v8  ;;  %v3461_v46 = vld [vmem:[#allocation2 + $0x58] sm:$0xf]  ;;  %v2757_v59 = vshrl.u32 %v2570_v48, 16  ;;  %v2573_v63 = vld [vmem:[#allocation2 + $0x64] sm:$0xf] }
 0x172   : > { %v2286_v13 = vpop.permute.xlu0 %2285  ;;  %v4220_v56 = vld [vmem:[#allocation2 + $0x58] sm:$0xf] }
 0x173   : > { %v2288_v15 = vpop.permute.xlu1 %2287  ;;  %2354 = vst.msk [vmem:[#allocation3 + $0x70] sm:$0xf] %vm2325_vm0, %v2286_v13  ;;  %v3458_v13 = vld [vmem:[#allocation2 + $0x48] sm:$0xf]  ;;  %v3805_v14 = vrot.slane %v3804_v25, 4  ;;  %v4337_v9 = vrot.slane %v4220_v56, 5 }
 0x174   : > { %2355 = vst.msk [vmem:[#allocation3 + $0x74] sm:$0xf] %vm2325_vm0, %v2288_v15  ;;  %4422 = vrot.lane.b32.xlu0 %v4320_v3, %s5861_s15  ;;  %v3790_v3 = vrot.slane %v3788_v36, 4  ;;  %v3657_v15 = vld [vmem:[#allocation2 + $0x50] sm:$0x1]  ;;  %v3833_v36 = vrot.slane %v3831_v41, 5 }
 0x175   : > { %4424 = vrot.lane.b32.xlu1 %v4324_v5, %s5861_s15  ;;  %v3807_v31 = vshll.u32 %v3657_v15, 16  ;;  %v4221_v15 = vld [vmem:[#allocation2 + $0x5c] sm:$0x1] }
 0x176   : > { %v2290_v33 = vpop.permute.xlu0 %2289 }
 0x177   : > { %v2292_v34 = vpop.permute.xlu1 %2291  ;;  %2356 = vst.msk [vmem:[#allocation3 + $0x78] sm:$0xf] %vm2325_vm0, %v2290_v33  ;;  %v3459_v33 = vld [vmem:[#allocation2 + $0x4c] sm:$0xf]  ;;  %v3809_v37 = vrot.slane %v3807_v31, 5 }
 0x178   : > { %2357 = vst.msk [vmem:[#allocation3 + $0x7c] sm:$0xf] %vm2325_vm0, %v2292_v34  ;;  %4426 = vrot.lane.b32.xlu0 %v4327_v20, %s5861_s15  ;;  %v3794_v20 = vor.u32 %v3793_v17, %v3790_v3  ;;  %v3460_v34 = vld [vmem:[#allocation2 + $0x54] sm:$0xf]  ;;  %v2771_v3 = vshll.u32 %v2572_v50, 16 }
 0x179   : > { %2999 = vrot.lane.b32.xlu1 %v2708_v24, %s5857_s19  ;;  %v3827_v24 = vrot.slane %v3825_v7, 4  ;;  %v3810_v54 = vsel %vm6018_vm10, %v3805_v14, %v3809_v37  ;;  %v4333_v7 = vrot.slane %v4218_v51, 5 }
 0x17a   : > { %v2423_v42 = vpop.permute.xlu0 %2422  ;;  %v3795_v38 = vrot.slane %v3794_v20, 4  ;;  %v2759_v20 = vrot.slane %v2757_v59, 4 }
 0x17b   : > { %v2425_v43 = vpop.permute.xlu1 %2424  ;;  %2519 = vst.msk [vmem:[#allocation3] sm:$0xf] %vm2518_vm2, %v2423_v42  ;;  %v3828_v29 = vor.u32 %v3827_v24, %v6763_v23  ;;  %v3819_v42 = vrot.slane %v3818_v32, 4  ;;  %v4339_v32 = vrot.slane %v4337_v9, 4 }
 0x17c   : > { %2520 = vst.msk [vmem:[#allocation3 + $0x4] sm:$0xf] %vm2518_vm2, %v2425_v43  ;;  %3001 = vrot.lane.b32.xlu0 %v2718_v27, %s5857_s19  ;;  %v4217_v43 = vld [vmem:[#allocation2 + $0x4c] sm:$0xf]  ;;  %v3800_v47 = vsel %vm6018_vm10, %v3795_v38, %v3799_v8 }
 0x17d   : > { %3003 = vrot.lane.b32.xlu1 %v2732_v30, %s5857_s19  ;;  %v2569_v30 = vld [vmem:[#allocation2 + $0x54] sm:$0xf]  ;;  %v3829_v44 = vrot.slane %v3828_v29, 4  ;;  %v3824_v55 = vsel %vm6018_vm10, %v3819_v42, %v6763_v23  ;;  %v2773_v23 = vrot.slane %v2771_v3, 5  ;;  %v2763_v29 = vshll.u32 %v2571_v26, 16 }
 0x17e   : > { %v2427_v52 = vpop.permute.xlu0 %2426  ;;  %v2747_v19 = vshll.u32 %v2569_v30, 16  ;;  %v3135_v3 = vld [vmem:[#allocation2 + $0x68] sm:$0x1] }
 0x17f   : > { %v2429_v53 = vpop.permute.xlu1 %2428  ;;  %2521 = vst.msk [vmem:[#allocation3 + $0x8] sm:$0xf] %vm2518_vm2, %v2427_v52  ;;  %v4330_v52 = vrot.slane %v4217_v43, 5 }
 0x180   : > { %2522 = vst.msk [vmem:[#allocation3 + $0xc] sm:$0xf] %vm2518_vm2, %v2429_v53  ;;  %3005 = vrot.lane.b32.xlu0 %v2742_v35, %s5857_s19  ;;  %v5462_v53 = vrot.slane %v4216_v45, 9  ;;  %v2749_v62 = vrot.slane %v2747_v19, 5 }
 0x181   : > { %3336 = vrot.lane.b32.xlu1 %v3239_v49, %s5858_s20  ;;  %v2744_v49 = vshrl.u32 %v2569_v30, 16  ;;  %v4332_v6 = vrot.slane %v4330_v52, 4  ;;  %v2574_v30 = vld [vmem:[#allocation2 + $0x68] sm:$0x1] }
 0x182   : > { %v2431_v4 = vpop.permute.xlu0 %2430  ;;  %v4331_v8 = vsel %vm6413_vm14, %v5462_v53, %v4330_v52  ;;  %v3134_v52 = vld [vmem:[#allocation2 + $0x64] sm:$0xf] }
 0x183   : > { %v2433_v5 = vpop.permute.xlu1 %2432  ;;  %2523 = vst.msk [vmem:[#allocation3 + $0x10] sm:$0xf] %vm2518_vm2, %v2431_v4  ;;  %v2746_v61 = vrot.slane %v2744_v49, 4  ;;  %v4334_v31 = vsel %vm6413_vm14, %v4332_v6, %v4333_v7 }
 0x184   : > { %2524 = vst.msk [vmem:[#allocation3 + $0x14] sm:$0xf] %vm2518_vm2, %v2433_v5  ;;  %3338 = vrot.lane.b32.xlu0 %v3242_v58, %s5858_s20  ;;  %v2753_v58 = vshll.u32 %v2570_v48, 16  ;;  %v3834_v5 = vsel %vm6018_vm10, %v3829_v44, %v3833_v36  ;;  %v2765_v48 = vrot.slane %v2763_v29, 5  ;;  %v3131_v44 = vld [vmem:[#allocation2 + $0x58] sm:$0xf] }
 0x185   : > { %3340 = vrot.lane.b32.xlu1 %v3246_v1, %s5858_s20  ;;  %v2768_v1 = vshrl.u32 %v2572_v50, 16  ;;  %v3130_v36 = vld [vmem:[#allocation2 + $0x54] sm:$0xe] }
 0x186   : > { %v2435_v21 = vpop.permute.xlu0 %2434  ;;  %v2755_v11 = vrot.slane %v2753_v58, 5  ;;  %v5448_v56 = vrot.slane %v3130_v36, 9 }
 0x187   : > { %v2437_v16 = vpop.permute.xlu1 %2436  ;;  %2525 = vst.msk [vmem:[#allocation3 + $0x18] sm:$0xf] %vm2518_vm2, %v2435_v21  ;;  %v2750_v21 = vor.u32 %v2749_v62, %v2746_v61  ;;  %v3132_v61 = vld [vmem:[#allocation2 + $0x5c] sm:$0x1]  ;;  %v3133_v62 = vld [vmem:[#allocation2 + $0x60] sm:$0xe] }
 0x188   : > { %2526 = vst.msk [vmem:[#allocation3 + $0x1c] sm:$0xf] %vm2518_vm2, %v2437_v16  ;;  %3342 = vrot.lane.b32.xlu0 %v3249_v12, %s5858_s20  ;;  %v2777_v12 = vshll.u32 %v2573_v63, 16  ;;  %v2770_v16 = vrot.slane %v2768_v1, 4  ;;  %v3255_v6 = vrot.slane %v3132_v61, 5 }
 0x189   : > { %3530 = vrot.lane.b32.xlu1 %v3458_v13, %s5859_s0  ;;  %v2781_v13 = vshrl.u32 %v2573_v63, 16  ;;  %v2751_v41 = vrot.slane %v2750_v21, 4  ;;  %v3259_v63 = vrot.slane %v3134_v52, 5 }
 0x18a   : > { %v2439_v40 = vpop.permute.xlu0 %2438  ;;  %v2779_v38 = vrot.slane %v2777_v12, 5  ;;  %v2774_v14 = vor.u32 %v2773_v23, %v2770_v16  ;;  %v3664_v12 = vld [vmem:[#allocation2 + $0x6c] sm:$0xf] }
 0x18b   : > { %v2441_v27 = vpop.permute.xlu1 %2440  ;;  %2527 = vst.msk [vmem:[#allocation3 + $0x20] sm:$0xf] %vm2518_vm2, %v2439_v40  ;;  %v2783_v40 = vrot.slane %v2781_v13, 4  ;;  %v2756_v49 = vsel %vm6018_vm10, %v2751_v41, %v2755_v11  ;;  %v3261_v13 = vrot.slane %v3259_v63, 4  ;;  %v3860_v26 = vshrl.u32 %v3664_v12, 16 }
 0x18c   : > { %2528 = vst.msk [vmem:[#allocation3 + $0x24] sm:$0xf] %vm2518_vm2, %v2441_v27  ;;  %3532 = vrot.lane.b32.xlu0 %v3459_v33, %s5859_s0  ;;  %v4340_v33 = vrot.slane %v4221_v15, 5  ;;  %v2760_v27 = vor.u32 %v2759_v20, %v2755_v11  ;;  %v2775_v19 = vrot.slane %v2774_v14, 4  ;;  %v3262_v15 = vrot.slane %v3135_v3, 5 }
 0x18d   : > { %3534 = vrot.lane.b32.xlu1 %v3460_v34, %s5859_s0  ;;  %v4338_v34 = vsel %vm6413_vm14, %v5463_v10, %v4337_v9  ;;  %v2784_v45 = vor.u32 %v2783_v40, %v2779_v38  ;;  %v3662_v9 = vld [vmem:[#allocation2 + $0x64] sm:$0xf]  ;;  %v3462_v40 = vld [vmem:[#allocation2 + $0x60] sm:$0xf] }
 0x18e   : > { %v2443_v28 = vpop.permute.xlu0 %2442  ;;  %v4341_v43 = vsel %vm6413_vm14, %v4339_v32, %v4340_v33  ;;  %v3845_v20 = vshll.u32 %v3662_v9, 16  ;;  %v3849_v21 = vshrl.u32 %v3662_v9, 16 }
 0x18f   : > { %v2445_v35 = vpop.permute.xlu1 %2444  ;;  %2529 = vst.msk [vmem:[#allocation3 + $0x28] sm:$0xf] %vm2518_vm2, %v2443_v28  ;;  %v2785_v50 = vrot.slane %v2784_v45, 4 }
 0x190   : > { %2530 = vst.msk [vmem:[#allocation3 + $0x2c] sm:$0xf] %vm2518_vm2, %v2445_v35  ;;  %3536 = vrot.lane.b32.xlu0 %v3461_v46, %s5859_s0  ;;  %v2787_v46 = vshll.u32 %v2574_v30, 16  ;;  %v3851_v29 = vrot.slane %v3849_v21, 4  ;;  %v3663_v30 = vld [vmem:[#allocation2 + $0x68] sm:$0x1] }
 0x191   : > { %4091 = vrot.lane.b32.xlu1 %v3800_v47, %s5860_s10  ;;  %v2761_v47 = vrot.slane %v2760_v27, 4  ;;  %v3847_v27 = vrot.slane %v3845_v20, 5 }
 0x192   : > { %v2447_v17 = vpop.permute.xlu0 %2446  ;;  %v2789_v51 = vrot.slane %v2787_v46, 5 }
 0x193   : > { %v2449_v4 = vpop.permute.xlu1 %2448  ;;  %2531 = vst.msk [vmem:[#allocation3 + $0x30] sm:$0xf] %vm2518_vm2, %v2447_v17  ;;  %v2766_v53 = vsel %vm6018_vm10, %v2761_v47, %v2765_v48  ;;  %v3836_v17 = vshrl.u32 %v3661_v57, 16  ;;  %v3463_v47 = vld [vmem:[#allocation2 + $0x64] sm:$0xf] }
 0x194   : > { %2532 = vst.msk [vmem:[#allocation3 + $0x34] sm:$0xf] %vm2518_vm2, %v2449_v4  ;;  %4093 = vrot.lane.b32.xlu0 %v3810_v54, %s5860_s10  ;;  %v2780_v54 = vsel %vm6018_vm10, %v2775_v19, %v2779_v38  ;;  %v2790_v1 = vsel %vm6018_vm10, %v2785_v50, %v2789_v51  ;;  %v3839_v4 = vshll.u32 %v3661_v57, 16  ;;  %v3263_v38 = vsel %vm6413_vm14, %v3261_v13, %v3262_v15  ;;  %v3464_v48 = vld [vmem:[#allocation2 + $0x6c] sm:$0xf] }
 0x195   : > { %4095 = vrot.lane.b32.xlu1 %v3824_v55, %s5860_s10  ;;  %v3252_v55 = vrot.slane %v3131_v44, 5  ;;  %v3838_v16 = vrot.slane %v3836_v17, 4  ;;  %v3855_v19 = vshll.u32 %v3663_v30, 16 }
 0x196   : > { %v2451_v24 = vpop.permute.xlu0 %2450  ;;  %v3841_v23 = vrot.slane %v3839_v4, 5  ;;  %v4224_v4 = vld [vmem:[#allocation2 + $0x68] sm:$0x1] }
 0x197   : > { %v2453_v25 = vpop.permute.xlu1 %2452  ;;  %2533 = vst.msk [vmem:[#allocation3 + $0x38] sm:$0xf] %vm2518_vm2, %v2451_v24  ;;  %v3253_v7 = vsel %vm6413_vm14, %v5448_v56, %v3252_v55  ;;  %v3465_v56 = vld [vmem:[#allocation2 + $0x70] sm:$0xf]  ;;  %v3857_v57 = vrot.slane %v3855_v19, 5  ;;  %v4347_v20 = vrot.slane %v4224_v4, 5 }
 0x198   : > { %2534 = vst.msk [vmem:[#allocation3 + $0x3c] sm:$0xf] %vm2518_vm2, %v2453_v25  ;;  %4097 = vrot.lane.b32.xlu0 %v3834_v5, %s5860_s10  ;;  %v3254_v5 = vrot.slane %v3252_v55, 4  ;;  %v3842_v41 = vor.u32 %v3841_v23, %v3838_v16  ;;  %v4223_v55 = vld [vmem:[#allocation2 + $0x64] sm:$0xf] }
 0x199   : > { %4428 = vrot.lane.b32.xlu1 %v4331_v8, %s5861_s15  ;;  %v5449_v8 = vrot.slane %v3133_v62, 9  ;;  %v4344_v3 = vrot.slane %v4223_v55, 5  ;;  %v2576_v16 = vld [vmem:[#allocation2 + $0x70] sm:$0xf] }
 0x19a   : > { %v2455_v37 = vpop.permute.xlu0 %2454  ;;  %v3256_v24 = vsel %vm6413_vm14, %v3254_v5, %v3255_v6  ;;  %v4226_v5 = vld [vmem:[#allocation2 + $0x70] sm:$0xf] }
 0x19b   : > { %v2984_v42 = vpop.permute.xlu1 %2983  ;;  %2535 = vst.msk [vmem:[#allocation3 + $0x40] sm:$0xf] %vm2518_vm2, %v2455_v37  ;;  %v3260_v25 = vsel %vm6413_vm14, %v5449_v8, %v3259_v63  ;;  %v4346_v15 = vrot.slane %v4344_v3, 4  ;;  %v4351_v21 = vrot.slane %v4226_v5, 5  ;;  %v6889_v5 = vld [vmem:[#allocation2 + $0x70] sm:$0xf] }
 0x19c   : > { %3080 = vst.msk [vmem:[#allocation3] sm:$0xf] %vm3079_vm7, %v2984_v42  ;;  %4430 = vrot.lane.b32.xlu0 %v4334_v31, %s5861_s15  ;;  %v3863_v31 = vshll.u32 %v3664_v12, 16  ;;  %v3862_v42 = vrot.slane %v3860_v26, 4 }
 0x19d   : > { %4432 = vrot.lane.b32.xlu1 %v4338_v34, %s5861_s15  ;;  %v3665_v34 = vld [vmem:[#allocation2 + $0x70] sm:$0xf]  ;;  %v4353_v30 = vrot.slane %v4351_v21, 4 }
 0x19e   : > { %v2986_v28 = vpop.permute.xlu0 %2985  ;;  %v3869_v14 = vshll.u32 %v3665_v34, 16  ;;  %v3873_v37 = vshrl.u32 %v3665_v34, 16 }
 0x19f   : > { %v2988_v35 = vpop.permute.xlu1 %2987  ;;  %3081 = vst.msk [vmem:[#allocation3 + $0x4] sm:$0xf] %vm3079_vm7, %v2986_v28  ;;  %v3843_v28 = vrot.slane %v3842_v41, 4  ;;  %v4348_v41 = vsel %vm6413_vm14, %v4346_v15, %v4347_v20 }
 0x1a0   : > { %3082 = vst.msk [vmem:[#allocation3 + $0x8] sm:$0xf] %vm3079_vm7, %v2988_v35  ;;  %4434 = vrot.lane.b32.xlu0 %v4341_v43, %s5861_s15  ;;  %v3865_v43 = vrot.slane %v3863_v31, 5  ;;  %v3666_v35 = vld [vmem:[#allocation2 + $0x74] sm:$0x1]  ;;  %v3871_v44 = vrot.slane %v3869_v14, 5 }
 0x1a1   : > { %3007 = vrot.lane.b32.xlu1 %v2756_v49, %s5857_s19  ;;  %v3852_v49 = vor.u32 %v3851_v29, %v3847_v27  ;;  %v3875_v36 = vrot.slane %v3873_v37, 4  ;;  %v2579_v29 = vld [vmem:[#allocation2 + $0x7c] sm:$0xf] }
 0x1a2   : > { %v2990_v58 = vpop.permute.xlu0 %2989  ;;  %v3866_v50 = vor.u32 %v3865_v43, %v3862_v42 }
 0x1a3   : > { %v3321_v59 = vpop.permute.xlu1 %3320  ;;  %3083 = vst.msk [vmem:[#allocation3 + $0xc] sm:$0xf] %vm3079_vm7, %v2990_v58  ;;  %v3848_v58 = vsel %vm6018_vm10, %v3843_v28, %v3847_v27  ;;  %v2578_v27 = vld [vmem:[#allocation2 + $0x78] sm:$0xf] }
 0x1a4   : > { %3417 = vst.msk [vmem:[#allocation3] sm:$0xf] %vm3416_vm8, %v3321_v59  ;;  %3009 = vrot.lane.b32.xlu0 %v2766_v53, %s5857_s19  ;;  %v3853_v53 = vrot.slane %v3852_v49, 4  ;;  %v3876_v59 = vor.u32 %v3875_v36, %v3871_v44  ;;  %v3867_v61 = vrot.slane %v3866_v50, 4  ;;  %v2375_v50 = vld [vmem:[#allocation2 + $0x70] sm:$0xf] }
 0x1a5   : > { %3011 = vrot.lane.b32.xlu1 %v2780_v54, %s5857_s19  ;;  %v3879_v54 = vshll.u32 %v3666_v35, 16 }
 0x1a6   : > { %v3323_v10 = vpop.permute.xlu0 %3322  ;;  %v3858_v6 = vsel %vm6018_vm10, %v3853_v53, %v3857_v57  ;;  %v3872_v8 = vsel %vm6018_vm10, %v3867_v61, %v3871_v44  ;;  %v2577_v44 = vld [vmem:[#allocation2 + $0x74] sm:$0x1]  ;;  %v5695_v57 = vld [vmem:[%s5963_s30 + $0x78] sm:$0xff]  }
 0x1a7   : > { %v3325_v11 = vpop.permute.xlu1 %3324  ;;  %3418 = vst.msk [vmem:[#allocation3 + $0x4] sm:$0xf] %vm3416_vm8, %v3323_v10  ;;  %v3881_v17 = vrot.slane %v3879_v54, 5  ;;  %v4225_v10 = vld [vmem:[#allocation2 + $0x6c] sm:$0xe] }
 0x1a8   : > { %3419 = vst.msk [vmem:[#allocation3 + $0x8] sm:$0xf] %vm3416_vm8, %v3325_v11  ;;  %3013 = vrot.lane.b32.xlu0 %v2790_v1, %s5857_s19  ;;  %v4222_v1 = vld [vmem:[#allocation2 + $0x60] sm:$0xe]  ;;  %v2575_v11 = vld [vmem:[#allocation2 + $0x6c] sm:$0xf] }
 0x1a9   : > { %3344 = vrot.lane.b32.xlu1 %v3253_v7, %s5858_s20  ;;  %v3877_v7 = vrot.slane %v3876_v59, 4  ;;  %v5464_v9 = vrot.slane %v4222_v1, 9  ;;  %v5465_v23 = vrot.slane %v4225_v10, 9  ;;  %v5679_v1 = vunpack.c.l.bf16 %v5695_v57  ;;  %v5827_v10 = vld [vmem:[%s7469_s3] ss:$0 sm:$0xff] }
 0x1aa   : > { %v3327_v32 = vpop.permute.xlu0 %3326 }
 0x1ab   : > { %v3515_v33 = vpop.permute.xlu1 %3514  ;;  %3420 = vst.msk [vmem:[#allocation3 + $0xc] sm:$0xf] %vm3416_vm8, %v3327_v32  ;;  %v3882_v26 = vsel %vm6018_vm10, %v3877_v7, %v3881_v17  ;;  %v4345_v31 = vsel %vm6413_vm14, %v5464_v9, %v4344_v3  ;;  %v4227_v32 = vld [vmem:[#allocation2 + $0x74] sm:$0x1]  ;;  %v4352_v37 = vsel %vm6413_vm14, %v5465_v23, %v4351_v21  ;;  %v5680_v3 = vunpack.c.h.bf16 %v5695_v57  ;;  %v2377_v7 = vld [vmem:[#allocation2 + $0x7c] sm:$0xf] }
 0x1ac   : > { %3611 = vst.msk [vmem:[#allocation3] sm:$0xf] %vm3610_vm9, %v3515_v33  ;;  %3346 = vrot.lane.b32.xlu0 %v3256_v24, %s5858_s20  ;;  %v2792_v24 = vshrl.u32 %v2575_v11, 16  ;;  %v4354_v14 = vrot.slane %v4227_v32, 5  ;;  %v3136_v32 = vld [vmem:[#allocation2 + $0x6c] sm:$0xe] }
 0x1ad   : > { %3348 = vrot.lane.b32.xlu1 %v3260_v25, %s5858_s20  ;;  %v2795_v25 = vshll.u32 %v2575_v11, 16  ;;  %v667_v11 = vmul.f32 %v5827_v10, %v5679_v1 }
 0x1ae   : > { %v3517_v45 = vpop.permute.xlu0 %3516  ;;  %v2794_v42 = vrot.slane %v2792_v24, 4  ;;  %v4355_v36 = vsel %vm6413_vm14, %v4353_v30, %v4354_v14  ;;  %v3266_v24 = vrot.slane %v6889_v5, 5 }
 0x1af   : > { %v3519_v46 = vpop.permute.xlu1 %3518  ;;  %3612 = vst.msk [vmem:[#allocation3 + $0x4] sm:$0xf] %vm3610_vm9, %v3517_v45  ;;  %v2797_v43 = vrot.slane %v2795_v25, 5  ;;  %v2816_v45 = vshrl.u32 %v2578_v27, 16  ;;  %v5828_v25 = vld [vmem:[%s7470_s4] ss:$0 sm:$0xff] }
 0x1b0   : > { %3613 = vst.msk [vmem:[#allocation3 + $0x8] sm:$0xf] %vm3610_vm9, %v3519_v46  ;;  %3350 = vrot.lane.b32.xlu0 %v3263_v38, %s5858_s20  ;;  %v2801_v38 = vshll.u32 %v2576_v16, 16  ;;  %v2819_v46 = vshll.u32 %v2578_v27, 16 }
 0x1b1   : > { %3538 = vrot.lane.b32.xlu1 %v3462_v40, %s5859_s0  ;;  %v2805_v40 = vshrl.u32 %v2576_v16, 16  ;;  %v2818_v53 = vrot.slane %v2816_v45, 4  ;;  %v668_v16 = vmul.f32 %v5827_v10, %v5680_v3  ;;  %v5450_v45 = vrot.slane %v3136_v32, 9  ;;  %v3670_v3 = vld [vmem:[#allocation2 + $0x84] sm:$0xf] }
 0x1b2   : > { %v3521_v51 = vpop.permute.xlu0 %3520  ;;  %v6873_v28 = vrot.slane %v2801_v38, 5  ;;  %v2821_v54 = vrot.slane %v2819_v46, 5  ;;  %v3268_v46 = vrot.slane %v3266_v24, 4 }
 0x1b3   : > { %v4076_v52 = vpop.permute.xlu1 %4075  ;;  %3614 = vst.msk [vmem:[#allocation3 + $0xc] sm:$0xf] %vm3610_vm9, %v3521_v51  ;;  %v2807_v35 = vrot.slane %v2805_v40, 4  ;;  %v2798_v51 = vor.u32 %v2797_v43, %v2794_v42  ;;  %v706_v38 = vadd.f32 %v5828_v25, %v668_v16  ;;  %v3908_v16 = vshrl.u32 %v3670_v3, 16 }
 0x1b4   : > { %4172 = vst.msk [vmem:[#allocation3] sm:$0xf] %vm4171_vm12, %v4076_v52  ;;  %3540 = vrot.lane.b32.xlu0 %v3463_v47, %s5859_s0  ;;  %v2825_v47 = vshll.u32 %v2579_v29, 16  ;;  %v2580_v52 = vld [vmem:[#allocation2 + $0x80] sm:$0x1] }
 0x1b5   : > { %3542 = vrot.lane.b32.xlu1 %v3464_v48, %s5859_s0  ;;  %v2829_v48 = vshrl.u32 %v2579_v29, 16  ;;  %v2835_v17 = vshll.u32 %v2580_v52, 16  ;;  %v2799_v4 = vrot.slane %v2798_v51, 4  ;;  %v6908_v29 = vld [vmem:[#allocation2 + $0x7c] sm:$0xf]  ;;  %v738_v43 = vmax.f32 %v706_v38, 0.0 }
 0x1b6   : > { %v4078_v62 = vpop.permute.xlu0 %4077  ;;  %v6881_v55 = vrot.slane %v2825_v47, 5  ;;  %v3667_v51 = vld [vmem:[#allocation2 + $0x78] sm:$0xf] }
 0x1b7   : > { %v4080_v63 = vpop.permute.xlu1 %4079  ;;  %4173 = vst.msk [vmem:[#allocation3 + $0x4] sm:$0xf] %vm4171_vm12, %v4078_v62  ;;  %v2808_v62 = vor.u32 %v2807_v35, %v6873_v28  ;;  %v2837_v23 = vrot.slane %v2835_v17, 5 }
 0x1b8   : > { %4174 = vst.msk [vmem:[#allocation3 + $0x8] sm:$0xf] %vm4171_vm12, %v4080_v63  ;;  %3544 = vrot.lane.b32.xlu0 %v3465_v56, %s5859_s0  ;;  %v2831_v56 = vrot.slane %v2829_v48, 4  ;;  %v2811_v63 = vshll.u32 %v2577_v44, 16 }
 0x1b9   : > { %4099 = vrot.lane.b32.xlu1 %v3848_v58, %s5860_s10  ;;  %v2809_v20 = vrot.slane %v2808_v62, 4 }
 0x1ba   : > { %v4082_v12 = vpop.permute.xlu0 %4081  ;;  %v2832_v9 = vor.u32 %v2831_v56, %v6881_v55  ;;  %v2813_v21 = vrot.slane %v2811_v63, 5 }
 0x1bb   : > { %v4413_v13 = vpop.permute.xlu1 %4412  ;;  %4175 = vst.msk [vmem:[#allocation3 + $0xc] sm:$0xf] %vm4171_vm12, %v4082_v12 }
 0x1bc   : > { %4509 = vst.msk [vmem:[#allocation3] sm:$0xf] %vm4508_vm13, %v4413_v13  ;;  %4101 = vrot.lane.b32.xlu0 %v3858_v6, %s5860_s10  ;;  %v2376_v6 = vld [vmem:[#allocation2 + $0x78] sm:$0xf]  ;;  %v2833_v27 = vrot.slane %v2832_v9, 4  ;;  %v2814_v42 = vsel %vm6018_vm10, %v2809_v20, %v2813_v21 }
 0x1bd   : > { %4103 = vrot.lane.b32.xlu1 %v3872_v8, %s5860_s10  ;;  %v2822_v8 = vor.u32 %v2821_v54, %v2818_v53  ;;  %v3668_v54 = vld [vmem:[#allocation2 + $0x7c] sm:$0xf]  ;;  %v3671_v21 = vld [vmem:[#allocation2 + $0x88] sm:$0xf] }
 0x1be   : > { %v4415_v33 = vpop.permute.xlu0 %4414  ;;  %v2838_v44 = vsel %vm6018_vm10, %v2833_v27, %v2837_v23  ;;  %v3911_v23 = vshll.u32 %v3670_v3, 16  ;;  %v3917_v39 = vshll.u32 %v3671_v21, 16  ;;  %v4228_v3 = vld [vmem:[#allocation2 + $0x78] sm:$0xe] }
 0x1bf   : > { %v4417_v34 = vpop.permute.xlu1 %4416  ;;  %4510 = vst.msk [vmem:[#allocation3 + $0x4] sm:$0xf] %vm4508_vm13, %v4415_v33  ;;  %v3138_v33 = vld [vmem:[#allocation2 + $0x74] sm:$0x1]  ;;  %v2823_v40 = vrot.slane %v2822_v8, 4  ;;  %v3893_v8 = vshll.u32 %v3668_v54, 16 }
 0x1c0   : > { %4511 = vst.msk [vmem:[#allocation3 + $0x8] sm:$0xf] %vm4508_vm13, %v4417_v34  ;;  %4105 = vrot.lane.b32.xlu0 %v3882_v26, %s5860_s10  ;;  %v705_v26 = vadd.f32 %v5828_v25, %v667_v11  ;;  %v505_v34 = vld [vmem:[#allocation2 + $0xc0] sm:$0x1]  ;;  %v3269_v47 = vrot.slane %v3138_v33, 5 }
 0x1c1   : > { %4436 = vrot.lane.b32.xlu1 %v4345_v31, %s5861_s15  ;;  %v2804_v31 = vsel %vm6018_vm10, %v2799_v4, %v6873_v28  ;;  %v561_v28 = vld [vmem:[#allocation2 + $0xc8] sm:$0x1]  ;;  %v2828_v35 = vsel %vm6018_vm10, %v2823_v40, %v6881_v55  ;;  %v3267_v55 = vsel %vm6413_vm14, %v5450_v45, %v3266_v24  ;;  %v3895_v27 = vrot.slane %v3893_v8, 5  ;;  %v3466_v45 = vld [vmem:[#allocation2 + $0x78] sm:$0xf] }
 0x1c2   : > { %v4419_v49 = vpop.permute.xlu0 %4418  ;;  %v737_v30 = vmax.f32 %v705_v26, 0.0  ;;  %v562_v62 = vsel %vm5928_vm5, 0, %v561_v28 }
 0x1c3   : > { %v2992_v19 = vpop.permute.xlu1 %2991  ;;  %4512 = vst.msk [vmem:[#allocation3 + $0xc] sm:$0xf] %vm4508_vm13, %v4419_v49  ;;  %v3273_v49 = vrot.slane %v6908_v29, 5  ;;  %563 = vst [vmem:[#allocation2 + $0xc8] sm:$0x1] %v562_v62 }
 0x1c4   : > { %3084 = vst.msk [vmem:[#allocation3 + $0x10] sm:$0xf] %vm3079_vm7, %v2992_v19  ;;  %4438 = vrot.lane.b32.xlu0 %v4348_v41, %s5861_s15  ;;  %v506_v41 = vsel %vm5923_vm4, 0, %v505_v34  ;;  %v5579_v48 = vpack.c.bf16 %v737_v30, %v737_v30  ;;  %v5580_v19 = vpack.c.bf16 %v738_v43, %v738_v43  ;;  %v3669_v30 = vld [vmem:[#allocation2 + $0x80] sm:$0x1] }
 0x1c5   : > { %4440 = vrot.lane.b32.xlu1 %v4352_v37, %s5861_s15  ;;  %507 = vst [vmem:[#allocation2 + $0xc0] sm:$0x1] %v506_v41  ;;  %v3275_v1 = vrot.slane %v3273_v49, 4  ;;  %v3921_v41 = vshrl.u32 %v3671_v21, 16  ;;  %v3903_v28 = vshll.u32 %v3669_v30, 16 }
 0x1c6   : > { %v2994_v58 = vpop.permute.xlu0 %2993  ;;  %v5809_v59 = vld [vmem:[#allocation3] sm:$0xff]   ;;  %v1093_v56 = vshrl.u32 %v5579_v48, 16  ;;  %v1096_v57 = vshll.u32 %v5579_v48, 16 }
 0x1c7   : > { %v2996_v61 = vpop.permute.xlu1 %2995  ;;  %3085 = vst.msk [vmem:[#allocation3 + $0x14] sm:$0xf] %vm3079_vm7, %v2994_v58  ;;  %5727 = vmatprep.mubr.msk.bf16.mxu0 %vm4689_vm15, %v5809_v59  ;;  %v1101_v58 = vshrl.u32 %v5580_v19, 16  ;;  %v1104_v59 = vshll.u32 %v5580_v19, 16 }
 0x1c8   : > { %3086 = vst.msk [vmem:[#allocation3 + $0x18] sm:$0xf] %vm3079_vm7, %v2996_v61  ;;  %4442 = vrot.lane.b32.xlu0 %v4355_v36, %s5861_s15  ;;  %v3139_v36 = vld [vmem:[#allocation2 + $0x78] sm:$0xe]  ;;  %v3270_v61 = vsel %vm6413_vm14, %v3268_v46, %v3269_v47  ;;  %v1095_v17 = vrot.slane %v1093_v56, 7 }
 0x1c9   : > { %2456 = vrot.lane.b32.xlu1 %v2375_v50, %s5856_s18  ;;  %v3141_v50 = vld [vmem:[#allocation2 + $0x80] sm:$0x1]  ;;  %v5451_v63 = vrot.slane %v3139_v36, 9  ;;  %v1103_v4 = vrot.slane %v1101_v58, 7  ;;  %v3672_v36 = vld [vmem:[#allocation2 + $0x8c] sm:$0x1] }
 0x1ca   : > { %v2998_v12 = vpop.permute.xlu0 %2997  ;;  %v5810_v13 = vld [vmem:[#allocation3 + $0x8] sm:$0xff]   ;;  %v3276_v5 = vrot.slane %v3141_v50, 5 }
 0x1cb   : > { %v3329_v15 = vpop.permute.xlu1 %3328  ;;  %3087 = vst.msk [vmem:[#allocation3 + $0x1c] sm:$0xf] %vm3079_vm7, %v2998_v12  ;;  %5728 = vmatmul.mubr.msk.bf16.vlgmr.msra.gmra.mxu0 %vm4689_vm15, %v5810_v13  ;;  %v3897_v12 = vshrl.u32 %v3668_v54, 16  ;;  %v1098_v13 = vor.u32 %v1096_v57, %v1095_v17  ;;  %v1106_v20 = vor.u32 %v1104_v59, %v1103_v4  ;;  %v1108_v26 = vrot.slane %v1103_v4, 4  ;;  %v3469_v57 = vld [vmem:[#allocation2 + $0x88] sm:$0xf] }
 0x1cc   : > { %3421 = vst.msk [vmem:[#allocation3 + $0x10] sm:$0xf] %vm3416_vm8, %v3329_v15  ;;  %2458 = vrot.lane.b32.xlu0 %v2376_v6, %s5856_s18  ;;  %v3884_v6 = vshrl.u32 %v3667_v51, 16  ;;  %v1266_v9 = vld [vmem:[#allocation2 + $0xc0] sm:$0xf]  ;;  %v1099_v15 = vrot.slane %v1095_v17, 4  ;;  %v3277_v32 = vsel %vm6413_vm14, %v3275_v1, %v3276_v5 }
 0x1cd   : > { %2460 = vrot.lane.b32.xlu1 %v2377_v7, %s5856_s18  ;;  %v3887_v7 = vshll.u32 %v3667_v51, 16  ;;  %v1267_v24 = vsel %vm5954_vm6, %v1098_v13, %v1266_v9  ;;  %v3899_v29 = vrot.slane %v3897_v12, 4  ;;  %v3468_v51 = vld [vmem:[#allocation2 + $0x84] sm:$0xf]  ;;  %v3905_v59 = vrot.slane %v3903_v28, 5 }
 0x1ce   : > { %v3331_v14 = vpop.permute.xlu0 %3330  ;;  %v1107_v25 = vsel %vm6026_vm11, %v1099_v15, %v1106_v20  ;;  %v3886_v33 = vrot.slane %v3884_v6, 4  ;;  %1268 = vst [vmem:[#allocation2 + $0xc0] sm:$0xf] %v1267_v24  ;;  %v4232_v17 = vld [vmem:[#allocation2 + $0x88] sm:$0xf]  ;;  %v5466_v12 = vrot.slane %v4228_v3, 9 }
 0x1cf   : > { %v3333_v37 = vpop.permute.xlu1 %3332  ;;  %3422 = vst.msk [vmem:[#allocation3 + $0x14] sm:$0xf] %vm3416_vm8, %v3331_v14  ;;  %v3889_v34 = vrot.slane %v3887_v7, 5  ;;  %v1270_v14 = vld [vmem:[#allocation2 + $0xc8] sm:$0x1]  ;;  %v3900_v19 = vor.u32 %v3899_v29, %v3895_v27  ;;  %v4365_v20 = vrot.slane %v4232_v17, 5 }
 0x1d0   : > { %3423 = vst.msk [vmem:[#allocation3 + $0x18] sm:$0xf] %vm3416_vm8, %v3333_v37  ;;  %3015 = vrot.lane.b32.xlu0 %v2804_v31, %s5857_s19  ;;  %v3274_v31 = vsel %vm6413_vm14, %v5451_v63, %v3273_v49  ;;  %v3910_v37 = vrot.slane %v3908_v16, 4  ;;  %v1271_v43 = vsel %vm5923_vm4, %v1108_v26, %v1270_v14  ;;  %v3467_v49 = vld [vmem:[#allocation2 + $0x7c] sm:$0xf] }
 0x1d1   : > { %3017 = vrot.lane.b32.xlu1 %v2814_v42, %s5857_s19  ;;  %1269 = vst.msk [vmem:[#allocation2 + $0xc4] sm:$0xf] %vm1158_vm3, %v1107_v25  ;;  %v3913_v42 = vrot.slane %v3911_v23, 5  ;;  %v3890_v46 = vor.u32 %v3889_v34, %v3886_v33  ;;  %1272 = vst [vmem:[#allocation2 + $0xc8] sm:$0x1] %v1271_v43  ;;  %v3901_v58 = vrot.slane %v3900_v19, 4 }
 0x1d2   : > { %v3335_v52 = vpop.permute.xlu0 %3334  ;;  %v508_v4 = vld [vmem:[#allocation2 + $0xcc] sm:$0x1]  ;;  %v4231_v15 = vld [vmem:[#allocation2 + $0x84] sm:$0xe]  ;;  %v564_v24 = vld [vmem:[#allocation2 + $0xd4] sm:$0x1] }
 0x1d3   : > { %v3523_v53 = vpop.permute.xlu1 %3522  ;;  %3424 = vst.msk [vmem:[#allocation3 + $0x1c] sm:$0xf] %vm3416_vm8, %v3335_v52  ;;  %v3914_v50 = vor.u32 %v3913_v42, %v3910_v37  ;;  %v3891_v52 = vrot.slane %v3890_v46, 4  ;;  %v3906_v7 = vsel %vm6018_vm10, %v3901_v58, %v3905_v59  ;;  %v4233_v16 = vld [vmem:[#allocation2 + $0x8c] sm:$0x1]  ;;  %v565_v34 = vsel %vm5928_vm5, 0, %v564_v24 }
 0x1d4   : > { %3615 = vst.msk [vmem:[#allocation3 + $0x10] sm:$0xf] %vm3610_vm9, %v3523_v53  ;;  %3019 = vrot.lane.b32.xlu0 %v2828_v35, %s5857_s19  ;;  %v3919_v35 = vrot.slane %v3917_v39, 5  ;;  %v4229_v53 = vld [vmem:[#allocation2 + $0x7c] sm:$0xf]  ;;  %v4367_v29 = vrot.slane %v4365_v20, 4 }
 0x1d5   : > { %3021 = vrot.lane.b32.xlu1 %v2838_v44, %s5857_s19  ;;  %v3923_v44 = vrot.slane %v3921_v41, 4  ;;  %v3915_v62 = vrot.slane %v3914_v50, 4  ;;  %v4358_v63 = vrot.slane %v4229_v53, 5  ;;  %v3896_v1 = vsel %vm6018_vm10, %v3891_v52, %v3895_v27  ;;  %v2581_v23 = vld [vmem:[#allocation2 + $0x84] sm:$0xf] }
 0x1d6   : > { %v3525_v10 = vpop.permute.xlu0 %3524  ;;  %v2582_v33 = vld [vmem:[#allocation2 + $0x88] sm:$0xf]  ;;  %566 = vst [vmem:[#allocation2 + $0xd4] sm:$0x1] %v565_v34  ;;  %v2840_v27 = vshrl.u32 %v2581_v23, 16  ;;  %v4368_v39 = vrot.slane %v4233_v16, 5 }
 0x1d7   : > { %v3527_v11 = vpop.permute.xlu1 %3526  ;;  %3616 = vst.msk [vmem:[#allocation3 + $0x14] sm:$0xf] %vm3610_vm9, %v3525_v10  ;;  %v509_v10 = vsel %vm5923_vm4, 0, %v508_v4  ;;  %v4360_v13 = vrot.slane %v4358_v63, 4  ;;  %v3920_v21 = vsel %vm6018_vm10, %v3915_v62, %v3919_v35  ;;  %v2843_v41 = vshll.u32 %v2581_v23, 16 }
 0x1d8   : > { %3617 = vst.msk [vmem:[#allocation3 + $0x18] sm:$0xf] %vm3610_vm9, %v3527_v11  ;;  %3352 = vrot.lane.b32.xlu0 %v3267_v55, %s5858_s20  ;;  %v3924_v55 = vor.u32 %v3923_v44, %v3919_v35  ;;  %v4230_v11 = vld [vmem:[#allocation2 + $0x80] sm:$0x1]  ;;  %510 = vst [vmem:[#allocation2 + $0xcc] sm:$0x1] %v509_v10  ;;  %v4369_v53 = vsel %vm6413_vm14, %v4367_v29, %v4368_v39 }
 0x1d9   : > { %3354 = vrot.lane.b32.xlu1 %v3270_v61, %s5858_s20  ;;  %v3927_v61 = vshll.u32 %v3672_v36, 16  ;;  %v2849_v30 = vshll.u32 %v2582_v33, 16  ;;  %v2585_v46 = vld [vmem:[#allocation2 + $0x94] sm:$0xf]  ;;  %v2845_v28 = vrot.slane %v2843_v41, 5  ;;  %v2864_v44 = vshrl.u32 %v2584_v2, 16 }
 0x1da   : > { %v3529_v38 = vpop.permute.xlu0 %3528  ;;  %v3925_v8 = vrot.slane %v3924_v55, 4  ;;  %v2867_v36 = vshll.u32 %v2584_v2, 16  ;;  %v2378_v55 = vld [vmem:[#allocation2 + $0x84] sm:$0xf]  ;;  %v2379_v17 = vld [vmem:[#allocation2 + $0x88] sm:$0xf] }
 0x1db   : > { %v4084_v40 = vpop.permute.xlu1 %4083  ;;  %3618 = vst.msk [vmem:[#allocation3 + $0x1c] sm:$0xf] %vm3610_vm9, %v3529_v38  ;;  %v3929_v9 = vrot.slane %v3927_v61, 5  ;;  %v4359_v38 = vsel %vm6413_vm14, %v5466_v12, %v4358_v63  ;;  %v6994_v35 = vrot.slane %v2849_v30, 5  ;;  %v2866_v62 = vrot.slane %v2864_v44, 4 }
 0x1dc   : > { %4176 = vst.msk [vmem:[#allocation3 + $0x10] sm:$0xf] %vm4171_vm12, %v4084_v40  ;;  %3356 = vrot.lane.b32.xlu0 %v3274_v31, %s5858_s20  ;;  %v5467_v40 = vrot.slane %v4231_v15, 9  ;;  %v2869_v63 = vrot.slane %v2867_v36, 5  ;;  %v2883_v16 = vshll.u32 %v2586_v0, 16  ;;  %vm5076_vm5 = vcmask 58368  }
 0x1dd   : > { %3358 = vrot.lane.b32.xlu1 %v3277_v32, %s5858_s20  ;;  %v3930_v31 = vsel %vm6018_vm10, %v3925_v8, %v3929_v9  ;;  %v4361_v32 = vrot.slane %v4230_v11, 5  ;;  %v1387_v58 = vld [vmem:[#allocation2 + $0xd4] sm:$0x1]  ;;  %v2380_v8 = vld [vmem:[#allocation2 + $0x90] sm:$0xf] }
 0x1de   : > { %v4086_v47 = vpop.permute.xlu0 %4085  ;;  %v1388_v59 = vsel %vm5923_vm4, 0, %v1387_v58  ;;  %v2870_v10 = vor.u32 %v2869_v63, %v2866_v62  ;;  %v3143_v23 = vld [vmem:[#allocation2 + $0x88] sm:$0xf]  ;;  %v3144_v29 = vld [vmem:[#allocation2 + $0x8c] sm:$0x1]  ;;  %vm4903_vm4 = vcmask 64512  }
 0x1df   : > { %v4088_v48 = vpop.permute.xlu1 %4087  ;;  %4177 = vst.msk [vmem:[#allocation3 + $0x14] sm:$0xf] %vm4171_vm12, %v4086_v47  ;;  %v4362_v43 = vsel %vm6413_vm14, %v4360_v13, %v4361_v32  ;;  %v1383_v47 = vld [vmem:[#allocation2 + $0xcc] sm:$0xf]  ;;  %1389 = vst [vmem:[#allocation2 + $0xd4] sm:$0x1] %v1388_v59 }
 0x1e0   : > { %4178 = vst.msk [vmem:[#allocation3 + $0x18] sm:$0xf] %vm4171_vm12, %v4088_v48  ;;  %3546 = vrot.lane.b32.xlu0 %v3466_v45, %s5859_s0  ;;  %v2853_v45 = vshrl.u32 %v2582_v33, 16  ;;  %v4366_v48 = vsel %vm6413_vm14, %v5467_v40, %v4365_v20  ;;  %v1384_v19 = vsel %vm5954_vm6, 0, %v1383_v47  ;;  %v2381_v13 = vld [vmem:[#allocation2 + $0x94] sm:$0xf] }
 0x1e1   : > { %3548 = vrot.lane.b32.xlu1 %v3467_v49, %s5859_s0  ;;  %v2842_v49 = vrot.slane %v2840_v27, 4  ;;  %1385 = vst [vmem:[#allocation2 + $0xcc] sm:$0xf] %v1384_v19  ;;  %v3142_v40 = vld [vmem:[#allocation2 + $0x84] sm:$0xe]  ;;  %v3280_v27 = vrot.slane %v3143_v23, 5 }
 0x1e2   : > { %v4090_v54 = vpop.permute.xlu0 %4089  ;;  %v5452_v30 = vrot.slane %v3142_v40, 9  ;;  %v3145_v2 = vld [vmem:[#allocation2 + $0x90] sm:$0xe] }
 0x1e3   : > { %v4421_v56 = vpop.permute.xlu1 %4420  ;;  %4179 = vst.msk [vmem:[#allocation3 + $0x1c] sm:$0xf] %vm4171_vm12, %v4090_v54  ;;  %v2855_v54 = vrot.slane %v2853_v45, 4  ;;  %v2846_v61 = vor.u32 %v2845_v28, %v2842_v49  ;;  %v3282_v45 = vrot.slane %v3280_v27, 4  ;;  %v3673_v47 = vld [vmem:[#allocation2 + $0x90] sm:$0xf] }
 0x1e4   : > { %4513 = vst.msk [vmem:[#allocation3 + $0x10] sm:$0xf] %vm4508_vm13, %v4421_v56  ;;  %3550 = vrot.lane.b32.xlu0 %v3468_v51, %s5859_s0  ;;  %v2873_v56 = vshll.u32 %v2585_v46, 16  ;;  %v5453_v49 = vrot.slane %v3145_v2, 9  ;;  %v3932_v44 = vshrl.u32 %v3673_v47, 16  ;;  %v3935_v36 = vshll.u32 %v3673_v47, 16 }
 0x1e5   : > { %3552 = vrot.lane.b32.xlu1 %v3469_v57, %s5859_s0  ;;  %v2877_v57 = vshrl.u32 %v2585_v46, 16  ;;  %v2856_v4 = vor.u32 %v2855_v54, %v6994_v35  ;;  %v2847_v9 = vrot.slane %v2846_v61, 4  ;;  %v3283_v46 = vrot.slane %v3144_v29, 5  ;;  %v4236_v47 = vld [vmem:[#allocation2 + $0x98] sm:$0x1] }
 0x1e6   : > { %v4423_v5 = vpop.permute.xlu0 %4422  ;;  %v3934_v59 = vrot.slane %v3932_v44, 4  ;;  %v4239_v44 = vld [vmem:[#allocation2 + $0xa4] sm:$0x1] }
 0x1e7   : > { %v4425_v6 = vpop.permute.xlu1 %4424  ;;  %4514 = vst.msk [vmem:[#allocation3 + $0x14] sm:$0xf] %vm4508_vm13, %v4423_v5  ;;  %v2859_v5 = vshll.u32 %v2583_v18, 16  ;;  %v2857_v15 = vrot.slane %v2856_v4, 4  ;;  %v2852_v24 = vsel %vm6018_vm10, %v2847_v9, %v6994_v35  ;;  %v3281_v35 = vsel %vm6413_vm14, %v5452_v30, %v3280_v27  ;;  %v4235_v27 = vld [vmem:[#allocation2 + $0x94] sm:$0xf] }
 0x1e8   : > { %4515 = vst.msk [vmem:[#allocation3 + $0x18] sm:$0xf] %vm4508_vm13, %v4425_v6  ;;  %4107 = vrot.lane.b32.xlu0 %v3896_v1, %s5860_s10  ;;  %v2875_v6 = vrot.slane %v2873_v56, 5  ;;  %v3676_v56 = vld [vmem:[#allocation2 + $0x9c] sm:$0xf]  ;;  %v4372_v2 = vrot.slane %v4235_v27, 5 }
 0x1e9   : > { %4109 = vrot.lane.b32.xlu1 %v3906_v7, %s5860_s10  ;;  %v2879_v7 = vrot.slane %v2877_v57, 4  ;;  %v2861_v20 = vrot.slane %v2859_v5, 5  ;;  %v3677_v57 = vld [vmem:[#allocation2 + $0xa0] sm:$0xf]  ;;  %v3956_v61 = vshrl.u32 %v3676_v56, 16  ;;  %v3959_v62 = vshll.u32 %v3676_v56, 16 }
 0x1ea   : > { %v4427_v25 = vpop.permute.xlu0 %4426  ;;  %v3965_v4 = vshll.u32 %v3677_v57, 16  ;;  %v3969_v5 = vshrl.u32 %v3677_v57, 16  ;;  %v4234_v30 = vld [vmem:[#allocation2 + $0x90] sm:$0xe]  ;;  %v2588_v56 = vld [vmem:[#allocation2 + $0xa0] sm:$0xf] }
 0x1eb   : > { %v3000_v26 = vpop.permute.xlu1 %2999  ;;  %4516 = vst.msk [vmem:[#allocation3 + $0x1c] sm:$0xf] %vm4508_vm13, %v4427_v25  ;;  %v2871_v25 = vrot.slane %v2870_v10, 4  ;;  %v2862_v33 = vsel %vm6018_vm10, %v2857_v15, %v2861_v20  ;;  %v3961_v9 = vrot.slane %v3959_v62, 5  ;;  %v3678_v10 = vld [vmem:[#allocation2 + $0xa4] sm:$0x1] }
 0x1ec   : > { %3088 = vst.msk [vmem:[#allocation3 + $0x20] sm:$0xf] %vm3079_vm7, %v3000_v26  ;;  %4111 = vrot.lane.b32.xlu0 %v3920_v21, %s5860_s10  ;;  %v2880_v21 = vor.u32 %v2879_v7, %v2875_v6  ;;  %v3146_v26 = vld [vmem:[#allocation2 + $0x94] sm:$0xf]  ;;  %v3470_v7 = vld [vmem:[#allocation2 + $0x90] sm:$0xf] }
 0x1ed   : > { %4113 = vrot.lane.b32.xlu1 %v3930_v31, %s5860_s10  ;;  %v3287_v39 = vrot.slane %v3146_v26, 5  ;;  %v2876_v41 = vsel %vm6018_vm10, %v2871_v25, %v2875_v6  ;;  %v3675_v6 = vld [vmem:[#allocation2 + $0x98] sm:$0x1]  ;;  %v3975_v23 = vshll.u32 %v3678_v10, 16  ;;  %v3473_v25 = vld [vmem:[#allocation2 + $0xa0] sm:$0xf] }
 0x1ee   : > { %v3002_v14 = vpop.permute.xlu0 %3001  ;;  %v5811_v37 = vld [vmem:[#allocation3 + $0x10] sm:$0xff]   ;;  %v2881_v34 = vrot.slane %v2880_v21, 4  ;;  %v3951_v20 = vshll.u32 %v3675_v6, 16  ;;  %v3967_v21 = vrot.slane %v3965_v4, 5  ;;  %v2592_v27 = vld [vmem:[#allocation2 + $0xb0] sm:$0x1] }
 0x1ef   : > { %v3004_v42 = vpop.permute.xlu1 %3003  ;;  %3089 = vst.msk [vmem:[#allocation3 + $0x24] sm:$0xf] %vm3079_vm7, %v3002_v14  ;;  %5731 = vmatprep.mubr.msk.bf16.mxu0 %vm4689_vm15, %v5811_v37  ;;  %v3147_v14 = vld [vmem:[#allocation2 + $0x98] sm:$0x1]  ;;  %v3289_v19 = vrot.slane %v3287_v39, 4  ;;  %v3288_v18 = vsel %vm6413_vm14, %v5453_v49, %v3287_v39  ;;  %v3977_v29 = vrot.slane %v3975_v23, 5 }
 0x1f0   : > { %3090 = vst.msk [vmem:[#allocation3 + $0x28] sm:$0xf] %vm3079_vm7, %v3004_v42  ;;  %4444 = vrot.lane.b32.xlu0 %v4359_v38, %s5861_s15  ;;  %v2885_v38 = vrot.slane %v2883_v16, 5  ;;  %v3290_v28 = vrot.slane %v3147_v14, 5  ;;  %v3971_v16 = vrot.slane %v3969_v5, 4 }
 0x1f1   : > { %4446 = vrot.lane.b32.xlu1 %v4362_v43, %s5861_s15  ;;  %v4238_v14 = vld [vmem:[#allocation2 + $0xa0] sm:$0xf]  ;;  %v2590_v4 = vld [vmem:[#allocation2 + $0xa8] sm:$0xf]  ;;  %v2591_v5 = vld [vmem:[#allocation2 + $0xac] sm:$0xf] }
 0x1f2   : > { %v3006_v50 = vpop.permute.xlu0 %3005  ;;  %v5812_v51 = vld [vmem:[#allocation3 + $0x18] sm:$0xff]   ;;  %v2886_v43 = vsel %vm6018_vm10, %v2881_v34, %v2885_v38  ;;  %v3291_v58 = vsel %vm6413_vm14, %v3289_v19, %v3290_v28  ;;  %v3953_v38 = vrot.slane %v3951_v20, 5  ;;  %v3972_v40 = vor.u32 %v3971_v16, %v3967_v21  ;;  %v2589_v16 = vld [vmem:[#allocation2 + $0xa4] sm:$0x1]  ;;  %v2382_v23 = vld [vmem:[#allocation2 + $0x9c] sm:$0xf] }
 0x1f3   : > { %v3337_v52 = vpop.permute.xlu1 %3336  ;;  %3091 = vst.msk [vmem:[#allocation3 + $0x2c] sm:$0xf] %vm3079_vm7, %v3006_v50  ;;  %5732 = vmatmul.mubr.msk.bf16.gmra.mxu0 %vm4689_vm15, %v5812_v51  ;;  %v5468_v19 = vrot.slane %v4234_v30, 9  ;;  %v4374_v28 = vrot.slane %v4372_v2, 4  ;;  %v2915_v10 = vshll.u32 %v2590_v4, 16  ;;  %v2921_v20 = vshll.u32 %v2591_v5, 16 }
 0x1f4   : > { %3425 = vst.msk [vmem:[#allocation3 + $0x20] sm:$0xf] %vm3416_vm8, %v3337_v52  ;;  %4448 = vrot.lane.b32.xlu0 %v4366_v48, %s5861_s15  ;;  %v3674_v48 = vld [vmem:[#allocation2 + $0x94] sm:$0xf]  ;;  %v3284_v52 = vsel %vm6413_vm14, %v3282_v45, %v3283_v46  ;;  %v3973_v46 = vrot.slane %v3972_v40, 4 }
 0x1f5   : > { %4450 = vrot.lane.b32.xlu1 %v4369_v53, %s5861_s15  ;;  %v3941_v53 = vshll.u32 %v3674_v48, 16  ;;  %v3945_v54 = vshrl.u32 %v3674_v48, 16  ;;  %v4379_v48 = vrot.slane %v4238_v14, 5  ;;  %v2923_v40 = vrot.slane %v2921_v20, 5 }
 0x1f6   : > { %v3339_v1 = vpop.permute.xlu0 %3338 }
 0x1f7   : > { %v3341_v3 = vpop.permute.xlu1 %3340  ;;  %3426 = vst.msk [vmem:[#allocation3 + $0x24] sm:$0xf] %vm3416_vm8, %v3339_v1 }
 0x1f8   : > { %3427 = vst.msk [vmem:[#allocation3 + $0x28] sm:$0xf] %vm3416_vm8, %v3341_v3  ;;  %2462 = vrot.lane.b32.xlu0 %v2378_v55, %s5856_s18  ;;  %v3937_v55 = vrot.slane %v3935_v36, 5  ;;  %v3943_v3 = vrot.slane %v3941_v53, 5  ;;  %v4375_v53 = vrot.slane %v4236_v47, 5 }
 0x1f9   : > { %2464 = vrot.lane.b32.xlu1 %v2379_v17, %s5856_s18  ;;  %v3947_v17 = vrot.slane %v3945_v54, 4  ;;  %v2587_v54 = vld [vmem:[#allocation2 + $0x9c] sm:$0xf]  ;;  %v3149_v47 = vld [vmem:[#allocation2 + $0xa0] sm:$0xf] }
 0x1fa   : > { %v3343_v11 = vpop.permute.xlu0 %3342  ;;  %v3938_v0 = vor.u32 %v3937_v55, %v3934_v59  ;;  %v4373_v59 = vsel %vm6413_vm14, %v5468_v19, %v4372_v2  ;;  %v2888_v55 = vshrl.u32 %v2587_v54, 16  ;;  %v2931_v2 = vshll.u32 %v2592_v27, 16  ;;  %v3474_v27 = vld [vmem:[#allocation2 + $0xa8] sm:$0xf] }
 0x1fb   : > { %v3531_v12 = vpop.permute.xlu1 %3530  ;;  %3428 = vst.msk [vmem:[#allocation3 + $0x2c] sm:$0xf] %vm3416_vm8, %v3343_v11  ;;  %v3948_v15 = vor.u32 %v3947_v17, %v3943_v3  ;;  %v2901_v17 = vshrl.u32 %v2588_v56, 16 }
 0x1fc   : > { %3619 = vst.msk [vmem:[#allocation3 + $0x20] sm:$0xf] %vm3610_vm9, %v3531_v12  ;;  %2466 = vrot.lane.b32.xlu0 %v2380_v8, %s5856_s18  ;;  %v3958_v8 = vrot.slane %v3956_v61, 4  ;;  %v3939_v26 = vrot.slane %v3938_v0, 4  ;;  %v2891_v61 = vshll.u32 %v2587_v54, 16  ;;  %v2890_v0 = vrot.slane %v2888_v55, 4 }
 0x1fd   : > { %2468 = vrot.lane.b32.xlu1 %v2381_v13, %s5856_s18  ;;  %v3471_v13 = vld [vmem:[#allocation2 + $0x94] sm:$0xf]  ;;  %v3949_v34 = vrot.slane %v3948_v15, 4  ;;  %v2903_v15 = vrot.slane %v2901_v17, 4  ;;  %v2933_v19 = vrot.slane %v2931_v2, 5 }
 0x1fe   : > { %v3533_v31 = vpop.permute.xlu0 %3532  ;;  %v3944_v39 = vsel %vm6018_vm10, %v3939_v26, %v3943_v3  ;;  %v2897_v3 = vshll.u32 %v2588_v56, 16 }
 0x1ff   : > { %v3535_v32 = vpop.permute.xlu1 %3534  ;;  %3620 = vst.msk [vmem:[#allocation3 + $0x24] sm:$0xf] %vm3610_vm9, %v3533_v31  ;;  %v3962_v31 = vor.u32 %v3961_v9, %v3958_v8  ;;  %v3954_v45 = vsel %vm6018_vm10, %v3949_v34, %v3953_v38  ;;  %v2893_v8 = vrot.slane %v2891_v61, 5  ;;  %v2912_v9 = vshrl.u32 %v2590_v4, 16 }
 0x200   : > { %3621 = vst.msk [vmem:[#allocation3 + $0x28] sm:$0xf] %vm3610_vm9, %v3535_v32  ;;  %3023 = vrot.lane.b32.xlu0 %v2852_v24, %s5857_s19  ;;  %v3472_v24 = vld [vmem:[#allocation2 + $0x9c] sm:$0xf]  ;;  %v2907_v38 = vshll.u32 %v2589_v16, 16 }
 0x201   : > { %3025 = vrot.lane.b32.xlu1 %v2862_v33, %s5857_s19  ;;  %v2914_v26 = vrot.slane %v2912_v9, 4 }
 0x202   : > { %v3537_v37 = vpop.permute.xlu0 %3536 }
 0x203   : > { %v4092_v42 = vpop.permute.xlu1 %4091  ;;  %3622 = vst.msk [vmem:[#allocation3 + $0x2c] sm:$0xf] %vm3610_vm9, %v3537_v37 }
 0x204   : > { %4180 = vst.msk [vmem:[#allocation3 + $0x20] sm:$0xf] %vm4171_vm12, %v4092_v42  ;;  %3027 = vrot.lane.b32.xlu0 %v2876_v41, %s5857_s19  ;;  %v3963_v41 = vrot.slane %v3962_v31, 4  ;;  %v2917_v31 = vrot.slane %v2915_v10, 5 }
 0x205   : > { %3029 = vrot.lane.b32.xlu1 %v2886_v43, %s5857_s19 }
 0x206   : > { %v4094_v50 = vpop.permute.xlu0 %4093  ;;  %v3968_v49 = vsel %vm6018_vm10, %v3963_v41, %v3967_v21  ;;  %v2925_v21 = vshrl.u32 %v2591_v5, 16  ;;  %v2918_v30 = vor.u32 %v2917_v31, %v2914_v26 }
 0x207   : > { %v4096_v51 = vpop.permute.xlu1 %4095  ;;  %4181 = vst.msk [vmem:[#allocation3 + $0x24] sm:$0xf] %vm4171_vm12, %v4094_v50 }
 0x208   : > { %4182 = vst.msk [vmem:[#allocation3 + $0x28] sm:$0xf] %vm4171_vm12, %v4096_v51  ;;  %3360 = vrot.lane.b32.xlu0 %v3281_v35, %s5858_s20  ;;  %v4237_v35 = vld [vmem:[#allocation2 + $0x9c] sm:$0xe] }
 0x209   : > { %3362 = vrot.lane.b32.xlu1 %v3284_v52, %s5858_s20  ;;  %v3978_v52 = vsel %vm6018_vm10, %v3973_v46, %v3977_v29  ;;  %v5469_v57 = vrot.slane %v4237_v35, 9  ;;  %v2927_v29 = vrot.slane %v2925_v21, 4 }
 0x20a   : > { %v4098_v63 = vpop.permute.xlu0 %4097 }
 0x20b   : > { %v4429_v1 = vpop.permute.xlu1 %4428  ;;  %4183 = vst.msk [vmem:[#allocation3 + $0x2c] sm:$0xf] %vm4171_vm12, %v4098_v63  ;;  %v4380_v6 = vsel %vm6413_vm14, %v5469_v57, %v4379_v48  ;;  %v2928_v46 = vor.u32 %v2927_v29, %v2923_v40  ;;  %v3151_v57 = vld [vmem:[#allocation2 + $0xa8] sm:$0xe] }
 0x20c   : > { %4517 = vst.msk [vmem:[#allocation3 + $0x20] sm:$0xf] %vm4508_vm13, %v4429_v1  ;;  %3364 = vrot.lane.b32.xlu0 %v3288_v18, %s5858_s20  ;;  %v4381_v18 = vrot.slane %v4379_v48, 4  ;;  %v4376_v1 = vsel %vm6413_vm14, %v4374_v28, %v4375_v53  ;;  %v3150_v53 = vld [vmem:[#allocation2 + $0xa4] sm:$0x1]  ;;  %v5455_v17 = vrot.slane %v3151_v57, 9 }
 0x20d   : > { %3366 = vrot.lane.b32.xlu1 %v3291_v58, %s5858_s20  ;;  %v4382_v58 = vrot.slane %v4239_v44, 5 }
 0x20e   : > { %v4431_v11 = vpop.permute.xlu0 %4430 }
 0x20f   : > { %v4433_v12 = vpop.permute.xlu1 %4432  ;;  %4518 = vst.msk [vmem:[#allocation3 + $0x24] sm:$0xf] %vm4508_vm13, %v4431_v11 }
 0x210   : > { %4519 = vst.msk [vmem:[#allocation3 + $0x28] sm:$0xf] %vm4508_vm13, %v4433_v12  ;;  %3554 = vrot.lane.b32.xlu0 %v3470_v7, %s5859_s0  ;;  %v4383_v7 = vsel %vm6413_vm14, %v4381_v18, %v4382_v58  ;;  %v3679_v58 = vld [vmem:[#allocation2 + $0xa8] sm:$0xf] }
 0x211   : > { %3556 = vrot.lane.b32.xlu1 %v3471_v13, %s5859_s0  ;;  %v2899_v13 = vrot.slane %v2897_v3, 5  ;;  %v3153_v3 = vld [vmem:[#allocation2 + $0xb0] sm:$0x1]  ;;  %v3980_v4 = vshrl.u32 %v3679_v58, 16  ;;  %v3983_v5 = vshll.u32 %v3679_v58, 16 }
 0x212   : > { %v4435_v32 = vpop.permute.xlu0 %4434 }
 0x213   : > { %v3008_v33 = vpop.permute.xlu1 %3007  ;;  %4520 = vst.msk [vmem:[#allocation3 + $0x2c] sm:$0xf] %vm4508_vm13, %v4435_v32  ;;  %v2904_v34 = vor.u32 %v2903_v15, %v2899_v13  ;;  %v3683_v15 = vld [vmem:[#allocation2 + $0xb8] sm:$0xf]  ;;  %v3982_v21 = vrot.slane %v3980_v4, 4  ;;  %v3985_v16 = vrot.slane %v3983_v5, 5 }
 0x214   : > { %3092 = vst.msk [vmem:[#allocation3 + $0x30] sm:$0xf] %vm3079_vm7, %v3008_v33  ;;  %3558 = vrot.lane.b32.xlu0 %v3472_v24, %s5859_s0  ;;  %v2383_v24 = vld [vmem:[#allocation2 + $0xa0] sm:$0xf]  ;;  %v4013_v26 = vshll.u32 %v3683_v15, 16 }
 0x215   : > { %3560 = vrot.lane.b32.xlu1 %v3473_v25, %s5859_s0  ;;  %v2894_v25 = vor.u32 %v2893_v8, %v2890_v0  ;;  %v3986_v29 = vor.u32 %v3985_v16, %v3982_v21 }
 0x216   : > { %v3010_v37 = vpop.permute.xlu0 %3009  ;;  %v5813_v42 = vld [vmem:[#allocation3 + $0x20] sm:$0xff]  }
 0x217   : > { %v3012_v43 = vpop.permute.xlu1 %3011  ;;  %3093 = vst.msk [vmem:[#allocation3 + $0x34] sm:$0xf] %vm3079_vm7, %v3010_v37  ;;  %5735 = vmatprep.mubr.msk.bf16.mxu0 %vm4689_vm15, %v5813_v42  ;;  %v2895_v41 = vrot.slane %v2894_v25, 4  ;;  %v2385_v42 = vld [vmem:[#allocation2 + $0xac] sm:$0xf] }
 0x218   : > { %3094 = vst.msk [vmem:[#allocation3 + $0x38] sm:$0xf] %vm3079_vm7, %v3012_v43  ;;  %4115 = vrot.lane.b32.xlu0 %v3944_v39, %s5860_s10  ;;  %v2384_v39 = vld [vmem:[#allocation2 + $0xa8] sm:$0xf]  ;;  %v2905_v43 = vrot.slane %v2904_v34, 4 }
 0x219   : > { %4117 = vrot.lane.b32.xlu1 %v3954_v45, %s5860_s10  ;;  %v2909_v45 = vrot.slane %v2907_v38, 5  ;;  %v2900_v48 = vsel %vm6018_vm10, %v2895_v41, %v2899_v13  ;;  %v3682_v13 = vld [vmem:[#allocation2 + $0xb4] sm:$0xf]  ;;  %v4017_v38 = vshrl.u32 %v3683_v15, 16 }
 0x21a   : > { %v3014_v36 = vpop.permute.xlu0 %3013  ;;  %v5814_v50 = vld [vmem:[#allocation3 + $0x28] sm:$0xff]   ;;  %v4007_v25 = vshll.u32 %v3682_v13, 16 }
 0x21b   : > { %v3345_v51 = vpop.permute.xlu1 %3344  ;;  %3095 = vst.msk [vmem:[#allocation3 + $0x3c] sm:$0xf] %vm3079_vm7, %v3014_v36  ;;  %5736 = vmatmul.mubr.msk.bf16.gmra.mxu0 %vm4689_vm15, %v5814_v50  ;;  %v2910_v44 = vsel %vm6018_vm10, %v2905_v43, %v2909_v45  ;;  %v2929_v36 = vrot.slane %v2928_v46, 4  ;;  %v3148_v50 = vld [vmem:[#allocation2 + $0x9c] sm:$0xe]  ;;  %v4019_v45 = vrot.slane %v4017_v38, 4 }
 0x21c   : > { %3429 = vst.msk [vmem:[#allocation3 + $0x30] sm:$0xf] %vm3416_vm8, %v3345_v51  ;;  %4119 = vrot.lane.b32.xlu0 %v3968_v49, %s5860_s10  ;;  %v2919_v49 = vrot.slane %v2918_v30, 4  ;;  %v3294_v51 = vrot.slane %v3149_v47, 5  ;;  %v5454_v56 = vrot.slane %v3148_v50, 9  ;;  %v4009_v2 = vrot.slane %v4007_v25, 5 }
 0x21d   : > { %4121 = vrot.lane.b32.xlu1 %v3978_v52, %s5860_s10  ;;  %v3152_v52 = vld [vmem:[#allocation2 + $0xac] sm:$0xf]  ;;  %v2934_v61 = vsel %vm6018_vm10, %v2929_v36, %v2933_v19  ;;  %v3684_v47 = vld [vmem:[#allocation2 + $0xbc] sm:$0x1]  ;;  %v3987_v19 = vrot.slane %v3986_v29, 4 }
 0x21e   : > { %v3347_v62 = vpop.permute.xlu0 %3346  ;;  %v2924_v54 = vsel %vm6018_vm10, %v2919_v49, %v2923_v40  ;;  %v3301_v18 = vrot.slane %v3152_v52, 5  ;;  %v3477_v49 = vld [vmem:[#allocation2 + $0xb8] sm:$0xf]  ;;  %v4023_v52 = vshll.u32 %v3684_v47, 16  ;;  %v2597_v38 = vld [vmem:[#allocation2 + $0xc4] sm:$0xf] }
 0x21f   : > { %v3349_v63 = vpop.permute.xlu1 %3348  ;;  %3430 = vst.msk [vmem:[#allocation3 + $0x34] sm:$0xf] %vm3416_vm8, %v3347_v62  ;;  %v3296_v62 = vrot.slane %v3294_v51, 4  ;;  %v2386_v47 = vld [vmem:[#allocation2 + $0xb4] sm:$0xf] }
 0x220   : > { %3431 = vst.msk [vmem:[#allocation3 + $0x38] sm:$0xf] %vm3416_vm8, %v3349_v63  ;;  %4452 = vrot.lane.b32.xlu0 %v4373_v59, %s5861_s15  ;;  %v3297_v63 = vrot.slane %v3150_v53, 5  ;;  %v3302_v20 = vsel %vm6413_vm14, %v5455_v17, %v3301_v18 }
 0x221   : > { %4454 = vrot.lane.b32.xlu1 %v4376_v1, %s5861_s15  ;;  %v3680_v1 = vld [vmem:[#allocation2 + $0xac] sm:$0xf] }
 0x222   : > { %v3351_v11 = vpop.permute.xlu0 %3350  ;;  %v3989_v0 = vshll.u32 %v3680_v1, 16  ;;  %v3298_v10 = vsel %vm6413_vm14, %v3296_v62, %v3297_v63  ;;  %v4240_v62 = vld [vmem:[#allocation2 + $0xa8] sm:$0xe] }
 0x223   : > { %v3539_v12 = vpop.permute.xlu1 %3538  ;;  %3432 = vst.msk [vmem:[#allocation3 + $0x3c] sm:$0xf] %vm3416_vm8, %v3351_v11  ;;  %v3304_v11 = vrot.slane %v3153_v3, 5  ;;  %v4242_v3 = vld [vmem:[#allocation2 + $0xb0] sm:$0x1]  ;;  %v5470_v5 = vrot.slane %v4240_v62, 9 }
 0x224   : > { %3623 = vst.msk [vmem:[#allocation3 + $0x30] sm:$0xf] %vm3610_vm9, %v3539_v12  ;;  %4456 = vrot.lane.b32.xlu0 %v4380_v6, %s5861_s15  ;;  %v3295_v6 = vsel %vm6413_vm14, %v5454_v56, %v3294_v51  ;;  %v3993_v12 = vshrl.u32 %v3680_v1, 16 }
 0x225   : > { %4458 = vrot.lane.b32.xlu1 %v4383_v7, %s5861_s15  ;;  %v3303_v7 = vrot.slane %v3301_v18, 4  ;;  %v4244_v18 = vld [vmem:[#allocation2 + $0xb8] sm:$0xf] }
 0x226   : > { %v3541_v32 = vpop.permute.xlu0 %3540  ;;  %v3995_v34 = vrot.slane %v3993_v12, 4  ;;  %v4393_v17 = vrot.slane %v4244_v18, 5 }
 0x227   : > { %v3543_v33 = vpop.permute.xlu1 %3542  ;;  %3624 = vst.msk [vmem:[#allocation3 + $0x34] sm:$0xf] %vm3610_vm9, %v3541_v32  ;;  %v3305_v32 = vsel %vm6413_vm14, %v3303_v7, %v3304_v11  ;;  %v4245_v7 = vld [vmem:[#allocation2 + $0xbc] sm:$0x1]  ;;  %v2593_v11 = vld [vmem:[#allocation2 + $0xb4] sm:$0xf] }
 0x228   : > { %3625 = vst.msk [vmem:[#allocation3 + $0x38] sm:$0xf] %vm3610_vm9, %v3543_v33  ;;  %2470 = vrot.lane.b32.xlu0 %v2382_v23, %s5856_s18  ;;  %v3991_v23 = vrot.slane %v3989_v0, 5  ;;  %v3681_v33 = vld [vmem:[#allocation2 + $0xb0] sm:$0x1]  ;;  %v4396_v21 = vrot.slane %v4245_v7, 5 }
 0x229   : > { %2472 = vrot.lane.b32.xlu1 %v2383_v24, %s5856_s18  ;;  %v4004_v24 = vshrl.u32 %v3682_v13, 16  ;;  %v3999_v41 = vshll.u32 %v3681_v33, 16  ;;  %v2594_v13 = vld [vmem:[#allocation2 + $0xb8] sm:$0xf]  ;;  %v2596_v33 = vld [vmem:[#allocation2 + $0xc0] sm:$0xf] }
 0x22a   : > { %v3545_v14 = vpop.permute.xlu0 %3544  ;;  %v3996_v43 = vor.u32 %v3995_v34, %v3991_v23  ;;  %v3992_v56 = vsel %vm6018_vm10, %v3987_v19, %v3991_v23  ;;  %v2936_v23 = vshrl.u32 %v2593_v11, 16 }
 0x22b   : > { %v4100_v37 = vpop.permute.xlu1 %4099  ;;  %3626 = vst.msk [vmem:[#allocation3 + $0x3c] sm:$0xf] %vm3610_vm9, %v3545_v14  ;;  %v4006_v30 = vrot.slane %v4004_v24, 4  ;;  %v4015_v14 = vrot.slane %v4013_v26, 5  ;;  %v4001_v50 = vrot.slane %v3999_v41, 5  ;;  %v2939_v24 = vshll.u32 %v2593_v11, 16 }
 0x22c   : > { %4184 = vst.msk [vmem:[#allocation3 + $0x30] sm:$0xf] %vm4171_vm12, %v4100_v37  ;;  %2474 = vrot.lane.b32.xlu0 %v2384_v39, %s5856_s18  ;;  %v3475_v39 = vld [vmem:[#allocation2 + $0xac] sm:$0xf]  ;;  %v3997_v36 = vrot.slane %v3996_v43, 4  ;;  %v2938_v29 = vrot.slane %v2936_v23, 4 }
 0x22d   : > { %2476 = vrot.lane.b32.xlu1 %v2385_v42, %s5856_s18  ;;  %v4020_v51 = vor.u32 %v4019_v45, %v4015_v14  ;;  %v2960_v41 = vshrl.u32 %v2596_v33, 16  ;;  %v2973_v43 = vshrl.u32 %v2597_v38, 16  ;;  %v3156_v11 = vld [vmem:[#allocation2 + $0xbc] sm:$0x1] }
 0x22e   : > { %v4102_v28 = vpop.permute.xlu0 %4101 }
 0x22f   : > { %v4104_v35 = vpop.permute.xlu1 %4103  ;;  %4185 = vst.msk [vmem:[#allocation3 + $0x34] sm:$0xf] %vm4171_vm12, %v4102_v28  ;;  %v4010_v28 = vor.u32 %v4009_v2, %v4006_v30  ;;  %v2963_v30 = vshll.u32 %v2596_v33, 16 }
 0x230   : > { %4186 = vst.msk [vmem:[#allocation3 + $0x38] sm:$0xf] %vm4171_vm12, %v4104_v35  ;;  %3031 = vrot.lane.b32.xlu0 %v2900_v48, %s5857_s19  ;;  %v3476_v48 = vld [vmem:[#allocation2 + $0xb4] sm:$0xf] }
 0x231   : > { %3033 = vrot.lane.b32.xlu1 %v2910_v44, %s5857_s19  ;;  %v4011_v57 = vrot.slane %v4010_v28, 4  ;;  %v2965_v19 = vrot.slane %v2963_v30, 5 }
 0x232   : > { %v4106_v59 = vpop.permute.xlu0 %4105 }
 0x233   : > { %v4437_v55 = vpop.permute.xlu1 %4436  ;;  %4187 = vst.msk [vmem:[#allocation3 + $0x3c] sm:$0xf] %vm4171_vm12, %v4106_v59  ;;  %v4002_v59 = vsel %vm6018_vm10, %v3997_v36, %v4001_v50  ;;  %v4016_v4 = vsel %vm6018_vm10, %v4011_v57, %v4015_v14 }
 0x234   : > { %4521 = vst.msk [vmem:[#allocation3 + $0x30] sm:$0xf] %vm4508_vm13, %v4437_v55  ;;  %3035 = vrot.lane.b32.xlu0 %v2924_v54, %s5857_s19  ;;  %v4241_v54 = vld [vmem:[#allocation2 + $0xac] sm:$0xf]  ;;  %v4021_v55 = vrot.slane %v4020_v51, 4  ;;  %v2975_v51 = vrot.slane %v2973_v43, 4 }
 0x235   : > { %3037 = vrot.lane.b32.xlu1 %v2934_v61, %s5857_s19  ;;  %v4025_v61 = vrot.slane %v4023_v52, 5  ;;  %v4386_v63 = vrot.slane %v4241_v54, 5  ;;  %v2388_v54 = vld [vmem:[#allocation2 + $0xc0] sm:$0xf] }
 0x236   : > { %v4439_v8 = vpop.permute.xlu0 %4438 }
 0x237   : > { %v4441_v9 = vpop.permute.xlu1 %4440  ;;  %4522 = vst.msk [vmem:[#allocation3 + $0x34] sm:$0xf] %vm4508_vm13, %v4439_v8  ;;  %v4026_v8 = vsel %vm6018_vm10, %v4021_v55, %v4025_v61  ;;  %v4387_v16 = vsel %vm6413_vm14, %v5470_v5, %v4386_v63 }
 0x238   : > { %4523 = vst.msk [vmem:[#allocation3 + $0x38] sm:$0xf] %vm4508_vm13, %v4441_v9  ;;  %3368 = vrot.lane.b32.xlu0 %v3295_v6, %s5858_s20  ;;  %v4243_v6 = vld [vmem:[#allocation2 + $0xb4] sm:$0xe]  ;;  %v4388_v9 = vrot.slane %v4386_v63, 4 }
 0x239   : > { %3370 = vrot.lane.b32.xlu1 %v3298_v10, %s5858_s20  ;;  %v4389_v10 = vrot.slane %v4242_v3, 5  ;;  %v5471_v15 = vrot.slane %v4243_v6, 9 }
 0x23a   : > { %v4443_v31 = vpop.permute.xlu0 %4442 }
 0x23b   : > { %4524 = vst.msk [vmem:[#allocation3 + $0x3c] sm:$0xf] %vm4508_vm13, %v4443_v31  ;;  %v2457_v40 = vpop.permute.xlu1 %2456  ;;  %v4390_v26 = vsel %vm6413_vm14, %v4388_v9, %v4389_v10  ;;  %v2945_v31 = vshll.u32 %v2594_v13, 16 }
 0x23c   : > { %2536 = vst.msk [vmem:[#allocation3 + $0x44] sm:$0xf] %vm2518_vm2, %v2457_v40  ;;  %3372 = vrot.lane.b32.xlu0 %v3302_v20, %s5858_s20  ;;  %v4395_v20 = vrot.slane %v4393_v17, 4  ;;  %v4394_v40 = vsel %vm6413_vm14, %v5471_v15, %v4393_v17 }
 0x23d   : > { %3374 = vrot.lane.b32.xlu1 %v3305_v32, %s5858_s20  ;;  %v2949_v32 = vshrl.u32 %v2594_v13, 16  ;;  %v2947_v14 = vrot.slane %v2945_v31, 5 }
 0x23e   : > { %v5815_v37 = vld [vmem:[#allocation3 + $0x30] sm:$0xff]   ;;  %v2459_v42 = vpop.permute.xlu0 %2458 }
 0x23f   : > { %2537 = vst.msk [vmem:[#allocation3 + $0x48] sm:$0xf] %vm2518_vm2, %v2459_v42  ;;  %v2461_v46 = vpop.permute.xlu1 %2460  ;;  %5739 = vmatprep.mubr.msk.bf16.mxu0 %vm4689_vm15, %v5815_v37  ;;  %v2951_v37 = vrot.slane %v2949_v32, 4  ;;  %v2969_v42 = vshll.u32 %v2597_v38, 16  ;;  %v3686_v32 = vld [vmem:[#allocation2 + $0xc4] sm:$0xf] }
 0x240   : > { %2538 = vst.msk [vmem:[#allocation3 + $0x4c] sm:$0xf] %vm2518_vm2, %v2461_v46  ;;  %3562 = vrot.lane.b32.xlu0 %v3474_v27, %s5859_s0  ;;  %v4397_v27 = vsel %vm6413_vm14, %v4395_v20, %v4396_v21  ;;  %v2595_v46 = vld [vmem:[#allocation2 + $0xbc] sm:$0x1]  ;;  %v3157_v20 = vld [vmem:[#allocation2 + $0xc0] sm:$0xe] }
 0x241   : > { %3564 = vrot.lane.b32.xlu1 %v3475_v39, %s5859_s0  ;;  %v2941_v39 = vrot.slane %v2939_v24, 5  ;;  %v2955_v36 = vshll.u32 %v2595_v46, 16  ;;  %v2971_v50 = vrot.slane %v2969_v42, 5  ;;  %v3159_v21 = vld [vmem:[#allocation2 + $0xc8] sm:$0x1]  ;;  %v5457_v33 = vrot.slane %v3157_v20, 9 }
 0x242   : > { %v5816_v35 = vld [vmem:[#allocation3 + $0x38] sm:$0xff]   ;;  %v3016_v44 = vpop.permute.xlu0 %3015  ;;  %v3318_v38 = vrot.slane %v3159_v21, 5  ;;  %v4037_v30 = vshll.u32 %v3686_v32, 16 }
 0x243   : > { %3096 = vst.msk [vmem:[#allocation3 + $0x40] sm:$0xf] %vm3079_vm7, %v3016_v44  ;;  %v3018_v53 = vpop.permute.xlu1 %3017  ;;  %5740 = vmatmul.mubr.msk.bf16.gmra.mxu0 %vm4689_vm15, %v5816_v35  ;;  %v2387_v35 = vld [vmem:[#allocation2 + $0xb8] sm:$0xf]  ;;  %v2952_v44 = vor.u32 %v2951_v37, %v2947_v14  ;;  %v2957_v55 = vrot.slane %v2955_v36, 5  ;;  %v2976_v61 = vor.u32 %v2975_v51, %v2971_v50 }
 0x244   : > { %3097 = vst.msk [vmem:[#allocation3 + $0x44] sm:$0xf] %vm3079_vm7, %v3018_v53  ;;  %3566 = vrot.lane.b32.xlu0 %v3476_v48, %s5859_s0  ;;  %v2942_v48 = vor.u32 %v2941_v39, %v2938_v29  ;;  %v2598_v53 = vld [vmem:[#allocation2 + $0xc8] sm:$0x1]  ;;  %v3689_v42 = vld [vmem:[#allocation2 + $0xd0] sm:$0xf] }
 0x245   : > { %3568 = vrot.lane.b32.xlu1 %v3477_v49, %s5859_s0  ;;  %v2962_v49 = vrot.slane %v2960_v41, 4  ;;  %v2979_v62 = vshll.u32 %v2598_v53, 16  ;;  %v2977_v7 = vrot.slane %v2976_v61, 4  ;;  %v4065_v36 = vshrl.u32 %v3689_v42, 16  ;;  %v3478_v53 = vld [vmem:[#allocation2 + $0xc0] sm:$0xf] }
 0x246   : > { %v3020_v58 = vpop.permute.xlu0 %3019 }
 0x247   : > { %3098 = vst.msk [vmem:[#allocation3 + $0x48] sm:$0xf] %vm3079_vm7, %v3020_v58  ;;  %v3022_v1 = vpop.permute.xlu1 %3021  ;;  %v2966_v57 = vor.u32 %v2965_v19, %v2962_v49  ;;  %v2389_v58 = vld [vmem:[#allocation2 + $0xc4] sm:$0xf] }
 0x248   : > { %3099 = vst.msk [vmem:[#allocation3 + $0x4c] sm:$0xf] %vm3079_vm7, %v3022_v1  ;;  %4123 = vrot.lane.b32.xlu0 %v3992_v56, %s5860_s10  ;;  %v2943_v56 = vrot.slane %v2942_v48, 4  ;;  %v3155_v1 = vld [vmem:[#allocation2 + $0xb8] sm:$0xf] }
 0x249   : > { %4125 = vrot.lane.b32.xlu1 %v4002_v59, %s5860_s10  ;;  %v2953_v59 = vrot.slane %v2952_v44, 4  ;;  %v2967_v17 = vrot.slane %v2966_v57, 4  ;;  %v3308_v9 = vrot.slane %v3155_v1, 5  ;;  %v4061_v44 = vshll.u32 %v3689_v42, 16 }
 0x24a   : > { %v3353_v0 = vpop.permute.xlu0 %3352  ;;  %v2948_v3 = vsel %vm6018_vm10, %v2943_v56, %v2947_v14  ;;  %v3688_v14 = vld [vmem:[#allocation2 + $0xcc] sm:$0xf] }
 0x24b   : > { %3433 = vst.msk [vmem:[#allocation3 + $0x40] sm:$0xf] %vm3416_vm8, %v3353_v0  ;;  %v3355_v12 = vpop.permute.xlu1 %3354  ;;  %v2958_v6 = vsel %vm6018_vm10, %v2953_v59, %v2957_v55  ;;  %v2981_v0 = vrot.slane %v2979_v62, 5  ;;  %v2972_v13 = vsel %vm6018_vm10, %v2967_v17, %v2971_v50  ;;  %v3310_v24 = vrot.slane %v3308_v9, 4  ;;  %v3480_v17 = vld [vmem:[#allocation2 + $0xcc] sm:$0xf] }
 0x24c   : > { %3434 = vst.msk [vmem:[#allocation3 + $0x44] sm:$0xf] %vm3416_vm8, %v3355_v12  ;;  %4127 = vrot.lane.b32.xlu0 %v4016_v4, %s5860_s10  ;;  %v3158_v4 = vld [vmem:[#allocation2 + $0xc4] sm:$0xf]  ;;  %v4052_v48 = vshrl.u32 %v3688_v14, 16  ;;  %v4055_v49 = vshll.u32 %v3688_v14, 16 }
 0x24d   : > { %4129 = vrot.lane.b32.xlu1 %v4026_v8, %s5860_s10  ;;  %v3154_v8 = vld [vmem:[#allocation2 + $0xb4] sm:$0xe]  ;;  %v3315_v12 = vrot.slane %v3158_v4, 5  ;;  %v2982_v23 = vsel %vm6018_vm10, %v2977_v7, %v2981_v0  ;;  %v4063_v61 = vrot.slane %v4061_v44, 5  ;;  %v4067_v62 = vrot.slane %v4065_v36, 4 }
 0x24e   : > { %v3357_v25 = vpop.permute.xlu0 %3356  ;;  %v5456_v15 = vrot.slane %v3154_v8, 9  ;;  %v4054_v57 = vrot.slane %v4052_v48, 4  ;;  %v3481_v7 = vld [vmem:[#allocation2 + $0xd0] sm:$0xf] }
 0x24f   : > { %3435 = vst.msk [vmem:[#allocation3 + $0x48] sm:$0xf] %vm3416_vm8, %v3357_v25  ;;  %v3359_v34 = vpop.permute.xlu1 %3358  ;;  %v3311_v25 = vrot.slane %v3156_v11, 5  ;;  %v3316_v43 = vsel %vm6413_vm14, %v5457_v33, %v3315_v12 }
 0x250   : > { %3436 = vst.msk [vmem:[#allocation3 + $0x4c] sm:$0xf] %vm3416_vm8, %v3359_v34  ;;  %4460 = vrot.lane.b32.xlu0 %v4387_v16, %s5861_s15  ;;  %v3317_v34 = vrot.slane %v3315_v12, 4  ;;  %v4247_v12 = vld [vmem:[#allocation2 + $0xc4] sm:$0xf] }
 0x251   : > { %4462 = vrot.lane.b32.xlu1 %v4390_v26, %s5861_s15  ;;  %v3685_v26 = vld [vmem:[#allocation2 + $0xc0] sm:$0xf]  ;;  %v3312_v41 = vsel %vm6413_vm14, %v3310_v24, %v3311_v25  ;;  %v4400_v25 = vrot.slane %v4247_v12, 5 }
 0x252   : > { %v3547_v2 = vpop.permute.xlu0 %3546  ;;  %v4031_v29 = vshll.u32 %v3685_v26, 16  ;;  %v4246_v24 = vld [vmem:[#allocation2 + $0xc0] sm:$0xe] }
 0x253   : > { %3627 = vst.msk [vmem:[#allocation3 + $0x40] sm:$0xf] %vm3610_vm9, %v3547_v2  ;;  %v3549_v45 = vpop.permute.xlu1 %3548  ;;  %v4041_v2 = vshrl.u32 %v3686_v32, 16  ;;  %v4250_v32 = vld [vmem:[#allocation2 + $0xd0] sm:$0xf] }
 0x254   : > { %3628 = vst.msk [vmem:[#allocation3 + $0x44] sm:$0xf] %vm3610_vm9, %v3549_v45  ;;  %4464 = vrot.lane.b32.xlu0 %v4394_v40, %s5861_s15  ;;  %v3309_v40 = vsel %vm6413_vm14, %v5456_v15, %v3308_v9  ;;  %v3319_v45 = vsel %vm6413_vm14, %v3317_v34, %v3318_v38  ;;  %v4068_v9 = vor.u32 %v4067_v62, %v4063_v61  ;;  %v5472_v34 = vrot.slane %v4246_v24, 9 }
 0x255   : > { %4466 = vrot.lane.b32.xlu1 %v4397_v27, %s5861_s15  ;;  %v4028_v27 = vshrl.u32 %v3685_v26, 16 }
 0x256   : > { %v3551_v28 = vpop.permute.xlu0 %3550  ;;  %v4401_v14 = vsel %vm6413_vm14, %v5472_v34, %v4400_v25 }
 0x257   : > { %3629 = vst.msk [vmem:[#allocation3 + $0x48] sm:$0xf] %vm3610_vm9, %v3551_v28  ;;  %v3553_v52 = vpop.permute.xlu1 %3552  ;;  %v4030_v46 = vrot.slane %v4028_v27, 4  ;;  %v4039_v28 = vrot.slane %v4037_v30, 5  ;;  %v4402_v27 = vrot.slane %v4400_v25, 4 }
 0x258   : > { %3630 = vst.msk [vmem:[#allocation3 + $0x4c] sm:$0xf] %vm3610_vm9, %v3553_v52  ;;  %2478 = vrot.lane.b32.xlu0 %v2386_v47, %s5856_s18  ;;  %v4033_v47 = vrot.slane %v4031_v29, 5  ;;  %v3687_v52 = vld [vmem:[#allocation2 + $0xc8] sm:$0x1] }
 0x259   : > { %2480 = vrot.lane.b32.xlu1 %v2387_v35, %s5856_s18  ;;  %v4043_v35 = vrot.slane %v4041_v2, 4  ;;  %v4047_v55 = vshll.u32 %v3687_v52, 16  ;;  %v4251_v2 = vld [vmem:[#allocation2 + $0xd4] sm:$0x1] }
 0x25a   : > { %v4108_v18 = vpop.permute.xlu0 %4107  ;;  %v4034_v56 = vor.u32 %v4033_v47, %v4030_v46 }
 0x25b   : > { %4188 = vst.msk [vmem:[#allocation3 + $0x40] sm:$0xf] %vm4171_vm12, %v4108_v18  ;;  %v4110_v63 = vpop.permute.xlu1 %4109  ;;  %v4057_v18 = vrot.slane %v4055_v49, 5  ;;  %v4044_v59 = vor.u32 %v4043_v35, %v4039_v28  ;;  %v4049_v8 = vrot.slane %v4047_v55, 5 }
 0x25c   : > { %4189 = vst.msk [vmem:[#allocation3 + $0x44] sm:$0xf] %vm4171_vm12, %v4110_v63  ;;  %2482 = vrot.lane.b32.xlu0 %v2388_v54, %s5856_s18  ;;  %v3479_v54 = vld [vmem:[#allocation2 + $0xc4] sm:$0xf]  ;;  %v4035_v4 = vrot.slane %v4034_v56, 4 }
 0x25d   : > { %2484 = vrot.lane.b32.xlu1 %v2389_v58, %s5856_s18  ;;  %v4045_v0 = vrot.slane %v4044_v59, 4 }
 0x25e   : > { %v4112_v5 = vpop.permute.xlu0 %4111 }
 0x25f   : > { %4190 = vst.msk [vmem:[#allocation3 + $0x48] sm:$0xf] %vm4171_vm12, %v4112_v5  ;;  %v4114_v10 = vpop.permute.xlu1 %4113  ;;  %v4058_v5 = vor.u32 %v4057_v18, %v4054_v57  ;;  %v4050_v21 = vsel %vm6018_vm10, %v4045_v0, %v4049_v8 }
 0x260   : > { %4191 = vst.msk [vmem:[#allocation3 + $0x4c] sm:$0xf] %vm4171_vm12, %v4114_v10  ;;  %3039 = vrot.lane.b32.xlu0 %v2948_v3, %s5857_s19  ;;  %v3690_v3 = vld [vmem:[#allocation2 + $0xd4] sm:$0x1] }
 0x261   : > { %3041 = vrot.lane.b32.xlu1 %v2958_v6, %s5857_s19  ;;  %v4071_v10 = vshll.u32 %v3690_v3, 16  ;;  %v4059_v15 = vrot.slane %v4058_v5, 4 }
 0x262   : > { %v4445_v16 = vpop.permute.xlu0 %4444 }
 0x263   : > { %4525 = vst.msk [vmem:[#allocation3 + $0x40] sm:$0xf] %vm4508_vm13, %v4445_v16  ;;  %v4447_v31 = vpop.permute.xlu1 %4446  ;;  %v4069_v16 = vrot.slane %v4068_v9, 4  ;;  %v4064_v33 = vsel %vm6018_vm10, %v4059_v15, %v4063_v61 }
 0x264   : > { %4526 = vst.msk [vmem:[#allocation3 + $0x44] sm:$0xf] %vm4508_vm13, %v4447_v31  ;;  %3043 = vrot.lane.b32.xlu0 %v2972_v13, %s5857_s19  ;;  %v4040_v13 = vsel %vm6018_vm10, %v4035_v4, %v4039_v28  ;;  %v4248_v31 = vld [vmem:[#allocation2 + $0xc8] sm:$0x1] }
 0x265   : > { %3045 = vrot.lane.b32.xlu1 %v2982_v23, %s5857_s19  ;;  %v4073_v23 = vrot.slane %v4071_v10, 5  ;;  %v4403_v29 = vrot.slane %v4248_v31, 5 }
 0x266   : > { %v4449_v39 = vpop.permute.xlu0 %4448 }
 0x267   : > { %4527 = vst.msk [vmem:[#allocation3 + $0x48] sm:$0xf] %vm4508_vm13, %v4449_v39  ;;  %v4451_v37 = vpop.permute.xlu1 %4450  ;;  %v4249_v39 = vld [vmem:[#allocation2 + $0xcc] sm:$0xe]  ;;  %v4404_v42 = vsel %vm6413_vm14, %v4402_v27, %v4403_v29 }
 0x268   : > { %4528 = vst.msk [vmem:[#allocation3 + $0x4c] sm:$0xf] %vm4508_vm13, %v4451_v37  ;;  %3376 = vrot.lane.b32.xlu0 %v3309_v40, %s5858_s20  ;;  %v4074_v40 = vsel %vm6018_vm10, %v4069_v16, %v4073_v23  ;;  %v5473_v37 = vrot.slane %v4249_v39, 9 }
 0x269   : > { %3378 = vrot.lane.b32.xlu1 %v3312_v41, %s5858_s20  ;;  %v4407_v41 = vrot.slane %v4250_v32, 5 }
 0x26a   : > { %v2463_v19 = vpop.permute.xlu0 %2462 }
 0x26b   : > { %2539 = vst.msk [vmem:[#allocation3 + $0x50] sm:$0xf] %vm2518_vm2, %v2463_v19  ;;  %v2465_v50 = vpop.permute.xlu1 %2464  ;;  %v5817_v51 = vld [vmem:[#allocation3 + $0x40] sm:$0xff]   ;;  %v4408_v47 = vsel %vm6413_vm14, %v5473_v37, %v4407_v41 }
 0x26c   : > { %2540 = vst.msk [vmem:[#allocation3 + $0x54] sm:$0xf] %vm2518_vm2, %v2465_v50  ;;  %3380 = vrot.lane.b32.xlu0 %v3316_v43, %s5858_s20  ;;  %5743 = vmatprep.mubr.msk.bf16.mxu1 %vm4689_vm15, %v5817_v51  ;;  %v4409_v43 = vrot.slane %v4407_v41, 4 }
 0x26d   : > { %3382 = vrot.lane.b32.xlu1 %v3319_v45, %s5858_s20  ;;  %v4410_v45 = vrot.slane %v4251_v2, 5  ;;  %s7261_s20 = scalar_lea.vmem %s7472_s6, %s5546_s27 }
 0x26e   : > { %v2467_v58 = vpop.permute.xlu0 %2466 }
 0x26f   : > { %2541 = vst.msk [vmem:[#allocation3 + $0x58] sm:$0xf] %vm2518_vm2, %v2467_v58  ;;  %v2469_v63 = vpop.permute.xlu1 %2468  ;;  %v5818_v1 = vld [vmem:[#allocation3 + $0x48] sm:$0xff]   ;;  %v4411_v49 = vsel %vm6413_vm14, %v4409_v43, %v4410_v45 }
 0x270   : > { %2542 = vst.msk [vmem:[#allocation3 + $0x5c] sm:$0xf] %vm2518_vm2, %v2469_v63  ;;  %3570 = vrot.lane.b32.xlu0 %v3478_v53, %s5859_s0  ;;  %5744 = vmatmul.mubr.msk.bf16.vlgmr.msra.gmra.mxu1 %vm4689_vm15, %v5818_v1 }
 0x271   : > { %3572 = vrot.lane.b32.xlu1 %v3479_v54, %s5859_s0 }
 0x272   : > { %v3024_v6 = vpop.permute.xlu0 %3023 }
 0x273   : > { %3100 = vst.msk [vmem:[#allocation3 + $0x50] sm:$0xf] %vm3079_vm7, %v3024_v6  ;;  %v3026_v11 = vpop.permute.xlu1 %3025 }
 0x274   : > { %3101 = vst.msk [vmem:[#allocation3 + $0x54] sm:$0xf] %vm3079_vm7, %v3026_v11  ;;  %3574 = vrot.lane.b32.xlu0 %v3480_v17, %s5859_s0 }
 0x275   : > { %3576 = vrot.lane.b32.xlu1 %v3481_v7, %s5859_s0  ;;  %s449_s0 = scalar_lea.vmem %s7473_s7, %s5387_s26 }
 0x276   : > { %v3028_v20 = vpop.permute.xlu0 %3027 }
 0x277   : > { %3102 = vst.msk [vmem:[#allocation3 + $0x58] sm:$0xf] %vm3079_vm7, %v3028_v20  ;;  %v3030_v26 = vpop.permute.xlu1 %3029 }
 0x278   : > { %3103 = vst.msk [vmem:[#allocation3 + $0x5c] sm:$0xf] %vm3079_vm7, %v3030_v26  ;;  %4131 = vrot.lane.b32.xlu0 %v4040_v13, %s5860_s10 }
 0x279   : > { %4133 = vrot.lane.b32.xlu1 %v4050_v21, %s5860_s10 }
 0x27a   : > { %v3361_v38 = vpop.permute.xlu0 %3360 }
 0x27b   : > { %3437 = vst.msk [vmem:[#allocation3 + $0x50] sm:$0xf] %vm3416_vm8, %v3361_v38  ;;  %v3363_v30 = vpop.permute.xlu1 %3362 }
 0x27c   : > { %3438 = vst.msk [vmem:[#allocation3 + $0x54] sm:$0xf] %vm3416_vm8, %v3363_v30  ;;  %4135 = vrot.lane.b32.xlu0 %v4064_v33, %s5860_s10 }
 0x27d   : > { %4137 = vrot.lane.b32.xlu1 %v4074_v40, %s5860_s10 }
 0x27e   : > { %v3365_v22 = vpop.permute.xlu0 %3364 }
 0x27f   : > { %3439 = vst.msk [vmem:[#allocation3 + $0x58] sm:$0xf] %vm3416_vm8, %v3365_v22  ;;  %v3367_v46 = vpop.permute.xlu1 %3366 }
 0x280   : > { %3440 = vst.msk [vmem:[#allocation3 + $0x5c] sm:$0xf] %vm3416_vm8, %v3367_v46  ;;  %4468 = vrot.lane.b32.xlu0 %v4401_v14, %s5861_s15 }
 0x281   : > { %4470 = vrot.lane.b32.xlu1 %v4404_v42, %s5861_s15 }
 0x282   : > { %v3555_v48 = vpop.permute.xlu0 %3554 }
 0x283   : > { %3631 = vst.msk [vmem:[#allocation3 + $0x50] sm:$0xf] %vm3610_vm9, %v3555_v48  ;;  %v3557_v19 = vpop.permute.xlu1 %3556 }
 0x284   : > { %3632 = vst.msk [vmem:[#allocation3 + $0x54] sm:$0xf] %vm3610_vm9, %v3557_v19  ;;  %4472 = vrot.lane.b32.xlu0 %v4408_v47, %s5861_s15 }
 0x285   : > { %4474 = vrot.lane.b32.xlu1 %v4411_v49, %s5861_s15 }
 0x286   : > { %v3559_v28 = vpop.permute.xlu0 %3558 }
 0x287   : > { %3633 = vst.msk [vmem:[#allocation3 + $0x58] sm:$0xf] %vm3610_vm9, %v3559_v28  ;;  %v3561_v35 = vpop.permute.xlu1 %3560 }
 0x288   : > { %3634 = vst.msk [vmem:[#allocation3 + $0x5c] sm:$0xf] %vm3610_vm9, %v3561_v35 }
 0x28a   : > { %v4116_v44 = vpop.permute.xlu0 %4115 }
 0x28b   : > { %4192 = vst.msk [vmem:[#allocation3 + $0x50] sm:$0xf] %vm4171_vm12, %v4116_v44  ;;  %v4118_v60 = vpop.permute.xlu1 %4117  ;;  %v5729_v36 = vpop.f32.mrf.mxu0 }
 0x28c   : > { %4193 = vst.msk [vmem:[#allocation3 + $0x54] sm:$0xf] %vm4171_vm12, %v4118_v60  ;;  %v5587_v50 = vpack.c.bf16 %v5729_v36, %v5729_v36  ;;  %v4975_v58 = vmul.f32 %v5729_v36, %v5729_v36  ;;  %v4907_v4 = vsel %vm4903_vm4, %v5729_v36, 0.0 }
 0x28d   : > { %v4776_v51 = vpop.f32.mrf.mxu0 }
 0x28e   : > { %v4120_v52 = vpop.permute.xlu0 %4119  ;;  %5208 = vst.msk [vmem:[%s7261_s20 + $0x8] sm:$0xf] %vm1158_vm3, %v5587_v50  ;;  %v5585_v53 = vpack.c.bf16 %v4776_v51, %v4776_v51  ;;  %v4973_v57 = vmul.f32 %v4776_v51, %v4776_v51  ;;  %v4904_v61 = vsel %vm4903_vm4, %v4776_v51, 0.0  ;;  %v5008_v10 = vsel %vm4903_vm4, %v4975_v58, 0.0 }
 0x28f   : > { %4194 = vst.msk [vmem:[#allocation3 + $0x58] sm:$0xf] %vm4171_vm12, %v4120_v52  ;;  %v4122_v54 = vpop.permute.xlu1 %4121  ;;  %v5730_v56 = vpop.f32.mrf.mxu0 }
 0x290   : > { %4195 = vst.msk [vmem:[#allocation3 + $0x5c] sm:$0xf] %vm4171_vm12, %v4122_v54  ;;  %v5588_v18 = vpack.c.bf16 %v5730_v56, %v5730_v56  ;;  %v5005_v5 = vsel %vm4903_vm4, %v4973_v57, 0.0  ;;  %v4976_v6 = vmul.f32 %v5730_v56, %v5730_v56  ;;  %v4909_v11 = vsel %vm4903_vm4, %v5730_v56, 0.0 }
 0x291   : > { %5206 = vst.msk [vmem:[%s7261_s20] sm:$0xf] %vm1158_vm3, %v5585_v53  ;;  %v4779_v59 = vpop.f32.mrf.mxu0 }
 0x292   : > { %v4453_v55 = vpop.permute.xlu0 %4452  ;;  %5209 = vst.msk [vmem:[%s7261_s20 + $0xc] sm:$0xf] %vm1158_vm3, %v5588_v18  ;;  %v4905_v62 = vsel %vm4903_vm4, %v4779_v59, 0.0  ;;  %v4974_v63 = vmul.f32 %v4779_v59, %v4779_v59  ;;  %v5586_v1 = vpack.c.bf16 %v4779_v59, %v4779_v59  ;;  %v5010_v20 = vsel %vm4903_vm4, %v4976_v6, 0.0 }
 0x293   : > { %4529 = vst.msk [vmem:[#allocation3 + $0x50] sm:$0xf] %vm4508_vm13, %v4453_v55  ;;  %v4455_v3 = vpop.permute.xlu1 %4454  ;;  %v4906_v17 = vadd.f32 %v4905_v62, %v4904_v61 }
 0x294   : > { %4530 = vst.msk [vmem:[#allocation3 + $0x54] sm:$0xf] %vm4508_vm13, %v4455_v3  ;;  %v5006_v7 = vsel %vm4903_vm4, %v4974_v63, 0.0 }
 0x295   : > { %5207 = vst.msk [vmem:[%s7261_s20 + $0x4] sm:$0xf] %vm1158_vm3, %v5586_v1  ;;  %v4908_v0 = vadd.f32 %v4907_v4, %v4906_v17  ;;  %v5007_v8 = vadd.f32 %v5006_v7, %v5005_v5 }
 0x296   : > { %v4457_v9 = vpop.permute.xlu0 %4456 }
 0x297   : > { %4531 = vst.msk [vmem:[#allocation3 + $0x58] sm:$0xf] %vm4508_vm13, %v4457_v9  ;;  %v4459_v12 = vpop.permute.xlu1 %4458  ;;  %v5009_v13 = vadd.f32 %v5008_v10, %v5007_v8  ;;  %v4910_v15 = vadd.f32 %v4909_v11, %v4908_v0 }
 0x298   : > { %4532 = vst.msk [vmem:[#allocation3 + $0x5c] sm:$0xf] %vm4508_vm13, %v4459_v12 }
 0x299   : > { %v5011_v16 = vadd.f32 %v5010_v20, %v5009_v13 }
 0x29a   : > { %v2471_v21 = vpop.permute.xlu0 %2470 }
 0x29b   : > { %2543 = vst.msk [vmem:[#allocation3 + $0x60] sm:$0xf] %vm2518_vm2, %v2471_v21  ;;  %v2473_v23 = vpop.permute.xlu1 %2472  ;;  %v5819_v24 = vld [vmem:[#allocation3 + $0x50] sm:$0xff]  }
 0x29c   : > { %2544 = vst.msk [vmem:[#allocation3 + $0x64] sm:$0xf] %vm2518_vm2, %v2473_v23  ;;  %5747 = vmatprep.mubr.msk.bf16.mxu1 %vm4689_vm15, %v5819_v24 }
 0x29e   : > { %v2475_v25 = vpop.permute.xlu0 %2474 }
 0x29f   : > { %2545 = vst.msk [vmem:[#allocation3 + $0x68] sm:$0xf] %vm2518_vm2, %v2475_v25  ;;  %v2477_v26 = vpop.permute.xlu1 %2476  ;;  %v5820_v31 = vld [vmem:[#allocation3 + $0x58] sm:$0xff]  }
 0x2a0   : > { %2546 = vst.msk [vmem:[#allocation3 + $0x6c] sm:$0xf] %vm2518_vm2, %v2477_v26  ;;  %5748 = vmatmul.mubr.msk.bf16.gmra.mxu1 %vm4689_vm15, %v5820_v31 }
 0x2a2   : > { %v3032_v32 = vpop.permute.xlu0 %3031 }
 0x2a3   : > { %3104 = vst.msk [vmem:[#allocation3 + $0x60] sm:$0xf] %vm3079_vm7, %v3032_v32  ;;  %v3034_v33 = vpop.permute.xlu1 %3033 }
 0x2a4   : > { %3105 = vst.msk [vmem:[#allocation3 + $0x64] sm:$0xf] %vm3079_vm7, %v3034_v33 }
 0x2a6   : > { %v3036_v34 = vpop.permute.xlu0 %3035 }
 0x2a7   : > { %3106 = vst.msk [vmem:[#allocation3 + $0x68] sm:$0xf] %vm3079_vm7, %v3036_v34  ;;  %v3038_v38 = vpop.permute.xlu1 %3037 }
 0x2a8   : > { %3107 = vst.msk [vmem:[#allocation3 + $0x6c] sm:$0xf] %vm3079_vm7, %v3038_v38 }
 0x2aa   : > { %v3369_v40 = vpop.permute.xlu0 %3368 }
 0x2ab   : > { %3441 = vst.msk [vmem:[#allocation3 + $0x60] sm:$0xf] %vm3416_vm8, %v3369_v40  ;;  %v3371_v27 = vpop.permute.xlu1 %3370 }
 0x2ac   : > { %3442 = vst.msk [vmem:[#allocation3 + $0x64] sm:$0xf] %vm3416_vm8, %v3371_v27 }
 0x2ae   : > { %v3373_v29 = vpop.permute.xlu0 %3372 }
 0x2af   : > { %3443 = vst.msk [vmem:[#allocation3 + $0x68] sm:$0xf] %vm3416_vm8, %v3373_v29  ;;  %v3375_v39 = vpop.permute.xlu1 %3374 }
 0x2b0   : > { %3444 = vst.msk [vmem:[#allocation3 + $0x6c] sm:$0xf] %vm3416_vm8, %v3375_v39 }
 0x2b2   : > { %v3563_v41 = vpop.permute.xlu0 %3562 }
 0x2b3   : > { %3635 = vst.msk [vmem:[#allocation3 + $0x60] sm:$0xf] %vm3610_vm9, %v3563_v41  ;;  %v3565_v30 = vpop.permute.xlu1 %3564  ;;  %v5733_v2 = vpop.f32.mrf.mxu0 }
 0x2b4   : > { %3636 = vst.msk [vmem:[#allocation3 + $0x64] sm:$0xf] %vm3610_vm9, %v3565_v30  ;;  %v5591_v14 = vpack.c.bf16 %v5733_v2, %v5733_v2  ;;  %v4979_v60 = vmul.f32 %v5733_v2, %v5733_v2  ;;  %v4915_v54 = vsel %vm4903_vm4, %v5733_v2, 0.0 }
 0x2b5   : > { %v4792_v37 = vpop.f32.mrf.mxu0 }
 0x2b6   : > { %v3567_v22 = vpop.permute.xlu0 %3566  ;;  %5212 = vst.msk [vmem:[%s7261_s20 + $0x18] sm:$0xf] %vm1158_vm3, %v5591_v14  ;;  %v4911_v42 = vsel %vm4903_vm4, %v4792_v37, 0.0  ;;  %v4977_v43 = vmul.f32 %v4792_v37, %v4792_v37  ;;  %v5589_v45 = vpack.c.bf16 %v4792_v37, %v4792_v37  ;;  %v5016_v55 = vsel %vm4903_vm4, %v4979_v60, 0.0 }
 0x2b7   : > { %3637 = vst.msk [vmem:[#allocation3 + $0x68] sm:$0xf] %vm3610_vm9, %v3567_v22  ;;  %v3569_v46 = vpop.permute.xlu1 %3568  ;;  %v4912_v47 = vadd.f32 %v4911_v42, %v4910_v15  ;;  %v5734_v48 = vpop.f32.mrf.mxu0 }
 0x2b8   : > { %3638 = vst.msk [vmem:[#allocation3 + $0x6c] sm:$0xf] %vm3610_vm9, %v3569_v46  ;;  %v5012_v49 = vsel %vm4903_vm4, %v4977_v43, 0.0  ;;  %v5592_v19 = vpack.c.bf16 %v5734_v48, %v5734_v48  ;;  %v4980_v56 = vmul.f32 %v5734_v48, %v5734_v48  ;;  %v4917_v61 = vsel %vm4903_vm4, %v5734_v48, 0.0 }
 0x2b9   : > { %5210 = vst.msk [vmem:[%s7261_s20 + $0x10] sm:$0xf] %vm1158_vm3, %v5589_v45  ;;  %v5013_v28 = vadd.f32 %v5012_v49, %v5011_v16  ;;  %v4795_v35 = vpop.f32.mrf.mxu0 }
 0x2ba   : > { %v4124_v44 = vpop.permute.xlu0 %4123  ;;  %5213 = vst.msk [vmem:[%s7261_s20 + $0x1c] sm:$0xf] %vm1158_vm3, %v5592_v19  ;;  %v4913_v36 = vsel %vm4903_vm4, %v4795_v35, 0.0  ;;  %v4978_v50 = vmul.f32 %v4795_v35, %v4795_v35  ;;  %v5590_v51 = vpack.c.bf16 %v4795_v35, %v4795_v35  ;;  %v5018_v3 = vsel %vm4903_vm4, %v4980_v56, 0.0 }
 0x2bb   : > { %4196 = vst.msk [vmem:[#allocation3 + $0x60] sm:$0xf] %vm4171_vm12, %v4124_v44  ;;  %v4126_v52 = vpop.permute.xlu1 %4125  ;;  %v4914_v53 = vadd.f32 %v4913_v36, %v4912_v47 }
 0x2bc   : > { %4197 = vst.msk [vmem:[#allocation3 + $0x64] sm:$0xf] %vm4171_vm12, %v4126_v52  ;;  %v5014_v57 = vsel %vm4903_vm4, %v4978_v50, 0.0 }
 0x2bd   : > { %5211 = vst.msk [vmem:[%s7261_s20 + $0x14] sm:$0xf] %vm1158_vm3, %v5590_v51  ;;  %v4916_v18 = vadd.f32 %v4915_v54, %v4914_v53  ;;  %v5015_v58 = vadd.f32 %v5014_v57, %v5013_v28 }
 0x2be   : > { %v4128_v59 = vpop.permute.xlu0 %4127 }
 0x2bf   : > { %4198 = vst.msk [vmem:[#allocation3 + $0x68] sm:$0xf] %vm4171_vm12, %v4128_v59  ;;  %v4130_v62 = vpop.permute.xlu1 %4129  ;;  %v5017_v63 = vadd.f32 %v5016_v55, %v5015_v58  ;;  %v4918_v1 = vadd.f32 %v4917_v61, %v4916_v18 }
 0x2c0   : > { %4199 = vst.msk [vmem:[#allocation3 + $0x6c] sm:$0xf] %vm4171_vm12, %v4130_v62 }
 0x2c1   : > { %v5019_v4 = vadd.f32 %v5018_v3, %v5017_v63 }
 0x2c2   : > { %v4461_v17 = vpop.permute.xlu0 %4460 }
 0x2c3   : > { %4533 = vst.msk [vmem:[#allocation3 + $0x60] sm:$0xf] %vm4508_vm13, %v4461_v17  ;;  %v4463_v5 = vpop.permute.xlu1 %4462 }
 0x2c4   : > { %4534 = vst.msk [vmem:[#allocation3 + $0x64] sm:$0xf] %vm4508_vm13, %v4463_v5 }
 0x2c6   : > { %v4465_v6 = vpop.permute.xlu0 %4464 }
 0x2c7   : > { %4535 = vst.msk [vmem:[#allocation3 + $0x68] sm:$0xf] %vm4508_vm13, %v4465_v6  ;;  %v4467_v7 = vpop.permute.xlu1 %4466 }
 0x2c8   : > { %4536 = vst.msk [vmem:[#allocation3 + $0x6c] sm:$0xf] %vm4508_vm13, %v4467_v7 }
 0x2ca   : > { %v2479_v0 = vpop.permute.xlu0 %2478 }
 0x2cb   : > { %2547 = vst.msk [vmem:[#allocation3 + $0x70] sm:$0xf] %vm2518_vm2, %v2479_v0  ;;  %v2481_v8 = vpop.permute.xlu1 %2480  ;;  %v5821_v9 = vld [vmem:[#allocation3 + $0x60] sm:$0xff]  }
 0x2cc   : > { %2548 = vst.msk [vmem:[#allocation3 + $0x74] sm:$0xf] %vm2518_vm2, %v2481_v8  ;;  %5751 = vmatprep.mubr.msk.bf16.mxu1 %vm4689_vm15, %v5821_v9 }
 0x2ce   : > { %v2483_v10 = vpop.permute.xlu0 %2482 }
 0x2cf   : > { %2549 = vst.msk [vmem:[#allocation3 + $0x78] sm:$0xf] %vm2518_vm2, %v2483_v10  ;;  %v2485_v11 = vpop.permute.xlu1 %2484  ;;  %v5822_v12 = vld [vmem:[#allocation3 + $0x68] sm:$0xff]  }
 0x2d0   : > { %2550 = vst.msk [vmem:[#allocation3 + $0x7c] sm:$0xf] %vm2518_vm2, %v2485_v11  ;;  %5752 = vmatmul.mubr.msk.bf16.gmra.mxu1 %vm4689_vm15, %v5822_v12 }
 0x2d2   : > { %v3040_v13 = vpop.permute.xlu0 %3039 }
 0x2d3   : > { %3108 = vst.msk [vmem:[#allocation3 + $0x70] sm:$0xf] %vm3079_vm7, %v3040_v13  ;;  %v3042_v15 = vpop.permute.xlu1 %3041 }
 0x2d4   : > { %3109 = vst.msk [vmem:[#allocation3 + $0x74] sm:$0xf] %vm3079_vm7, %v3042_v15 }
 0x2d6   : > { %v3044_v20 = vpop.permute.xlu0 %3043 }
 0x2d7   : > { %3110 = vst.msk [vmem:[#allocation3 + $0x78] sm:$0xf] %vm3079_vm7, %v3044_v20  ;;  %v3046_v21 = vpop.permute.xlu1 %3045 }
 0x2d8   : > { %3111 = vst.msk [vmem:[#allocation3 + $0x7c] sm:$0xf] %vm3079_vm7, %v3046_v21 }
 0x2da   : > { %v3377_v16 = vpop.permute.xlu0 %3376 }
 0x2db   : > { %3445 = vst.msk [vmem:[#allocation3 + $0x70] sm:$0xf] %vm3416_vm8, %v3377_v16  ;;  %v3379_v23 = vpop.permute.xlu1 %3378  ;;  %v5737_v24 = vpop.f32.mrf.mxu0 }
 0x2dc   : > { %3446 = vst.msk [vmem:[#allocation3 + $0x74] sm:$0xf] %vm3416_vm8, %v3379_v23  ;;  %v5595_v25 = vpack.c.bf16 %v5737_v24, %v5737_v24  ;;  %v4983_v14 = vmul.f32 %v5737_v24, %v5737_v24  ;;  %v4923_v46 = vsel %vm4903_vm4, %v5737_v24, 0.0 }
 0x2dd   : > { %v4808_v26 = vpop.f32.mrf.mxu0 }
 0x2de   : > { %v3381_v31 = vpop.permute.xlu0 %3380  ;;  %5216 = vst.msk [vmem:[%s7261_s20 + $0x28] sm:$0xf] %vm1158_vm3, %v5595_v25  ;;  %v4919_v32 = vsel %vm4903_vm4, %v4808_v26, 0.0  ;;  %v4981_v33 = vmul.f32 %v4808_v26, %v4808_v26  ;;  %v5593_v34 = vpack.c.bf16 %v4808_v26, %v4808_v26  ;;  %v5024_v35 = vsel %vm4903_vm4, %v4983_v14, 0.0 }
 0x2df   : > { %3447 = vst.msk [vmem:[#allocation3 + $0x78] sm:$0xf] %vm3416_vm8, %v3381_v31  ;;  %v3383_v38 = vpop.permute.xlu1 %3382  ;;  %v4920_v40 = vadd.f32 %v4919_v32, %v4918_v1  ;;  %v5738_v27 = vpop.f32.mrf.mxu0 }
 0x2e0   : > { %3448 = vst.msk [vmem:[#allocation3 + $0x7c] sm:$0xf] %vm3416_vm8, %v3383_v38  ;;  %v5020_v29 = vsel %vm4903_vm4, %v4981_v33, 0.0  ;;  %v5596_v39 = vpack.c.bf16 %v5738_v27, %v5738_v27  ;;  %v4984_v47 = vmul.f32 %v5738_v27, %v5738_v27  ;;  %v4925_v44 = vsel %vm4903_vm4, %v5738_v27, 0.0 }
 0x2e1   : > { %5214 = vst.msk [vmem:[%s7261_s20 + $0x20] sm:$0xf] %vm1158_vm3, %v5593_v34  ;;  %v5021_v41 = vadd.f32 %v5020_v29, %v5019_v4  ;;  %v4811_v30 = vpop.f32.mrf.mxu0 }
 0x2e2   : > { %v3571_v2 = vpop.permute.xlu0 %3570  ;;  %5217 = vst.msk [vmem:[%s7261_s20 + $0x2c] sm:$0xf] %vm1158_vm3, %v5596_v39  ;;  %v4921_v37 = vsel %vm4903_vm4, %v4811_v30, 0.0  ;;  %v4982_v22 = vmul.f32 %v4811_v30, %v4811_v30  ;;  %v5594_v42 = vpack.c.bf16 %v4811_v30, %v4811_v30  ;;  %v5026_v51 = vsel %vm4903_vm4, %v4984_v47, 0.0 }
 0x2e3   : > { %3639 = vst.msk [vmem:[#allocation3 + $0x70] sm:$0xf] %vm3610_vm9, %v3571_v2  ;;  %v3573_v43 = vpop.permute.xlu1 %3572  ;;  %v4922_v45 = vadd.f32 %v4921_v37, %v4920_v40 }
 0x2e4   : > { %3640 = vst.msk [vmem:[#allocation3 + $0x74] sm:$0xf] %vm3610_vm9, %v3573_v43  ;;  %v5022_v48 = vsel %vm4903_vm4, %v4982_v22, 0.0 }
 0x2e5   : > { %5215 = vst.msk [vmem:[%s7261_s20 + $0x24] sm:$0xf] %vm1158_vm3, %v5594_v42  ;;  %v4924_v49 = vadd.f32 %v4923_v46, %v4922_v45  ;;  %v5023_v19 = vadd.f32 %v5022_v48, %v5021_v41 }
 0x2e6   : > { %v3575_v28 = vpop.permute.xlu0 %3574 }
 0x2e7   : > { %3641 = vst.msk [vmem:[#allocation3 + $0x78] sm:$0xf] %vm3610_vm9, %v3575_v28  ;;  %v3577_v60 = vpop.permute.xlu1 %3576  ;;  %v5025_v36 = vadd.f32 %v5024_v35, %v5023_v19  ;;  %v4926_v50 = vadd.f32 %v4925_v44, %v4924_v49 }
 0x2e8   : > { %3642 = vst.msk [vmem:[#allocation3 + $0x7c] sm:$0xf] %vm3610_vm9, %v3577_v60 }
 0x2e9   : > { %v5027_v53 = vadd.f32 %v5026_v51, %v5025_v36 }
 0x2ea   : > { %v4132_v52 = vpop.permute.xlu0 %4131 }
 0x2eb   : > { %4200 = vst.msk [vmem:[#allocation3 + $0x70] sm:$0xf] %vm4171_vm12, %v4132_v52  ;;  %v4134_v54 = vpop.permute.xlu1 %4133 }
 0x2ec   : > { %4201 = vst.msk [vmem:[#allocation3 + $0x74] sm:$0xf] %vm4171_vm12, %v4134_v54 }
 0x2ee   : > { %v4136_v56 = vpop.permute.xlu0 %4135 }
 0x2ef   : > { %4202 = vst.msk [vmem:[#allocation3 + $0x78] sm:$0xf] %vm4171_vm12, %v4136_v56  ;;  %v4138_v57 = vpop.permute.xlu1 %4137 }
 0x2f0   : > { %4203 = vst.msk [vmem:[#allocation3 + $0x7c] sm:$0xf] %vm4171_vm12, %v4138_v57 }
 0x2f2   : > { %v4469_v18 = vpop.permute.xlu0 %4468 }
 0x2f3   : > { %4537 = vst.msk [vmem:[#allocation3 + $0x70] sm:$0xf] %vm4508_vm13, %v4469_v18  ;;  %v4471_v58 = vpop.permute.xlu1 %4470 }
 0x2f4   : > { %4538 = vst.msk [vmem:[#allocation3 + $0x74] sm:$0xf] %vm4508_vm13, %v4471_v58 }
 0x2f6   : > { %v4473_v59 = vpop.permute.xlu0 %4472 }
 0x2f7   : > { %4539 = vst.msk [vmem:[#allocation3 + $0x78] sm:$0xf] %vm4508_vm13, %v4473_v59  ;;  %v4475_v55 = vpop.permute.xlu1 %4474 }
 0x2f8   : > { %4540 = vst.msk [vmem:[#allocation3 + $0x7c] sm:$0xf] %vm4508_vm13, %v4475_v55 }
 0x2fb   : > { %v5823_v61 = vld [vmem:[#allocation3 + $0x70] sm:$0xff]  }
 0x2fc   : > { %5755 = vmatprep.mubr.msk.bf16.mxu1 %vm4689_vm15, %v5823_v61 }
 0x2ff   : > { %v5824_v62 = vld [vmem:[#allocation3 + $0x78] sm:$0xff]  }
 0x300   : > { %5756 = vmatmul.mubr.msk.bf16.gmra.mxu1 %vm4689_vm15, %v5824_v62 }
 0x303   : > { %v5741_v63 = vpop.f32.mrf.mxu0 }
 0x304   : > { %v5599_v1 = vpack.c.bf16 %v5741_v63, %v5741_v63  ;;  %v4987_v11 = vmul.f32 %v5741_v63, %v5741_v63  ;;  %v4931_v21 = vsel %vm4903_vm4, %v5741_v63, 0.0 }
 0x305   : > { %v4824_v3 = vpop.f32.mrf.mxu0 }
 0x306   : > { %5220 = vst.msk [vmem:[%s7261_s20 + $0x38] sm:$0xf] %vm1158_vm3, %v5599_v1  ;;  %v4927_v17 = vsel %vm4903_vm4, %v4824_v3, 0.0  ;;  %v4985_v4 = vmul.f32 %v4824_v3, %v4824_v3  ;;  %v5597_v5 = vpack.c.bf16 %v4824_v3, %v4824_v3  ;;  %v5032_v26 = vsel %vm4903_vm4, %v4987_v11, 0.0 }
 0x307   : > { %v4928_v6 = vadd.f32 %v4927_v17, %v4926_v50  ;;  %v5742_v7 = vpop.f32.mrf.mxu0 }
 0x308   : > { %v5028_v0 = vsel %vm4903_vm4, %v4985_v4, 0.0  ;;  %5218 = vst.msk [vmem:[%s7261_s20 + $0x30] sm:$0xf] %vm1158_vm3, %v5597_v5  ;;  %v5600_v8 = vpack.c.bf16 %v5742_v7, %v5742_v7  ;;  %v4988_v16 = vmul.f32 %v5742_v7, %v5742_v7  ;;  %v4933_v31 = vsel %vm4903_vm4, %v5742_v7, 0.0 }
 0x309   : > { %v5029_v9 = vadd.f32 %v5028_v0, %v5027_v53  ;;  %v4827_v10 = vpop.f32.mrf.mxu0 }
 0x30a   : > { %5221 = vst.msk [vmem:[%s7261_s20 + $0x3c] sm:$0xf] %vm1158_vm3, %v5600_v8  ;;  %v4929_v12 = vsel %vm4903_vm4, %v4827_v10, 0.0  ;;  %v4986_v13 = vmul.f32 %v4827_v10, %v4827_v10  ;;  %v5598_v15 = vpack.c.bf16 %v4827_v10, %v4827_v10  ;;  %v5034_v34 = vsel %vm4903_vm4, %v4988_v16, 0.0 }
 0x30b   : > { %v4930_v20 = vadd.f32 %v4929_v12, %v4928_v6 }
 0x30c   : > { %v5030_v23 = vsel %vm4903_vm4, %v4986_v13, 0.0  ;;  %5219 = vst.msk [vmem:[%s7261_s20 + $0x34] sm:$0xf] %vm1158_vm3, %v5598_v15 }
 0x30d   : > { %v4932_v24 = vadd.f32 %v4931_v21, %v4930_v20  ;;  %v5031_v25 = vadd.f32 %v5030_v23, %v5029_v9 }
 0x30f   : > { %v5033_v32 = vadd.f32 %v5032_v26, %v5031_v25  ;;  %v4934_v33 = vadd.f32 %v4933_v31, %v4932_v24 }
 0x311   : > { %v5035_v38 = vadd.f32 %v5034_v34, %v5033_v32 }
 0x330   : > { %v5745_v40 = vpop.f32.mrf.mxu1 }
 0x331   : > { %v5603_v27 = vpack.c.bf16 %v5745_v40, %v5745_v40  ;;  %v4991_v45 = vmul.f32 %v5745_v40, %v5745_v40  ;;  %v4939_v19 = vsel %vm4903_vm4, %v5745_v40, 0.0 }
 0x332   : > { %v4840_v29 = vpop.f32.mrf.mxu1 }
 0x333   : > { %5224 = vst.msk [vmem:[%s7261_s20 + $0x48] sm:$0xf] %vm1158_vm3, %v5603_v27  ;;  %v4935_v39 = vsel %vm4903_vm4, %v4840_v29, 0.0  ;;  %v4989_v41 = vmul.f32 %v4840_v29, %v4840_v29  ;;  %v5601_v30 = vpack.c.bf16 %v4840_v29, %v4840_v29  ;;  %v5040_v36 = vsel %vm4903_vm4, %v4991_v45, 0.0 }
 0x334   : > { %v4936_v2 = vadd.f32 %v4935_v39, %v4934_v33  ;;  %v5746_v14 = vpop.f32.mrf.mxu1 }
 0x335   : > { %v5036_v37 = vsel %vm4903_vm4, %v4989_v41, 0.0  ;;  %5222 = vst.msk [vmem:[%s7261_s20 + $0x40] sm:$0xf] %vm1158_vm3, %v5601_v30  ;;  %v5604_v22 = vpack.c.bf16 %v5746_v14, %v5746_v14  ;;  %v4992_v28 = vmul.f32 %v5746_v14, %v5746_v14  ;;  %v4941_v50 = vsel %vm4903_vm4, %v5746_v14, 0.0 }
 0x336   : > { %v5037_v42 = vadd.f32 %v5036_v37, %v5035_v38  ;;  %v4843_v43 = vpop.f32.mrf.mxu1 }
 0x337   : > { %5225 = vst.msk [vmem:[%s7261_s20 + $0x4c] sm:$0xf] %vm1158_vm3, %v5604_v22  ;;  %v4937_v46 = vsel %vm4903_vm4, %v4843_v43, 0.0  ;;  %v4990_v47 = vmul.f32 %v4843_v43, %v4843_v43  ;;  %v5602_v48 = vpack.c.bf16 %v4843_v43, %v4843_v43  ;;  %v5042_v53 = vsel %vm4903_vm4, %v4992_v28, 0.0 }
 0x338   : > { %v4938_v49 = vadd.f32 %v4937_v46, %v4936_v2 }
 0x339   : > { %v5038_v35 = vsel %vm4903_vm4, %v4990_v47, 0.0  ;;  %5223 = vst.msk [vmem:[%s7261_s20 + $0x44] sm:$0xf] %vm1158_vm3, %v5602_v48 }
 0x33a   : > { %v4940_v44 = vadd.f32 %v4939_v19, %v4938_v49  ;;  %v5039_v60 = vadd.f32 %v5038_v35, %v5037_v42 }
 0x33c   : > { %v5041_v51 = vadd.f32 %v5040_v36, %v5039_v60  ;;  %v4942_v52 = vadd.f32 %v4941_v50, %v4940_v44 }
 0x33e   : > { %v5043_v54 = vadd.f32 %v5042_v53, %v5041_v51 }
 0x360   : > { %v5749_v56 = vpop.f32.mrf.mxu1 }
 0x361   : > { %v5607_v57 = vpack.c.bf16 %v5749_v56, %v5749_v56  ;;  %v4995_v4 = vmul.f32 %v5749_v56, %v5749_v56  ;;  %v4947_v8 = vsel %vm4903_vm4, %v5749_v56, 0.0 }
 0x362   : > { %v4856_v18 = vpop.f32.mrf.mxu1 }
 0x363   : > { %5228 = vst.msk [vmem:[%s7261_s20 + $0x58] sm:$0xf] %vm1158_vm3, %v5607_v57  ;;  %v4943_v58 = vsel %vm4903_vm4, %v4856_v18, 0.0  ;;  %v4993_v59 = vmul.f32 %v4856_v18, %v4856_v18  ;;  %v5605_v55 = vpack.c.bf16 %v4856_v18, %v4856_v18  ;;  %v5048_v13 = vsel %vm4903_vm4, %v4995_v4, 0.0 }
 0x364   : > { %v4944_v61 = vadd.f32 %v4943_v58, %v4942_v52  ;;  %v5750_v62 = vpop.f32.mrf.mxu1 }
 0x365   : > { %v5044_v63 = vsel %vm4903_vm4, %v4993_v59, 0.0  ;;  %5226 = vst.msk [vmem:[%s7261_s20 + $0x50] sm:$0xf] %vm1158_vm3, %v5605_v55  ;;  %v5608_v1 = vpack.c.bf16 %v5750_v62, %v5750_v62  ;;  %v4996_v9 = vmul.f32 %v5750_v62, %v5750_v62  ;;  %v4949_v15 = vsel %vm4903_vm4, %v5750_v62, 0.0 }
 0x366   : > { %v5045_v3 = vadd.f32 %v5044_v63, %v5043_v54  ;;  %v4859_v17 = vpop.f32.mrf.mxu1 }
 0x367   : > { %5229 = vst.msk [vmem:[%s7261_s20 + $0x5c] sm:$0xf] %vm1158_vm3, %v5608_v1  ;;  %v4945_v5 = vsel %vm4903_vm4, %v4859_v17, 0.0  ;;  %v4994_v6 = vmul.f32 %v4859_v17, %v4859_v17  ;;  %v5606_v7 = vpack.c.bf16 %v4859_v17, %v4859_v17  ;;  %v5050_v16 = vsel %vm4903_vm4, %v4996_v9, 0.0 }
 0x368   : > { %v4946_v0 = vadd.f32 %v4945_v5, %v4944_v61 }
 0x369   : > { %v5046_v10 = vsel %vm4903_vm4, %v4994_v6, 0.0  ;;  %5227 = vst.msk [vmem:[%s7261_s20 + $0x54] sm:$0xf] %vm1158_vm3, %v5606_v7 }
 0x36a   : > { %v4948_v11 = vadd.f32 %v4947_v8, %v4946_v0  ;;  %v5047_v12 = vadd.f32 %v5046_v10, %v5045_v3 }
 0x36c   : > { %v5049_v20 = vadd.f32 %v5048_v13, %v5047_v12  ;;  %v4950_v21 = vadd.f32 %v4949_v15, %v4948_v11 }
 0x36e   : > { %v5051_v23 = vadd.f32 %v5050_v16, %v5049_v20 }
 0x390   : > { %v5753_v24 = vpop.f32.mrf.mxu1 }
 0x391   : > { %v5611_v25 = vpack.c.bf16 %v5753_v24, %v5753_v24  ;;  %v4999_v22 = vmul.f32 %v5753_v24, %v5753_v24  ;;  %v4955_v43 = vsel %vm4903_vm4, %v5753_v24, 0.0 }
 0x392   : > { %v4872_v26 = vpop.f32.mrf.mxu1 }
 0x393   : > { %5232 = vst.msk [vmem:[%s7261_s20 + $0x68] sm:$0xf] %vm1158_vm3, %v5611_v25  ;;  %v5609_v31 = vpack.c.bf16 %v4872_v26, %v4872_v26  ;;  %v4997_v40 = vmul.f32 %v4872_v26, %v4872_v26  ;;  %v4951_v27 = vsel %vm4903_vm4, %v4872_v26, 0.0  ;;  %v5056_v47 = vsel %vm4903_vm4, %v4999_v22, 0.0 }
 0x394   : > { %v5754_v32 = vpop.f32.mrf.mxu1  ;;  %v4952_v30 = vadd.f32 %v4951_v27, %v4950_v21 }
 0x395   : > { %5230 = vst.msk [vmem:[%s7261_s20 + $0x60] sm:$0xf] %vm1158_vm3, %v5609_v31  ;;  %v5612_v33 = vpack.c.bf16 %v5754_v32, %v5754_v32  ;;  %v5052_v39 = vsel %vm4903_vm4, %v4997_v40, 0.0  ;;  %v5000_v48 = vmul.f32 %v5754_v32, %v5754_v32  ;;  %v4957_v35 = vsel %vm4903_vm4, %v5754_v32, 0.0 }
 0x396   : > { %v4875_v34 = vpop.f32.mrf.mxu1  ;;  %v5053_v14 = vadd.f32 %v5052_v39, %v5051_v23 }
 0x397   : > { %5233 = vst.msk [vmem:[%s7261_s20 + $0x6c] sm:$0xf] %vm1158_vm3, %v5612_v33  ;;  %v5610_v38 = vpack.c.bf16 %v4875_v34, %v4875_v34  ;;  %v4998_v29 = vmul.f32 %v4875_v34, %v4875_v34  ;;  %v4953_v41 = vsel %vm4903_vm4, %v4875_v34, 0.0  ;;  %v5058_v52 = vsel %vm4903_vm4, %v5000_v48, 0.0 }
 0x398   : > { %v4954_v37 = vadd.f32 %v4953_v41, %v4952_v30 }
 0x399   : > { %5231 = vst.msk [vmem:[%s7261_s20 + $0x64] sm:$0xf] %vm1158_vm3, %v5610_v38  ;;  %v5054_v2 = vsel %vm4903_vm4, %v4998_v29, 0.0 }
 0x39a   : > { %v5055_v42 = vadd.f32 %v5054_v2, %v5053_v14  ;;  %v4956_v45 = vadd.f32 %v4955_v43, %v4954_v37 }
 0x39c   : > { %v5057_v19 = vadd.f32 %v5056_v47, %v5055_v42  ;;  %v4958_v50 = vadd.f32 %v4957_v35, %v4956_v45 }
 0x39e   : > { %v5059_v57 = vadd.f32 %v5058_v52, %v5057_v19 }
 0x3c0   : > { %v5757_v46 = vpop.f32.mrf.mxu1 }
 0x3c1   : > { %v5615_v49 = vpack.c.bf16 %v5757_v46, %v5757_v46  ;;  %v5003_v58 = vmul.f32 %v5757_v46, %v5757_v46  ;;  %v4963_v1 = vsel %vm4903_vm4, %v5757_v46, 0.0 }
 0x3c2   : > { %v4888_v28 = vpop.f32.mrf.mxu1 }
 0x3c3   : > { %5236 = vst.msk [vmem:[%s7261_s20 + $0x78] sm:$0xf] %vm1158_vm3, %v5615_v49  ;;  %v4959_v44 = vsel %vm4903_vm4, %v4888_v28, 0.0  ;;  %v5001_v60 = vmul.f32 %v4888_v28, %v4888_v28  ;;  %v5613_v36 = vpack.c.bf16 %v4888_v28, %v4888_v28  ;;  %v5064_v6 = vsel %vm4903_vm4, %v5003_v58, 0.0 }
 0x3c4   : > { %v5758_v51 = vpop.f32.mrf.mxu1  ;;  %v4960_v56 = vadd.f32 %v4959_v44, %v4958_v50 }
 0x3c5   : > { %v5060_v53 = vsel %vm4903_vm4, %v5001_v60, 0.0  ;;  %5234 = vst.msk [vmem:[%s7261_s20 + $0x70] sm:$0xf] %vm1158_vm3, %v5613_v36  ;;  %v5616_v54 = vpack.c.bf16 %v5758_v51, %v5758_v51  ;;  %v5004_v3 = vmul.f32 %v5758_v51, %v5758_v51  ;;  %v4965_v7 = vsel %vm4903_vm4, %v5758_v51, 0.0 }
 0x3c6   : > { %v4891_v18 = vpop.f32.mrf.mxu1  ;;  %v5061_v62 = vadd.f32 %v5060_v53, %v5059_v57 }
 0x3c7   : > { %5237 = vst.msk [vmem:[%s7261_s20 + $0x7c] sm:$0xf] %vm1158_vm3, %v5616_v54  ;;  %v4961_v59 = vsel %vm4903_vm4, %v4891_v18, 0.0  ;;  %v5002_v55 = vmul.f32 %v4891_v18, %v4891_v18  ;;  %v5614_v61 = vpack.c.bf16 %v4891_v18, %v4891_v18  ;;  %v5066_v9 = vsel %vm4903_vm4, %v5004_v3, 0.0 }
 0x3c8   : > { %v4962_v63 = vadd.f32 %v4961_v59, %v4960_v56 }
 0x3c9   : > { %v5062_v17 = vsel %vm4903_vm4, %v5002_v55, 0.0  ;;  %5235 = vst.msk [vmem:[%s7261_s20 + $0x74] sm:$0xf] %vm1158_vm3, %v5614_v61  ;;  %vm5074_vm3 = vcmask 1040384  }
 0x3ca   : > { %v4964_v4 = vadd.f32 %v4963_v1, %v4962_v63  ;;  %v5063_v5 = vadd.f32 %v5062_v17, %v5061_v62 }
 0x3cc   : > { %v4966_v0 = vadd.f32 %v4965_v7, %v4964_v4  ;;  %v5065_v8 = vadd.f32 %v5064_v6, %v5063_v5 }
 0x3ce   : > { %v4967_v10 = vrot.slane %v4966_v0, 4  ;;  %v5067_v11 = vadd.f32 %v5066_v9, %v5065_v8 }
 0x3d0   : > { %v4968_v12 = vadd.f32 %v4967_v10, %v4966_v0  ;;  %v5068_v13 = vrot.slane %v5067_v11, 4 }
 0x3d2   : > { %v4969_v15 = vrot.slane %v4968_v12, 2  ;;  %v5069_v20 = vadd.f32 %v5068_v13, %v5067_v11 }
 0x3d4   : > { %v4970_v21 = vadd.f32 %v4969_v15, %v4968_v12  ;;  %v5070_v16 = vrot.slane %v5069_v20, 2 }
 0x3d6   : > { %v4971_v23 = vrot.slane %v4970_v21, 1  ;;  %v5071_v24 = vadd.f32 %v5070_v16, %v5069_v20 }
 0x3d8   : > { %v5072_v25 = vrot.slane %v5071_v24, 1  ;;  %v4972_v26 = vadd.f32 %v4971_v23, %v4970_v21 }
 0x3da   : > { %v5073_v31 = vadd.f32 %v5072_v25, %v5071_v24 }
 0x3dc   : > { %v5075_v32 = vsel %vm5074_vm3, %v4972_v26, %v5073_v31 }
 0x3dd   : > { %5077 = vst.msk [vmem:[%s449_s0] sm:$0x3] %vm5076_vm5, %v5075_v32 }
 0x3de PF: > { %s18_s2 = sadd.s32 1, %s5851_s2   ;;  %s7486_s23 = smov %s5847_s24 }
 0x3df   : > { %p15_p6 = scmp.ge.s32.totalorder %s18_s2, 4   ;;  %s7487_s24 = smov %s7489_s25 }
 0x3e1   :  { %17 = sbr.rel (!%p15_p6) target bundleno = 2 (0x2), region = 112 }

</bundles_post_ra>
